<compile_context>
chip_gen: v7x
topology: tpu7x:2x2x1
jax: 0.10.0
libtpu: 0.0.40
codegen_flags: <defaults>
</compile_context>

<pallas_src>
import functools

import numpy as np
import jax
import jax.numpy as jnp
from jax.experimental import pallas as pl
from jax.experimental.pallas import tpu as pltpu


def _round_up(x, m):
    return ((x + m - 1) // m) * m


def _pad_rows(x, n):
    return x if x.shape[0] == n else jnp.pad(x, ((0, n - x.shape[0]), (0, 0)))


def _pad_cols(x, n):
    return x if x.shape[1] == n else jnp.pad(x, ((0, 0), (0, n - x.shape[1])))


# ----------------------------------------------------------------------------
# Fused (im2col-matmul [+ pool folded into weights] + RelBerLeaky) kernel
# ----------------------------------------------------------------------------

def _matmul_lif_kernel(x_ref, w_ref, u_ref, mem_ref, spk_ref, mem_out_ref,
                       *, beta, threshold, temp, valid_cols):
    """One M-tile: cur = X @ W (MXU, f32 acc); mem = beta*mem + cur;
    spk ~ (Relaxed)Bernoulli(logits = mem - threshold) using uniforms u."""
    cur = jnp.dot(x_ref[...], w_ref[...], preferred_element_type=jnp.float32)
    mem = beta * mem_ref[...] + cur
    logits = mem - threshold
    u = u_ref[...]
    if temp == 0.0:
        p = 1.0 / (1.0 + jnp.exp(-logits))              # sigmoid (EUP)
        spk = (u < p).astype(jnp.float32)               # Bernoulli(logits)
    else:
        uc = jnp.clip(u, 1e-6, 1.0 - 1e-6)
        noise = jnp.log(uc) - jnp.log(1.0 - uc)         # logistic noise
        spk = 1.0 / (1.0 + jnp.exp(-(logits + noise) / temp))
    if valid_cols is not None:                          # mask padded FC lanes
        lane = jax.lax.broadcasted_iota(jnp.int32, mem.shape, 1)
        keep = lane < valid_cols
        spk = jnp.where(keep, spk, 0.0)
        mem = jnp.where(keep, mem, 0.0)
    spk_ref[...] = spk.astype(spk_ref.dtype)
    mem_out_ref[...] = mem


def matmul_lif_pallas(x_bf16, w_bf16, u, mem, *, beta, threshold, temp,
                      num_blocks=2, valid_cols=None, spk_dtype=jnp.bfloat16):
    """Fused layer: [Mp, K]bf16 @ [K, Cout]bf16 + LIF.  M tiled on a
    `parallel` grid axis; weight resident in VMEM (not double-buffered);
    membrane aliased in place."""
    Mp, K = x_bf16.shape
    Kw, Cout = w_bf16.shape
    assert K == Kw and u.shape == (Mp, Cout) and mem.shape == (Mp, Cout)
    assert Mp % (8 * num_blocks) == 0
    tm = Mp // num_blocks

    kern = functools.partial(_matmul_lif_kernel, beta=float(beta),
                             threshold=float(threshold), temp=float(temp),
                             valid_cols=valid_cols)
    row_spec = pl.BlockSpec((tm, Cout), lambda i: (i, 0))

    spk, mem_out = pl.pallas_call(
        kern,
        out_shape=(jax.ShapeDtypeStruct((Mp, Cout), spk_dtype),
                   jax.ShapeDtypeStruct((Mp, Cout), jnp.float32)),
        grid=(num_blocks,),
        in_specs=[
            pl.BlockSpec((tm, K), lambda i: (i, 0)),               # patches
            pl.BlockSpec(memory_space=pltpu.MemorySpace.VMEM),     # whole weight
            row_spec,                                              # uniforms
            row_spec,                                              # membrane in
        ],
        out_specs=(row_spec, row_spec),
        input_output_aliases={3: 1},        # mem_in -> mem_out (in place)
        compiler_params=pltpu.CompilerParams(
            dimension_semantics=("parallel",)),
    )(x_bf16, w_bf16, u, mem)
    return spk, mem_out


# ----------------------------------------------------------------------------
# XLA glue: im2col (stride 1 for plain conv, stride 2 / 8x8 for pool-folded)
# ----------------------------------------------------------------------------

def conv_patches(x_nhwc, *, ksize, stride, pad=2):
    """[B,H,W,C] -> ([B*Ho*Wo, ksize*ksize*C], Ho, Wo); taps kh-major, kw, c."""
    B, H, W, C = x_nhwc.shape
    xp = jnp.pad(x_nhwc, ((0, 0), (pad, pad), (pad, pad), (0, 0)))
    Ho = (H + 2 * pad - ksize) // stride + 1
    Wo = (W + 2 * pad - ksize) // stride + 1
    cols = [xp[:, kh:kh + (Ho - 1) * stride + 1:stride,
               kw:kw + (Wo - 1) * stride + 1:stride, :]
            for kh in range(ksize) for kw in range(ksize)]
    patches = jnp.concatenate(cols, axis=-1).reshape(B * Ho * Wo,
                                                     ksize * ksize * C)
    return patches, Ho, Wo


# ----------------------------------------------------------------------------
# Parameters: torch layouts -> MXU-ready matrices (pool folded, FC permuted)
# ----------------------------------------------------------------------------

def init_torch_params(key):
    """Synthetic weights in the PyTorch layouts of the reference module."""
    k1, k2, k3, k4 = jax.random.split(key, 4)

    def conv_w(k, cout, cin):
        fan_in = cin * 49
        return jax.random.normal(k, (cout, cin, 7, 7), jnp.float32) / np.sqrt(fan_in)

    w1 = conv_w(k1, 64, 2)                                     # Conv_1
    w2 = conv_w(k2, 128, 64)                                   # Conv_2
    w3 = conv_w(k3, 128, 128)                                  # Conv_3
    wfc = jax.random.normal(k4, (11, 5 * 5 * 128), jnp.float32) / np.sqrt(3200.0)
    return w1, w2, w3, wfc


def _fold_pool_into_conv_weight(w_oihw):
    """AvgPool2d(2) after a 7x7/stride-1 conv == stride-2 8x8 conv whose
    kernel is W'[u,v] = 1/4 * sum_{dh,dw in {0,1}} W[u-dh, v-dw] (linearity)."""
    w = jnp.transpose(w_oihw, (2, 3, 1, 0))                    # [7,7,Cin,Cout]

    def sh(dh, dw):
        return jnp.pad(w, ((dh, 1 - dh), (dw, 1 - dw), (0, 0), (0, 0)))

    return 0.25 * (sh(0, 0) + sh(0, 1) + sh(1, 0) + sh(1, 1))  # [8,8,Cin,Cout]


def prepare_params(torch_params):
    """Torch-layout weights -> bf16 matmul weights used by the kernels."""
    w1, w2, w3, wfc = torch_params
    # Conv_1 + pool_1 folded: [8*8*2, 64] = [128, 64] (K exactly lane-aligned).
    w1m = _fold_pool_into_conv_weight(w1).reshape(8 * 8 * 2, 64)
    # Conv_2 (pool_2 is unused in forward): [49*64, 128] -> K padded to 3200.
    w2m = jnp.transpose(w2, (2, 3, 1, 0)).reshape(49 * 64, 128)
    w2m = jnp.pad(w2m, ((0, 3200 - 49 * 64), (0, 0)))
    # Conv_3 + pool_3 folded: [8*8*128, 128] = [8192, 128].
    w3m = _fold_pool_into_conv_weight(w3).reshape(8 * 8 * 128, 128)
    # FC: torch flatten order is (c,h,w); kernels use NHWC (h,w,c) flatten, so
    # pre-permute once here (no per-step transpose) and pad 11 -> 128 lanes.
    wfcm = wfc.reshape(11, 128, 5, 5).transpose(0, 2, 3, 1).reshape(11, 3200).T
    wfcm = jnp.pad(wfcm, ((0, 0), (0, 128 - 11)))
    to_bf16 = lambda a: a.astype(jnp.bfloat16)
    return to_bf16(w1m), to_bf16(w2m), to_bf16(w3m), to_bf16(wfcm)


# ----------------------------------------------------------------------------
# Net.forward (jit + scan over time)
# ----------------------------------------------------------------------------

def net_forward(params, x_tbchw, rng_key, *, beta, threshold, temp):
    w1m, w2m, w3m, wfcm = params
    T, B, Cin, H, W = x_tbchw.shape
    assert Cin == 2 and H == W

    p1 = (H + 4 - 7 + 1) // 2            # pool_1 output side   (15 for H=32)
    c2 = p1 + 4 - 7 + 1                  # Conv_2 output side   (13)
    p3 = (c2 + 4 - 7 + 1) // 2           # pool_3 output side   (5)
    assert p3 * p3 * 128 == wfcm.shape[0], "input must yield 5x5x128 features"

    nb = 2                               # M blocks per conv (>=2 -> both TCs on v7x)
    M1, M2, M3 = B * p1 * p1, B * c2 * c2, B * p3 * p3
    M1p, M2p, M3p = (_round_up(m, 8 * nb) for m in (M1, M2, M3))
    Bp = _round_up(B, 8)

    spk_dtype = jnp.bfloat16 if temp == 0.0 else jnp.float32   # 0/1 exact in bf16
    lif_kw = dict(beta=beta, threshold=threshold, temp=temp)

    x_seq = jnp.transpose(x_tbchw, (0, 1, 3, 4, 2)).astype(jnp.bfloat16)
    step_keys = jax.random.split(rng_key, T)

    def step_fn(carry, xs):
        mem1, mem2, mem3, mem4, out_sum = carry
        xt, key = xs
        k1, k2, k3, k4 = jax.random.split(key, 4)

        # ---- Conv_1 (+ folded pool_1) + LiF_1 : one fused pallas_call ----
        pch, _, _ = conv_patches(xt, ksize=8, stride=2)              # [M1, 128]
        pch = _pad_rows(pch, M1p)
        u1 = jax.random.uniform(k1, (M1p, 64), jnp.float32)
        spk1, mem1 = matmul_lif_pallas(pch, w1m, u1, mem1, num_blocks=nb,
                                       spk_dtype=spk_dtype, **lif_kw)
        spk1_map = spk1[:M1].reshape(B, p1, p1, 64)

        # ---- Conv_2 + LiF_2 (pool_2 exists in __init__ but is unused) ----
        pch, _, _ = conv_patches(spk1_map.astype(jnp.bfloat16),
                                 ksize=7, stride=1)                  # [M2, 3136]
        pch = _pad_rows(_pad_cols(pch, w2m.shape[0]), M2p)
        u2 = jax.random.uniform(k2, (M2p, 128), jnp.float32)
        spk2, mem2 = matmul_lif_pallas(pch, w2m, u2, mem2, num_blocks=nb,
                                       spk_dtype=spk_dtype, **lif_kw)
        spk2_map = spk2[:M2].reshape(B, c2, c2, 128)

        # ---- Conv_3 (+ folded pool_3) + LiF_3 ----
        pch, _, _ = conv_patches(spk2_map.astype(jnp.bfloat16),
                                 ksize=8, stride=2)                  # [M3, 8192]
        pch = _pad_rows(pch, M3p)
        u3 = jax.random.uniform(k3, (M3p, 128), jnp.float32)
        spk3, mem3 = matmul_lif_pallas(pch, w3m, u3, mem3, num_blocks=nb,
                                       spk_dtype=spk_dtype, **lif_kw)
        spk3_map = spk3[:M3].reshape(B, p3, p3, 128)

        # ---- FC (weight pre-permuted to NHWC flatten order) + LiF_out ----
        flat = _pad_rows(spk3_map.reshape(B, p3 * p3 * 128),
                         Bp).astype(jnp.bfloat16)
        u4 = jax.random.uniform(k4, (Bp, 128), jnp.float32)
        spk4p, mem4 = matmul_lif_pallas(flat, wfcm, u4, mem4, num_blocks=1,
                                        valid_cols=11, spk_dtype=spk_dtype,
                                        **lif_kw)
        spk4 = spk4p[:B, :11].astype(jnp.float32)
        mem4_rec = mem4[:B, :11]

        out_sum = out_sum + spk4
        carry = (mem1, mem2, mem3, mem4, out_sum)
        # Records kept in NHWC; NCHW transposes happen once after the scan.
        return carry, (spk4, mem4_rec, spk1_map, spk2_map, spk3_map)

    carry0 = (jnp.zeros((M1p, 64), jnp.float32),
              jnp.zeros((M2p, 128), jnp.float32),
              jnp.zeros((M3p, 128), jnp.float32),
              jnp.zeros((Bp, 128), jnp.float32),
              jnp.zeros((B, 11), jnp.float32))

    (_, _, _, _, out_sum), ys = jax.lax.scan(step_fn, carry0, (x_seq, step_keys))
    spk4_rec, mem4_rec, l1, l2, l3 = ys

    to_nchw = lambda a: jnp.transpose(a.astype(jnp.float32), (0, 1, 4, 2, 3))
    return (out_sum / T, spk4_rec, mem4_rec,
            to_nchw(l1), to_nchw(l2), to_nchw(l3))


# ----------------------------------------------------------------------------
# Main
# ----------------------------------------------------------------------------

if __name__ == "__main__":
    key = jax.random.PRNGKey(0)
    k_in, k_param, k_rng = jax.random.split(key, 3)

    # FC expects 5*5*128 features -> 32x32 DVS frames, 2 polarity channels.
    T, B, H, W = 3, 2, 32, 32
    x = jax.random.normal(k_in, (T, B, 2, H, W), dtype=jnp.float32)

    params = prepare_params(init_torch_params(k_param))

    fwd = jax.jit(functools.partial(net_forward, beta=0.9, threshold=1.0,
                                    temp=0.0))
    outs = jax.block_until_ready(fwd(params, x, k_rng))

    out_sum, spk4_rec, mem4_rec, l1, l2, l3 = outs
    assert out_sum.shape == (B, 11)
    assert spk4_rec.shape == (T, B, 11)
    assert mem4_rec.shape == (T, B, 11)
    assert l1.shape == (T, B, 64, 15, 15)
    assert l2.shape == (T, B, 128, 13, 13)
    assert l3.shape == (T, B, 128, 5, 5)
    assert bool(jnp.all(jnp.isfinite(out_sum)))

    print("KERNEL_OK")
</pallas_src>

<mosaic_0001>
module attributes {stable_mosaic.version = 11 : i64} {
  func.func @_matmul_lif_kernel(%arg0: i32, %arg1: memref<232x128xbf16, #tpu.memory_space<vmem>>, %arg2: memref<128x64xbf16, #tpu.memory_space<vmem>>, %arg3: memref<232x64xf32, #tpu.memory_space<vmem>>, %arg4: memref<232x64xf32, #tpu.memory_space<vmem>>, %arg5: memref<232x64xbf16, #tpu.memory_space<vmem>>, %arg6: memref<232x64xf32, #tpu.memory_space<vmem>>) attributes {dimension_semantics = [#tpu.dimension_semantics<parallel>], iteration_bounds = array<i64: 2>, scalar_prefetch = 0 : i64, scratch_operands = 0 : i64, tpu.core_type = #tpu.core_type<tc>, window_params = [{transform_indices = @transform_0, window_bounds = array<i64: 232, 128>}, {pipeline_mode = #tpu.pipeline_mode<synchronous>, transform_indices = @transform_1, window_bounds = array<i64: 128, 64>}, {transform_indices = @transform_2, window_bounds = array<i64: 232, 64>}, {transform_indices = @transform_3, window_bounds = array<i64: 232, 64>}, {transform_indices = @transform_4, window_bounds = array<i64: 232, 64>}, {transform_indices = @transform_5, window_bounds = array<i64: 232, 64>}]} {
    %c0 = arith.constant 0 : index
    %c0_0 = arith.constant 0 : index
    %0 = vector.load %arg1[%c0, %c0_0] : memref<232x128xbf16, #tpu.memory_space<vmem>>, vector<232x128xbf16>
    %c0_1 = arith.constant 0 : index
    %c0_2 = arith.constant 0 : index
    %1 = vector.load %arg2[%c0_1, %c0_2] : memref<128x64xbf16, #tpu.memory_space<vmem>>, vector<128x64xbf16>
    %cst = arith.constant dense<0.000000e+00> : vector<232x64xf32>
    %2 = tpu.matmul %0, %1, %cst {dimension_numbers = #tpu.dot_dimension_numbers<[1], [0], [0], [1], [0, 0, 1, 1], [], []>} : vector<232x128xbf16>, vector<128x64xbf16>, vector<232x64xf32> -> vector<232x64xf32>
    %c0_3 = arith.constant 0 : index
    %c0_4 = arith.constant 0 : index
    %3 = vector.load %arg4[%c0_3, %c0_4] : memref<232x64xf32, #tpu.memory_space<vmem>>, vector<232x64xf32>
    %cst_5 = arith.constant 0.899999976 : f32
    %4 = vector.broadcast %cst_5 : f32 to vector<232x64xf32>
    %5 = arith.mulf %4, %3 : vector<232x64xf32>
    %6 = arith.addf %5, %2 : vector<232x64xf32>
    %cst_6 = arith.constant 1.000000e+00 : f32
    %7 = vector.broadcast %cst_6 : f32 to vector<232x64xf32>
    %8 = arith.subf %6, %7 : vector<232x64xf32>
    %c0_7 = arith.constant 0 : index
    %c0_8 = arith.constant 0 : index
    %9 = vector.load %arg3[%c0_7, %c0_8] : memref<232x64xf32, #tpu.memory_space<vmem>>, vector<232x64xf32>
    %cst_9 = arith.constant 0.000000e+00 : f32
    %10 = vector.broadcast %cst_9 : f32 to vector<232x64xf32>
    %11 = arith.subf %10, %8 : vector<232x64xf32>
    %12 = math.exp %11 : vector<232x64xf32>
    %cst_10 = arith.constant 1.000000e+00 : f32
    %13 = vector.broadcast %cst_10 : f32 to vector<232x64xf32>
    %14 = arith.addf %13, %12 : vector<232x64xf32>
    %cst_11 = arith.constant 1.000000e+00 : f32
    %15 = vector.broadcast %cst_11 : f32 to vector<232x64xf32>
    %16 = arith.divf %15, %14 : vector<232x64xf32>
    %17 = arith.cmpf olt, %9, %16 : vector<232x64xf32>
    %18 = arith.extui %17 : vector<232x64xi1> to vector<232x64xi32>
    %19 = arith.sitofp %18 : vector<232x64xi32> to vector<232x64xf32>
    %20 = arith.truncf %19 : vector<232x64xf32> to vector<232x64xbf16>
    %c0_12 = arith.constant 0 : index
    %c0_13 = arith.constant 0 : index
    %21 = vector.load %arg5[%c0_12, %c0_13] : memref<232x64xbf16, #tpu.memory_space<vmem>>, vector<232x64xbf16>
    tpu.vector_store %arg5[%c0_12, %c0_13], %20 {strides = array<i32>} : memref<232x64xbf16, #tpu.memory_space<vmem>>, vector<232x64xbf16>,
    %c0_14 = arith.constant 0 : index
    %c0_15 = arith.constant 0 : index
    %22 = vector.load %arg6[%c0_14, %c0_15] : memref<232x64xf32, #tpu.memory_space<vmem>>, vector<232x64xf32>
    tpu.vector_store %arg6[%c0_14, %c0_15], %6 {strides = array<i32>} : memref<232x64xf32, #tpu.memory_space<vmem>>, vector<232x64xf32>,
    return
  }
  func.func @transform_0(%arg0: i32) -> (i32, i32) {
    %c0_i32 = arith.constant 0 : i32
    %c0_i32_0 = arith.constant 0 : i32
    return %arg0, %c0_i32 : i32, i32
  }
  func.func @transform_1(%arg0: i32) -> (i32, i32) {
    %c0_i32 = arith.constant 0 : i32
    %c0_i32_0 = arith.constant 0 : i32
    %c0_i32_1 = arith.constant 0 : i32
    return %c0_i32, %c0_i32_0 : i32, i32
  }
  func.func @transform_2(%arg0: i32) -> (i32, i32) {
    %c0_i32 = arith.constant 0 : i32
    %c0_i32_0 = arith.constant 0 : i32
    return %arg0, %c0_i32 : i32, i32
  }
  func.func @transform_3(%arg0: i32) -> (i32, i32) {
    %c0_i32 = arith.constant 0 : i32
    %c0_i32_0 = arith.constant 0 : i32
    return %arg0, %c0_i32 : i32, i32
  }
  func.func @transform_4(%arg0: i32) -> (i32, i32) {
    %c0_i32 = arith.constant 0 : i32
    %c0_i32_0 = arith.constant 0 : i32
    return %arg0, %c0_i32 : i32, i32
  }
  func.func @transform_5(%arg0: i32) -> (i32, i32) {
    %c0_i32 = arith.constant 0 : i32
    %c0_i32_0 = arith.constant 0 : i32
    return %arg0, %c0_i32 : i32, i32
  }
}

module attributes {stable_mosaic.version = 11 : i64} {
  func.func @_matmul_lif_kernel(%arg0: i32, %arg1: memref<176x3200xbf16, #tpu.memory_space<vmem>>, %arg2: memref<3200x128xbf16, #tpu.memory_space<vmem>>, %arg3: memref<176x128xf32, #tpu.memory_space<vmem>>, %arg4: memref<176x128xf32, #tpu.memory_space<vmem>>, %arg5: memref<176x128xbf16, #tpu.memory_space<vmem>>, %arg6: memref<176x128xf32, #tpu.memory_space<vmem>>) attributes {dimension_semantics = [#tpu.dimension_semantics<parallel>], iteration_bounds = array<i64: 2>, scalar_prefetch = 0 : i64, scratch_operands = 0 : i64, tpu.core_type = #tpu.core_type<tc>, window_params = [{transform_indices = @transform_0, window_bounds = array<i64: 176, 3200>}, {pipeline_mode = #tpu.pipeline_mode<synchronous>, transform_indices = @transform_1, window_bounds = array<i64: 3200, 128>}, {transform_indices = @transform_2, window_bounds = array<i64: 176, 128>}, {transform_indices = @transform_3, window_bounds = array<i64: 176, 128>}, {transform_indices = @transform_4, window_bounds = array<i64: 176, 128>}, {transform_indices = @transform_5, window_bounds = array<i64: 176, 128>}]} {
    %c0 = arith.constant 0 : index
    %c0_0 = arith.constant 0 : index
    %0 = vector.load %arg1[%c0, %c0_0] : memref<176x3200xbf16, #tpu.memory_space<vmem>>, vector<176x3200xbf16>
    %c0_1 = arith.constant 0 : index
    %c0_2 = arith.constant 0 : index
    %1 = vector.load %arg2[%c0_1, %c0_2] : memref<3200x128xbf16, #tpu.memory_space<vmem>>, vector<3200x128xbf16>
    %cst = arith.constant dense<0.000000e+00> : vector<176x128xf32>
    %2 = tpu.matmul %0, %1, %cst {dimension_numbers = #tpu.dot_dimension_numbers<[1], [0], [0], [1], [0, 0, 1, 1], [], []>} : vector<176x3200xbf16>, vector<3200x128xbf16>, vector<176x128xf32> -> vector<176x128xf32>
    %c0_3 = arith.constant 0 : index
    %c0_4 = arith.constant 0 : index
    %3 = vector.load %arg4[%c0_3, %c0_4] : memref<176x128xf32, #tpu.memory_space<vmem>>, vector<176x128xf32>
    %cst_5 = arith.constant 0.899999976 : f32
    %4 = vector.broadcast %cst_5 : f32 to vector<176x128xf32>
    %5 = arith.mulf %4, %3 : vector<176x128xf32>
    %6 = arith.addf %5, %2 : vector<176x128xf32>
    %cst_6 = arith.constant 1.000000e+00 : f32
    %7 = vector.broadcast %cst_6 : f32 to vector<176x128xf32>
    %8 = arith.subf %6, %7 : vector<176x128xf32>
    %c0_7 = arith.constant 0 : index
    %c0_8 = arith.constant 0 : index
    %9 = vector.load %arg3[%c0_7, %c0_8] : memref<176x128xf32, #tpu.memory_space<vmem>>, vector<176x128xf32>
    %cst_9 = arith.constant 0.000000e+00 : f32
    %10 = vector.broadcast %cst_9 : f32 to vector<176x128xf32>
    %11 = arith.subf %10, %8 : vector<176x128xf32>
    %12 = math.exp %11 : vector<176x128xf32>
    %cst_10 = arith.constant 1.000000e+00 : f32
    %13 = vector.broadcast %cst_10 : f32 to vector<176x128xf32>
    %14 = arith.addf %13, %12 : vector<176x128xf32>
    %cst_11 = arith.constant 1.000000e+00 : f32
    %15 = vector.broadcast %cst_11 : f32 to vector<176x128xf32>
    %16 = arith.divf %15, %14 : vector<176x128xf32>
    %17 = arith.cmpf olt, %9, %16 : vector<176x128xf32>
    %18 = arith.extui %17 : vector<176x128xi1> to vector<176x128xi32>
    %19 = arith.sitofp %18 : vector<176x128xi32> to vector<176x128xf32>
    %20 = arith.truncf %19 : vector<176x128xf32> to vector<176x128xbf16>
    %c0_12 = arith.constant 0 : index
    %c0_13 = arith.constant 0 : index
    %21 = vector.load %arg5[%c0_12, %c0_13] : memref<176x128xbf16, #tpu.memory_space<vmem>>, vector<176x128xbf16>
    tpu.vector_store %arg5[%c0_12, %c0_13], %20 {strides = array<i32>} : memref<176x128xbf16, #tpu.memory_space<vmem>>, vector<176x128xbf16>,
    %c0_14 = arith.constant 0 : index
    %c0_15 = arith.constant 0 : index
    %22 = vector.load %arg6[%c0_14, %c0_15] : memref<176x128xf32, #tpu.memory_space<vmem>>, vector<176x128xf32>
    tpu.vector_store %arg6[%c0_14, %c0_15], %6 {strides = array<i32>} : memref<176x128xf32, #tpu.memory_space<vmem>>, vector<176x128xf32>,
    return
  }
  func.func @transform_0(%arg0: i32) -> (i32, i32) {
    %c0_i32 = arith.constant 0 : i32
    %c0_i32_0 = arith.constant 0 : i32
    return %arg0, %c0_i32 : i32, i32
  }
  func.func @transform_1(%arg0: i32) -> (i32, i32) {
    %c0_i32 = arith.constant 0 : i32
    %c0_i32_0 = arith.constant 0 : i32
    %c0_i32_1 = arith.constant 0 : i32
    return %c0_i32, %c0_i32_0 : i32, i32
  }
  func.func @transform_2(%arg0: i32) -> (i32, i32) {
    %c0_i32 = arith.constant 0 : i32
    %c0_i32_0 = arith.constant 0 : i32
    return %arg0, %c0_i32 : i32, i32
  }
  func.func @transform_3(%arg0: i32) -> (i32, i32) {
    %c0_i32 = arith.constant 0 : i32
    %c0_i32_0 = arith.constant 0 : i32
    return %arg0, %c0_i32 : i32, i32
  }
  func.func @transform_4(%arg0: i32) -> (i32, i32) {
    %c0_i32 = arith.constant 0 : i32
    %c0_i32_0 = arith.constant 0 : i32
    return %arg0, %c0_i32 : i32, i32
  }
  func.func @transform_5(%arg0: i32) -> (i32, i32) {
    %c0_i32 = arith.constant 0 : i32
    %c0_i32_0 = arith.constant 0 : i32
    return %arg0, %c0_i32 : i32, i32
  }
}

module attributes {stable_mosaic.version = 11 : i64} {
  func.func @_matmul_lif_kernel(%arg0: i32, %arg1: memref<32x8192xbf16, #tpu.memory_space<vmem>>, %arg2: memref<8192x128xbf16, #tpu.memory_space<vmem>>, %arg3: memref<32x128xf32, #tpu.memory_space<vmem>>, %arg4: memref<32x128xf32, #tpu.memory_space<vmem>>, %arg5: memref<32x128xbf16, #tpu.memory_space<vmem>>, %arg6: memref<32x128xf32, #tpu.memory_space<vmem>>) attributes {dimension_semantics = [#tpu.dimension_semantics<parallel>], iteration_bounds = array<i64: 2>, scalar_prefetch = 0 : i64, scratch_operands = 0 : i64, tpu.core_type = #tpu.core_type<tc>, window_params = [{transform_indices = @transform_0, window_bounds = array<i64: 32, 8192>}, {pipeline_mode = #tpu.pipeline_mode<synchronous>, transform_indices = @transform_1, window_bounds = array<i64: 8192, 128>}, {transform_indices = @transform_2, window_bounds = array<i64: 32, 128>}, {transform_indices = @transform_3, window_bounds = array<i64: 32, 128>}, {transform_indices = @transform_4, window_bounds = array<i64: 32, 128>}, {transform_indices = @transform_5, window_bounds = array<i64: 32, 128>}]} {
    %c0 = arith.constant 0 : index
    %c0_0 = arith.constant 0 : index
    %0 = vector.load %arg1[%c0, %c0_0] : memref<32x8192xbf16, #tpu.memory_space<vmem>>, vector<32x8192xbf16>
    %c0_1 = arith.constant 0 : index
    %c0_2 = arith.constant 0 : index
    %1 = vector.load %arg2[%c0_1, %c0_2] : memref<8192x128xbf16, #tpu.memory_space<vmem>>, vector<8192x128xbf16>
    %cst = arith.constant dense<0.000000e+00> : vector<32x128xf32>
    %2 = tpu.matmul %0, %1, %cst {dimension_numbers = #tpu.dot_dimension_numbers<[1], [0], [0], [1], [0, 0, 1, 1], [], []>} : vector<32x8192xbf16>, vector<8192x128xbf16>, vector<32x128xf32> -> vector<32x128xf32>
    %c0_3 = arith.constant 0 : index
    %c0_4 = arith.constant 0 : index
    %3 = vector.load %arg4[%c0_3, %c0_4] : memref<32x128xf32, #tpu.memory_space<vmem>>, vector<32x128xf32>
    %cst_5 = arith.constant 0.899999976 : f32
    %4 = vector.broadcast %cst_5 : f32 to vector<32x128xf32>
    %5 = arith.mulf %4, %3 : vector<32x128xf32>
    %6 = arith.addf %5, %2 : vector<32x128xf32>
    %cst_6 = arith.constant 1.000000e+00 : f32
    %7 = vector.broadcast %cst_6 : f32 to vector<32x128xf32>
    %8 = arith.subf %6, %7 : vector<32x128xf32>
    %c0_7 = arith.constant 0 : index
    %c0_8 = arith.constant 0 : index
    %9 = vector.load %arg3[%c0_7, %c0_8] : memref<32x128xf32, #tpu.memory_space<vmem>>, vector<32x128xf32>
    %cst_9 = arith.constant 0.000000e+00 : f32
    %10 = vector.broadcast %cst_9 : f32 to vector<32x128xf32>
    %11 = arith.subf %10, %8 : vector<32x128xf32>
    %12 = math.exp %11 : vector<32x128xf32>
    %cst_10 = arith.constant 1.000000e+00 : f32
    %13 = vector.broadcast %cst_10 : f32 to vector<32x128xf32>
    %14 = arith.addf %13, %12 : vector<32x128xf32>
    %cst_11 = arith.constant 1.000000e+00 : f32
    %15 = vector.broadcast %cst_11 : f32 to vector<32x128xf32>
    %16 = arith.divf %15, %14 : vector<32x128xf32>
    %17 = arith.cmpf olt, %9, %16 : vector<32x128xf32>
    %18 = arith.extui %17 : vector<32x128xi1> to vector<32x128xi32>
    %19 = arith.sitofp %18 : vector<32x128xi32> to vector<32x128xf32>
    %20 = arith.truncf %19 : vector<32x128xf32> to vector<32x128xbf16>
    %c0_12 = arith.constant 0 : index
    %c0_13 = arith.constant 0 : index
    %21 = vector.load %arg5[%c0_12, %c0_13] : memref<32x128xbf16, #tpu.memory_space<vmem>>, vector<32x128xbf16>
    tpu.vector_store %arg5[%c0_12, %c0_13], %20 {strides = array<i32>} : memref<32x128xbf16, #tpu.memory_space<vmem>>, vector<32x128xbf16>,
    %c0_14 = arith.constant 0 : index
    %c0_15 = arith.constant 0 : index
    %22 = vector.load %arg6[%c0_14, %c0_15] : memref<32x128xf32, #tpu.memory_space<vmem>>, vector<32x128xf32>
    tpu.vector_store %arg6[%c0_14, %c0_15], %6 {strides = array<i32>} : memref<32x128xf32, #tpu.memory_space<vmem>>, vector<32x128xf32>,
    return
  }
  func.func @transform_0(%arg0: i32) -> (i32, i32) {
    %c0_i32 = arith.constant 0 : i32
    %c0_i32_0 = arith.constant 0 : i32
    return %arg0, %c0_i32 : i32, i32
  }
  func.func @transform_1(%arg0: i32) -> (i32, i32) {
    %c0_i32 = arith.constant 0 : i32
    %c0_i32_0 = arith.constant 0 : i32
    %c0_i32_1 = arith.constant 0 : i32
    return %c0_i32, %c0_i32_0 : i32, i32
  }
  func.func @transform_2(%arg0: i32) -> (i32, i32) {
    %c0_i32 = arith.constant 0 : i32
    %c0_i32_0 = arith.constant 0 : i32
    return %arg0, %c0_i32 : i32, i32
  }
  func.func @transform_3(%arg0: i32) -> (i32, i32) {
    %c0_i32 = arith.constant 0 : i32
    %c0_i32_0 = arith.constant 0 : i32
    return %arg0, %c0_i32 : i32, i32
  }
  func.func @transform_4(%arg0: i32) -> (i32, i32) {
    %c0_i32 = arith.constant 0 : i32
    %c0_i32_0 = arith.constant 0 : i32
    return %arg0, %c0_i32 : i32, i32
  }
  func.func @transform_5(%arg0: i32) -> (i32, i32) {
    %c0_i32 = arith.constant 0 : i32
    %c0_i32_0 = arith.constant 0 : i32
    return %arg0, %c0_i32 : i32, i32
  }
}

module attributes {stable_mosaic.version = 11 : i64} {
  func.func @_matmul_lif_kernel(%arg0: i32, %arg1: memref<8x3200xbf16, #tpu.memory_space<vmem>>, %arg2: memref<3200x128xbf16, #tpu.memory_space<vmem>>, %arg3: memref<8x128xf32, #tpu.memory_space<vmem>>, %arg4: memref<8x128xf32, #tpu.memory_space<vmem>>, %arg5: memref<8x128xbf16, #tpu.memory_space<vmem>>, %arg6: memref<8x128xf32, #tpu.memory_space<vmem>>) attributes {dimension_semantics = [#tpu.dimension_semantics<parallel>], iteration_bounds = array<i64: 1>, scalar_prefetch = 0 : i64, scratch_operands = 0 : i64, tpu.core_type = #tpu.core_type<tc>, window_params = [{transform_indices = @transform_0, window_bounds = array<i64: 8, 3200>}, {pipeline_mode = #tpu.pipeline_mode<synchronous>, transform_indices = @transform_1, window_bounds = array<i64: 3200, 128>}, {transform_indices = @transform_2, window_bounds = array<i64: 8, 128>}, {transform_indices = @transform_3, window_bounds = array<i64: 8, 128>}, {transform_indices = @transform_4, window_bounds = array<i64: 8, 128>}, {transform_indices = @transform_5, window_bounds = array<i64: 8, 128>}]} {
    %c0 = arith.constant 0 : index
    %c0_0 = arith.constant 0 : index
    %0 = vector.load %arg1[%c0, %c0_0] : memref<8x3200xbf16, #tpu.memory_space<vmem>>, vector<8x3200xbf16>
    %c0_1 = arith.constant 0 : index
    %c0_2 = arith.constant 0 : index
    %1 = vector.load %arg2[%c0_1, %c0_2] : memref<3200x128xbf16, #tpu.memory_space<vmem>>, vector<3200x128xbf16>
    %cst = arith.constant dense<0.000000e+00> : vector<8x128xf32>
    %2 = tpu.matmul %0, %1, %cst {dimension_numbers = #tpu.dot_dimension_numbers<[1], [0], [0], [1], [0, 0, 1, 1], [], []>} : vector<8x3200xbf16>, vector<3200x128xbf16>, vector<8x128xf32> -> vector<8x128xf32>
    %c0_3 = arith.constant 0 : index
    %c0_4 = arith.constant 0 : index
    %3 = vector.load %arg4[%c0_3, %c0_4] : memref<8x128xf32, #tpu.memory_space<vmem>>, vector<8x128xf32>
    %cst_5 = arith.constant 0.899999976 : f32
    %4 = vector.broadcast %cst_5 : f32 to vector<8x128xf32>
    %5 = arith.mulf %4, %3 : vector<8x128xf32>
    %6 = arith.addf %5, %2 : vector<8x128xf32>
    %cst_6 = arith.constant 1.000000e+00 : f32
    %7 = vector.broadcast %cst_6 : f32 to vector<8x128xf32>
    %8 = arith.subf %6, %7 : vector<8x128xf32>
    %c0_7 = arith.constant 0 : index
    %c0_8 = arith.constant 0 : index
    %9 = vector.load %arg3[%c0_7, %c0_8] : memref<8x128xf32, #tpu.memory_space<vmem>>, vector<8x128xf32>
    %cst_9 = arith.constant 0.000000e+00 : f32
    %10 = vector.broadcast %cst_9 : f32 to vector<8x128xf32>
    %11 = arith.subf %10, %8 : vector<8x128xf32>
    %12 = math.exp %11 : vector<8x128xf32>
    %cst_10 = arith.constant 1.000000e+00 : f32
    %13 = vector.broadcast %cst_10 : f32 to vector<8x128xf32>
    %14 = arith.addf %13, %12 : vector<8x128xf32>
    %cst_11 = arith.constant 1.000000e+00 : f32
    %15 = vector.broadcast %cst_11 : f32 to vector<8x128xf32>
    %16 = arith.divf %15, %14 : vector<8x128xf32>
    %17 = arith.cmpf olt, %9, %16 : vector<8x128xf32>
    %18 = arith.extui %17 : vector<8x128xi1> to vector<8x128xi32>
    %19 = arith.sitofp %18 : vector<8x128xi32> to vector<8x128xf32>
    %20 = tpu.iota {dimensions = array<i32: 1>} : vector<8x128xi32>
    %c11_i32 = arith.constant 11 : i32
    %21 = vector.broadcast %c11_i32 : i32 to vector<8x128xi32>
    %22 = arith.cmpi slt, %20, %21 : vector<8x128xi32>
    %cst_12 = arith.constant 0.000000e+00 : f32
    %23 = vector.broadcast %cst_12 : f32 to vector<8x128xf32>
    %24 = arith.select %22, %19, %23 : vector<8x128xi1>, vector<8x128xf32>
    %cst_13 = arith.constant 0.000000e+00 : f32
    %25 = vector.broadcast %cst_13 : f32 to vector<8x128xf32>
    %26 = arith.select %22, %6, %25 : vector<8x128xi1>, vector<8x128xf32>
    %27 = arith.truncf %24 : vector<8x128xf32> to vector<8x128xbf16>
    %c0_14 = arith.constant 0 : index
    %c0_15 = arith.constant 0 : index
    %28 = vector.load %arg5[%c0_14, %c0_15] : memref<8x128xbf16, #tpu.memory_space<vmem>>, vector<8x128xbf16>
    tpu.vector_store %arg5[%c0_14, %c0_15], %27 {strides = array<i32>} : memref<8x128xbf16, #tpu.memory_space<vmem>>, vector<8x128xbf16>,
    %c0_16 = arith.constant 0 : index
    %c0_17 = arith.constant 0 : index
    %29 = vector.load %arg6[%c0_16, %c0_17] : memref<8x128xf32, #tpu.memory_space<vmem>>, vector<8x128xf32>
    tpu.vector_store %arg6[%c0_16, %c0_17], %26 {strides = array<i32>} : memref<8x128xf32, #tpu.memory_space<vmem>>, vector<8x128xf32>,
    return
  }
  func.func @transform_0(%arg0: i32) -> (i32, i32) {
    %c0_i32 = arith.constant 0 : i32
    %c0_i32_0 = arith.constant 0 : i32
    return %arg0, %c0_i32 : i32, i32
  }
  func.func @transform_1(%arg0: i32) -> (i32, i32) {
    %c0_i32 = arith.constant 0 : i32
    %c0_i32_0 = arith.constant 0 : i32
    %c0_i32_1 = arith.constant 0 : i32
    return %c0_i32, %c0_i32_0 : i32, i32
  }
  func.func @transform_2(%arg0: i32) -> (i32, i32) {
    %c0_i32 = arith.constant 0 : i32
    %c0_i32_0 = arith.constant 0 : i32
    return %arg0, %c0_i32 : i32, i32
  }
  func.func @transform_3(%arg0: i32) -> (i32, i32) {
    %c0_i32 = arith.constant 0 : i32
    %c0_i32_0 = arith.constant 0 : i32
    return %arg0, %c0_i32 : i32, i32
  }
  func.func @transform_4(%arg0: i32) -> (i32, i32) {
    %c0_i32 = arith.constant 0 : i32
    %c0_i32_0 = arith.constant 0 : i32
    return %arg0, %c0_i32 : i32, i32
  }
  func.func @transform_5(%arg0: i32) -> (i32, i32) {
    %c0_i32 = arith.constant 0 : i32
    %c0_i32_0 = arith.constant 0 : i32
    return %arg0, %c0_i32 : i32, i32
  }
}

</mosaic_0001>

<bundles_post_ra>
// kernel: custom-call.5
= control target key start
LH: loop header
LB: loop body
LE: loop exit
PB: predicated region body
PF: predicated region fallthrough
CT: control target
= control target key end

     0   :  { %s6_s0 = inlined_call_operand.vmem [shape: bf16[3,2,13,13,128], index: 0, kind: output, shape index: {}]  }

// kernel: custom-call.4
= control target key start
LH: loop header
LB: loop body
LE: loop exit
PB: predicated region body
PF: predicated region fallthrough
CT: control target
= control target key end

     0   :  { %s6_s0 = inlined_call_operand.vmem [shape: bf16[3,2,15,15,64], index: 0, kind: output, shape index: {}]  }

// kernel: custom-call.6
= control target key start
LH: loop header
LB: loop body
LE: loop exit
PB: predicated region body
PF: predicated region fallthrough
CT: control target
= control target key end

     0   :  { %s6_s0 = inlined_call_operand.vmem [shape: bf16[3,2,5,5,128], index: 0, kind: output, shape index: {}]  }

// kernel: custom-call.2
= control target key start
LH: loop header
LB: loop body
LE: loop exit
PB: predicated region body
PF: predicated region fallthrough
CT: control target
= control target key end

     0   :  { %s6_s0 = inlined_call_operand.vmem [shape: f32[3,2,11], index: 0, kind: output, shape index: {}]  }

// kernel: custom-call
= control target key start
LH: loop header
LB: loop body
LE: loop exit
PB: predicated region body
PF: predicated region fallthrough
CT: control target
= control target key end

     0   :  { %s6_s0 = inlined_call_operand.vmem [shape: f32[2,11], index: 0, kind: output, shape index: {}]  }

// kernel: closed_call.46
= control target key start
LH: loop header
LB: loop body
LE: loop exit
PB: predicated region body
PF: predicated region fallthrough
CT: control target
= control target key end

     0   :  { %s1772_s18 = smov 0   ;;  %s2211_s0 = inlined_call_operand.vmem [shape: bf16[464,128], index: 0, kind: input, shape index: {}]   ;;  %s2212_s1 = inlined_call_operand.vmem [shape: bf16[128,64], index: 1, kind: input, shape index: {}]   ;;  %s2213_s2 = inlined_call_operand.vmem [shape: f32[464,64], index: 2, kind: input, shape index: {}]   ;;  %s2214_s3 = inlined_call_operand.vmem [shape: f32[464,64], index: 3, kind: input, shape index: {}, may-alias: {3,5}]   ;;  %s2215_s4 = inlined_call_operand.vmem [shape: bf16[464,64], index: 4, kind: output, shape index: {0}]   ;;  %s2216_s5 = inlined_call_operand.vmem [shape: f32[464,64], index: 5, kind: output, shape index: {1}, may-alias: {3,5}]  }
   0x1 LB: > { %s1317_s19 = sadd.s32 4294967295, %s1738_s18   ;;  %p1321_p0 = scmp.ge.s32.totalorder %s1738_s18, 1  ;;  %s1738_s18 = sphi %s1772_s18, %s16_s18  }
   0x2   : > { %p213_p1 = scmp.lt.s32.totalorder %s1738_s18, 3 }
   0x4   : > { %p214_p2 = pnand %p1321_p0, %p213_p1 }
   0x5   : > { %v1593_v0 = vld [vmem:[%s2212_s1] sm:$0xff] (!%p214_p2)   ;;  %v1740_v1 = vmov (!%p214_p2), 0.0   ;;  %v1594_v2 = vld [vmem:[%s2212_s1 + $0x8] sm:$0xff] (!%p214_p2)   ;;  %s256_s24 = smul.u32 (!%p214_p2), 29, %s1317_s19  ;;  %vm1741_vm0 = vmmov (!%p214_p2), 0   ;;  %v1595_v3 = vld [vmem:[%s2212_s1 + $0x10] sm:$0xff] (!%p214_p2)  }
   0x6   : > { %217 = sbr.rel (%p214_p2) target bundleno = 355 (0x163), region = 36  ;;  %1491 = vmatprep.subr.bf16.mxu0 (!%p214_p2), %v1740_v1  ;;  %1567 = vmatprep.subr.bf16.mxu1 (!%p214_p2), %v1740_v1  ;;  %v1596_v4 = vld [vmem:[%s2212_s1 + $0x18] sm:$0xff] (!%p214_p2)   ;;  %v1597_v5 = vld [vmem:[%s2212_s1 + $0x20] sm:$0xff] (!%p214_p2)   ;;  %v1598_v6 = vld [vmem:[%s2212_s1 + $0x28] sm:$0xff] (!%p214_p2)   ;;  %vm1173_vm1 = vcmask (!%p214_p2), 523264   ;;  %vm1143_vm2 = vcmask (!%p214_p2), 519168  }
   0x7   : > { %1492 = vmatpush3.bf16.msra.mxu0 (!%p214_p2), %v1593_v0  ;;  %1575 = vmatpush3.bf16.msra.mxu1 (!%p214_p2), %v1593_v0  ;;  %p257_p3 = scmp.lt.s32.totalorder (!%p214_p2), %s256_s24, 57  ;;  %v1599_v7 = vld [vmem:[%s2212_s1 + $0x30] sm:$0xff] (!%p214_p2)   ;;  %v1600_v8 = vld [vmem:[%s2212_s1 + $0x38] sm:$0xff] (!%p214_p2)  }
   0x8   : > { %1493 = vmatprep.subr.bf16.mxu0 (!%p214_p2), %v1740_v1  ;;  %1568 = vmatprep.subr.bf16.mxu1 (!%p214_p2), %v1740_v1 }
   0x9   : > { %1507 = vmatprep.mubr.msk.bf16.mxu0 (!%p214_p2), %vm1741_vm0, %v1740_v1  ;;  %1539 = vmatprep.mubr.msk.bf16.mxu1 (!%p214_p2), %vm1741_vm0, %v1740_v1 }
   0xb   : > { %1494 = vmatpush3.bf16.msra.mxu0 (!%p214_p2), %v1594_v2  ;;  %1576 = vmatpush3.bf16.msra.mxu1 (!%p214_p2), %v1594_v2 }
   0xc   : > { %1495 = vmatprep.subr.bf16.mxu0 (!%p214_p2), %v1740_v1  ;;  %1569 = vmatprep.subr.bf16.mxu1 (!%p214_p2), %v1740_v1 }
   0xd   : > { %s2218_s24 = smov (!%p257_p3, %s256_s24), 57 }
   0xe   : > { %s1322_s27 = sshll.u32 %s2218_s24, 2  ;;  %s1876_s16 = sshll.u32 %s2218_s24, 3 }
   0xf   : > { %s1807_s30 = scalar_lea.vmem %s2211_s0, %s1322_s27  ;;  %1496 = vmatpush3.bf16.msra.mxu0 %v1595_v3  ;;  %1577 = vmatpush3.bf16.msra.mxu1 %v1595_v3  ;;  %s1882_s20 = scalar_lea.vmem %s2214_s3, %s1876_s16 }
  0x10   : > { %1497 = vmatprep.subr.bf16.mxu0 %v1740_v1  ;;  %1570 = vmatprep.subr.bf16.mxu1 %v1740_v1  ;;  %v1601_v9 = vld [vmem:[%s1807_s30] sm:$0xff]   ;;  %v1603_v11 = vld [vmem:[%s1807_s30 + $0x8] sm:$0xff]   ;;  %v1605_v13 = vld [vmem:[%s1807_s30 + $0x10] sm:$0xff]   ;;  %s1938_s23 = scalar_lea.vmem %s2216_s5, %s1876_s16  ;;  %s2028_s28 = scalar_lea.vmem %s2213_s2, %s1876_s16 }
  0x11   : > { %v1602_v10 = vld [vmem:[%s1807_s30 + $0x40] sm:$0xff]   ;;  %v1604_v12 = vld [vmem:[%s1807_s30 + $0x48] sm:$0xff]   ;;  %v1606_v14 = vld [vmem:[%s1807_s30 + $0x50] sm:$0xff]   ;;  %s2053_s6 = scalar_lea.vmem %s2215_s4, %s1322_s27 }
  0x12   : > { %v1607_v15 = vld [vmem:[%s1807_s30 + $0x18] sm:$0xff]   ;;  %v1609_v17 = vld [vmem:[%s1807_s30 + $0x20] sm:$0xff]   ;;  %v1611_v19 = vld [vmem:[%s1807_s30 + $0x28] sm:$0xff]  }
  0x13   : > { %1498 = vmatpush3.bf16.msra.mxu0 %v1596_v4  ;;  %1578 = vmatpush3.bf16.msra.mxu1 %v1596_v4  ;;  %v1608_v16 = vld [vmem:[%s1807_s30 + $0x58] sm:$0xff]   ;;  %v1610_v18 = vld [vmem:[%s1807_s30 + $0x60] sm:$0xff]   ;;  %v1612_v20 = vld [vmem:[%s1807_s30 + $0x68] sm:$0xff]  }
  0x14   : > { %1499 = vmatprep.subr.bf16.mxu0 %v1740_v1  ;;  %1571 = vmatprep.subr.bf16.mxu1 %v1740_v1  ;;  %v1613_v21 = vld [vmem:[%s1807_s30 + $0x30] sm:$0xff]   ;;  %v1615_v23 = vld [vmem:[%s1807_s30 + $0x38] sm:$0xff]   ;;  %v620_v24 = vld [vmem:[%s1882_s20] sm:$0xff] }
  0x15   : > { %v1614_v22 = vld [vmem:[%s1807_s30 + $0x70] ss:$0 sps:$4 sm:$0xff]   ;;  %v621_v25 = vld [vmem:[%s1882_s20 + $0x8] sm:$0xff]  ;;  %v636_v26 = vld [vmem:[%s1882_s20 + $0x80] sm:$0xff]  ;;  %v649_v27 = vmul.f32 0.9, %v620_v24 }
  0x16   : > { %v665_v28 = vmul.f32 0.9, %v636_v26  ;;  %v637_v29 = vld [vmem:[%s1882_s20 + $0x88] sm:$0xff]  ;;  %v650_v30 = vmul.f32 0.9, %v621_v25  ;;  %v622_v31 = vld [vmem:[%s1882_s20 + $0x10] sm:$0xff] }
  0x17   : > { %1500 = vmatpush3.bf16.msra.mxu0 %v1597_v5  ;;  %1579 = vmatpush3.bf16.msra.mxu1 %v1597_v5  ;;  %v623_v32 = vld [vmem:[%s1882_s20 + $0x18] sm:$0xff]  ;;  %v638_v33 = vld [vmem:[%s1882_s20 + $0x90] sm:$0xff]  ;;  %v624_v34 = vld [vmem:[%s1882_s20 + $0x20] sm:$0xff]  ;;  %v666_v50 = vmul.f32 0.9, %v637_v29 }
  0x18   : > { %1501 = vmatprep.subr.bf16.mxu0 %v1740_v1  ;;  %1572 = vmatprep.subr.bf16.mxu1 %v1740_v1  ;;  %v639_v35 = vld [vmem:[%s1882_s20 + $0x98] sm:$0xff]  ;;  %v625_v36 = vld [vmem:[%s1882_s20 + $0x28] sm:$0xff]  ;;  %v640_v37 = vld [vmem:[%s1882_s20 + $0xa0] sm:$0xff]  ;;  %v651_v0 = vmul.f32 0.9, %v622_v31 }
  0x19   : > { %v626_v38 = vld [vmem:[%s1882_s20 + $0x30] sm:$0xff]  ;;  %v641_v39 = vld [vmem:[%s1882_s20 + $0xa8] sm:$0xff]  ;;  %v627_v40 = vld [vmem:[%s1882_s20 + $0x38] sm:$0xff]  ;;  %v652_v3 = vmul.f32 0.9, %v623_v32 }
  0x1a   : > { %v1899_v41 = vld [vmem:[%s1882_s20 + $0xb0] sm:$0xff]  ;;  %v1902_v42 = vld [vmem:[%s1882_s20 + $0x40] sm:$0xff]  ;;  %v1905_v43 = vld [vmem:[%s1882_s20 + $0xb8] sm:$0xff]  ;;  %v670_v26 = vmul.f32 0.9, %v641_v39 }
  0x1b   : > { %1502 = vmatpush3.bf16.msra.mxu0 %v1598_v6  ;;  %1580 = vmatpush3.bf16.msra.mxu1 %v1598_v6  ;;  %v1908_v44 = vld [vmem:[%s1882_s20 + $0x48] sm:$0xff]  ;;  %v1911_v45 = vld [vmem:[%s1882_s20 + $0xc0] sm:$0xff]  ;;  %v1914_v46 = vld [vmem:[%s1882_s20 + $0x50] sm:$0xff] }
  0x1c   : > { %1503 = vmatprep.subr.bf16.mxu0 %v1740_v1  ;;  %1573 = vmatprep.subr.bf16.mxu1 %v1740_v1  ;;  %v1917_v47 = vld [vmem:[%s1882_s20 + $0xc8] sm:$0xff]  ;;  %v1920_v48 = vld [vmem:[%s1882_s20 + $0x58] sm:$0xff]  ;;  %v1923_v49 = vld [vmem:[%s1882_s20 + $0xd0] sm:$0xff] }
  0x1d   : > { %v1926_v51 = vld [vmem:[%s1882_s20 + $0x60] sm:$0xff]  ;;  %v1929_v52 = vld [vmem:[%s1882_s20 + $0xd8] sm:$0xff]  ;;  %v1932_v53 = vld [vmem:[%s1882_s20 + $0x68] sm:$0xff] }
  0x1e   : > { %v1941_v56 = vld [vmem:[%s1882_s20 + $0xe0] sm:$0xff]  ;;  %v1944_v57 = vld [vmem:[%s1882_s20 + $0x70] sm:$0xff]  ;;  %v1947_v58 = vld [vmem:[%s1882_s20 + $0x78] sm:$0xff] }
  0x1f   : > { %1504 = vmatpush3.bf16.msra.mxu0 %v1599_v7  ;;  %1581 = vmatpush3.bf16.msra.mxu1 %v1599_v7 }
  0x20   : > { %1505 = vmatprep.subr.bf16.mxu0 %v1740_v1  ;;  %1574 = vmatprep.subr.bf16.mxu1 %v1740_v1 }
  0x23   : > { %1506 = vmatpush3.bf16.msra.mxu0 %v1600_v8  ;;  %1582 = vmatpush3.bf16.msra.mxu1 %v1600_v8 }
  0x26   : > { %1508 = vmatmul.mubr.bf16.vlgmr.msra.gmra.mrb[0].mxu0 %v1601_v9  ;;  %1540 = vmatmul.mubr.bf16.vlgmr.msra.gmra.mrb[0].mxu1 %v1602_v10  ;;  %v667_v10 = vmul.f32 0.9, %v638_v33 }
  0x27   : > { %1511 = vmatprep.mubr.msk.bf16.mxu0 %vm1741_vm0, %v1740_v1  ;;  %1543 = vmatprep.mubr.msk.bf16.mxu1 %vm1741_vm0, %v1740_v1 }
  0x2e   : > { %1512 = vmatmul.mubr.bf16.gmra.mrb[4].mxu0 %v1603_v11  ;;  %1544 = vmatmul.mubr.bf16.gmra.mrb[4].mxu1 %v1604_v12  ;;  %v653_v11 = vmul.f32 0.9, %v624_v34  ;;  %v668_v12 = vmul.f32 0.9, %v639_v35 }
  0x2f   : > { %1515 = vmatprep.mubr.msk.bf16.mxu0 %vm1741_vm0, %v1740_v1  ;;  %1547 = vmatprep.mubr.msk.bf16.mxu1 %vm1741_vm0, %v1740_v1 }
  0x36   : > { %1516 = vmatmul.mubr.bf16.gmra.mrb[8].mxu0 %v1605_v13  ;;  %1548 = vmatmul.mubr.bf16.gmra.mrb[8].mxu1 %v1606_v14 }
  0x37   : > { %1519 = vmatprep.mubr.msk.bf16.mxu0 %vm1741_vm0, %v1740_v1  ;;  %1551 = vmatprep.mubr.msk.bf16.mxu1 %vm1741_vm0, %v1740_v1 }
  0x3e   : > { %1520 = vmatmul.mubr.bf16.gmra.mrb[12].mxu0 %v1607_v15  ;;  %1552 = vmatmul.mubr.bf16.gmra.mrb[12].mxu1 %v1608_v16 }
  0x3f   : > { %1523 = vmatprep.mubr.msk.bf16.mxu0 %vm1741_vm0, %v1740_v1  ;;  %1555 = vmatprep.mubr.msk.bf16.mxu1 %vm1741_vm0, %v1740_v1 }
  0x46   : > { %1524 = vmatmul.mubr.bf16.gmra.mrb[16].mxu0 %v1609_v17  ;;  %1556 = vmatmul.mubr.bf16.gmra.mrb[16].mxu1 %v1610_v18  ;;  %v1957_v17 = vmul.f32 0.9, %v625_v36  ;;  %v669_v18 = vmul.f32 0.9, %v640_v37  ;;  %v1964_v36 = vmul.f32 0.9, %v1899_v41 }
  0x47   : > { %1527 = vmatprep.mubr.msk.bf16.mxu0 %vm1741_vm0, %v1740_v1  ;;  %1559 = vmatprep.mubr.msk.bf16.mxu1 %vm1741_vm0, %v1740_v1  ;;  %v1967_v37 = vmul.f32 0.9, %v1902_v42  ;;  %v1975_v41 = vmul.f32 0.9, %v1908_v44 }
  0x4e   : > { %1528 = vmatmul.mubr.bf16.gmra.mrb[20].mxu0 %v1611_v19  ;;  %1560 = vmatmul.mubr.bf16.gmra.mrb[20].mxu1 %v1612_v20  ;;  %v1959_v19 = vmul.f32 0.9, %v626_v38 }
  0x4f   : > { %1531 = vmatprep.mubr.msk.bf16.mxu0 %vm1741_vm0, %v1740_v1  ;;  %1563 = vmatprep.mubr.msk.bf16.mxu1 %vm1741_vm0, %v1740_v1 }
  0x56   : > { %1532 = vmatmul.mubr.bf16.gmra.mrb[24].mxu0 %v1613_v21  ;;  %1564 = vmatmul.mubr.bf16.gmra.mrb[24].mxu1 %v1614_v22 }
  0x57   : > { %1535 = vmatprep.mubr.msk.bf16.mxu0 %vm1741_vm0, %v1740_v1 }
  0x5e   : > { %1536 = vmatmul.mubr.bf16.gmra.mrb[28].mxu0 %v1615_v23 }
  0xf9   : > { %v502_v54 = vpop.f32.mrb[0].mxu0  ;;  %v566_v55 = vpop.f32.mrb[0].mxu1 }
  0xfa   : > { %v678_v59 = vadd.f32 %v649_v27, %v502_v54  ;;  %v1509_v60 = vpop.f32.mrb[1].mxu0  ;;  %v694_v61 = vadd.f32 %v665_v28, %v566_v55  ;;  %v1541_v62 = vpop.f32.mrb[1].mxu1  ;;  %v1961_v27 = vmul.f32 0.9, %v627_v40 }
  0xfb   : > { %v505_v63 = vpop.f32.mrb[2].mxu0  ;;  %v569_v2 = vpop.f32.mrb[2].mxu1  ;;  %v1980_v62 = vmul.f32 0.9, %v1914_v46 }
  0xfc   : > { %v1350_v4 = vadd.f32 -1.0, %v678_v59  ;;  %v679_v5 = vadd.f32 %v650_v30, %v505_v63  ;;  %v1510_v6 = vpop.f32.mrb[3].mxu0  ;;  %v1366_v7 = vadd.f32 -1.0, %v694_v61  ;;  %v695_v8 = vadd.f32 %v666_v50, %v569_v2  ;;  %v1542_v9 = vpop.f32.mrb[3].mxu1  ;;  %1174 = vst.msk [vmem:[%s1938_s23] sm:$0xff] %vm1173_vm1, %v678_v59  ;;  %1190 = vst.msk [vmem:[%s1938_s23 + $0x80] sm:$0xff] %vm1173_vm1, %v694_v61 }
  0xfd   : > { %v1972_v59 = vmul.f32 0.9, %v1905_v43  ;;  %v1990_v43 = vmul.f32 0.9, %v1917_v47 }
  0xfe   : > { %v765_v13 = vsub.f32 0.0, %v1350_v4  ;;  %v1351_v14 = vadd.f32 -1.0, %v679_v5  ;;  %v781_v15 = vsub.f32 0.0, %v1366_v7  ;;  %v1367_v16 = vadd.f32 -1.0, %v695_v8  ;;  %1175 = vst.msk [vmem:[%s1938_s23 + $0x8] sm:$0xff] %vm1173_vm1, %v679_v5  ;;  %1191 = vst.msk [vmem:[%s1938_s23 + $0x88] sm:$0xff] %vm1173_vm1, %v695_v8 }
  0xff   : > { %v1993_v4 = vmul.f32 0.9, %v1920_v48  ;;  %v1996_v7 = vmul.f32 0.9, %v1926_v51  ;;  %v1999_v48 = vmul.f32 0.9, %v1923_v49 }
 0x100   : > { %v794_v20 = vmul.f32 1.442695, %v765_v13  ;;  %v766_v21 = vsub.f32 0.0, %v1351_v14  ;;  %v826_v22 = vmul.f32 1.442695, %v781_v15  ;;  %v782_v23 = vsub.f32 0.0, %v1367_v16 }
 0x101   : > { %v510_v24 = vpop.f32.mrb[4].mxu0  ;;  %v574_v25 = vpop.f32.mrb[4].mxu1  ;;  %v2002_v15 = vmul.f32 0.9, %v1929_v52 }
 0x102   : > { %1616 = vpow2.f32 %v794_v20  ;;  %v796_v28 = vmul.f32 1.442695, %v766_v21  ;;  %v680_v29 = vadd.f32 %v651_v0, %v510_v24  ;;  %v1513_v30 = vpop.f32.mrb[5].mxu0  ;;  %v828_v31 = vmul.f32 1.442695, %v782_v23  ;;  %v1545_v32 = vpop.f32.mrb[5].mxu1 }
 0x103   : > { %1618 = vpow2.f32 %v826_v22  ;;  %v513_v33 = vpop.f32.mrb[6].mxu0  ;;  %v696_v34 = vadd.f32 %v667_v10, %v574_v25  ;;  %v577_v35 = vpop.f32.mrb[6].mxu1  ;;  %v1987_v0 = vmul.f32 0.9, %v1911_v45  ;;  %v2008_v24 = vmul.f32 0.9, %v1932_v53 }
 0x104   : > { %1620 = vpow2.f32 %v796_v28  ;;  %v1352_v38 = vadd.f32 -1.0, %v680_v29  ;;  %v681_v39 = vadd.f32 %v652_v3, %v513_v33  ;;  %v1514_v40 = vpop.f32.mrb[7].mxu0  ;;  %v697_v50 = vadd.f32 %v668_v12, %v577_v35  ;;  %v1546_v54 = vpop.f32.mrb[7].mxu1  ;;  %1176 = vst.msk [vmem:[%s1938_s23 + $0x10] sm:$0xff] %vm1173_vm1, %v680_v29 }
 0x105   : > { %1622 = vpow2.f32 %v828_v31  ;;  %v1368_v55 = vadd.f32 -1.0, %v696_v34  ;;  %1192 = vst.msk [vmem:[%s1938_s23 + $0x90] sm:$0xff] %vm1173_vm1, %v696_v34  ;;  %v2017_v32 = vmul.f32 0.9, %v1944_v57 }
 0x106   : > { %v767_v42 = vsub.f32 0.0, %v1352_v38  ;;  %v1353_v60 = vadd.f32 -1.0, %v681_v39  ;;  %v1369_v61 = vadd.f32 -1.0, %v697_v50  ;;  %1177 = vst.msk [vmem:[%s1938_s23 + $0x18] sm:$0xff] %vm1173_vm1, %v681_v39  ;;  %1193 = vst.msk [vmem:[%s1938_s23 + $0x98] sm:$0xff] %vm1173_vm1, %v697_v50 }
 0x107   : > { %v783_v63 = vsub.f32 0.0, %v1368_v55 }
 0x108   : > { %v798_v44 = vmul.f32 1.442695, %v767_v42  ;;  %v768_v2 = vsub.f32 0.0, %v1353_v60  ;;  %v784_v3 = vsub.f32 0.0, %v1369_v61 }
 0x109   : > { %v830_v5 = vmul.f32 1.442695, %v783_v63  ;;  %v518_v46 = vpop.f32.mrb[8].mxu0  ;;  %v582_v6 = vpop.f32.mrb[8].mxu1 }
 0x10a   : > { %1624 = vpow2.f32 %v798_v44  ;;  %v800_v8 = vmul.f32 1.442695, %v768_v2  ;;  %v682_v9 = vadd.f32 %v653_v11, %v518_v46  ;;  %v1517_v45 = vpop.f32.mrb[9].mxu0  ;;  %v832_v10 = vmul.f32 1.442695, %v784_v3  ;;  %v1549_v47 = vpop.f32.mrb[9].mxu1 }
 0x10b   : > { %1626 = vpow2.f32 %v830_v5  ;;  %v521_v12 = vpop.f32.mrb[10].mxu0  ;;  %v698_v13 = vadd.f32 %v669_v18, %v582_v6  ;;  %v585_v14 = vpop.f32.mrb[10].mxu1  ;;  %v2022_v44 = vmul.f32 0.9, %v1941_v56 }
 0x10c   : > { %v1617_v51 = vpop.eup %1616  ;;  %1628 = vpow2.f32 %v800_v8  ;;  %v1354_v16 = vadd.f32 -1.0, %v682_v9  ;;  %v683_v11 = vadd.f32 %v1957_v17, %v521_v12  ;;  %v1518_v20 = vpop.f32.mrb[11].mxu0  ;;  %v699_v21 = vadd.f32 %v670_v26, %v585_v14  ;;  %1178 = vst.msk [vmem:[%s1938_s23 + $0x20] sm:$0xff] %vm1173_vm1, %v682_v9 }
 0x10d   : > { %v1550_v22 = vpop.f32.mrb[11].mxu1  ;;  %v1619_v18 = vpop.eup %1618  ;;  %v852_v23 = vadd.f32 1.0, %v1617_v51  ;;  %1630 = vpow2.f32 %v832_v10  ;;  %v1370_v49 = vadd.f32 -1.0, %v698_v13  ;;  %1194 = vst.msk [vmem:[%s1938_s23 + $0xa0] sm:$0xff] %vm1173_vm1, %v698_v13  ;;  %v2037_v9 = vmul.f32 0.9, %v1947_v58 }
 0x10e   : > { %v1621_v52 = vpop.eup %1620  ;;  %v868_v25 = vadd.f32 1.0, %v1619_v18  ;;  %v769_v28 = vsub.f32 0.0, %v1354_v16  ;;  %v1355_v17 = vadd.f32 -1.0, %v683_v11  ;;  %v1371_v29 = vadd.f32 -1.0, %v699_v21  ;;  %1179 = vst.msk [vmem:[%s1938_s23 + $0x28] sm:$0xff] %vm1173_vm1, %v683_v11  ;;  %1195 = vst.msk [vmem:[%s1938_s23 + $0xa8] sm:$0xff] %vm1173_vm1, %v699_v21 }
 0x10f   : > { %v1623_v26 = vpop.eup %1622  ;;  %1632 = vrcp.f32 %v852_v23  ;;  %v853_v30 = vadd.f32 1.0, %v1621_v52  ;;  %v785_v31 = vsub.f32 0.0, %v1370_v49  ;;  %v736_v13 = vld [vmem:[%s2028_s28] sm:$0xff] }
 0x110   : > { %1634 = vrcp.f32 %v868_v25  ;;  %v869_v53 = vadd.f32 1.0, %v1623_v26  ;;  %v802_v33 = vmul.f32 1.442695, %v769_v28  ;;  %v770_v34 = vsub.f32 0.0, %v1355_v17  ;;  %v752_v11 = vld [vmem:[%s2028_s28 + $0x80] sm:$0xff]  ;;  %v753_v28 = vld [vmem:[%s2028_s28 + $0x88] sm:$0xff] }
 0x111   : > { %1636 = vrcp.f32 %v853_v30  ;;  %v834_v35 = vmul.f32 1.442695, %v785_v31  ;;  %v526_v38 = vpop.f32.mrb[12].mxu0  ;;  %v786_v39 = vsub.f32 0.0, %v1371_v29  ;;  %v590_v40 = vpop.f32.mrb[12].mxu1 }
 0x112   : > { %1638 = vrcp.f32 %v869_v53  ;;  %v804_v50 = vmul.f32 1.442695, %v770_v34  ;;  %v684_v54 = vadd.f32 %v1959_v19, %v526_v38  ;;  %v1521_v55 = vpop.f32.mrb[13].mxu0  ;;  %v700_v42 = vadd.f32 %v1964_v36, %v590_v40  ;;  %v1553_v57 = vpop.f32.mrb[13].mxu1 }
 0x113   : > { %1640 = vpow2.f32 %v802_v33  ;;  %v836_v60 = vmul.f32 1.442695, %v786_v39  ;;  %v529_v61 = vpop.f32.mrb[14].mxu0  ;;  %v593_v63 = vpop.f32.mrb[14].mxu1 }
 0x114   : > { %v1625_v2 = vpop.eup %1624  ;;  %1642 = vpow2.f32 %v804_v50  ;;  %v1356_v19 = vadd.f32 -1.0, %v684_v54  ;;  %v685_v3 = vadd.f32 %v1961_v27, %v529_v61  ;;  %v1522_v36 = vpop.f32.mrb[15].mxu0  ;;  %v1372_v5 = vadd.f32 -1.0, %v700_v42  ;;  %1180 = vst.msk [vmem:[%s1938_s23 + $0x30] sm:$0xff] %vm1173_vm1, %v684_v54  ;;  %1196 = vst.msk [vmem:[%s1938_s23 + $0xb0] sm:$0xff] %vm1173_vm1, %v700_v42 }
 0x115   : > { %v1554_v46 = vpop.f32.mrb[15].mxu1  ;;  %v1627_v56 = vpop.eup %1626  ;;  %v854_v6 = vadd.f32 1.0, %v1625_v2  ;;  %1644 = vpow2.f32 %v834_v35  ;;  %v701_v8 = vadd.f32 %v1972_v59, %v593_v63  ;;  %v737_v59 = vld [vmem:[%s2028_s28 + $0x8] sm:$0xff] }
 0x116   : > { %v1629_v27 = vpop.eup %1628  ;;  %v870_v45 = vadd.f32 1.0, %v1627_v56  ;;  %v771_v10 = vsub.f32 0.0, %v1356_v19  ;;  %1646 = vpow2.f32 %v836_v60  ;;  %v1357_v47 = vadd.f32 -1.0, %v685_v3  ;;  %1181 = vst.msk [vmem:[%s1938_s23 + $0x38] sm:$0xff] %vm1173_vm1, %v685_v3  ;;  %v738_v3 = vld [vmem:[%s2028_s28 + $0x10] sm:$0xff] }
 0x117   : > { %v1631_v12 = vpop.eup %1630  ;;  %1648 = vrcp.f32 %v854_v6  ;;  %v855_v14 = vadd.f32 1.0, %v1629_v27  ;;  %v787_v51 = vsub.f32 0.0, %v1372_v5  ;;  %v1373_v16 = vadd.f32 -1.0, %v701_v8  ;;  %1197 = vst.msk [vmem:[%s1938_s23 + $0xb8] sm:$0xff] %vm1173_vm1, %v701_v8  ;;  %v754_v6 = vld [vmem:[%s2028_s28 + $0x90] sm:$0xff] }
 0x118   : > { %1650 = vrcp.f32 %v870_v45  ;;  %v871_v58 = vadd.f32 1.0, %v1631_v12  ;;  %v806_v20 = vmul.f32 1.442695, %v771_v10  ;;  %v772_v21 = vsub.f32 0.0, %v1357_v47  ;;  %v739_v47 = vld [vmem:[%s2028_s28 + $0x18] sm:$0xff] }
 0x119   : > { %v1633_v22 = vpop.eup %1632  ;;  %1652 = vrcp.f32 %v855_v14  ;;  %v838_v18 = vmul.f32 1.442695, %v787_v51  ;;  %v534_v23 = vpop.f32.mrb[16].mxu0  ;;  %v788_v49 = vsub.f32 0.0, %v1373_v16 }
 0x11a   : > { %v598_v52 = vpop.f32.mrb[16].mxu1  ;;  %v1635_v25 = vpop.eup %1634  ;;  %vm939_vm3 = vcmp.lt.f32.partialorder %v736_v13, %v1633_v22  ;;  %1654 = vrcp.f32 %v871_v58  ;;  %v808_v17 = vmul.f32 1.442695, %v772_v21  ;;  %v686_v29 = vadd.f32 %v1967_v37, %v534_v23 }
 0x11b   : > { %v1525_v26 = vpop.f32.mrb[17].mxu0  ;;  %v1557_v30 = vpop.f32.mrb[17].mxu1  ;;  %v1379_v53 = vsel %vm939_vm3, 1.0, %v1740_v1  ;;  %vm955_vm4 = vcmp.lt.f32.partialorder %v752_v11, %v1635_v25  ;;  %1656 = vpow2.f32 %v806_v20  ;;  %v840_v33 = vmul.f32 1.442695, %v788_v49 }
 0x11c   : > { %v1637_v31 = vpop.eup %1636  ;;  %v537_v34 = vpop.f32.mrb[18].mxu0  ;;  %v1439_v37 = vpack.c.bf16 %v1379_v53, %v1379_v53  ;;  %v1395_v39 = vsel %vm955_vm4, 1.0, %v1740_v1  ;;  %1658 = vpow2.f32 %v808_v17  ;;  %1182 = vst.msk [vmem:[%s1938_s23 + $0x40] sm:$0xff] %vm1173_vm1, %v686_v29  ;;  %v1358_v2 = vadd.f32 -1.0, %v686_v29 }
 0x11d   : > { %v601_v35 = vpop.f32.mrb[18].mxu1  ;;  %v1639_v38 = vpop.eup %1638  ;;  %vm940_vm5 = vcmp.lt.f32.partialorder %v737_v59, %v1637_v31  ;;  %v1455_v42 = vpack.c.bf16 %v1395_v39, %v1395_v39  ;;  %1660 = vpow2.f32 %v838_v18  ;;  %v687_v46 = vadd.f32 %v1975_v41, %v537_v34  ;;  %v755_v59 = vld [vmem:[%s2028_s28 + $0x98] sm:$0xff] }
 0x11e   : > { %v1526_v40 = vpop.f32.mrb[19].mxu0  ;;  %v1558_v50 = vpop.f32.mrb[19].mxu1  ;;  %v1380_v55 = vsel %vm940_vm5, 1.0, %v1740_v1  ;;  %vm956_vm6 = vcmp.lt.f32.partialorder %v753_v28, %v1639_v38  ;;  %1144 = vst.msk [vmem:[%s2053_s6] sm:$0xf] %vm1143_vm2, %v1439_v37  ;;  %1662 = vpow2.f32 %v840_v33  ;;  %v773_v27 = vsub.f32 0.0, %v1358_v2 }
 0x11f   : > { %v1641_v54 = vpop.eup %1640  ;;  %v1440_v60 = vpack.c.bf16 %v1380_v55, %v1380_v55  ;;  %v1396_v61 = vsel %vm956_vm6, 1.0, %v1740_v1  ;;  %1160 = vst.msk [vmem:[%s2053_s6 + $0x40] sm:$0xf] %vm1143_vm2, %v1455_v42  ;;  %v702_v45 = vadd.f32 %v1987_v0, %v598_v52  ;;  %v1359_v13 = vadd.f32 -1.0, %v687_v46 }
 0x120   : > { %v1643_v57 = vpop.eup %1642  ;;  %v856_v63 = vadd.f32 1.0, %v1641_v54  ;;  %v1456_v36 = vpack.c.bf16 %v1396_v61, %v1396_v61  ;;  %v703_v14 = vadd.f32 %v1990_v43, %v601_v35  ;;  %1183 = vst.msk [vmem:[%s1938_s23 + $0x48] sm:$0xff] %vm1173_vm1, %v687_v46  ;;  %v810_v0 = vmul.f32 1.442695, %v773_v27  ;;  %v740_v54 = vld [vmem:[%s2028_s28 + $0x20] sm:$0xff]  ;;  %v741_v61 = vld [vmem:[%s2028_s28 + $0x28] sm:$0xff] }
 0x121   : > { %v1645_v19 = vpop.eup %1644  ;;  %v857_v5 = vadd.f32 1.0, %v1643_v57  ;;  %1145 = vst.msk [vmem:[%s2053_s6 + $0x4] sm:$0xf] %vm1143_vm2, %v1440_v60  ;;  %v542_v41 = vpop.f32.mrb[20].mxu0  ;;  %v1374_v11 = vadd.f32 -1.0, %v702_v45  ;;  %v774_v43 = vsub.f32 0.0, %v1359_v13 }
 0x122   : > { %v1647_v56 = vpop.eup %1646  ;;  %1664 = vrcp.f32 %v856_v63  ;;  %v872_v8 = vadd.f32 1.0, %v1645_v19  ;;  %1161 = vst.msk [vmem:[%s2053_s6 + $0x44] sm:$0xf] %vm1143_vm2, %v1456_v36  ;;  %v606_v51 = vpop.f32.mrb[20].mxu1  ;;  %v688_v50 = vadd.f32 %v1980_v62, %v542_v41  ;;  %v1375_v57 = vadd.f32 -1.0, %v703_v14 }
 0x123   : > { %v1649_v10 = vpop.eup %1648  ;;  %1666 = vrcp.f32 %v857_v5  ;;  %v873_v12 = vadd.f32 1.0, %v1647_v56  ;;  %v1529_v58 = vpop.f32.mrb[21].mxu0  ;;  %1198 = vst.msk [vmem:[%s1938_s23 + $0xc0] sm:$0xff] %vm1173_vm1, %v702_v45  ;;  %1199 = vst.msk [vmem:[%s1938_s23 + $0xc8] sm:$0xff] %vm1173_vm1, %v703_v14  ;;  %v812_v31 = vmul.f32 1.442695, %v774_v43  ;;  %v704_v62 = vadd.f32 %v1999_v48, %v606_v51 }
 0x124   : > { %v1651_v16 = vpop.eup %1650  ;;  %vm941_vm7 = vcmp.lt.f32.partialorder %v738_v3, %v1649_v10  ;;  %1668 = vrcp.f32 %v872_v8  ;;  %v1561_v20 = vpop.f32.mrb[21].mxu1  ;;  %v789_v38 = vsub.f32 0.0, %v1374_v11  ;;  %v1360_v63 = vadd.f32 -1.0, %v688_v50  ;;  %1184 = vst.msk [vmem:[%s1938_s23 + $0x50] sm:$0xff] %vm1173_vm1, %v688_v50  ;;  %v756_v5 = vld [vmem:[%s2028_s28 + $0xa0] sm:$0xff] }
 0x125   : > { %v1653_v21 = vpop.eup %1652  ;;  %v1381_v22 = vsel %vm941_vm7, 1.0, %v1740_v1  ;;  %vm957_vm8 = vcmp.lt.f32.partialorder %v754_v6, %v1651_v16  ;;  %1670 = vrcp.f32 %v873_v12  ;;  %v545_v18 = vpop.f32.mrb[22].mxu0  ;;  %v790_v56 = vsub.f32 0.0, %v1375_v57  ;;  %1200 = vst.msk [vmem:[%s1938_s23 + $0xd0] sm:$0xff] %vm1173_vm1, %v704_v62  ;;  %v759_v57 = vld [vmem:[%s2028_s28 + $0xb8] sm:$0xff] }
 0x126   : > { %v2081_v23 = vpop.f32.mrb[22].mxu1  ;;  %v1655_v49 = vpop.eup %1654  ;;  %v1441_v52 = vpack.c.bf16 %v1381_v22, %v1381_v22  ;;  %vm942_vm9 = vcmp.lt.f32.partialorder %v739_v47, %v1653_v21  ;;  %v1397_v25 = vsel %vm957_vm8, 1.0, %v1740_v1  ;;  %1672 = vpow2.f32 %v810_v0 }
 0x127   : > { %v1530_v28 = vpop.f32.mrb[23].mxu0  ;;  %v1562_v17 = vpop.f32.mrb[23].mxu1  ;;  %v1382_v26 = vsel %vm942_vm9, 1.0, %v1740_v1  ;;  %v1457_v30 = vpack.c.bf16 %v1397_v25, %v1397_v25  ;;  %vm958_vm10 = vcmp.lt.f32.partialorder %v755_v59, %v1655_v49  ;;  %1674 = vpow2.f32 %v812_v31  ;;  %v742_v49 = vld [vmem:[%s2028_s28 + $0x30] sm:$0xff] }
 0x128   : > { %v1657_v29 = vpop.eup %1656  ;;  %1146 = vst.msk [vmem:[%s2053_s6 + $0x8] sm:$0xf] %vm1143_vm2, %v1441_v52  ;;  %v1442_v33 = vpack.c.bf16 %v1382_v26, %v1382_v26  ;;  %v1398_v34 = vsel %vm958_vm10, 1.0, %v1740_v1  ;;  %v842_v42 = vmul.f32 1.442695, %v789_v38  ;;  %v689_v2 = vadd.f32 %v1993_v4, %v545_v18  ;;  %v757_v4 = vld [vmem:[%s2028_s28 + $0xa8] sm:$0xff] }
 0x129   : > { %v1659_v53 = vpop.eup %1658  ;;  %v858_v35 = vadd.f32 1.0, %v1657_v29  ;;  %1162 = vst.msk [vmem:[%s2053_s6 + $0x48] sm:$0xf] %vm1143_vm2, %v1457_v30  ;;  %v1458_v39 = vpack.c.bf16 %v1398_v34, %v1398_v34  ;;  %v550_v19 = vpop.f32.mrb[24].mxu0  ;;  %v775_v48 = vsub.f32 0.0, %v1360_v63  ;;  %v1376_v28 = vadd.f32 -1.0, %v704_v62 }
 0x12a   : > { %v1661_v37 = vpop.eup %1660  ;;  %v859_v40 = vadd.f32 1.0, %v1659_v53  ;;  %1147 = vst.msk [vmem:[%s2053_s6 + $0xc] sm:$0xf] %vm1143_vm2, %v1442_v33  ;;  %v614_v3 = vpop.f32.mrb[24].mxu1  ;;  %v690_v6 = vadd.f32 %v1996_v7, %v550_v19  ;;  %v1361_v10 = vadd.f32 -1.0, %v689_v2  ;;  %v743_v26 = vld [vmem:[%s2028_s28 + $0x38] sm:$0xff]  ;;  %v705_v31 = vadd.f32 %v2002_v15, %v2081_v23 }
 0x12b   : > { %1676 = vrcp.f32 %v858_v35  ;;  %v874_v55 = vadd.f32 1.0, %v1661_v37  ;;  %v1663_v60 = vpop.eup %1662  ;;  %1163 = vst.msk [vmem:[%s2053_s6 + $0x4c] sm:$0xf] %vm1143_vm2, %v1458_v39  ;;  %v1533_v8 = vpop.f32.mrb[25].mxu0  ;;  %v844_v7 = vmul.f32 1.442695, %v790_v56  ;;  %v706_v33 = vadd.f32 %v2022_v44, %v614_v3 }
 0x12c   : > { %1678 = vrcp.f32 %v859_v40  ;;  %v1665_v36 = vpop.eup %1664  ;;  %v875_v46 = vadd.f32 1.0, %v1663_v60  ;;  %v1565_v27 = vpop.f32.mrb[25].mxu1  ;;  %1185 = vst.msk [vmem:[%s1938_s23 + $0x58] sm:$0xff] %vm1173_vm1, %v689_v2  ;;  %1186 = vst.msk [vmem:[%s1938_s23 + $0x60] sm:$0xff] %vm1173_vm1, %v690_v6  ;;  %v814_v11 = vmul.f32 1.442695, %v775_v48 }
 0x12d   : > { %1680 = vrcp.f32 %v874_v55  ;;  %v1667_v45 = vpop.eup %1666  ;;  %vm943_vm11 = vcmp.lt.f32.partialorder %v740_v54, %v1665_v36  ;;  %v553_v47 = vpop.f32.mrb[26].mxu0  ;;  %v776_v25 = vsub.f32 0.0, %v1361_v10  ;;  %v1362_v17 = vadd.f32 -1.0, %v690_v6  ;;  %v758_v30 = vld [vmem:[%s2028_s28 + $0xb0] sm:$0xff]  ;;  %1201 = vst.msk [vmem:[%s1938_s23 + $0xd8] sm:$0xff] %vm1173_vm1, %v705_v31  ;;  %1202 = vst.msk [vmem:[%s1938_s23 + $0xe0] sm:$0xff] %vm1173_vm1, %v706_v33 }
 0x12e   : > { %1682 = vpow2.f32 %v842_v42  ;;  %v617_v12 = vpop.f32.mrb[26].mxu1  ;;  %v1669_v13 = vpop.eup %1668  ;;  %v1383_v41 = vsel %vm943_vm11, 1.0, %v1740_v1  ;;  %vm944_vm12 = vcmp.lt.f32.partialorder %v741_v61, %v1667_v45  ;;  %v691_v53 = vadd.f32 %v2008_v24, %v553_v47  ;;  %v744_v10 = vld [vmem:[%s2028_s28 + $0x40] sm:$0xff] }
 0x12f   : > { %1684 = vrcp.f32 %v875_v46  ;;  %v1534_v14 = vpop.f32.mrb[27].mxu0  ;;  %v1566_v51 = vpop.f32.mrb[27].mxu1  ;;  %v1443_v59 = vpack.c.bf16 %v1383_v41, %v1383_v41  ;;  %v1384_v0 = vsel %vm944_vm12, 1.0, %v1740_v1  ;;  %vm959_vm13 = vcmp.lt.f32.partialorder %v756_v5, %v1669_v13 }
 0x130   : > { %v1671_v16 = vpop.eup %1670  ;;  %v1444_v20 = vpack.c.bf16 %v1384_v0, %v1384_v0  ;;  %v1399_v21 = vsel %vm959_vm13, 1.0, %v1740_v1  ;;  %1686 = vpow2.f32 %v844_v7  ;;  %v816_v37 = vmul.f32 1.442695, %v776_v25  ;;  %1187 = vst.msk [vmem:[%s1938_s23 + $0x68] sm:$0xff] %vm1173_vm1, %v691_v53  ;;  %v745_v0 = vld [vmem:[%s2028_s28 + $0x48] sm:$0xff] }
 0x131   : > { %v1673_v58 = vpop.eup %1672  ;;  %vm960_vm14 = vcmp.lt.f32.partialorder %v757_v4, %v1671_v16  ;;  %1148 = vst.msk [vmem:[%s2053_s6 + $0x10] sm:$0xf] %vm1143_vm2, %v1443_v59  ;;  %v1459_v22 = vpack.c.bf16 %v1399_v21, %v1399_v21  ;;  %1688 = vpow2.f32 %v814_v11  ;;  %v558_v34 = vpop.f32.mrb[28].mxu0  ;;  %v791_v39 = vsub.f32 0.0, %v1376_v28 }
 0x132   : > { %v1400_v43 = vsel %vm960_vm14, 1.0, %v1740_v1  ;;  %v860_v18 = vadd.f32 1.0, %v1673_v58  ;;  %1149 = vst.msk [vmem:[%s2053_s6 + $0x14] sm:$0xf] %vm1143_vm2, %v1444_v20  ;;  %v1675_v29 = vpop.eup %1674  ;;  %v777_v40 = vsub.f32 0.0, %v1362_v17  ;;  %v1537_v50 = vpop.f32.mrb[29].mxu0  ;;  %v692_v14 = vadd.f32 %v2017_v32, %v558_v34 }
 0x133   : > { %v1460_v52 = vpack.c.bf16 %v1400_v43, %v1400_v43  ;;  %1164 = vst.msk [vmem:[%s2053_s6 + $0x50] sm:$0xf] %vm1143_vm2, %v1459_v22  ;;  %v861_v38 = vadd.f32 1.0, %v1675_v29  ;;  %v1377_v15 = vadd.f32 -1.0, %v705_v31  ;;  %v1363_v23 = vadd.f32 -1.0, %v691_v53  ;;  %v561_v55 = vpop.f32.mrb[30].mxu0 }
 0x134   : > { %1690 = vrcp.f32 %v860_v18  ;;  %v1378_v24 = vadd.f32 -1.0, %v706_v33  ;;  %v846_v60 = vmul.f32 1.442695, %v791_v39  ;;  %v1538_v61 = vpop.f32.mrb[31].mxu0  ;;  %v818_v56 = vmul.f32 1.442695, %v777_v40 }
 0x135   : > { %v1677_v35 = vpop.eup %1676  ;;  %1165 = vst.msk [vmem:[%s2053_s6 + $0x54] sm:$0xf] %vm1143_vm2, %v1460_v52  ;;  %1692 = vrcp.f32 %v861_v38  ;;  %v792_v6 = vsub.f32 0.0, %v1377_v15  ;;  %v778_v45 = vsub.f32 0.0, %v1363_v23  ;;  %v693_v59 = vadd.f32 %v2037_v9, %v561_v55  ;;  %v760_v52 = vld [vmem:[%s2028_s28 + $0xc0] sm:$0xff]  ;;  %v761_v53 = vld [vmem:[%s2028_s28 + $0xc8] sm:$0xff] }
 0x136   : > { %v1679_v54 = vpop.eup %1678  ;;  %vm945_vm15 = vcmp.lt.f32.partialorder %v742_v49, %v1677_v35  ;;  %1694 = vpow2.f32 %v816_v37  ;;  %v793_v4 = vsub.f32 0.0, %v1378_v24  ;;  %v1364_v11 = vadd.f32 -1.0, %v692_v14  ;;  %1188 = vst.msk [vmem:[%s1938_s23 + $0x70] sm:$0xff] %vm1173_vm1, %v692_v14  ;;  %v746_v34 = vld [vmem:[%s2028_s28 + $0x50] sm:$0xff] }
 0x137   : > { %v1681_v44 = vpop.eup %1680  ;;  %v1385_v42 = vsel %vm945_vm15, 1.0, %v1740_v1  ;;  %vm946_vm0 = vcmp.lt.f32.partialorder %v743_v26, %v1679_v54  ;;  %1696 = vpow2.f32 %v846_v60  ;;  %v848_v13 = vmul.f32 1.442695, %v792_v6  ;;  %1189 = vst.msk [vmem:[%s1938_s23 + $0x78] sm:$0xff] %vm1173_vm1, %v693_v59  ;;  %v762_v61 = vld [vmem:[%s2028_s28 + $0xd0] sm:$0xff] }
 0x138   : > { %v1683_v63 = vpop.eup %1682  ;;  %v1445_v2 = vpack.c.bf16 %v1385_v42, %v1385_v42  ;;  %v1386_v62 = vsel %vm946_vm0, 1.0, %v1740_v1  ;;  %vm961_vm3 = vcmp.lt.f32.partialorder %v758_v30, %v1681_v44  ;;  %v820_v7 = vmul.f32 1.442695, %v778_v45 }
 0x139   : > { %v1685_v19 = vpop.eup %1684  ;;  %v1446_v3 = vpack.c.bf16 %v1386_v62, %v1386_v62  ;;  %v1401_v36 = vsel %vm961_vm3, 1.0, %v1740_v1  ;;  %v876_v5 = vadd.f32 1.0, %v1683_v63  ;;  %v850_v16 = vmul.f32 1.442695, %v793_v4  ;;  %v763_v4 = vld [vmem:[%s2028_s28 + $0xd8] sm:$0xff] }
 0x13a   : > { %1150 = vst.msk [vmem:[%s2053_s6 + $0x18] sm:$0xf] %vm1143_vm2, %v1445_v2  ;;  %v1461_v46 = vpack.c.bf16 %v1401_v36, %v1401_v36  ;;  %vm962_vm4 = vcmp.lt.f32.partialorder %v759_v57, %v1685_v19  ;;  %v1687_v8 = vpop.eup %1686  ;;  %v1365_v20 = vadd.f32 -1.0, %v693_v59  ;;  %v779_v22 = vsub.f32 0.0, %v1364_v11  ;;  %v747_v57 = vld [vmem:[%s2028_s28 + $0x58] sm:$0xff]  ;;  %v750_v11 = vld [vmem:[%s2028_s28 + $0x70] sm:$0xff] }
 0x13b   : > { %1151 = vst.msk [vmem:[%s2053_s6 + $0x1c] sm:$0xf] %vm1143_vm2, %v1446_v3  ;;  %v1402_v27 = vsel %vm962_vm4, 1.0, %v1740_v1  ;;  %1698 = vrcp.f32 %v876_v5  ;;  %v1689_v48 = vpop.eup %1688  ;;  %v877_v12 = vadd.f32 1.0, %v1687_v8  ;;  %v748_v3 = vld [vmem:[%s2028_s28 + $0x60] sm:$0xff] }
 0x13c   : > { %1166 = vst.msk [vmem:[%s2053_s6 + $0x58] sm:$0xf] %vm1143_vm2, %v1461_v46  ;;  %v1462_v47 = vpack.c.bf16 %v1402_v27, %v1402_v27  ;;  %1700 = vpow2.f32 %v818_v56  ;;  %v862_v41 = vadd.f32 1.0, %v1689_v48  ;;  %v780_v9 = vsub.f32 0.0, %v1365_v20 }
 0x13d   : > { %1702 = vrcp.f32 %v877_v12  ;;  %v822_v28 = vmul.f32 1.442695, %v779_v22  ;;  %v764_v12 = vld [vmem:[%s2028_s28 + $0xe0] sm:$0xff] }
 0x13e   : > { %v1691_v51 = vpop.eup %1690  ;;  %1167 = vst.msk [vmem:[%s2053_s6 + $0x5c] sm:$0xf] %vm1143_vm2, %v1462_v47  ;;  %1704 = vrcp.f32 %v862_v41  ;;  %v824_v26 = vmul.f32 1.442695, %v780_v9 }
 0x13f   : > { %vm947_vm5 = vcmp.lt.f32.partialorder %v744_v10, %v1691_v51  ;;  %1706 = vpow2.f32 %v848_v13  ;;  %v1693_v32 = vpop.eup %1692  ;;  %v749_v10 = vld [vmem:[%s2028_s28 + $0x68] sm:$0xff] }
 0x140   : > { %v1387_v58 = vsel %vm947_vm5, 1.0, %v1740_v1  ;;  %1708 = vpow2.f32 %v820_v7  ;;  %v1695_v43 = vpop.eup %1694  ;;  %vm948_vm6 = vcmp.lt.f32.partialorder %v745_v0, %v1693_v32 }
 0x141   : > { %v1447_v21 = vpack.c.bf16 %v1387_v58, %v1387_v58  ;;  %1710 = vpow2.f32 %v850_v16  ;;  %v1697_v18 = vpop.eup %1696  ;;  %v1388_v49 = vsel %vm948_vm6, 1.0, %v1740_v1  ;;  %v863_v25 = vadd.f32 1.0, %v1695_v43  ;;  %v751_v58 = vld [vmem:[%s2028_s28 + $0x78] sm:$0xff] }
 0x142   : > { %v1448_v17 = vpack.c.bf16 %v1388_v49, %v1388_v49  ;;  %v878_v29 = vadd.f32 1.0, %v1697_v18 }
 0x143   : > { %1152 = vst.msk [vmem:[%s2053_s6 + $0x20] sm:$0xf] %vm1143_vm2, %v1447_v21  ;;  %1712 = vrcp.f32 %v863_v25 }
 0x144   : > { %1153 = vst.msk [vmem:[%s2053_s6 + $0x24] sm:$0xf] %vm1143_vm2, %v1448_v17  ;;  %1714 = vrcp.f32 %v878_v29 }
 0x145   : > { %v1699_v30 = vpop.eup %1698  ;;  %1716 = vpow2.f32 %v822_v28 }
 0x146   : > { %v1701_v31 = vpop.eup %1700  ;;  %vm963_vm1 = vcmp.lt.f32.partialorder %v760_v52, %v1699_v30  ;;  %1718 = vpow2.f32 %v824_v26 }
 0x147   : > { %v1403_v33 = vsel %vm963_vm1, 1.0, %v1740_v1  ;;  %v864_v35 = vadd.f32 1.0, %v1701_v31  ;;  %v1703_v38 = vpop.eup %1702 }
 0x148   : > { %v1463_v37 = vpack.c.bf16 %v1403_v33, %v1403_v33  ;;  %v1705_v39 = vpop.eup %1704  ;;  %vm964_vm7 = vcmp.lt.f32.partialorder %v761_v53, %v1703_v38 }
 0x149   : > { %1720 = vrcp.f32 %v864_v35  ;;  %v1707_v40 = vpop.eup %1706  ;;  %vm949_vm8 = vcmp.lt.f32.partialorder %v746_v34, %v1705_v39  ;;  %v1404_v50 = vsel %vm964_vm7, 1.0, %v1740_v1 }
 0x14a   : > { %1168 = vst.msk [vmem:[%s2053_s6 + $0x60] sm:$0xf] %vm1143_vm2, %v1463_v37  ;;  %v1709_v54 = vpop.eup %1708  ;;  %v1389_v15 = vsel %vm949_vm8, 1.0, %v1740_v1  ;;  %v1464_v23 = vpack.c.bf16 %v1404_v50, %v1404_v50  ;;  %v879_v24 = vadd.f32 1.0, %v1707_v40 }
 0x14b   : > { %v1711_v55 = vpop.eup %1710  ;;  %v1449_v44 = vpack.c.bf16 %v1389_v15, %v1389_v15  ;;  %v865_v42 = vadd.f32 1.0, %v1709_v54 }
 0x14c   : > { %1169 = vst.msk [vmem:[%s2053_s6 + $0x64] sm:$0xf] %vm1143_vm2, %v1464_v23  ;;  %1722 = vrcp.f32 %v879_v24  ;;  %v880_v60 = vadd.f32 1.0, %v1711_v55 }
 0x14d   : > { %1154 = vst.msk [vmem:[%s2053_s6 + $0x28] sm:$0xf] %vm1143_vm2, %v1449_v44  ;;  %1724 = vrcp.f32 %v865_v42  ;;  %v1713_v63 = vpop.eup %1712 }
 0x14e   : > { %1726 = vrcp.f32 %v880_v60  ;;  %v1715_v2 = vpop.eup %1714  ;;  %vm950_vm9 = vcmp.lt.f32.partialorder %v747_v57, %v1713_v63 }
 0x14f   : > { %v1717_v62 = vpop.eup %1716  ;;  %v1390_v19 = vsel %vm950_vm9, 1.0, %v1740_v1  ;;  %vm965_vm10 = vcmp.lt.f32.partialorder %v762_v61, %v1715_v2 }
 0x150   : > { %v1719_v36 = vpop.eup %1718  ;;  %v1450_v5 = vpack.c.bf16 %v1390_v19, %v1390_v19  ;;  %v1405_v46 = vsel %vm965_vm10, 1.0, %v1740_v1  ;;  %v866_v56 = vadd.f32 1.0, %v1717_v62 }
 0x151   : > { %v1465_v8 = vpack.c.bf16 %v1405_v46, %v1405_v46  ;;  %v867_v27 = vadd.f32 1.0, %v1719_v36 }
 0x152   : > { %1155 = vst.msk [vmem:[%s2053_s6 + $0x2c] sm:$0xf] %vm1143_vm2, %v1450_v5  ;;  %1728 = vrcp.f32 %v866_v56 }
 0x153   : > { %v1721_v6 = vpop.eup %1720  ;;  %1170 = vst.msk [vmem:[%s2053_s6 + $0x68] sm:$0xf] %vm1143_vm2, %v1465_v8  ;;  %1730 = vrcp.f32 %v867_v27 }
 0x154   : > { %vm951_vm11 = vcmp.lt.f32.partialorder %v748_v3, %v1721_v6 }
 0x155   : > { %v1391_v45 = vsel %vm951_vm11, 1.0, %v1740_v1 }
 0x156   : > { %v1451_v48 = vpack.c.bf16 %v1391_v45, %v1391_v45  ;;  %v1723_v47 = vpop.eup %1722 }
 0x157   : > { %v1725_v13 = vpop.eup %1724  ;;  %vm966_vm12 = vcmp.lt.f32.partialorder %v763_v4, %v1723_v47 }
 0x158   : > { %1156 = vst.msk [vmem:[%s2053_s6 + $0x30] sm:$0xf] %vm1143_vm2, %v1451_v48  ;;  %v1727_v41 = vpop.eup %1726  ;;  %v1406_v7 = vsel %vm966_vm12, 1.0, %v1740_v1  ;;  %vm952_vm13 = vcmp.lt.f32.partialorder %v749_v10, %v1725_v13 }
 0x159   : > { %v1466_v14 = vpack.c.bf16 %v1406_v7, %v1406_v7  ;;  %v1392_v51 = vsel %vm952_vm13, 1.0, %v1740_v1  ;;  %vm967_vm14 = vcmp.lt.f32.partialorder %v764_v12, %v1727_v41 }
 0x15a   : > { %v1452_v16 = vpack.c.bf16 %v1392_v51, %v1392_v51  ;;  %v1407_v59 = vsel %vm967_vm14, 1.0, %v1740_v1 }
 0x15b   : > { %1171 = vst.msk [vmem:[%s2053_s6 + $0x6c] sm:$0xf] %vm1143_vm2, %v1466_v14  ;;  %v1467_v0 = vpack.c.bf16 %v1407_v59, %v1407_v59 }
 0x15c   : > { %1157 = vst.msk [vmem:[%s2053_s6 + $0x34] sm:$0xf] %vm1143_vm2, %v1452_v16  ;;  %v1729_v20 = vpop.eup %1728 }
 0x15d   : > { %1172 = vst.msk [vmem:[%s2053_s6 + $0x70] sm:$0xf] %vm1143_vm2, %v1467_v0  ;;  %v1731_v32 = vpop.eup %1730  ;;  %vm953_vm15 = vcmp.lt.f32.partialorder %v750_v11, %v1729_v20 }
 0x15e   : > { %v1393_v21 = vsel %vm953_vm15, 1.0, %v1740_v1  ;;  %vm954_vm0 = vcmp.lt.f32.partialorder %v751_v58, %v1731_v32 }
 0x15f   : > { %v1453_v22 = vpack.c.bf16 %v1393_v21, %v1393_v21  ;;  %v1394_v43 = vsel %vm954_vm0, 1.0, %v1740_v1 }
 0x160   : > { %v1454_v9 = vpack.c.bf16 %v1394_v43, %v1394_v43 }
 0x161   : > { %1158 = vst.msk [vmem:[%s2053_s6 + $0x38] sm:$0xf] %vm1143_vm2, %v1453_v22 }
 0x162   : > { %1159 = vst.msk [vmem:[%s2053_s6 + $0x3c] sm:$0xf] %vm1143_vm2, %v1454_v9 }
 0x163 PF: > { %s16_s18 = sadd.s32 1, %s1738_s18  }
 0x164   : > { %p13_p4 = scmp.ge.s32.totalorder %s16_s18, 4  }
 0x166   :  { %15 = sbr.rel (!%p13_p4) target bundleno = 1 (0x1), region = 84 }

// kernel: closed_call.47
= control target key start
LH: loop header
LB: loop body
LE: loop exit
PB: predicated region body
PF: predicated region fallthrough
CT: control target
= control target key end

     0   :  { %s8132_s18 = smov 0   ;;  %s9632_s0 = inlined_call_operand.vmem [shape: bf16[352,3200], index: 0, kind: input, shape index: {}]   ;;  %s9633_s1 = inlined_call_operand.vmem [shape: bf16[3200,128], index: 1, kind: input, shape index: {}]   ;;  %s9634_s2 = inlined_call_operand.vmem [shape: f32[352,128], index: 2, kind: input, shape index: {}]   ;;  %s9635_s3 = inlined_call_operand.vmem [shape: f32[352,128], index: 3, kind: input, shape index: {}, may-alias: {3,5}]   ;;  %s9636_s4 = inlined_call_operand.vmem [shape: bf16[352,128], index: 4, kind: output, shape index: {0}]   ;;  %s9637_s5 = inlined_call_operand.vmem [shape: f32[352,128], index: 5, kind: output, shape index: {1}, may-alias: {3,5}]  }
   0x1 LB: > { %s5689_s19 = sadd.s32 4294967295, %s8098_s18   ;;  %p5693_p0 = scmp.ge.s32.totalorder %s8098_s18, 1  ;;  %s8098_s18 = sphi %s8132_s18, %s16_s18  }
   0x2   : > { %p214_p1 = scmp.lt.s32.totalorder %s8098_s18, 3 }
   0x4   : > { %p215_p2 = pnand %p5693_p0, %p214_p1 }
   0x5   : > { %v7397_v0 = vld [vmem:[%s9633_s1 + $0x40] sm:$0xff] (!%p215_p2)   ;;  %s258_s22 = smul.u32 (!%p215_p2), 22, %s5689_s19  ;;  %v7399_v2 = vld [vmem:[%s9633_s1 + $0x48] sm:$0xff] (!%p215_p2)   ;;  %v7401_v4 = vld [vmem:[%s9633_s1 + $0x50] sm:$0xff] (!%p215_p2)   ;;  %vm8101_vm0 = vmmov (!%p215_p2), 0  }
   0x6   : > { %218 = sbr.rel (%p215_p2) target bundleno = 859 (0x35b), region = 36  ;;  %v7398_v1 = vld [vmem:[%s9633_s1] sm:$0xff] (!%p215_p2)   ;;  %6307 = vmatprep.subr.bf16.mxu0 (!%p215_p2), %v7397_v0  ;;  %7370 = vmatprep.subr.bf16.mxu1 (!%p215_p2), %v7397_v0  ;;  %v7400_v3 = vld [vmem:[%s9633_s1 + $0x8] sm:$0xff] (!%p215_p2)   ;;  %v7402_v5 = vld [vmem:[%s9633_s1 + $0x10] sm:$0xff] (!%p215_p2)  }
   0x7   : > { %p259_p3 = scmp.lt.s32.totalorder (!%p215_p2), %s258_s22, 43  ;;  %6308 = vmatpush3.bf16.msra.mxu0 (!%p215_p2), %v7398_v1  ;;  %7378 = vmatpush3.bf16.msra.mxu1 (!%p215_p2), %v7398_v1  ;;  %v7403_v6 = vld [vmem:[%s9633_s1 + $0x58] sm:$0xff] (!%p215_p2)   ;;  %v7405_v8 = vld [vmem:[%s9633_s1 + $0x60] sm:$0xff] (!%p215_p2)   ;;  %v7407_v10 = vld [vmem:[%s9633_s1 + $0x68] sm:$0xff] (!%p215_p2)  }
   0x8   : > { %6309 = vmatprep.subr.bf16.mxu0 (!%p215_p2), %v7399_v2  ;;  %7371 = vmatprep.subr.bf16.mxu1 (!%p215_p2), %v7399_v2  ;;  %v7404_v7 = vld [vmem:[%s9633_s1 + $0x18] sm:$0xff] (!%p215_p2)   ;;  %v7406_v9 = vld [vmem:[%s9633_s1 + $0x20] sm:$0xff] (!%p215_p2)   ;;  %v7408_v13 = vld [vmem:[%s9633_s1 + $0x28] sm:$0xff] (!%p215_p2)  }
   0x9   : > { %v7409_v14 = vld [vmem:[%s9633_s1 + $0x70] sm:$0xff] (!%p215_p2)   ;;  %v7411_v16 = vld [vmem:[%s9633_s1 + $0x78] sm:$0xff] (!%p215_p2)   ;;  %v7419_v18 = vld [vmem:[%s9633_s1 + $0x140] sm:$0xff] (!%p215_p2)  }
   0xa   : > { %v7410_v15 = vld [vmem:[%s9633_s1 + $0x30] sm:$0xff] (!%p215_p2)   ;;  %v7412_v17 = vld [vmem:[%s9633_s1 + $0x38] sm:$0xff] (!%p215_p2)   ;;  %v7421_v21 = vld [vmem:[%s9633_s1 + $0xc0] sm:$0xff] (!%p215_p2)  }
   0xb   : > { %6310 = vmatpush3.bf16.msra.mxu0 (!%p215_p2), %v7400_v3  ;;  %7379 = vmatpush3.bf16.msra.mxu1 (!%p215_p2), %v7400_v3  ;;  %v7420_v22 = vld [vmem:[%s9633_s1 + $0x100] sm:$0xff] (!%p215_p2)   ;;  %v7423_v24 = vld [vmem:[%s9633_s1 + $0x148] sm:$0xff] (!%p215_p2)   ;;  %v7433_v30 = vld [vmem:[%s9633_s1 + $0x150] sm:$0xff] (!%p215_p2)  }
   0xc   : > { %6311 = vmatprep.subr.bf16.mxu0 (!%p215_p2), %v7401_v4  ;;  %7372 = vmatprep.subr.bf16.mxu1 (!%p215_p2), %v7401_v4  ;;  %v7422_v23 = vld [vmem:[%s9633_s1 + $0x80] sm:$0xff] (!%p215_p2)   ;;  %v7431_v27 = vld [vmem:[%s9633_s1 + $0xc8] sm:$0xff] (!%p215_p2)   ;;  %v7434_v33 = vld [vmem:[%s9633_s1 + $0xd0] sm:$0xff] (!%p215_p2)  }
   0xd   : > { %s9639_s22 = smov (!%p259_p3, %s258_s22), 43  ;;  %v7428_v28 = vld [vmem:[%s9633_s1 + $0x108] sm:$0xff]   ;;  %v7435_v34 = vld [vmem:[%s9633_s1 + $0x110] sm:$0xff]   ;;  %v7443_v38 = vld [vmem:[%s9633_s1 + $0xd8] sm:$0xff]  }
   0xe   : > { %s7386_s10 = smul.u32 100, %s9639_s22  ;;  %v7432_v29 = vld [vmem:[%s9633_s1 + $0x88] sm:$0xff]   ;;  %v7436_v35 = vld [vmem:[%s9633_s1 + $0x90] sm:$0xff]   ;;  %v7444_v39 = vld [vmem:[%s9633_s1 + $0x158] sm:$0xff]   ;;  %s5697_s12 = sshll.u32 %s9639_s22, 2 }
   0xf   : > { %6312 = vmatpush3.bf16.msra.mxu0 %v7402_v5  ;;  %7380 = vmatpush3.bf16.msra.mxu1 %v7402_v5  ;;  %v7445_v40 = vld [vmem:[%s9633_s1 + $0x98] sm:$0xff]   ;;  %v7451_v44 = vld [vmem:[%s9633_s1 + $0xe0] sm:$0xff]   ;;  %v7457_v50 = vld [vmem:[%s9633_s1 + $0xe8] sm:$0xff]   ;;  %s9539_s14 = scalar_lea.vmem %s9636_s4, %s5697_s12 }
  0x10   : > { %6313 = vmatprep.subr.bf16.mxu0 %v7403_v6  ;;  %7373 = vmatprep.subr.bf16.mxu1 %v7403_v6  ;;  %s8173_s17 = scalar_lea.vmem %s9632_s0, %s7386_s10  ;;  %v7446_v41 = vld [vmem:[%s9633_s1 + $0x118] sm:$0xff]   ;;  %v7455_v47 = vld [vmem:[%s9633_s1 + $0x160] sm:$0xff]   ;;  %v7459_v51 = vld [vmem:[%s9633_s1 + $0x168] sm:$0xff]  }
  0x11   : > { %v7415_v11 = vld [vmem:[%s8173_s17 + $0x4] ss:$100 sps:$4 sm:$0xff]   ;;  %v7418_v12 = vld [vmem:[%s8173_s17 + $0x4b4] ss:$100 sps:$4 sm:$0xff]   ;;  %v7424_v25 = vld [vmem:[%s8173_s17 + $0xcc] ss:$100 sps:$4 sm:$0xff]  }
  0x12   : > { %3594 = vmatprep.mubr.bf16.mxu0 %v7415_v11  ;;  %3642 = vmatprep.mubr.bf16.mxu1 %v7418_v12  ;;  %v7413_v19 = vld [vmem:[%s8173_s17] ss:$100 sps:$4 sm:$0xff]   ;;  %v7416_v20 = vld [vmem:[%s8173_s17 + $0x4b0] ss:$100 sps:$4 sm:$0xff]   ;;  %v7429_v31 = vld [vmem:[%s8173_s17 + $0xc8] ss:$100 sps:$4 sm:$0xff]  }
  0x13   : > { %6314 = vmatpush3.bf16.msra.mxu0 %v7404_v7  ;;  %7381 = vmatpush3.bf16.msra.mxu1 %v7404_v7  ;;  %v7426_v26 = vld [vmem:[%s8173_s17 + $0x57c] ss:$100 sps:$4 sm:$0xff]   ;;  %v7437_v36 = vld [vmem:[%s8173_s17 + $0x194] ss:$100 sps:$4 sm:$0xff]   ;;  %v7439_v37 = vld [vmem:[%s8173_s17 + $0x644] ss:$100 sps:$4 sm:$0xff]  }
  0x14   : > { %6315 = vmatprep.subr.bf16.mxu0 %v7405_v8  ;;  %7374 = vmatprep.subr.bf16.mxu1 %v7405_v8  ;;  %v7430_v32 = vld [vmem:[%s8173_s17 + $0x578] ss:$100 sps:$4 sm:$0xff]   ;;  %v7441_v42 = vld [vmem:[%s8173_s17 + $0x190] ss:$100 sps:$4 sm:$0xff]   ;;  %v7442_v43 = vld [vmem:[%s8173_s17 + $0x640] ss:$100 sps:$4 sm:$0xff]  }
  0x15   : > { %v7447_v45 = vld [vmem:[%s8173_s17 + $0x25c] ss:$100 sps:$4 sm:$0xff]   ;;  %v7449_v46 = vld [vmem:[%s8173_s17 + $0x70c] ss:$100 sps:$4 sm:$0xff]   ;;  %v7460_v56 = vld [vmem:[%s8173_s17 + $0x324] ss:$100 sps:$4 sm:$0xff]  }
  0x16   : > { %v7454_v48 = vld [vmem:[%s9633_s1 + $0xa0] sm:$0xff]   ;;  %v7452_v52 = vld [vmem:[%s8173_s17 + $0x258] ss:$100 sps:$4 sm:$0xff]   ;;  %v7453_v53 = vld [vmem:[%s8173_s17 + $0x708] ss:$100 sps:$4 sm:$0xff]  }
  0x17   : > { %6316 = vmatpush3.bf16.msra.mxu0 %v7406_v9  ;;  %7382 = vmatpush3.bf16.msra.mxu1 %v7406_v9  ;;  %v7456_v49 = vld [vmem:[%s9633_s1 + $0x120] sm:$0xff]   ;;  %v7458_v54 = vld [vmem:[%s9633_s1 + $0xa8] sm:$0xff]   ;;  %v7462_v57 = vld [vmem:[%s8173_s17 + $0x7d4] ss:$100 sps:$4 sm:$0xff]  }
  0x18   : > { %6317 = vmatprep.subr.bf16.mxu0 %v7407_v10  ;;  %7375 = vmatprep.subr.bf16.mxu1 %v7407_v10  ;;  %v7464_v55 = vld [vmem:[%s9633_s1 + $0x128] sm:$0xff]   ;;  %v7467_v58 = vld [vmem:[%s9633_s1 + $0xf0] sm:$0xff]   ;;  %v7469_v60 = vld [vmem:[%s9633_s1 + $0xf8] sm:$0xff]  }
  0x19   : > { %v7468_v59 = vld [vmem:[%s9633_s1 + $0xb0] sm:$0xff]   ;;  %v7465_v63 = vld [vmem:[%s8173_s17 + $0x320] ss:$100 sps:$4 sm:$0xff]   ;;  %v7471_v0 = vld [vmem:[%s9633_s1 + $0xb8] sm:$0xff]  }
  0x1a   : > { %v7470_v61 = vld [vmem:[%s9633_s1 + $0x170] sm:$0xff]   ;;  %v7479_v4 = vld [vmem:[%s9633_s1 + $0x178] sm:$0xff]   ;;  %v7481_v6 = vld [vmem:[%s9633_s1 + $0x1c0] sm:$0xff]  }
  0x1b   : > { %6318 = vmatpush3.bf16.msra.mxu0 %v7408_v13  ;;  %7383 = vmatpush3.bf16.msra.mxu1 %v7408_v13  ;;  %v7472_v62 = vld [vmem:[%s9633_s1 + $0x130] sm:$0xff]   ;;  %v7480_v5 = vld [vmem:[%s9633_s1 + $0x138] sm:$0xff]   ;;  %v7475_v7 = vld [vmem:[%s8173_s17 + $0x8] ss:$100 sps:$4 sm:$0xff]  }
  0x1c   : > { %6319 = vmatprep.subr.bf16.mxu0 %v7409_v14  ;;  %7376 = vmatprep.subr.bf16.mxu1 %v7409_v14  ;;  %v7466_v1 = vld [vmem:[%s8173_s17 + $0x7d0] ss:$100 sps:$4 sm:$0xff]   ;;  %v7478_v8 = vld [vmem:[%s8173_s17 + $0x3e8] ss:$100 sps:$4 sm:$0xff]   ;;  %v7482_v9 = vld [vmem:[%s9633_s1 + $0x180] sm:$0xff]  }
  0x1d   : > { %v7473_v2 = vld [vmem:[%s8173_s17 + $0x3ec] ss:$100 sps:$4 sm:$0xff]   ;;  %v7489_v10 = vld [vmem:[%s9633_s1 + $0x240] sm:$0xff]   ;;  %v7483_v11 = vld [vmem:[%s8173_s17 + $0xd4] ss:$100 sps:$4 sm:$0xff]  }
  0x1e   : > { %v7477_v3 = vld [vmem:[%s8173_s17 + $0xc] ss:$100 sps:$4 sm:$0xff]   ;;  %v7487_v12 = vld [vmem:[%s8173_s17 + $0x14] ss:$100 sps:$4 sm:$0xff]  }
  0x1f   : > { %6320 = vmatpush3.bf16.msra.mxu0 %v7410_v15  ;;  %7384 = vmatpush3.bf16.msra.mxu1 %v7410_v15  ;;  %v7491_v13 = vld [vmem:[%s9633_s1 + $0x1c8] sm:$0xff]   ;;  %v7485_v15 = vld [vmem:[%s8173_s17 + $0x10] ss:$100 sps:$4 sm:$0xff]  }
  0x20   : > { %6321 = vmatprep.subr.bf16.mxu0 %v7411_v16  ;;  %7377 = vmatprep.subr.bf16.mxu1 %v7411_v16  ;;  %v7496_v14 = vld [vmem:[%s9633_s1 + $0x188] sm:$0xff]   ;;  %v7488_v16 = vld [vmem:[%s8173_s17 + $0xd0] ss:$100 sps:$4 sm:$0xff]  }
  0x23   : > { %6322 = vmatpush3.bf16.msra.mxu0 %v7412_v17  ;;  %7385 = vmatpush3.bf16.msra.mxu1 %v7412_v17  ;;  %v7490_v17 = vld [vmem:[%s9633_s1 + $0x200] sm:$0xff]  }
  0x24   : > { %6471 = vmatprep.subr.bf16.mxu0 %v7419_v18  ;;  %6389 = vmatprep.subr.bf16.mxu1 %v7421_v21  ;;  %v7492_v18 = vld [vmem:[%s8173_s17 + $0x19c] ss:$100 sps:$4 sm:$0xff]   ;;  %v7507_v21 = vld [vmem:[%s9633_s1 + $0x1d0] sm:$0xff]  }
  0x26   : > { %3595 = vmatmul.mubr.bf16.vlgmr.msra.gmra.mrb[0].mxu0 %v7413_v19  ;;  %3643 = vmatmul.mubr.bf16.vlgmr.msra.gmra.mrb[0].mxu1 %v7416_v20  ;;  %v7494_v19 = vld [vmem:[%s8173_s17 + $0xdc] ss:$100 sps:$4 sm:$0xff]   ;;  %v7499_v20 = vld [vmem:[%s9633_s1 + $0x248] sm:$0xff]  }
  0x27   : > { %6472 = vmatpush3.bf16.msra.mxu0 %v7420_v22  ;;  %6390 = vmatpush3.bf16.msra.mxu1 %v7422_v23  ;;  %v7508_v22 = vld [vmem:[%s9633_s1 + $0x190] sm:$0xff]   ;;  %v7500_v23 = vld [vmem:[%s9633_s1 + $0x208] sm:$0xff]  }
  0x28   : > { %6473 = vmatprep.subr.bf16.mxu0 %v7423_v24  ;;  %3602 = vmatprep.mubr.bf16.mxu0 %v7424_v25  ;;  %v7497_v24 = vld [vmem:[%s8173_s17 + $0x198] ss:$100 sps:$4 sm:$0xff]  }
  0x29   : > { %3650 = vmatprep.mubr.bf16.mxu1 %v7426_v26  ;;  %6391 = vmatprep.subr.bf16.mxu1 %v7431_v27  ;;  %v7498_v25 = vld [vmem:[%s8173_s17 + $0xd8] ss:$100 sps:$4 sm:$0xff]   ;;  %v7509_v26 = vld [vmem:[%s9633_s1 + $0x250] sm:$0xff]   ;;  %v7501_v27 = vld [vmem:[%s8173_s17 + $0x264] ss:$100 sps:$4 sm:$0xff]  }
  0x2b   : > { %6474 = vmatpush3.bf16.msra.mxu0 %v7428_v28  ;;  %6392 = vmatpush3.bf16.msra.mxu1 %v7432_v29  ;;  %v7503_v28 = vld [vmem:[%s8173_s17 + $0x1a4] ss:$100 sps:$4 sm:$0xff]   ;;  %v7514_v29 = vld [vmem:[%s9633_s1 + $0x210] sm:$0xff]  }
  0x2c   : > { %6475 = vmatprep.subr.bf16.mxu0 %v7433_v30  ;;  %6393 = vmatprep.subr.bf16.mxu1 %v7434_v33  ;;  %v7517_v30 = vld [vmem:[%s9633_s1 + $0x1d8] sm:$0xff]   ;;  %v7506_v33 = vld [vmem:[%s8173_s17 + $0x1a0] ss:$100 sps:$4 sm:$0xff]  }
  0x2e   : > { %3603 = vmatmul.mubr.bf16.gmra.mrb[4].mxu0 %v7429_v31  ;;  %3651 = vmatmul.mubr.bf16.gmra.mrb[4].mxu1 %v7430_v32  ;;  %v7518_v31 = vld [vmem:[%s9633_s1 + $0x198] sm:$0xff]   ;;  %v7505_v32 = vld [vmem:[%s8173_s17 + $0x260] ss:$100 sps:$4 sm:$0xff]  }
  0x2f   : > { %6476 = vmatpush3.bf16.msra.mxu0 %v7435_v34  ;;  %6394 = vmatpush3.bf16.msra.mxu1 %v7436_v35  ;;  %v7525_v34 = vld [vmem:[%s9633_s1 + $0x258] sm:$0xff]  }
  0x30   : > { %3610 = vmatprep.mubr.bf16.mxu0 %v7437_v36  ;;  %3658 = vmatprep.mubr.bf16.mxu1 %v7439_v37  ;;  %v7526_v35 = vld [vmem:[%s9633_s1 + $0x218] sm:$0xff]   ;;  %v7510_v36 = vld [vmem:[%s8173_s17 + $0x32c] ss:$100 sps:$4 sm:$0xff]  }
  0x31   : > { %6395 = vmatprep.subr.bf16.mxu1 %v7443_v38  ;;  %6477 = vmatprep.subr.bf16.mxu0 %v7444_v39  ;;  %v7512_v37 = vld [vmem:[%s8173_s17 + $0x26c] ss:$100 sps:$4 sm:$0xff]   ;;  %v7531_v38 = vld [vmem:[%s9633_s1 + $0x1e0] sm:$0xff]  }
  0x32   : > { %v7534_v39 = vld [vmem:[%s9633_s1 + $0x1a0] sm:$0xff]  }
  0x33   : > { %6396 = vmatpush3.bf16.msra.mxu1 %v7445_v40  ;;  %6478 = vmatpush3.bf16.msra.mxu0 %v7446_v41  ;;  %v7535_v40 = vld [vmem:[%s9633_s1 + $0x260] sm:$0xff]  }
  0x34   : > { %6397 = vmatprep.subr.bf16.mxu1 %v7451_v44  ;;  %6479 = vmatprep.subr.bf16.mxu0 %v7455_v47  ;;  %v7536_v41 = vld [vmem:[%s9633_s1 + $0x220] sm:$0xff]   ;;  %v7519_v44 = vld [vmem:[%s8173_s17 + $0x3f4] ss:$100 sps:$4 sm:$0xff]   ;;  %v7544_v47 = vld [vmem:[%s9633_s1 + $0x1a8] sm:$0xff]  }
  0x36   : > { %3611 = vmatmul.mubr.bf16.gmra.mrb[8].mxu0 %v7441_v42  ;;  %3659 = vmatmul.mubr.bf16.gmra.mrb[8].mxu1 %v7442_v43  ;;  %v7515_v42 = vld [vmem:[%s8173_s17 + $0x328] ss:$100 sps:$4 sm:$0xff]  }
  0x37   : > { %3618 = vmatprep.mubr.bf16.mxu0 %v7447_v45  ;;  %3666 = vmatprep.mubr.bf16.mxu1 %v7449_v46  ;;  %v7516_v43 = vld [vmem:[%s8173_s17 + $0x268] ss:$100 sps:$4 sm:$0xff]   ;;  %v7521_v45 = vld [vmem:[%s8173_s17 + $0x334] ss:$100 sps:$4 sm:$0xff]  }
  0x38   : > { %6398 = vmatpush3.bf16.msra.mxu1 %v7454_v48  ;;  %6480 = vmatpush3.bf16.msra.mxu0 %v7456_v49  ;;  %v7543_v46 = vld [vmem:[%s9633_s1 + $0x1e8] sm:$0xff]   ;;  %v7523_v49 = vld [vmem:[%s8173_s17 + $0x3f0] ss:$100 sps:$4 sm:$0xff]  }
  0x39   : > { %6399 = vmatprep.subr.bf16.mxu1 %v7457_v50  ;;  %6481 = vmatprep.subr.bf16.mxu0 %v7459_v51  ;;  %v7549_v48 = vld [vmem:[%s9633_s1 + $0x268] sm:$0xff]   ;;  %v7524_v50 = vld [vmem:[%s8173_s17 + $0x330] ss:$100 sps:$4 sm:$0xff]   ;;  %v7527_v51 = vld [vmem:[%s8173_s17 + $0x4bc] ss:$100 sps:$4 sm:$0xff]  }
  0x3c   : > { %6400 = vmatpush3.bf16.msra.mxu1 %v7458_v54  ;;  %6482 = vmatpush3.bf16.msra.mxu0 %v7464_v55  ;;  %v7553_v54 = vld [vmem:[%s9633_s1 + $0x1f0] sm:$0xff]  }
  0x3d   : > { %6401 = vmatprep.subr.bf16.mxu1 %v7467_v58  ;;  %6483 = vmatprep.subr.bf16.mxu0 %v7470_v61  ;;  %v7554_v55 = vld [vmem:[%s9633_s1 + $0x1b0] sm:$0xff]   ;;  %v7532_v58 = vld [vmem:[%s8173_s17 + $0x4b8] ss:$100 sps:$4 sm:$0xff]   ;;  %v7539_v61 = vld [vmem:[%s8173_s17 + $0x4c4] ss:$100 sps:$4 sm:$0xff]  }
  0x3e   : > { %3619 = vmatmul.mubr.bf16.gmra.mrb[12].mxu0 %v7452_v52  ;;  %3667 = vmatmul.mubr.bf16.gmra.mrb[12].mxu1 %v7453_v53  ;;  %v7529_v52 = vld [vmem:[%s8173_s17 + $0x3fc] ss:$100 sps:$4 sm:$0xff]   ;;  %v7552_v53 = vld [vmem:[%s9633_s1 + $0x228] sm:$0xff]  }
  0x3f   : > { %3626 = vmatprep.mubr.bf16.mxu0 %v7460_v56  ;;  %3674 = vmatprep.mubr.bf16.mxu1 %v7462_v57  ;;  %v7561_v56 = vld [vmem:[%s9633_s1 + $0x270] sm:$0xff]  }
  0x40   : > { %6402 = vmatpush3.bf16.msra.mxu1 %v7468_v59  ;;  %6484 = vmatpush3.bf16.msra.mxu0 %v7472_v62  ;;  %v7562_v57 = vld [vmem:[%s9633_s1 + $0x230] sm:$0xff]   ;;  %v7533_v59 = vld [vmem:[%s8173_s17 + $0x3f8] ss:$100 sps:$4 sm:$0xff]  }
  0x41   : > { %6403 = vmatprep.subr.bf16.mxu1 %v7469_v60  ;;  %6485 = vmatprep.subr.bf16.mxu0 %v7479_v4  ;;  %v7537_v60 = vld [vmem:[%s8173_s17 + $0x584] ss:$100 sps:$4 sm:$0xff]   ;;  %v7569_v62 = vld [vmem:[%s9633_s1 + $0x1f8] sm:$0xff]   ;;  %v7545_v4 = vld [vmem:[%s8173_s17 + $0x64c] ss:$100 sps:$4 sm:$0xff]  }
  0x44   : > { %6404 = vmatpush3.bf16.msra.mxu1 %v7471_v0  ;;  %6486 = vmatpush3.bf16.msra.mxu0 %v7480_v5  ;;  %v7571_v0 = vld [vmem:[%s9633_s1 + $0x278] sm:$0xff]   ;;  %v7579_v5 = vld [vmem:[%s9633_s1 + $0x2c0] sm:$0xff]  }
  0x45   : > { %6553 = vmatprep.subr.bf16.mxu1 %v7481_v6  ;;  %6635 = vmatprep.subr.bf16.mxu0 %v7489_v10  ;;  %v7547_v6 = vld [vmem:[%s8173_s17 + $0x58c] ss:$100 sps:$4 sm:$0xff]   ;;  %v7555_v10 = vld [vmem:[%s8173_s17 + $0x714] ss:$100 sps:$4 sm:$0xff]  }
  0x46   : > { %3627 = vmatmul.mubr.bf16.gmra.mrb[16].mxu0 %v7465_v63  ;;  %3675 = vmatmul.mubr.bf16.gmra.mrb[16].mxu1 %v7466_v1  ;;  %v7570_v63 = vld [vmem:[%s9633_s1 + $0x1b8] sm:$0xff]  }
  0x47   : > { %3634 = vmatprep.mubr.bf16.mxu0 %v7473_v2  ;;  %3715 = vmatprep.mubr.bf16.mxu1 %v7477_v3  ;;  %v7572_v1 = vld [vmem:[%s9633_s1 + $0x238] sm:$0xff]   ;;  %v7541_v2 = vld [vmem:[%s8173_s17 + $0x580] ss:$100 sps:$4 sm:$0xff]  }
  0x48   : > { %v7542_v3 = vld [vmem:[%s8173_s17 + $0x4c0] ss:$100 sps:$4 sm:$0xff]  }
  0x4e   : > { %3635 = vmatmul.mubr.bf16.gmra.mrb[20].mxu0 %v7478_v8  ;;  %3716 = vmatmul.mubr.bf16.vlgmr.msra.gmra.mrb[20].mxu1 %v7475_v7  ;;  %v7587_v7 = vld [vmem:[%s9633_s1 + $0x340] sm:$0xff]   ;;  %v7550_v8 = vld [vmem:[%s8173_s17 + $0x648] ss:$100 sps:$4 sm:$0xff]  }
  0x4f   : > { %6554 = vmatpush3.bf16.msra.mxu1 %v7482_v9  ;;  %3723 = vmatprep.mubr.bf16.mxu1 %v7483_v11  ;;  %v7551_v9 = vld [vmem:[%s8173_s17 + $0x588] ss:$100 sps:$4 sm:$0xff]   ;;  %v7557_v11 = vld [vmem:[%s8173_s17 + $0x654] ss:$100 sps:$4 sm:$0xff]  }
  0x50   : > { %3836 = vmatprep.mubr.bf16.mxu0 %v7487_v12  ;;  %6555 = vmatprep.subr.bf16.mxu1 %v7491_v13  ;;  %v7559_v12 = vld [vmem:[%s8173_s17 + $0x710] ss:$100 sps:$4 sm:$0xff]  }
  0x51   : > { %v7560_v13 = vld [vmem:[%s8173_s17 + $0x650] ss:$100 sps:$4 sm:$0xff]  }
  0x53   : > { %6556 = vmatpush3.bf16.msra.mxu1 %v7496_v14  ;;  %v7563_v14 = vld [vmem:[%s8173_s17 + $0x7dc] ss:$100 sps:$4 sm:$0xff]  }
  0x54   : > { %6557 = vmatprep.subr.bf16.mxu1 %v7507_v21  ;;  %v7578_v21 = vld [vmem:[%s8173_s17 + $0x7e0] ss:$100 sps:$4 sm:$0xff]  }
  0x56   : > { %3724 = vmatmul.mubr.bf16.gmra.mrb[24].mxu1 %v7488_v16  ;;  %3837 = vmatmul.mubr.bf16.vlgmr.msra.gmra.mrb[24].mxu0 %v7485_v15  ;;  %v7565_v15 = vld [vmem:[%s8173_s17 + $0x71c] ss:$100 sps:$4 sm:$0xff]  }
  0x57   : > { %6636 = vmatpush3.bf16.msra.mxu0 %v7490_v17  ;;  %3731 = vmatprep.mubr.bf16.mxu1 %v7492_v18  ;;  %v7567_v16 = vld [vmem:[%s8173_s17 + $0x7d8] ss:$100 sps:$4 sm:$0xff]   ;;  %v7573_v18 = vld [vmem:[%s8173_s17 + $0x7e4] ss:$100 sps:$4 sm:$0xff]  }
  0x58   : > { %3844 = vmatprep.mubr.bf16.mxu0 %v7494_v19  ;;  %6637 = vmatprep.subr.bf16.mxu0 %v7499_v20  ;;  %v7568_v17 = vld [vmem:[%s8173_s17 + $0x718] ss:$100 sps:$4 sm:$0xff]  }
  0x59   : > { %6558 = vmatpush3.bf16.msra.mxu1 %v7508_v22  ;;  %v7577_v19 = vld [vmem:[%s8173_s17 + $0x1c] ss:$100 sps:$4 sm:$0xff]  }
  0x5a   : > { %6559 = vmatprep.subr.bf16.mxu1 %v7517_v30  ;;  %v7575_v20 = vld [vmem:[%s8173_s17 + $0x18] ss:$100 sps:$4 sm:$0xff]   ;;  %v7580_v22 = vld [vmem:[%s9633_s1 + $0x280] sm:$0xff]  }
  0x5b   : > { %6638 = vmatpush3.bf16.msra.mxu0 %v7500_v23  ;;  %v7581_v23 = vld [vmem:[%s8173_s17 + $0xe4] ss:$100 sps:$4 sm:$0xff]  }
  0x5c   : > { %6639 = vmatprep.subr.bf16.mxu0 %v7509_v26  ;;  %v7594_v26 = vld [vmem:[%s9633_s1 + $0x288] sm:$0xff]   ;;  %v7588_v30 = vld [vmem:[%s9633_s1 + $0x300] sm:$0xff]  }
  0x5d   : > { %6560 = vmatpush3.bf16.msra.mxu1 %v7518_v31  ;;  %v7590_v31 = vld [vmem:[%s8173_s17 + $0x1ac] ss:$100 sps:$4 sm:$0xff]  }
  0x5e   : > { %3732 = vmatmul.mubr.bf16.gmra.mrb[28].mxu1 %v7497_v24  ;;  %3845 = vmatmul.mubr.bf16.gmra.mrb[28].mxu0 %v7498_v25  ;;  %v7585_v24 = vld [vmem:[%s8173_s17 + $0x24] ss:$100 sps:$4 sm:$0xff]  }
  0x5f   : > { %3739 = vmatprep.mubr.bf16.mxu1 %v7501_v27  ;;  %3852 = vmatprep.mubr.bf16.mxu0 %v7503_v28  ;;  %v7589_v25 = vld [vmem:[%s9633_s1 + $0x2c8] sm:$0xff]   ;;  %v7583_v27 = vld [vmem:[%s8173_s17 + $0x20] ss:$100 sps:$4 sm:$0xff]  }
  0x60   : > { %6640 = vmatpush3.bf16.msra.mxu0 %v7514_v29  ;;  %6561 = vmatprep.subr.bf16.mxu1 %v7531_v38  ;;  %v7586_v28 = vld [vmem:[%s8173_s17 + $0xe0] ss:$100 sps:$4 sm:$0xff]   ;;  %v7605_v29 = vld [vmem:[%s9633_s1 + $0x2d0] sm:$0xff]   ;;  %v7596_v38 = vld [vmem:[%s8173_s17 + $0xe8] ss:$100 sps:$4 sm:$0xff]  }
  0x61   : > { %6641 = vmatprep.subr.bf16.mxu0 %v7525_v34  ;;  %6562 = vmatpush3.bf16.msra.mxu1 %v7534_v39  ;;  %v7606_v34 = vld [vmem:[%s9633_s1 + $0x290] sm:$0xff]  }
  0x62   : > { %6563 = vmatprep.subr.bf16.mxu1 %v7543_v46  ;;  %v7607_v39 = vld [vmem:[%s9633_s1 + $0x350] sm:$0xff]   ;;  %v7632_v46 = vld [vmem:[%s9633_s1 + $0x2a0] sm:$0xff]  }
  0x64   : > { %6642 = vmatpush3.bf16.msra.mxu0 %v7526_v35  ;;  %v7615_v35 = vld [vmem:[%s9633_s1 + $0x2d8] sm:$0xff]  }
  0x65   : > { %6643 = vmatprep.subr.bf16.mxu0 %v7535_v40  ;;  %6564 = vmatpush3.bf16.msra.mxu1 %v7544_v47  ;;  %v7599_v40 = vld [vmem:[%s8173_s17 + $0x274] ss:$100 sps:$4 sm:$0xff]   ;;  %v7641_v47 = vld [vmem:[%s9633_s1 + $0x2e8] sm:$0xff]  }
  0x66   : > { %3740 = vmatmul.mubr.bf16.gmra.mrb[32].mxu1 %v7505_v32  ;;  %3853 = vmatmul.mubr.bf16.gmra.mrb[32].mxu0 %v7506_v33  ;;  %v7592_v32 = vld [vmem:[%s8173_s17 + $0xec] ss:$100 sps:$4 sm:$0xff]  }
  0x67   : > { %3747 = vmatprep.mubr.bf16.mxu1 %v7510_v36  ;;  %3860 = vmatprep.mubr.bf16.mxu0 %v7512_v37  ;;  %v7597_v33 = vld [vmem:[%s9633_s1 + $0x348] sm:$0xff]  }
  0x68   : > { %6644 = vmatpush3.bf16.msra.mxu0 %v7536_v41  ;;  %6565 = vmatprep.subr.bf16.mxu1 %v7553_v54  ;;  %v7598_v36 = vld [vmem:[%s9633_s1 + $0x308] sm:$0xff]   ;;  %v7616_v41 = vld [vmem:[%s9633_s1 + $0x298] sm:$0xff]  }
  0x69   : > { %6645 = vmatprep.subr.bf16.mxu0 %v7549_v48  ;;  %6566 = vmatpush3.bf16.msra.mxu1 %v7554_v55  ;;  %v7595_v37 = vld [vmem:[%s8173_s17 + $0x1a8] ss:$100 sps:$4 sm:$0xff]   ;;  %v7624_v48 = vld [vmem:[%s9633_s1 + $0x318] sm:$0xff]   ;;  %v7634_v55 = vld [vmem:[%s9633_s1 + $0x320] sm:$0xff]  }
  0x6a   : > { %6567 = vmatprep.subr.bf16.mxu1 %v7569_v62  ;;  %v7642_v54 = vld [vmem:[%s9633_s1 + $0x2a8] sm:$0xff]   ;;  %v7614_v62 = vld [vmem:[%s8173_s17 + $0x278] ss:$100 sps:$4 sm:$0xff]  }
  0x6c   : > { %6646 = vmatpush3.bf16.msra.mxu0 %v7552_v53  ;;  %v7610_v53 = vld [vmem:[%s8173_s17 + $0x27c] ss:$100 sps:$4 sm:$0xff]  }
  0x6d   : > { %6647 = vmatprep.subr.bf16.mxu0 %v7561_v56  ;;  %6568 = vmatpush3.bf16.msra.mxu1 %v7570_v63  ;;  %v7647_v56 = vld [vmem:[%s9633_s1 + $0x368] sm:$0xff]   ;;  %v7659_v63 = vld [vmem:[%s9633_s1 + $0x370] sm:$0xff]  }
  0x6e   : > { %3748 = vmatmul.mubr.bf16.gmra.mrb[36].mxu1 %v7515_v42  ;;  %3861 = vmatmul.mubr.bf16.gmra.mrb[36].mxu0 %v7516_v43  ;;  %v7601_v42 = vld [vmem:[%s8173_s17 + $0x1b4] ss:$100 sps:$4 sm:$0xff]  }
  0x6f   : > { %3755 = vmatprep.mubr.bf16.mxu1 %v7519_v44  ;;  %3868 = vmatprep.mubr.bf16.mxu0 %v7521_v45  ;;  %v7612_v43 = vld [vmem:[%s9633_s1 + $0x310] sm:$0xff]   ;;  %v7623_v44 = vld [vmem:[%s9633_s1 + $0x358] sm:$0xff]   ;;  %v7629_v45 = vld [vmem:[%s9633_s1 + $0x2e0] sm:$0xff]  }
  0x70   : > { %6648 = vmatpush3.bf16.msra.mxu0 %v7562_v57  ;;  %6717 = vmatprep.subr.bf16.mxu1 %v7579_v5  ;;  %v7651_v57 = vld [vmem:[%s9633_s1 + $0x2f0] sm:$0xff]   ;;  %v7669_v5 = vld [vmem:[%s9633_s1 + $0x378] sm:$0xff]  }
  0x71   : > { %6649 = vmatprep.subr.bf16.mxu0 %v7571_v0  ;;  %v7668_v0 = vld [vmem:[%s9633_s1 + $0x2b8] sm:$0xff]  }
  0x74   : > { %6650 = vmatpush3.bf16.msra.mxu0 %v7572_v1  ;;  %v7617_v1 = vld [vmem:[%s8173_s17 + $0x404] ss:$100 sps:$4 sm:$0xff]  }
  0x75   : > { %6799 = vmatprep.subr.bf16.mxu0 %v7587_v7  ;;  %v7621_v7 = vld [vmem:[%s8173_s17 + $0x400] ss:$100 sps:$4 sm:$0xff]  }
  0x76   : > { %3756 = vmatmul.mubr.bf16.gmra.mrb[40].mxu1 %v7523_v49  ;;  %3869 = vmatmul.mubr.bf16.gmra.mrb[40].mxu0 %v7524_v50  ;;  %v7603_v49 = vld [vmem:[%s8173_s17 + $0x270] ss:$100 sps:$4 sm:$0xff]  }
  0x77   : > { %3763 = vmatprep.mubr.bf16.mxu1 %v7527_v51  ;;  %3876 = vmatprep.mubr.bf16.mxu0 %v7529_v52  ;;  %v7604_v50 = vld [vmem:[%s8173_s17 + $0x1b0] ss:$100 sps:$4 sm:$0xff]   ;;  %v7633_v51 = vld [vmem:[%s9633_s1 + $0x360] sm:$0xff]  }
  0x78   : > { %v7608_v52 = vld [vmem:[%s8173_s17 + $0x33c] ss:$100 sps:$4 sm:$0xff]  }
  0x7e   : > { %3764 = vmatmul.mubr.bf16.gmra.mrb[44].mxu1 %v7532_v58  ;;  %3877 = vmatmul.mubr.bf16.gmra.mrb[44].mxu0 %v7533_v59  ;;  %v7652_v58 = vld [vmem:[%s9633_s1 + $0x2b0] sm:$0xff]   ;;  %v7667_v59 = vld [vmem:[%s9633_s1 + $0x2f8] sm:$0xff]  }
  0x7f   : > { %3771 = vmatprep.mubr.bf16.mxu1 %v7537_v60  ;;  %3884 = vmatprep.mubr.bf16.mxu0 %v7539_v61  ;;  %v7650_v60 = vld [vmem:[%s9633_s1 + $0x328] sm:$0xff]   ;;  %v7613_v61 = vld [vmem:[%s8173_s17 + $0x338] ss:$100 sps:$4 sm:$0xff]  }
  0x86   : > { %3772 = vmatmul.mubr.bf16.gmra.mrb[48].mxu1 %v7541_v2  ;;  %3885 = vmatmul.mubr.bf16.gmra.mrb[48].mxu0 %v7542_v3  ;;  %v7619_v2 = vld [vmem:[%s8173_s17 + $0x344] ss:$100 sps:$4 sm:$0xff]   ;;  %v7660_v3 = vld [vmem:[%s9633_s1 + $0x330] sm:$0xff]  }
  0x87   : > { %3779 = vmatprep.mubr.bf16.mxu1 %v7545_v4  ;;  %3892 = vmatprep.mubr.bf16.mxu0 %v7547_v6  ;;  %v7677_v4 = vld [vmem:[%s9633_s1 + $0x3c0] sm:$0xff]   ;;  %v7670_v6 = vld [vmem:[%s9633_s1 + $0x338] sm:$0xff]  }
  0x8e   : > { %3780 = vmatmul.mubr.bf16.gmra.mrb[52].mxu1 %v7550_v8  ;;  %3893 = vmatmul.mubr.bf16.gmra.mrb[52].mxu0 %v7551_v9  ;;  %v7622_v8 = vld [vmem:[%s8173_s17 + $0x340] ss:$100 sps:$4 sm:$0xff]  }
  0x8f   : > { %3787 = vmatprep.mubr.bf16.mxu1 %v7555_v10  ;;  %3900 = vmatprep.mubr.bf16.mxu0 %v7557_v11  ;;  %v7685_v9 = vld [vmem:[%s9633_s1 + $0x440] sm:$0xff]   ;;  %v7625_v10 = vld [vmem:[%s8173_s17 + $0x4cc] ss:$100 sps:$4 sm:$0xff]  }
  0x90   : > { %v7627_v11 = vld [vmem:[%s8173_s17 + $0x40c] ss:$100 sps:$4 sm:$0xff]  }
  0x96   : > { %3788 = vmatmul.mubr.bf16.gmra.mrb[56].mxu1 %v7559_v12  ;;  %3901 = vmatmul.mubr.bf16.gmra.mrb[56].mxu0 %v7560_v13  ;;  %v7630_v12 = vld [vmem:[%s8173_s17 + $0x4c8] ss:$100 sps:$4 sm:$0xff]  }
  0x97   : > { %3795 = vmatprep.mubr.bf16.mxu1 %v7563_v14  ;;  %3908 = vmatprep.mubr.bf16.mxu0 %v7565_v15  ;;  %v7631_v13 = vld [vmem:[%s8173_s17 + $0x408] ss:$100 sps:$4 sm:$0xff]   ;;  %v7635_v14 = vld [vmem:[%s8173_s17 + $0x594] ss:$100 sps:$4 sm:$0xff]  }
  0x98   : > { %v7637_v15 = vld [vmem:[%s8173_s17 + $0x4d4] ss:$100 sps:$4 sm:$0xff]  }
  0x9e   : > { %3796 = vmatmul.mubr.bf16.gmra.mrb[60].mxu1 %v7567_v16  ;;  %3909 = vmatmul.mubr.bf16.gmra.mrb[60].mxu0 %v7568_v17  ;;  %v7639_v16 = vld [vmem:[%s8173_s17 + $0x590] ss:$100 sps:$4 sm:$0xff]  }
  0x9f   : > { %3916 = vmatprep.mubr.bf16.mxu0 %v7573_v18  ;;  %3957 = vmatprep.mubr.bf16.mxu1 %v7577_v19  ;;  %v7640_v17 = vld [vmem:[%s8173_s17 + $0x4d0] ss:$100 sps:$4 sm:$0xff]   ;;  %v7643_v18 = vld [vmem:[%s8173_s17 + $0x65c] ss:$100 sps:$4 sm:$0xff]  }
  0xa0   : > { %v7645_v19 = vld [vmem:[%s8173_s17 + $0x59c] ss:$100 sps:$4 sm:$0xff]  }
  0xa6   : > { %3917 = vmatmul.mubr.bf16.gmra.mrb[64].mxu0 %v7578_v21  ;;  %3958 = vmatmul.mubr.bf16.vlgmr.msra.gmra.mrb[64].mxu1 %v7575_v20  ;;  %v7648_v20 = vld [vmem:[%s8173_s17 + $0x658] ss:$100 sps:$4 sm:$0xff]  }
  0xa7   : > { %6718 = vmatpush3.bf16.msra.mxu1 %v7580_v22  ;;  %3965 = vmatprep.mubr.bf16.mxu1 %v7581_v23  ;;  %v7649_v21 = vld [vmem:[%s8173_s17 + $0x598] ss:$100 sps:$4 sm:$0xff]   ;;  %v7653_v22 = vld [vmem:[%s8173_s17 + $0x724] ss:$100 sps:$4 sm:$0xff]  }
  0xa8   : > { %4078 = vmatprep.mubr.bf16.mxu0 %v7585_v24  ;;  %6719 = vmatprep.subr.bf16.mxu1 %v7589_v25  ;;  %v7655_v23 = vld [vmem:[%s8173_s17 + $0x664] ss:$100 sps:$4 sm:$0xff]  }
  0xa9   : > { %v7657_v24 = vld [vmem:[%s8173_s17 + $0x720] ss:$100 sps:$4 sm:$0xff]  }
  0xaa   : > { %v7658_v25 = vld [vmem:[%s8173_s17 + $0x660] ss:$100 sps:$4 sm:$0xff]  }
  0xab   : > { %6720 = vmatpush3.bf16.msra.mxu1 %v7594_v26  ;;  %v7661_v26 = vld [vmem:[%s8173_s17 + $0x7ec] ss:$100 sps:$4 sm:$0xff]  }
  0xac   : > { %6721 = vmatprep.subr.bf16.mxu1 %v7605_v29  ;;  %v7666_v29 = vld [vmem:[%s8173_s17 + $0x728] ss:$100 sps:$4 sm:$0xff]  }
  0xae   : > { %3966 = vmatmul.mubr.bf16.gmra.mrb[68].mxu1 %v7586_v28  ;;  %4079 = vmatmul.mubr.bf16.vlgmr.msra.gmra.mrb[68].mxu0 %v7583_v27  ;;  %v7663_v27 = vld [vmem:[%s8173_s17 + $0x72c] ss:$100 sps:$4 sm:$0xff]  }
  0xaf   : > { %6800 = vmatpush3.bf16.msra.mxu0 %v7588_v30  ;;  %3973 = vmatprep.mubr.bf16.mxu1 %v7590_v31  ;;  %v7665_v28 = vld [vmem:[%s8173_s17 + $0x7e8] ss:$100 sps:$4 sm:$0xff]   ;;  %v7671_v30 = vld [vmem:[%s8173_s17 + $0x7f4] ss:$100 sps:$4 sm:$0xff]  }
  0xb0   : > { %4086 = vmatprep.mubr.bf16.mxu0 %v7592_v32  ;;  %6801 = vmatprep.subr.bf16.mxu0 %v7597_v33  ;;  %v7675_v31 = vld [vmem:[%s8173_s17 + $0x2c] ss:$100 sps:$4 sm:$0xff]  }
  0xb1   : > { %6722 = vmatpush3.bf16.msra.mxu1 %v7606_v34  ;;  %v7673_v32 = vld [vmem:[%s8173_s17 + $0x28] ss:$100 sps:$4 sm:$0xff]  }
  0xb2   : > { %6723 = vmatprep.subr.bf16.mxu1 %v7615_v35  ;;  %v7676_v35 = vld [vmem:[%s8173_s17 + $0x7f0] ss:$100 sps:$4 sm:$0xff]  }
  0xb3   : > { %6802 = vmatpush3.bf16.msra.mxu0 %v7598_v36 }
  0xb4   : > { %6803 = vmatprep.subr.bf16.mxu0 %v7607_v39 }
  0xb5   : > { %6724 = vmatpush3.bf16.msra.mxu1 %v7616_v41 }
  0xb6   : > { %3974 = vmatmul.mubr.bf16.gmra.mrb[72].mxu1 %v7595_v37  ;;  %4087 = vmatmul.mubr.bf16.gmra.mrb[72].mxu0 %v7596_v38  ;;  %v7678_v38 = vld [vmem:[%s9633_s1 + $0x380] sm:$0xff]  }
  0xb7   : > { %3981 = vmatprep.mubr.bf16.mxu1 %v7599_v40  ;;  %4094 = vmatprep.mubr.bf16.mxu0 %v7601_v42 }
  0xb8   : > { %6804 = vmatpush3.bf16.msra.mxu0 %v7612_v43  ;;  %6725 = vmatprep.subr.bf16.mxu1 %v7629_v45  ;;  %v7679_v43 = vld [vmem:[%s8173_s17 + $0xf4] ss:$100 sps:$4 sm:$0xff]  }
  0xb9   : > { %6805 = vmatprep.subr.bf16.mxu0 %v7623_v44  ;;  %6726 = vmatpush3.bf16.msra.mxu1 %v7632_v46  ;;  %v7683_v44 = vld [vmem:[%s8173_s17 + $0x34] ss:$100 sps:$4 sm:$0xff]  }
  0xba   : > { %6727 = vmatprep.subr.bf16.mxu1 %v7641_v47  ;;  %v7687_v47 = vld [vmem:[%s9633_s1 + $0x3c8] sm:$0xff]  }
  0xbc   : > { %6806 = vmatpush3.bf16.msra.mxu0 %v7624_v48 }
  0xbd   : > { %6807 = vmatprep.subr.bf16.mxu0 %v7633_v51  ;;  %6728 = vmatpush3.bf16.msra.mxu1 %v7642_v54  ;;  %v7681_v51 = vld [vmem:[%s8173_s17 + $0x30] ss:$100 sps:$4 sm:$0xff]  }
  0xbe   : > { %3982 = vmatmul.mubr.bf16.gmra.mrb[76].mxu1 %v7603_v49  ;;  %4095 = vmatmul.mubr.bf16.gmra.mrb[76].mxu0 %v7604_v50  ;;  %v7692_v50 = vld [vmem:[%s9633_s1 + $0x388] sm:$0xff]  }
  0xbf   : > { %3989 = vmatprep.mubr.bf16.mxu1 %v7608_v52  ;;  %4102 = vmatprep.mubr.bf16.mxu0 %v7610_v53  ;;  %v7684_v52 = vld [vmem:[%s8173_s17 + $0xf0] ss:$100 sps:$4 sm:$0xff]  }
  0xc0   : > { %6808 = vmatpush3.bf16.msra.mxu0 %v7634_v55  ;;  %6729 = vmatprep.subr.bf16.mxu1 %v7651_v57  ;;  %v7703_v53 = vld [vmem:[%s9633_s1 + $0x3d0] sm:$0xff]  }
  0xc1   : > { %6809 = vmatprep.subr.bf16.mxu0 %v7647_v56  ;;  %6730 = vmatpush3.bf16.msra.mxu1 %v7652_v58  ;;  %v7688_v56 = vld [vmem:[%s8173_s17 + $0x1bc] ss:$100 sps:$4 sm:$0xff]  }
  0xc2   : > { %6731 = vmatprep.subr.bf16.mxu1 %v7667_v59  ;;  %v7686_v59 = vld [vmem:[%s9633_s1 + $0x400] sm:$0xff]  }
  0xc4   : > { %6810 = vmatpush3.bf16.msra.mxu0 %v7650_v60  ;;  %v7690_v60 = vld [vmem:[%s8173_s17 + $0xfc] ss:$100 sps:$4 sm:$0xff]  }
  0xc5   : > { %6811 = vmatprep.subr.bf16.mxu0 %v7659_v63  ;;  %6732 = vmatpush3.bf16.msra.mxu1 %v7668_v0 }
  0xc6   : > { %3990 = vmatmul.mubr.bf16.gmra.mrb[80].mxu1 %v7613_v61  ;;  %4103 = vmatmul.mubr.bf16.gmra.mrb[80].mxu0 %v7614_v62  ;;  %v7695_v61 = vld [vmem:[%s9633_s1 + $0x448] sm:$0xff]  }
  0xc7   : > { %3997 = vmatprep.mubr.bf16.mxu1 %v7617_v1  ;;  %4110 = vmatprep.mubr.bf16.mxu0 %v7619_v2 }
  0xc8   : > { %6812 = vmatpush3.bf16.msra.mxu0 %v7660_v3  ;;  %6881 = vmatprep.subr.bf16.mxu1 %v7677_v4 }
  0xc9   : > { %6813 = vmatprep.subr.bf16.mxu0 %v7669_v5 }
  0xcc   : > { %6814 = vmatpush3.bf16.msra.mxu0 %v7670_v6  ;;  %v7704_v6 = vld [vmem:[%s9633_s1 + $0x390] sm:$0xff]  }
  0xcd   : > { %6963 = vmatprep.subr.bf16.mxu0 %v7685_v9  ;;  %v7693_v9 = vld [vmem:[%s8173_s17 + $0x1b8] ss:$100 sps:$4 sm:$0xff]  }
  0xce   : > { %3998 = vmatmul.mubr.bf16.gmra.mrb[84].mxu1 %v7621_v7  ;;  %4111 = vmatmul.mubr.bf16.gmra.mrb[84].mxu0 %v7622_v8  ;;  %v7713_v7 = vld [vmem:[%s9633_s1 + $0x3d8] sm:$0xff]   ;;  %v7696_v8 = vld [vmem:[%s9633_s1 + $0x408] sm:$0xff]  }
  0xcf   : > { %4005 = vmatprep.mubr.bf16.mxu1 %v7625_v10  ;;  %4118 = vmatprep.mubr.bf16.mxu0 %v7627_v11  ;;  %v7694_v10 = vld [vmem:[%s8173_s17 + $0xf8] ss:$100 sps:$4 sm:$0xff]   ;;  %v7705_v11 = vld [vmem:[%s9633_s1 + $0x450] sm:$0xff]  }
  0xd6   : > { %4006 = vmatmul.mubr.bf16.gmra.mrb[88].mxu1 %v7630_v12  ;;  %4119 = vmatmul.mubr.bf16.gmra.mrb[88].mxu0 %v7631_v13  ;;  %v7714_v12 = vld [vmem:[%s9633_s1 + $0x398] sm:$0xff]  }
  0xd7   : > { %4013 = vmatprep.mubr.bf16.mxu1 %v7635_v14  ;;  %4126 = vmatprep.mubr.bf16.mxu0 %v7637_v15  ;;  %v7697_v15 = vld [vmem:[%s8173_s17 + $0x284] ss:$100 sps:$4 sm:$0xff]  }
  0xde   : > { %4014 = vmatmul.mubr.bf16.gmra.mrb[92].mxu1 %v7639_v16  ;;  %4127 = vmatmul.mubr.bf16.gmra.mrb[92].mxu0 %v7640_v17  ;;  %v7699_v16 = vld [vmem:[%s8173_s17 + $0x1c4] ss:$100 sps:$4 sm:$0xff]  }
  0xdf   : > { %4021 = vmatprep.mubr.bf16.mxu1 %v7643_v18  ;;  %4134 = vmatprep.mubr.bf16.mxu0 %v7645_v19  ;;  %v7710_v19 = vld [vmem:[%s9633_s1 + $0x410] sm:$0xff]  }
  0xe6   : > { %4022 = vmatmul.mubr.bf16.gmra.mrb[96].mxu1 %v7648_v20  ;;  %4135 = vmatmul.mubr.bf16.gmra.mrb[96].mxu0 %v7649_v21 }
  0xe7   : > { %4029 = vmatprep.mubr.bf16.mxu1 %v7653_v22  ;;  %4142 = vmatprep.mubr.bf16.mxu0 %v7655_v23 }
  0xee   : > { %4030 = vmatmul.mubr.bf16.gmra.mrb[100].mxu1 %v7657_v24  ;;  %4143 = vmatmul.mubr.bf16.gmra.mrb[100].mxu0 %v7658_v25 }
  0xef   : > { %4037 = vmatprep.mubr.bf16.mxu1 %v7661_v26  ;;  %4150 = vmatprep.mubr.bf16.mxu0 %v7663_v27  ;;  %v7727_v26 = vld [vmem:[%s9633_s1 + $0x3e0] sm:$0xff]  }
  0xf6   : > { %4038 = vmatmul.mubr.bf16.gmra.mrb[104].mxu1 %v7665_v28  ;;  %4151 = vmatmul.mubr.bf16.gmra.mrb[104].mxu0 %v7666_v29  ;;  %v7721_v29 = vld [vmem:[%s9633_s1 + $0x458] sm:$0xff]  }
  0xf7   : > { %4158 = vmatprep.mubr.bf16.mxu0 %v7671_v30  ;;  %4199 = vmatprep.mubr.bf16.mxu1 %v7675_v31  ;;  %v7730_v30 = vld [vmem:[%s9633_s1 + $0x3a0] sm:$0xff]   ;;  %v7739_v31 = vld [vmem:[%s9633_s1 + $0x3e8] sm:$0xff]  }
  0xf9   : > { %v6323_v33 = vpop.f32.mrb[0].mxu0  ;;  %v6359_v34 = vpop.f32.mrb[0].mxu1 }
  0xfa   : > { %v6324_v36 = vpop.f32.mrb[1].mxu0  ;;  %v6360_v37 = vpop.f32.mrb[1].mxu1 }
  0xfb   : > { %v8605_v39 = vadd.f32 %v6324_v36, %v6323_v33  ;;  %v6326_v40 = vpop.f32.mrb[2].mxu0  ;;  %v8607_v41 = vadd.f32 %v6360_v37, %v6359_v34  ;;  %v6362_v42 = vpop.f32.mrb[2].mxu1  ;;  %v7701_v33 = vld [vmem:[%s8173_s17 + $0x280] ss:$100 sps:$4 sm:$0xff]  }
  0xfc   : > { %v6327_v45 = vpop.f32.mrb[3].mxu0  ;;  %v6363_v46 = vpop.f32.mrb[3].mxu1  ;;  %v7702_v34 = vld [vmem:[%s8173_s17 + $0x1c0] ss:$100 sps:$4 sm:$0xff]  }
  0xfd   : > { %v8614_v48 = vadd.f32 %v6327_v45, %v6326_v40  ;;  %v8616_v49 = vadd.f32 %v6363_v46, %v6362_v42  ;;  %v7740_v40 = vld [vmem:[%s9633_s1 + $0x3a8] sm:$0xff]  }
  0xfe   : > { %4159 = vmatmul.mubr.bf16.gmra.mrb[108].mxu0 %v7676_v35  ;;  %4200 = vmatmul.mubr.bf16.vlgmr.msra.gmra.mrb[108].mxu1 %v7673_v32  ;;  %v7722_v32 = vld [vmem:[%s9633_s1 + $0x418] sm:$0xff]   ;;  %v7731_v35 = vld [vmem:[%s9633_s1 + $0x460] sm:$0xff]  }
  0xff   : > { %6882 = vmatpush3.bf16.msra.mxu1 %v7678_v38  ;;  %4207 = vmatprep.mubr.bf16.mxu1 %v7679_v43  ;;  %v7706_v38 = vld [vmem:[%s8173_s17 + $0x34c] ss:$100 sps:$4 sm:$0xff]  }
 0x100   : > { %4320 = vmatprep.mubr.bf16.mxu0 %v7683_v44  ;;  %6883 = vmatprep.subr.bf16.mxu1 %v7687_v47  ;;  %v7708_v44 = vld [vmem:[%s8173_s17 + $0x28c] ss:$100 sps:$4 sm:$0xff]  }
 0x101   : > { %v6329_v54 = vpop.f32.mrb[4].mxu0  ;;  %v6365_v55 = vpop.f32.mrb[4].mxu1 }
 0x102   : > { %v6330_v57 = vpop.f32.mrb[5].mxu0  ;;  %v6366_v58 = vpop.f32.mrb[5].mxu1 }
 0x103   : > { %v8634_v62 = vadd.f32 %v6330_v57, %v6329_v54  ;;  %v6332_v63 = vpop.f32.mrb[6].mxu0  ;;  %v8636_v0 = vadd.f32 %v6366_v58, %v6365_v55  ;;  %v6368_v1 = vpop.f32.mrb[6].mxu1  ;;  %6884 = vmatpush3.bf16.msra.mxu1 %v7692_v50  ;;  %v7745_v54 = vld [vmem:[%s9633_s1 + $0x468] sm:$0xff]   ;;  %v7749_v55 = vld [vmem:[%s9633_s1 + $0x3f0] sm:$0xff]  }
 0x104   : > { %v6333_v2 = vpop.f32.mrb[7].mxu0  ;;  %v6369_v3 = vpop.f32.mrb[7].mxu1  ;;  %6885 = vmatprep.subr.bf16.mxu1 %v7703_v53  ;;  %v7732_v53 = vld [vmem:[%s9633_s1 + $0x420] sm:$0xff]   ;;  %v7750_v58 = vld [vmem:[%s9633_s1 + $0x3b0] sm:$0xff]  }
 0x105   : > { %v8638_v4 = vadd.f32 %v6333_v2, %v6332_v63  ;;  %v8640_v5 = vadd.f32 %v6369_v3, %v6368_v1  ;;  %v7748_v63 = vld [vmem:[%s9633_s1 + $0x428] sm:$0xff]   ;;  %v7715_v3 = vld [vmem:[%s8173_s17 + $0x414] ss:$100 sps:$4 sm:$0xff]  }
 0x106   : > { %4208 = vmatmul.mubr.bf16.gmra.mrb[112].mxu1 %v7684_v52  ;;  %4321 = vmatmul.mubr.bf16.vlgmr.msra.gmra.mrb[112].mxu0 %v7681_v51 }
 0x107   : > { %6964 = vmatpush3.bf16.msra.mxu0 %v7686_v59  ;;  %4215 = vmatprep.mubr.bf16.mxu1 %v7688_v56  ;;  %v7765_v59 = vld [vmem:[%s9633_s1 + $0x3f8] sm:$0xff]  }
 0x108   : > { %4328 = vmatprep.mubr.bf16.mxu0 %v7690_v60  ;;  %6965 = vmatprep.subr.bf16.mxu0 %v7695_v61  ;;  %v7711_v60 = vld [vmem:[%s8173_s17 + $0x348] ss:$100 sps:$4 sm:$0xff]  }
 0x109   : > { %v6335_v13 = vpop.f32.mrb[8].mxu0  ;;  %v6371_v14 = vpop.f32.mrb[8].mxu1  ;;  %6886 = vmatpush3.bf16.msra.mxu1 %v7704_v6  ;;  %v7712_v61 = vld [vmem:[%s8173_s17 + $0x288] ss:$100 sps:$4 sm:$0xff]   ;;  %v7717_v6 = vld [vmem:[%s8173_s17 + $0x354] ss:$100 sps:$4 sm:$0xff]  }
 0x10a   : > { %v6336_v17 = vpop.f32.mrb[9].mxu0  ;;  %v6372_v18 = vpop.f32.mrb[9].mxu1  ;;  %6887 = vmatprep.subr.bf16.mxu1 %v7713_v7  ;;  %v7757_v7 = vld [vmem:[%s9633_s1 + $0x470] sm:$0xff]  }
 0x10b   : > { %v8664_v20 = vadd.f32 %v6336_v17, %v6335_v13  ;;  %v6338_v21 = vpop.f32.mrb[10].mxu0  ;;  %v8666_v22 = vadd.f32 %v6372_v18, %v6371_v14  ;;  %v6374_v23 = vpop.f32.mrb[10].mxu1  ;;  %6966 = vmatpush3.bf16.msra.mxu0 %v7696_v8  ;;  %v7766_v8 = vld [vmem:[%s9633_s1 + $0x3b8] sm:$0xff]  }
 0x10c   : > { %v6339_v24 = vpop.f32.mrb[11].mxu0  ;;  %v6375_v25 = vpop.f32.mrb[11].mxu1  ;;  %6967 = vmatprep.subr.bf16.mxu0 %v7705_v11 }
 0x10d   : > { %v8671_v27 = vadd.f32 %v6339_v24, %v6338_v21  ;;  %v8673_v28 = vadd.f32 %v6375_v25, %v6374_v23  ;;  %6888 = vmatpush3.bf16.msra.mxu1 %v7714_v12  ;;  %v7767_v23 = vld [vmem:[%s9633_s1 + $0x478] sm:$0xff]   ;;  %v7719_v25 = vld [vmem:[%s8173_s17 + $0x410] ss:$100 sps:$4 sm:$0xff]  }
 0x10e   : > { %4216 = vmatmul.mubr.bf16.gmra.mrb[116].mxu1 %v7693_v9  ;;  %4329 = vmatmul.mubr.bf16.gmra.mrb[116].mxu0 %v7694_v10  ;;  %v7768_v24 = vld [vmem:[%s9633_s1 + $0x438] sm:$0xff]  }
 0x10f   : > { %4223 = vmatprep.mubr.bf16.mxu1 %v7697_v15  ;;  %4336 = vmatprep.mubr.bf16.mxu0 %v7699_v16  ;;  %v7758_v15 = vld [vmem:[%s9633_s1 + $0x430] sm:$0xff]   ;;  %v7775_v16 = vld [vmem:[%s9633_s1 + $0x4c0] sm:$0xff]  }
 0x110   : > { %6968 = vmatpush3.bf16.msra.mxu0 %v7710_v19  ;;  %6889 = vmatprep.subr.bf16.mxu1 %v7727_v26  ;;  %v7720_v26 = vld [vmem:[%s8173_s17 + $0x350] ss:$100 sps:$4 sm:$0xff]  }
 0x111   : > { %v6341_v36 = vpop.f32.mrb[12].mxu0  ;;  %v6377_v37 = vpop.f32.mrb[12].mxu1  ;;  %6969 = vmatprep.subr.bf16.mxu0 %v7721_v29  ;;  %6890 = vmatpush3.bf16.msra.mxu1 %v7730_v30  ;;  %v7783_v29 = vld [vmem:[%s9633_s1 + $0x540] sm:$0xff]  }
 0x112   : > { %v6342_v42 = vpop.f32.mrb[13].mxu0  ;;  %v6378_v43 = vpop.f32.mrb[13].mxu1  ;;  %6891 = vmatprep.subr.bf16.mxu1 %v7739_v31 }
 0x113   : > { %v8697_v45 = vadd.f32 %v6342_v42, %v6341_v36  ;;  %v6344_v46 = vpop.f32.mrb[14].mxu0  ;;  %v8699_v47 = vadd.f32 %v6378_v43, %v6377_v37  ;;  %v6380_v50 = vpop.f32.mrb[14].mxu1 }
 0x114   : > { %v6345_v51 = vpop.f32.mrb[15].mxu0  ;;  %v6381_v52 = vpop.f32.mrb[15].mxu1  ;;  %6970 = vmatpush3.bf16.msra.mxu0 %v7722_v32  ;;  %v7723_v32 = vld [vmem:[%s8173_s17 + $0x4dc] ss:$100 sps:$4 sm:$0xff]  }
 0x115   : > { %v8710_v56 = vadd.f32 %v6345_v51, %v6344_v46  ;;  %v8712_v57 = vadd.f32 %v6381_v52, %v6380_v50  ;;  %6971 = vmatprep.subr.bf16.mxu0 %v7731_v35  ;;  %6892 = vmatpush3.bf16.msra.mxu1 %v7740_v40  ;;  %v7725_v35 = vld [vmem:[%s8173_s17 + $0x41c] ss:$100 sps:$4 sm:$0xff]  }
 0x116   : > { %4224 = vmatmul.mubr.bf16.gmra.mrb[120].mxu1 %v7701_v33  ;;  %4337 = vmatmul.mubr.bf16.gmra.mrb[120].mxu0 %v7702_v34  ;;  %v7728_v52 = vld [vmem:[%s8173_s17 + $0x4d8] ss:$100 sps:$4 sm:$0xff]  }
 0x117   : > { %4231 = vmatprep.mubr.bf16.mxu1 %v7706_v38  ;;  %4344 = vmatprep.mubr.bf16.mxu0 %v7708_v44 }
 0x118   : > { %6972 = vmatpush3.bf16.msra.mxu0 %v7732_v53  ;;  %6893 = vmatprep.subr.bf16.mxu1 %v7749_v55  ;;  %v7729_v55 = vld [vmem:[%s8173_s17 + $0x418] ss:$100 sps:$4 sm:$0xff]  }
 0x119   : > { %v6347_v1 = vpop.f32.mrb[16].mxu0  ;;  %v6383_v2 = vpop.f32.mrb[16].mxu1  ;;  %6973 = vmatprep.subr.bf16.mxu0 %v7745_v54  ;;  %6894 = vmatpush3.bf16.msra.mxu1 %v7750_v58 }
 0x11a   : > { %v6348_v9 = vpop.f32.mrb[17].mxu0  ;;  %v6384_v10 = vpop.f32.mrb[17].mxu1  ;;  %6895 = vmatprep.subr.bf16.mxu1 %v7765_v59 }
 0x11b   : > { %v8733_v11 = vadd.f32 %v6348_v9, %v6347_v1  ;;  %v6350_v12 = vpop.f32.mrb[18].mxu0  ;;  %v8735_v13 = vadd.f32 %v6384_v10, %v6383_v2  ;;  %v6386_v14 = vpop.f32.mrb[18].mxu1  ;;  %v7733_v1 = vld [vmem:[%s8173_s17 + $0x5a4] ss:$100 sps:$4 sm:$0xff]  }
 0x11c   : > { %v6351_v17 = vpop.f32.mrb[19].mxu0  ;;  %v6387_v18 = vpop.f32.mrb[19].mxu1  ;;  %6974 = vmatpush3.bf16.msra.mxu0 %v7748_v63  ;;  %v7735_v2 = vld [vmem:[%s8173_s17 + $0x4e4] ss:$100 sps:$4 sm:$0xff]  }
 0x11d   : > { %v8743_v19 = vadd.f32 %v6351_v17, %v6350_v12  ;;  %v8745_v21 = vadd.f32 %v6387_v18, %v6386_v14  ;;  %6975 = vmatprep.subr.bf16.mxu0 %v7757_v7  ;;  %6896 = vmatpush3.bf16.msra.mxu1 %v7766_v8  ;;  %v7738_v17 = vld [vmem:[%s8173_s17 + $0x4e0] ss:$100 sps:$4 sm:$0xff]  }
 0x11e   : > { %4232 = vmatmul.mubr.bf16.gmra.mrb[124].mxu1 %v7711_v60  ;;  %4345 = vmatmul.mubr.bf16.gmra.mrb[124].mxu0 %v7712_v61 }
 0x11f   : > { %4239 = vmatprep.mubr.bf16.mxu1 %v7715_v3  ;;  %4352 = vmatprep.mubr.bf16.mxu0 %v7717_v6 }
 0x120   : > { %6976 = vmatpush3.bf16.msra.mxu0 %v7758_v15  ;;  %7045 = vmatprep.subr.bf16.mxu1 %v7775_v16  ;;  %v7737_v16 = vld [vmem:[%s8173_s17 + $0x5a0] ss:$100 sps:$4 sm:$0xff]  }
 0x121   : > { %v6353_v30 = vpop.f32.mrb[20].mxu0  ;;  %v6405_v31 = vpop.f32.mrb[20].mxu1  ;;  %6977 = vmatprep.subr.bf16.mxu0 %v7767_v23  ;;  %v7741_v23 = vld [vmem:[%s8173_s17 + $0x66c] ss:$100 sps:$4 sm:$0xff]  }
 0x122   : > { %v6354_v33 = vpop.f32.mrb[21].mxu0  ;;  %v6406_v34 = vpop.f32.mrb[21].mxu1 }
 0x123   : > { %v8760_v36 = vadd.f32 %v6354_v33, %v6353_v30  ;;  %v6407_v37 = vadd.f32 %v6406_v34, %v6405_v31  ;;  %v6356_v38 = vpop.f32.mrb[22].mxu0  ;;  %v6408_v40 = vpop.f32.mrb[22].mxu1  ;;  %v7743_v30 = vld [vmem:[%s8173_s17 + $0x5ac] ss:$100 sps:$4 sm:$0xff]  }
 0x124   : > { %v6357_v42 = vpop.f32.mrb[23].mxu0  ;;  %v6409_v43 = vpop.f32.mrb[23].mxu1  ;;  %6978 = vmatpush3.bf16.msra.mxu0 %v7768_v24 }
 0x125   : > { %v3718_v44 = vadd.f32 %v6407_v37, %v8605_v39  ;;  %v8763_v46 = vadd.f32 %v6357_v42, %v6356_v38  ;;  %v6410_v50 = vadd.f32 %v6409_v43, %v6408_v40  ;;  %7127 = vmatprep.subr.bf16.mxu0 %v7783_v29  ;;  %v7746_v40 = vld [vmem:[%s8173_s17 + $0x668] ss:$100 sps:$4 sm:$0xff]  }
 0x126   : > { %4240 = vmatmul.mubr.bf16.gmra.mrb[128].mxu1 %v7719_v25  ;;  %4353 = vmatmul.mubr.bf16.gmra.mrb[128].mxu0 %v7720_v26  ;;  %v7747_v42 = vld [vmem:[%s8173_s17 + $0x5a8] ss:$100 sps:$4 sm:$0xff]  }
 0x127   : > { %v3721_v51 = vadd.f32 %v6410_v50, %v8614_v48  ;;  %4247 = vmatprep.mubr.bf16.mxu1 %v7723_v32  ;;  %4360 = vmatprep.mubr.bf16.mxu0 %v7725_v35  ;;  %v7751_v50 = vld [vmem:[%s8173_s17 + $0x734] ss:$100 sps:$4 sm:$0xff]  }
 0x129   : > { %v6411_v53 = vpop.f32.mrb[24].mxu1  ;;  %v6487_v54 = vpop.f32.mrb[24].mxu0 }
 0x12a   : > { %v6412_v58 = vpop.f32.mrb[25].mxu1  ;;  %v6488_v59 = vpop.f32.mrb[25].mxu0 }
 0x12b   : > { %v6413_v60 = vadd.f32 %v6412_v58, %v6411_v53  ;;  %v6489_v39 = vadd.f32 %v6488_v59, %v6487_v54  ;;  %v6414_v61 = vpop.f32.mrb[26].mxu1  ;;  %v6490_v63 = vpop.f32.mrb[26].mxu0 }
 0x12c   : > { %v6415_v3 = vpop.f32.mrb[27].mxu1  ;;  %v6491_v6 = vpop.f32.mrb[27].mxu0 }
 0x12d   : > { %v3726_v48 = vadd.f32 %v6413_v60, %v8634_v62  ;;  %v6416_v7 = vadd.f32 %v6415_v3, %v6414_v61  ;;  %v6492_v8 = vadd.f32 %v6491_v6, %v6490_v63  ;;  %v8771_v9 = vadd.f32 %v6489_v39, %v3718_v44 }
 0x12e   : > { %4248 = vmatmul.mubr.bf16.gmra.mrb[132].mxu1 %v7728_v52  ;;  %4361 = vmatmul.mubr.bf16.gmra.mrb[132].mxu0 %v7729_v55 }
 0x12f   : > { %v3729_v10 = vadd.f32 %v6416_v7, %v8638_v4  ;;  %4255 = vmatprep.mubr.bf16.mxu1 %v7733_v1  ;;  %4368 = vmatprep.mubr.bf16.mxu0 %v7735_v2  ;;  %v8774_v12 = vadd.f32 %v6492_v8, %v3721_v51  ;;  %v7753_v51 = vld [vmem:[%s8173_s17 + $0x674] ss:$100 sps:$4 sm:$0xff]  }
 0x131   : > { %v6417_v14 = vpop.f32.mrb[28].mxu1  ;;  %v6493_v15 = vpop.f32.mrb[28].mxu0 }
 0x132   : > { %v6418_v18 = vpop.f32.mrb[29].mxu1  ;;  %v6494_v62 = vpop.f32.mrb[29].mxu0 }
 0x133   : > { %v6419_v24 = vadd.f32 %v6418_v18, %v6417_v14  ;;  %v6495_v25 = vadd.f32 %v6494_v62, %v6493_v15  ;;  %v6420_v26 = vpop.f32.mrb[30].mxu1  ;;  %v6496_v29 = vpop.f32.mrb[30].mxu0  ;;  %v7761_v18 = vld [vmem:[%s8173_s17 + $0x73c] ss:$100 sps:$4 sm:$0xff]  }
 0x134   : > { %v6421_v31 = vpop.f32.mrb[31].mxu1  ;;  %v6497_v4 = vpop.f32.mrb[31].mxu0 }
 0x135   : > { %v3734_v32 = vadd.f32 %v6419_v24, %v8664_v20  ;;  %v6422_v33 = vadd.f32 %v6421_v31, %v6420_v26  ;;  %v6498_v34 = vadd.f32 %v6497_v4, %v6496_v29  ;;  %v8781_v35 = vadd.f32 %v6495_v25, %v3726_v48  ;;  %v7755_v48 = vld [vmem:[%s8173_s17 + $0x730] ss:$100 sps:$4 sm:$0xff]   ;;  %v7763_v31 = vld [vmem:[%s8173_s17 + $0x7f8] ss:$100 sps:$4 sm:$0xff]  }
 0x136   : > { %4256 = vmatmul.mubr.bf16.gmra.mrb[136].mxu1 %v7737_v16  ;;  %4369 = vmatmul.mubr.bf16.gmra.mrb[136].mxu0 %v7738_v17  ;;  %v7759_v17 = vld [vmem:[%s8173_s17 + $0x7fc] ss:$100 sps:$4 sm:$0xff]  }
 0x137   : > { %v3737_v37 = vadd.f32 %v6422_v33, %v8671_v27  ;;  %4263 = vmatprep.mubr.bf16.mxu1 %v7741_v23  ;;  %4376 = vmatprep.mubr.bf16.mxu0 %v7743_v30  ;;  %v8784_v38 = vadd.f32 %v6498_v34, %v3729_v10  ;;  %v7764_v33 = vld [vmem:[%s8173_s17 + $0x738] ss:$100 sps:$4 sm:$0xff]   ;;  %v7769_v34 = vld [vmem:[%s8173_s17 + $0x804] ss:$100 sps:$4 sm:$0xff]  }
 0x139   : > { %v6423_v43 = vpop.f32.mrb[32].mxu1  ;;  %v6499_v44 = vpop.f32.mrb[32].mxu0 }
 0x13a   : > { %v6424_v52 = vpop.f32.mrb[33].mxu1  ;;  %v6500_v20 = vpop.f32.mrb[33].mxu0 }
 0x13b   : > { %v6425_v53 = vadd.f32 %v6424_v52, %v6423_v43  ;;  %v6501_v54 = vadd.f32 %v6500_v20, %v6499_v44  ;;  %v6426_v55 = vpop.f32.mrb[34].mxu1  ;;  %v6502_v58 = vpop.f32.mrb[34].mxu0 }
 0x13c   : > { %v6427_v59 = vpop.f32.mrb[35].mxu1  ;;  %v6503_v60 = vpop.f32.mrb[35].mxu0 }
 0x13d   : > { %v3742_v27 = vadd.f32 %v6425_v53, %v8697_v45  ;;  %v8791_v39 = vadd.f32 %v6501_v54, %v3734_v32  ;;  %v6428_v61 = vadd.f32 %v6427_v59, %v6426_v55  ;;  %v6504_v63 = vadd.f32 %v6503_v60, %v6502_v58  ;;  %v7756_v45 = vld [vmem:[%s8173_s17 + $0x670] ss:$100 sps:$4 sm:$0xff]   ;;  %v7771_v59 = vld [vmem:[%s8173_s17 + $0x38] ss:$100 sps:$4 sm:$0xff]   ;;  %v7774_v60 = vld [vmem:[%s8173_s17 + $0x800] ss:$100 sps:$4 sm:$0xff]  }
 0x13e   : > { %4264 = vmatmul.mubr.bf16.gmra.mrb[140].mxu1 %v7746_v40  ;;  %4377 = vmatmul.mubr.bf16.gmra.mrb[140].mxu0 %v7747_v42  ;;  %v7773_v40 = vld [vmem:[%s8173_s17 + $0x3c] ss:$100 sps:$4 sm:$0xff]  }
 0x13f   : > { %v3745_v1 = vadd.f32 %v6428_v61, %v8710_v56  ;;  %v8794_v2 = vadd.f32 %v6504_v63, %v3737_v37  ;;  %4271 = vmatprep.mubr.bf16.mxu1 %v7751_v50  ;;  %4384 = vmatprep.mubr.bf16.mxu0 %v7753_v51  ;;  %v7777_v63 = vld [vmem:[%s8173_s17 + $0x104] ss:$100 sps:$4 sm:$0xff]  }
 0x141   : > { %v6429_v3 = vpop.f32.mrb[36].mxu1  ;;  %v6505_v6 = vpop.f32.mrb[36].mxu0 }
 0x142   : > { %v6430_v7 = vpop.f32.mrb[37].mxu1  ;;  %v6506_v8 = vpop.f32.mrb[37].mxu0 }
 0x143   : > { %v6431_v10 = vadd.f32 %v6430_v7, %v6429_v3  ;;  %v6507_v14 = vadd.f32 %v6506_v8, %v6505_v6  ;;  %v6432_v15 = vpop.f32.mrb[38].mxu1  ;;  %v6508_v16 = vpop.f32.mrb[38].mxu0  ;;  %v7781_v8 = vld [vmem:[%s8173_s17 + $0x44] ss:$100 sps:$4 sm:$0xff]  }
 0x144   : > { %v6433_v62 = vpop.f32.mrb[39].mxu1  ;;  %v6509_v56 = vpop.f32.mrb[39].mxu0 }
 0x145   : > { %v3750_v23 = vadd.f32 %v6431_v10, %v8733_v11  ;;  %v8801_v24 = vadd.f32 %v6507_v14, %v3742_v27  ;;  %v6434_v25 = vadd.f32 %v6433_v62, %v6432_v15  ;;  %v6510_v26 = vadd.f32 %v6509_v56, %v6508_v16  ;;  %v7785_v14 = vld [vmem:[%s9633_s1 + $0x4c8] sm:$0xff]  }
 0x146   : > { %4272 = vmatmul.mubr.bf16.gmra.mrb[144].mxu1 %v7755_v48  ;;  %4385 = vmatmul.mubr.bf16.gmra.mrb[144].mxu0 %v7756_v45 }
 0x147   : > { %v3753_v29 = vadd.f32 %v6434_v25, %v8743_v19  ;;  %v8804_v30 = vadd.f32 %v6510_v26, %v3745_v1  ;;  %4279 = vmatprep.mubr.bf16.mxu1 %v7759_v17  ;;  %4392 = vmatprep.mubr.bf16.mxu0 %v7761_v18  ;;  %v7779_v25 = vld [vmem:[%s8173_s17 + $0x40] ss:$100 sps:$4 sm:$0xff]   ;;  %v7801_v26 = vld [vmem:[%s9633_s1 + $0x4d0] sm:$0xff]  }
 0x149   : > { %v6435_v4 = vpop.f32.mrb[40].mxu1  ;;  %v6511_v32 = vpop.f32.mrb[40].mxu0 }
 0x14a   : > { %v6436_v37 = vpop.f32.mrb[41].mxu1  ;;  %v6512_v11 = vpop.f32.mrb[41].mxu0 }
 0x14b   : > { %v6437_v42 = vadd.f32 %v6436_v37, %v6435_v4  ;;  %v6513_v43 = vadd.f32 %v6512_v11, %v6511_v32  ;;  %v6438_v44 = vpop.f32.mrb[42].mxu1  ;;  %v6514_v50 = vpop.f32.mrb[42].mxu0 }
 0x14c   : > { %v6439_v51 = vpop.f32.mrb[43].mxu1  ;;  %v6515_v19 = vpop.f32.mrb[43].mxu0 }
 0x14d   : > { %v3758_v52 = vadd.f32 %v6437_v42, %v8760_v36  ;;  %v8811_v20 = vadd.f32 %v6513_v43, %v3750_v23  ;;  %v6440_v53 = vadd.f32 %v6439_v51, %v6438_v44  ;;  %v6516_v54 = vadd.f32 %v6515_v19, %v6514_v50  ;;  %v7790_v23 = vld [vmem:[%s9633_s1 + $0x488] sm:$0xff]  }
 0x14e   : > { %4280 = vmatmul.mubr.bf16.gmra.mrb[148].mxu1 %v7763_v31  ;;  %4393 = vmatmul.mubr.bf16.gmra.mrb[148].mxu0 %v7764_v33  ;;  %v7786_v33 = vld [vmem:[%s8173_s17 + $0x1cc] ss:$100 sps:$4 sm:$0xff]  }
 0x14f   : > { %v3761_v55 = vadd.f32 %v6440_v53, %v8763_v46  ;;  %v8814_v58 = vadd.f32 %v6516_v54, %v3753_v29  ;;  %4400 = vmatprep.mubr.bf16.mxu0 %v7769_v34  ;;  %4441 = vmatprep.mubr.bf16.mxu1 %v7773_v40  ;;  %v7776_v46 = vld [vmem:[%s9633_s1 + $0x480] sm:$0xff]   ;;  %v7788_v42 = vld [vmem:[%s8173_s17 + $0x10c] ss:$100 sps:$4 sm:$0xff]  }
 0x150   : > { %v7793_v50 = vld [vmem:[%s9633_s1 + $0x548] sm:$0xff]  }
 0x151   : > { %v6441_v27 = vpop.f32.mrb[44].mxu1  ;;  %v6517_v61 = vpop.f32.mrb[44].mxu0  ;;  %v7794_v54 = vld [vmem:[%s9633_s1 + $0x508] sm:$0xff]  }
 0x152   : > { %v6442_v1 = vpop.f32.mrb[45].mxu1  ;;  %v6518_v36 = vpop.f32.mrb[45].mxu0 }
 0x153   : > { %v6443_v3 = vadd.f32 %v6442_v1, %v6441_v27  ;;  %v6519_v6 = vadd.f32 %v6518_v36, %v6517_v61  ;;  %v6444_v48 = vpop.f32.mrb[46].mxu1  ;;  %v6520_v7 = vpop.f32.mrb[46].mxu0  ;;  %v7803_v27 = vld [vmem:[%s9633_s1 + $0x550] sm:$0xff]   ;;  %v7812_v61 = vld [vmem:[%s9633_s1 + $0x498] sm:$0xff]   ;;  %v7792_v1 = vld [vmem:[%s8173_s17 + $0x108] ss:$100 sps:$4 sm:$0xff]  }
 0x154   : > { %v6445_v45 = vpop.f32.mrb[47].mxu1  ;;  %v6521_v10 = vpop.f32.mrb[47].mxu0 }
 0x155   : > { %v3766_v15 = vadd.f32 %v6443_v3, %v8607_v41  ;;  %v8827_v16 = vadd.f32 %v6519_v6, %v3758_v52  ;;  %v6446_v17 = vadd.f32 %v6445_v45, %v6444_v48  ;;  %v6522_v18 = vadd.f32 %v6521_v10, %v6520_v7  ;;  %v7782_v41 = vld [vmem:[%s8173_s17 + $0x100] ss:$100 sps:$4 sm:$0xff]   ;;  %v7797_v10 = vld [vmem:[%s8173_s17 + $0x1d4] ss:$100 sps:$4 sm:$0xff]  }
 0x156   : > { %4401 = vmatmul.mubr.bf16.gmra.mrb[152].mxu0 %v7774_v60  ;;  %4442 = vmatmul.mubr.bf16.vlgmr.msra.gmra.mrb[152].mxu1 %v7771_v59  ;;  %v7811_v59 = vld [vmem:[%s9633_s1 + $0x4d8] sm:$0xff]  }
 0x157   : > { %v3769_v62 = vadd.f32 %v6446_v17, %v8616_v49  ;;  %v8830_v56 = vadd.f32 %v6522_v18, %v3761_v55  ;;  %7046 = vmatpush3.bf16.msra.mxu1 %v7776_v46  ;;  %4449 = vmatprep.mubr.bf16.mxu1 %v7777_v63  ;;  %v7784_v49 = vld [vmem:[%s9633_s1 + $0x500] sm:$0xff]   ;;  %v7802_v55 = vld [vmem:[%s9633_s1 + $0x490] sm:$0xff]   ;;  %v7791_v63 = vld [vmem:[%s8173_s17 + $0x1c8] ss:$100 sps:$4 sm:$0xff]  }
 0x158   : > { %4562 = vmatprep.mubr.bf16.mxu0 %v7781_v8  ;;  %7047 = vmatprep.subr.bf16.mxu1 %v7785_v14  ;;  %v7808_v14 = vld [vmem:[%s9633_s1 + $0x510] sm:$0xff]   ;;  %v7819_v18 = vld [vmem:[%s9633_s1 + $0x558] sm:$0xff]  }
 0x159   : > { %v6447_v29 = vpop.f32.mrb[48].mxu1  ;;  %v6523_v31 = vpop.f32.mrb[48].mxu0 }
 0x15a   : > { %v6448_v4 = vpop.f32.mrb[49].mxu1  ;;  %v6524_v32 = vpop.f32.mrb[49].mxu0 }
 0x15b   : > { %v6449_v34 = vadd.f32 %v6448_v4, %v6447_v29  ;;  %v6525_v37 = vadd.f32 %v6524_v32, %v6523_v31  ;;  %v6450_v11 = vpop.f32.mrb[50].mxu1  ;;  %v6526_v40 = vpop.f32.mrb[50].mxu0  ;;  %7048 = vmatpush3.bf16.msra.mxu1 %v7790_v23  ;;  %v7828_v23 = vld [vmem:[%s9633_s1 + $0x4a0] sm:$0xff]   ;;  %v7837_v31 = vld [vmem:[%s9633_s1 + $0x4e8] sm:$0xff]   ;;  %v7799_v32 = vld [vmem:[%s8173_s17 + $0x290] ss:$100 sps:$4 sm:$0xff]  }
 0x15c   : > { %v6451_v43 = vpop.f32.mrb[51].mxu1  ;;  %v6527_v44 = vpop.f32.mrb[51].mxu0  ;;  %7049 = vmatprep.subr.bf16.mxu1 %v7801_v26 }
 0x15d   : > { %v3774_v51 = vadd.f32 %v6449_v34, %v8636_v0  ;;  %v8849_v19 = vadd.f32 %v6525_v37, %v3766_v15  ;;  %v6452_v52 = vadd.f32 %v6451_v43, %v6450_v11  ;;  %v6528_v53 = vadd.f32 %v6527_v44, %v6526_v40  ;;  %v7804_v11 = vld [vmem:[%s8173_s17 + $0x35c] ss:$100 sps:$4 sm:$0xff]  }
 0x15e   : > { %4450 = vmatmul.mubr.bf16.gmra.mrb[156].mxu1 %v7782_v41  ;;  %4563 = vmatmul.mubr.bf16.vlgmr.msra.gmra.mrb[156].mxu0 %v7779_v25 }
 0x15f   : > { %v3777_v0 = vadd.f32 %v6452_v52, %v8640_v5  ;;  %v8861_v60 = vadd.f32 %v6528_v53, %v3769_v62  ;;  %7128 = vmatpush3.bf16.msra.mxu0 %v7784_v49  ;;  %4457 = vmatprep.mubr.bf16.mxu1 %v7786_v33  ;;  %v7795_v5 = vld [vmem:[%s8173_s17 + $0x294] ss:$100 sps:$4 sm:$0xff]   ;;  %v7825_v62 = vld [vmem:[%s9633_s1 + $0x4e0] sm:$0xff]  }
 0x160   : > { %4570 = vmatprep.mubr.bf16.mxu0 %v7788_v42  ;;  %7129 = vmatprep.subr.bf16.mxu0 %v7793_v50  ;;  %v7800_v33 = vld [vmem:[%s8173_s17 + $0x1d0] ss:$100 sps:$4 sm:$0xff]   ;;  %v7806_v52 = vld [vmem:[%s8173_s17 + $0x29c] ss:$100 sps:$4 sm:$0xff]  }
 0x161   : > { %v6453_v36 = vpop.f32.mrb[52].mxu1  ;;  %v6529_v3 = vpop.f32.mrb[52].mxu0  ;;  %7050 = vmatpush3.bf16.msra.mxu1 %v7802_v55  ;;  %v7830_v53 = vld [vmem:[%s9633_s1 + $0x520] sm:$0xff]  }
 0x162   : > { %v6454_v6 = vpop.f32.mrb[53].mxu1  ;;  %v6530_v48 = vpop.f32.mrb[53].mxu0  ;;  %7051 = vmatprep.subr.bf16.mxu1 %v7811_v59  ;;  %v7838_v59 = vld [vmem:[%s9633_s1 + $0x4a8] sm:$0xff]  }
 0x163   : > { %v6455_v7 = vadd.f32 %v6454_v6, %v6453_v36  ;;  %v6531_v46 = vadd.f32 %v6530_v48, %v6529_v3  ;;  %v6456_v8 = vpop.f32.mrb[54].mxu1  ;;  %v6532_v45 = vpop.f32.mrb[54].mxu0  ;;  %7130 = vmatpush3.bf16.msra.mxu0 %v7794_v54  ;;  %v7846_v3 = vld [vmem:[%s9633_s1 + $0x528] sm:$0xff]  }
 0x164   : > { %v6457_v15 = vpop.f32.mrb[55].mxu1  ;;  %v6533_v17 = vpop.f32.mrb[55].mxu0  ;;  %7131 = vmatprep.subr.bf16.mxu0 %v7803_v27  ;;  %v7847_v27 = vld [vmem:[%s9633_s1 + $0x4f0] sm:$0xff]  }
 0x165   : > { %v3782_v25 = vadd.f32 %v6455_v7, %v8666_v22  ;;  %v8886_v41 = vadd.f32 %v6531_v46, %v3774_v51  ;;  %v6458_v26 = vadd.f32 %v6457_v15, %v6456_v8  ;;  %v6534_v29 = vadd.f32 %v6533_v17, %v6532_v45  ;;  %7052 = vmatpush3.bf16.msra.mxu1 %v7812_v61  ;;  %v7820_v22 = vld [vmem:[%s9633_s1 + $0x518] sm:$0xff]  }
 0x166   : > { %4458 = vmatmul.mubr.bf16.gmra.mrb[160].mxu1 %v7791_v63  ;;  %4571 = vmatmul.mubr.bf16.gmra.mrb[160].mxu0 %v7792_v1  ;;  %v7809_v7 = vld [vmem:[%s8173_s17 + $0x358] ss:$100 sps:$4 sm:$0xff]  }
 0x167   : > { %v3785_v49 = vadd.f32 %v6458_v26, %v8673_v28  ;;  %v8892_v4 = vadd.f32 %v6534_v29, %v3777_v0  ;;  %4465 = vmatprep.mubr.bf16.mxu1 %v7795_v5  ;;  %4578 = vmatprep.mubr.bf16.mxu0 %v7797_v10  ;;  %v7829_v28 = vld [vmem:[%s9633_s1 + $0x560] sm:$0xff]   ;;  %v7843_v0 = vld [vmem:[%s9633_s1 + $0x568] sm:$0xff]   ;;  %v7848_v5 = vld [vmem:[%s9633_s1 + $0x4b0] sm:$0xff]  }
 0x168   : > { %7132 = vmatpush3.bf16.msra.mxu0 %v7808_v14  ;;  %7053 = vmatprep.subr.bf16.mxu1 %v7825_v62  ;;  %v7810_v46 = vld [vmem:[%s8173_s17 + $0x298] ss:$100 sps:$4 sm:$0xff]   ;;  %v7813_v10 = vld [vmem:[%s8173_s17 + $0x424] ss:$100 sps:$4 sm:$0xff]  }
 0x169   : > { %v6459_v34 = vpop.f32.mrb[56].mxu1  ;;  %v6535_v37 = vpop.f32.mrb[56].mxu0  ;;  %7133 = vmatprep.subr.bf16.mxu0 %v7819_v18  ;;  %7054 = vmatpush3.bf16.msra.mxu1 %v7828_v23  ;;  %v7815_v23 = vld [vmem:[%s8173_s17 + $0x364] ss:$100 sps:$4 sm:$0xff]  }
 0x16a   : > { %v6460_v40 = vpop.f32.mrb[57].mxu1  ;;  %v6536_v42 = vpop.f32.mrb[57].mxu0  ;;  %7055 = vmatprep.subr.bf16.mxu1 %v7837_v31  ;;  %v7863_v31 = vld [vmem:[%s9633_s1 + $0x4f8] sm:$0xff]  }
 0x16b   : > { %v6461_v43 = vadd.f32 %v6460_v40, %v6459_v34  ;;  %v6537_v44 = vadd.f32 %v6536_v42, %v6535_v37  ;;  %v6462_v50 = vpop.f32.mrb[58].mxu1  ;;  %v6538_v51 = vpop.f32.mrb[58].mxu0  ;;  %v7817_v42 = vld [vmem:[%s8173_s17 + $0x420] ss:$100 sps:$4 sm:$0xff]  }
 0x16c   : > { %v6463_v54 = vpop.f32.mrb[59].mxu1  ;;  %v6539_v55 = vpop.f32.mrb[59].mxu0  ;;  %7134 = vmatpush3.bf16.msra.mxu0 %v7820_v22  ;;  %v7865_v22 = vld [vmem:[%s9633_s1 + $0x578] sm:$0xff]  }
 0x16d   : > { %v3790_v61 = vadd.f32 %v6461_v43, %v8699_v47  ;;  %v8917_v63 = vadd.f32 %v6537_v44, %v3782_v25  ;;  %v6464_v1 = vadd.f32 %v6463_v54, %v6462_v50  ;;  %v6540_v36 = vadd.f32 %v6539_v55, %v6538_v51  ;;  %7135 = vmatprep.subr.bf16.mxu0 %v7829_v28  ;;  %v7855_v47 = vld [vmem:[%s9633_s1 + $0x570] sm:$0xff]   ;;  %v7818_v43 = vld [vmem:[%s8173_s17 + $0x360] ss:$100 sps:$4 sm:$0xff]  }
 0x16e   : > { %4466 = vmatmul.mubr.bf16.gmra.mrb[164].mxu1 %v7799_v32  ;;  %4579 = vmatmul.mubr.bf16.gmra.mrb[164].mxu0 %v7800_v33  ;;  %v7856_v25 = vld [vmem:[%s9633_s1 + $0x530] sm:$0xff]  }
 0x16f   : > { %v3793_v6 = vadd.f32 %v6464_v1, %v8712_v57  ;;  %v8926_v48 = vadd.f32 %v6540_v36, %v3785_v49  ;;  %4473 = vmatprep.mubr.bf16.mxu1 %v7804_v11  ;;  %4586 = vmatprep.mubr.bf16.mxu0 %v7806_v52  ;;  %v7864_v49 = vld [vmem:[%s9633_s1 + $0x4b8] sm:$0xff]   ;;  %v7873_v11 = vld [vmem:[%s9633_s1 + $0x5c0] sm:$0xff]  }
 0x170   : > { %7136 = vmatpush3.bf16.msra.mxu0 %v7830_v53  ;;  %7056 = vmatpush3.bf16.msra.mxu1 %v7838_v59  ;;  %v7821_v59 = vld [vmem:[%s8173_s17 + $0x4ec] ss:$100 sps:$4 sm:$0xff]  }
 0x171   : > { %v6465_v8 = vpop.f32.mrb[60].mxu1  ;;  %v6541_v45 = vpop.f32.mrb[60].mxu0  ;;  %7137 = vmatprep.subr.bf16.mxu0 %v7843_v0  ;;  %7057 = vmatprep.subr.bf16.mxu1 %v7847_v27  ;;  %v7823_v0 = vld [vmem:[%s8173_s17 + $0x42c] ss:$100 sps:$4 sm:$0xff]  }
 0x172   : > { %v6466_v14 = vpop.f32.mrb[61].mxu1  ;;  %v6542_v57 = vpop.f32.mrb[61].mxu0 }
 0x173   : > { %v6467_v15 = vadd.f32 %v6466_v14, %v6465_v8  ;;  %v6543_v17 = vadd.f32 %v6542_v57, %v6541_v45  ;;  %v6468_v18 = vpop.f32.mrb[62].mxu1  ;;  %v6544_v62 = vpop.f32.mrb[62].mxu0  ;;  %v7827_v8 = vld [vmem:[%s8173_s17 + $0x428] ss:$100 sps:$4 sm:$0xff]  }
 0x174   : > { %v6469_v26 = vpop.f32.mrb[63].mxu1  ;;  %v6545_v29 = vpop.f32.mrb[63].mxu0  ;;  %7138 = vmatpush3.bf16.msra.mxu0 %v7846_v3  ;;  %7058 = vmatpush3.bf16.msra.mxu1 %v7848_v5 }
 0x175   : > { %v3798_v32 = vadd.f32 %v6467_v15, %v8735_v13  ;;  %v8948_v33 = vadd.f32 %v6543_v17, %v3790_v61  ;;  %v6470_v34 = vadd.f32 %v6469_v26, %v6468_v18  ;;  %v6546_v37 = vadd.f32 %v6545_v29, %v6544_v62  ;;  %7139 = vmatprep.subr.bf16.mxu0 %v7855_v47  ;;  %v7866_v13 = vld [vmem:[%s9633_s1 + $0x538] sm:$0xff]  }
 0x176   : > { %4474 = vmatmul.mubr.bf16.gmra.mrb[168].mxu1 %v7809_v7  ;;  %4587 = vmatmul.mubr.bf16.gmra.mrb[168].mxu0 %v7810_v46  ;;  %v7826_v46 = vld [vmem:[%s8173_s17 + $0x4e8] ss:$100 sps:$4 sm:$0xff]   ;;  %v7831_v62 = vld [vmem:[%s8173_s17 + $0x5b4] ss:$100 sps:$4 sm:$0xff]  }
 0x177   : > { %v3801_v28 = vadd.f32 %v6470_v34, %v8745_v21  ;;  %v8954_v40 = vadd.f32 %v6546_v37, %v3793_v6  ;;  %4481 = vmatprep.mubr.bf16.mxu1 %v7813_v10  ;;  %4594 = vmatprep.mubr.bf16.mxu0 %v7815_v23  ;;  %v8100_v6 = vmov 0.0   ;;  %v7833_v23 = vld [vmem:[%s8173_s17 + $0x4f4] ss:$100 sps:$4 sm:$0xff]  }
 0x178   : > { %7140 = vmatpush3.bf16.msra.mxu0 %v7856_v25  ;;  %7059 = vmatprep.subr.bf16.mxu1 %v7863_v31 }
 0x179   : > { %v6547_v44 = vpop.f32.mrb[64].mxu0  ;;  %v6569_v50 = vpop.f32.mrb[64].mxu1  ;;  %7060 = vmatpush3.bf16.msra.mxu1 %v7864_v49  ;;  %7141 = vmatprep.subr.bf16.mxu0 %v7865_v22 }
 0x17a   : > { %v6548_v51 = vpop.f32.mrb[65].mxu0  ;;  %v6570_v21 = vpop.f32.mrb[65].mxu1  ;;  %7209 = vmatprep.subr.bf16.mxu1 %v7873_v11 }
 0x17b   : > { %v6549_v52 = vadd.f32 %v6548_v51, %v6547_v44  ;;  %v6571_v53 = vadd.f32 %v6570_v21, %v6569_v50  ;;  %v6550_v54 = vpop.f32.mrb[66].mxu0  ;;  %v6572_v55 = vpop.f32.mrb[66].mxu1  ;;  %v7839_v51 = vld [vmem:[%s8173_s17 + $0x67c] ss:$100 sps:$4 sm:$0xff]  }
 0x17c   : > { %v6551_v27 = vpop.f32.mrb[67].mxu0  ;;  %v6573_v61 = vpop.f32.mrb[67].mxu1  ;;  %7142 = vmatpush3.bf16.msra.mxu0 %v7866_v13  ;;  %v7835_v13 = vld [vmem:[%s8173_s17 + $0x5b0] ss:$100 sps:$4 sm:$0xff]   ;;  %v7841_v21 = vld [vmem:[%s8173_s17 + $0x5bc] ss:$100 sps:$4 sm:$0xff]  }
 0x17d   : > { %v8963_v1 = vadd.f32 %v6549_v52, %v3798_v32  ;;  %v3960_v36 = vadd.f32 %v6571_v53, %v8771_v9  ;;  %v6552_v3 = vadd.f32 %v6551_v27, %v6550_v54  ;;  %v6574_v5 = vadd.f32 %v6573_v61, %v6572_v55  ;;  %7310 = vmatprep.subr.bf16.mxu0 %v8100_v6 }
 0x17e   : > { %4482 = vmatmul.mubr.bf16.gmra.mrb[172].mxu1 %v7817_v42  ;;  %4595 = vmatmul.mubr.bf16.gmra.mrb[172].mxu0 %v7818_v43 }
 0x17f   : > { %v8967_v47 = vadd.f32 %v6552_v3, %v3801_v28  ;;  %v3963_v7 = vadd.f32 %v6574_v5, %v8774_v12  ;;  %4489 = vmatprep.mubr.bf16.mxu1 %v7821_v59  ;;  %4602 = vmatprep.mubr.bf16.mxu0 %v7823_v0 }
 0x181   : > { %v6575_v45 = vpop.f32.mrb[68].mxu1  ;;  %v6651_v10 = vpop.f32.mrb[68].mxu0 }
 0x182   : > { %v6576_v9 = vpop.f32.mrb[69].mxu1  ;;  %v6652_v14 = vpop.f32.mrb[69].mxu0 }
 0x183   : > { %v6577_v57 = vadd.f32 %v6576_v9, %v6575_v45  ;;  %v6653_v15 = vadd.f32 %v6652_v14, %v6651_v10  ;;  %v6578_v17 = vpop.f32.mrb[70].mxu1  ;;  %v6654_v18 = vpop.f32.mrb[70].mxu0  ;;  %v7849_v9 = vld [vmem:[%s8173_s17 + $0x744] ss:$100 sps:$4 sm:$0xff]  }
 0x184   : > { %v6579_v25 = vpop.f32.mrb[71].mxu1  ;;  %v6655_v26 = vpop.f32.mrb[71].mxu0  ;;  %v7851_v14 = vld [vmem:[%s8173_s17 + $0x684] ss:$100 sps:$4 sm:$0xff]  }
 0x185   : > { %v3968_v12 = vadd.f32 %v6577_v57, %v8781_v35  ;;  %v8975_v29 = vadd.f32 %v6653_v15, %v3960_v36  ;;  %v6580_v31 = vadd.f32 %v6579_v25, %v6578_v17  ;;  %v6656_v49 = vadd.f32 %v6655_v26, %v6654_v18  ;;  %v7836_v35 = vld [vmem:[%s8173_s17 + $0x4f0] ss:$100 sps:$4 sm:$0xff]  }
 0x186   : > { %4490 = vmatmul.mubr.bf16.gmra.mrb[176].mxu1 %v7826_v46  ;;  %4603 = vmatmul.mubr.bf16.gmra.mrb[176].mxu0 %v7827_v8 }
 0x187   : > { %v3971_v22 = vadd.f32 %v6580_v31, %v8784_v38  ;;  %v8978_v32 = vadd.f32 %v6656_v49, %v3963_v7  ;;  %4497 = vmatprep.mubr.bf16.mxu1 %v7831_v62  ;;  %4610 = vmatprep.mubr.bf16.mxu0 %v7833_v23  ;;  %v7844_v7 = vld [vmem:[%s8173_s17 + $0x678] ss:$100 sps:$4 sm:$0xff]  }
 0x189   : > { %v6581_v34 = vpop.f32.mrb[72].mxu1  ;;  %v6657_v37 = vpop.f32.mrb[72].mxu0 }
 0x18a   : > { %v6582_v11 = vpop.f32.mrb[73].mxu1  ;;  %v6658_v28 = vpop.f32.mrb[73].mxu0 }
 0x18b   : > { %v6583_v42 = vadd.f32 %v6582_v11, %v6581_v34  ;;  %v6659_v43 = vadd.f32 %v6658_v28, %v6657_v37  ;;  %v6584_v44 = vpop.f32.mrb[74].mxu1  ;;  %v6660_v50 = vpop.f32.mrb[74].mxu0 }
 0x18c   : > { %v6585_v52 = vpop.f32.mrb[75].mxu1  ;;  %v6661_v53 = vpop.f32.mrb[75].mxu0 }
 0x18d   : > { %v3976_v38 = vadd.f32 %v6583_v42, %v8791_v39  ;;  %v8985_v54 = vadd.f32 %v6659_v43, %v3968_v12  ;;  %v6586_v55 = vadd.f32 %v6585_v52, %v6584_v44  ;;  %v6662_v59 = vadd.f32 %v6661_v53, %v6660_v50  ;;  %v7845_v39 = vld [vmem:[%s8173_s17 + $0x5b8] ss:$100 sps:$4 sm:$0xff]  }
 0x18e   : > { %4498 = vmatmul.mubr.bf16.gmra.mrb[180].mxu1 %v7835_v13  ;;  %4611 = vmatmul.mubr.bf16.gmra.mrb[180].mxu0 %v7836_v35  ;;  %v7857_v13 = vld [vmem:[%s8173_s17 + $0x80c] ss:$100 sps:$4 sm:$0xff]  }
 0x18f   : > { %v3979_v0 = vadd.f32 %v6586_v55, %v8794_v2  ;;  %v8988_v27 = vadd.f32 %v6662_v59, %v3971_v22  ;;  %4505 = vmatprep.mubr.bf16.mxu1 %v7839_v51  ;;  %4618 = vmatprep.mubr.bf16.mxu0 %v7841_v21  ;;  %v7853_v22 = vld [vmem:[%s8173_s17 + $0x740] ss:$100 sps:$4 sm:$0xff]   ;;  %v7859_v35 = vld [vmem:[%s8173_s17 + $0x74c] ss:$100 sps:$4 sm:$0xff]  }
 0x191   : > { %v6587_v61 = vpop.f32.mrb[76].mxu1  ;;  %v6663_v36 = vpop.f32.mrb[76].mxu0 }
 0x192   : > { %v6588_v3 = vpop.f32.mrb[77].mxu1  ;;  %v6664_v5 = vpop.f32.mrb[77].mxu0 }
 0x193   : > { %v6589_v46 = vadd.f32 %v6588_v3, %v6587_v61  ;;  %v6665_v8 = vadd.f32 %v6664_v5, %v6663_v36  ;;  %v6590_v45 = vpop.f32.mrb[78].mxu1  ;;  %v6666_v10 = vpop.f32.mrb[78].mxu0 }
 0x194   : > { %v6591_v57 = vpop.f32.mrb[79].mxu1  ;;  %v6667_v15 = vpop.f32.mrb[79].mxu0 }
 0x195   : > { %v3984_v2 = vadd.f32 %v6589_v46, %v8801_v24  ;;  %v8995_v17 = vadd.f32 %v6665_v8, %v3976_v38  ;;  %v6592_v18 = vadd.f32 %v6591_v57, %v6590_v45  ;;  %v6668_v62 = vadd.f32 %v6667_v15, %v6666_v10  ;;  %v7854_v24 = vld [vmem:[%s8173_s17 + $0x680] ss:$100 sps:$4 sm:$0xff]  }
 0x196   : > { %4506 = vmatmul.mubr.bf16.gmra.mrb[184].mxu1 %v7844_v7  ;;  %4619 = vmatmul.mubr.bf16.gmra.mrb[184].mxu0 %v7845_v39  ;;  %v7867_v7 = vld [vmem:[%s8173_s17 + $0x814] ss:$100 sps:$4 sm:$0xff]   ;;  %v7871_v39 = vld [vmem:[%s8173_s17 + $0x4c] ss:$100 sps:$4 sm:$0xff]  }
 0x197   : > { %v3987_v23 = vadd.f32 %v6592_v18, %v8804_v30  ;;  %v8998_v25 = vadd.f32 %v6668_v62, %v3979_v0  ;;  %4513 = vmatprep.mubr.bf16.mxu1 %v7849_v9  ;;  %4626 = vmatprep.mubr.bf16.mxu0 %v7851_v14  ;;  %v7861_v0 = vld [vmem:[%s8173_s17 + $0x808] ss:$100 sps:$4 sm:$0xff]  }
 0x199   : > { %v6593_v26 = vpop.f32.mrb[80].mxu1  ;;  %v6669_v12 = vpop.f32.mrb[80].mxu0 }
 0x19a   : > { %v6594_v31 = vpop.f32.mrb[81].mxu1  ;;  %v6670_v49 = vpop.f32.mrb[81].mxu0 }
 0x19b   : > { %v6595_v34 = vadd.f32 %v6594_v31, %v6593_v26  ;;  %v6671_v37 = vadd.f32 %v6670_v49, %v6669_v12  ;;  %v6596_v11 = vpop.f32.mrb[82].mxu1  ;;  %v6672_v28 = vpop.f32.mrb[82].mxu0 }
 0x19c   : > { %v6597_v42 = vpop.f32.mrb[83].mxu1  ;;  %v6673_v43 = vpop.f32.mrb[83].mxu0 }
 0x19d   : > { %v3992_v30 = vadd.f32 %v6595_v34, %v8811_v20  ;;  %v9005_v44 = vadd.f32 %v6671_v37, %v3984_v2  ;;  %v6598_v50 = vadd.f32 %v6597_v42, %v6596_v11  ;;  %v6674_v51 = vadd.f32 %v6673_v43, %v6672_v28  ;;  %v7862_v20 = vld [vmem:[%s8173_s17 + $0x748] ss:$100 sps:$4 sm:$0xff]   ;;  %v7879_v37 = vld [vmem:[%s8173_s17 + $0x54] ss:$100 sps:$4 sm:$0xff]  }
 0x19e   : > { %4514 = vmatmul.mubr.bf16.gmra.mrb[188].mxu1 %v7853_v22  ;;  %4627 = vmatmul.mubr.bf16.gmra.mrb[188].mxu0 %v7854_v24  ;;  %v7874_v22 = vld [vmem:[%s9633_s1 + $0x580] sm:$0xff]   ;;  %v7882_v11 = vld [vmem:[%s9633_s1 + $0x5c8] sm:$0xff]  }
 0x19f   : > { %v3995_v21 = vadd.f32 %v6598_v50, %v8814_v58  ;;  %v9008_v52 = vadd.f32 %v6674_v51, %v3987_v23  ;;  %4521 = vmatprep.mubr.bf16.mxu1 %v7857_v13  ;;  %4634 = vmatprep.mubr.bf16.mxu0 %v7859_v35  ;;  %v7869_v23 = vld [vmem:[%s8173_s17 + $0x48] ss:$100 sps:$4 sm:$0xff]  }
 0x1a0   : > { %v7887_v50 = vld [vmem:[%s9633_s1 + $0x588] sm:$0xff]  }
 0x1a1   : > { %v6599_v53 = vpop.f32.mrb[84].mxu1  ;;  %v6675_v38 = vpop.f32.mrb[84].mxu0 }
 0x1a2   : > { %v6600_v55 = vpop.f32.mrb[85].mxu1  ;;  %v6676_v59 = vpop.f32.mrb[85].mxu0 }
 0x1a3   : > { %v6601_v61 = vadd.f32 %v6600_v55, %v6599_v53  ;;  %v6677_v36 = vadd.f32 %v6676_v59, %v6675_v38  ;;  %v6602_v3 = vpop.f32.mrb[86].mxu1  ;;  %v6678_v5 = vpop.f32.mrb[86].mxu0  ;;  %v7877_v38 = vld [vmem:[%s8173_s17 + $0x50] ss:$100 sps:$4 sm:$0xff]  }
 0x1a4   : > { %v6603_v46 = vpop.f32.mrb[87].mxu1  ;;  %v6679_v8 = vpop.f32.mrb[87].mxu0  ;;  %v7880_v55 = vld [vmem:[%s8173_s17 + $0x110] ss:$100 sps:$4 sm:$0xff]  }
 0x1a5   : > { %v4000_v58 = vadd.f32 %v6601_v61, %v8827_v16  ;;  %v9015_v45 = vadd.f32 %v6677_v36, %v3992_v30  ;;  %v6604_v10 = vadd.f32 %v6603_v46, %v6602_v3  ;;  %v6680_v9 = vadd.f32 %v6679_v8, %v6678_v5  ;;  %v7872_v16 = vld [vmem:[%s8173_s17 + $0x810] ss:$100 sps:$4 sm:$0xff]   ;;  %v7881_v36 = vld [vmem:[%s9633_s1 + $0x600] sm:$0xff]  }
 0x1a6   : > { %4522 = vmatmul.mubr.bf16.gmra.mrb[192].mxu1 %v7861_v0  ;;  %4635 = vmatmul.mubr.bf16.gmra.mrb[192].mxu0 %v7862_v20  ;;  %v7883_v3 = vld [vmem:[%s8173_s17 + $0x1dc] ss:$100 sps:$4 sm:$0xff]  }
 0x1a7   : > { %v4003_v14 = vadd.f32 %v6604_v10, %v8830_v56  ;;  %v9018_v57 = vadd.f32 %v6680_v9, %v3995_v21  ;;  %4642 = vmatprep.mubr.bf16.mxu0 %v7867_v7  ;;  %4683 = vmatprep.mubr.bf16.mxu1 %v7871_v39  ;;  %v7875_v56 = vld [vmem:[%s8173_s17 + $0x114] ss:$100 sps:$4 sm:$0xff]   ;;  %v7885_v39 = vld [vmem:[%s8173_s17 + $0x11c] ss:$100 sps:$4 sm:$0xff]  }
 0x1a8   : > { %v7898_v9 = vld [vmem:[%s9633_s1 + $0x590] sm:$0xff]  }
 0x1a9   : > { %v6605_v15 = vpop.f32.mrb[88].mxu1  ;;  %v6681_v2 = vpop.f32.mrb[88].mxu0 }
 0x1aa   : > { %v6606_v18 = vpop.f32.mrb[89].mxu1  ;;  %v6682_v62 = vpop.f32.mrb[89].mxu0 }
 0x1ab   : > { %v6607_v26 = vadd.f32 %v6606_v18, %v6605_v15  ;;  %v6683_v12 = vadd.f32 %v6682_v62, %v6681_v2  ;;  %v6608_v31 = vpop.f32.mrb[90].mxu1  ;;  %v6684_v49 = vpop.f32.mrb[90].mxu0 }
 0x1ac   : > { %v6609_v24 = vpop.f32.mrb[91].mxu1  ;;  %v6685_v34 = vpop.f32.mrb[91].mxu0 }
 0x1ad   : > { %v4008_v28 = vadd.f32 %v6607_v26, %v8849_v19  ;;  %v9031_v13 = vadd.f32 %v6683_v12, %v4000_v58  ;;  %v6610_v35 = vadd.f32 %v6609_v24, %v6608_v31  ;;  %v6686_v42 = vadd.f32 %v6685_v34, %v6684_v49  ;;  %v7897_v19 = vld [vmem:[%s9633_s1 + $0x5d0] sm:$0xff]   ;;  %v7888_v26 = vld [vmem:[%s8173_s17 + $0x1d8] ss:$100 sps:$4 sm:$0xff]   ;;  %v7891_v24 = vld [vmem:[%s8173_s17 + $0x2a4] ss:$100 sps:$4 sm:$0xff]  }
 0x1ae   : > { %4643 = vmatmul.mubr.bf16.gmra.mrb[196].mxu0 %v7872_v16  ;;  %4684 = vmatmul.mubr.bf16.vlgmr.msra.gmra.mrb[196].mxu1 %v7869_v23  ;;  %v7889_v12 = vld [vmem:[%s8173_s17 + $0x118] ss:$100 sps:$4 sm:$0xff]   ;;  %v7893_v34 = vld [vmem:[%s8173_s17 + $0x1e4] ss:$100 sps:$4 sm:$0xff]  }
 0x1af   : > { %v4011_v43 = vadd.f32 %v6610_v35, %v8861_v60  ;;  %v9034_v30 = vadd.f32 %v6686_v42, %v4003_v14  ;;  %7210 = vmatpush3.bf16.msra.mxu1 %v7874_v22  ;;  %4691 = vmatprep.mubr.bf16.mxu1 %v7875_v56  ;;  %v7906_v14 = vld [vmem:[%s9633_s1 + $0x5d8] sm:$0xff]   ;;  %v7919_v35 = vld [vmem:[%s9633_s1 + $0x5e0] sm:$0xff]  }
 0x1b0   : > { %4804 = vmatprep.mubr.bf16.mxu0 %v7879_v37  ;;  %7211 = vmatprep.subr.bf16.mxu1 %v7882_v11 }
 0x1b1   : > { %v6611_v51 = vpop.f32.mrb[92].mxu1  ;;  %v6687_v21 = vpop.f32.mrb[92].mxu0 }
 0x1b2   : > { %v6612_v53 = vpop.f32.mrb[93].mxu1  ;;  %v6688_v60 = vpop.f32.mrb[93].mxu0 }
 0x1b3   : > { %v6613_v59 = vadd.f32 %v6612_v53, %v6611_v51  ;;  %v6689_v0 = vadd.f32 %v6688_v60, %v6687_v21  ;;  %v6614_v20 = vpop.f32.mrb[94].mxu1  ;;  %v6690_v61 = vpop.f32.mrb[94].mxu0  ;;  %7212 = vmatpush3.bf16.msra.mxu1 %v7887_v50  ;;  %v7922_v51 = vld [vmem:[%s9633_s1 + $0x5a0] sm:$0xff]   ;;  %v7930_v21 = vld [vmem:[%s9633_s1 + $0x5e8] sm:$0xff]   ;;  %v7914_v60 = vld [vmem:[%s9633_s1 + $0x618] sm:$0xff]  }
 0x1b4   : > { %v6615_v5 = vpop.f32.mrb[95].mxu1  ;;  %v6691_v7 = vpop.f32.mrb[95].mxu0  ;;  %7213 = vmatprep.subr.bf16.mxu1 %v7897_v19 }
 0x1b5   : > { %v4016_v46 = vadd.f32 %v6613_v59, %v8886_v41  ;;  %v9050_v8 = vadd.f32 %v6689_v0, %v4008_v28  ;;  %v6616_v58 = vadd.f32 %v6615_v5, %v6614_v20  ;;  %v6692_v10 = vadd.f32 %v6691_v7, %v6690_v61  ;;  %v7890_v41 = vld [vmem:[%s9633_s1 + $0x608] sm:$0xff]   ;;  %v7903_v28 = vld [vmem:[%s9633_s1 + $0x610] sm:$0xff]   ;;  %v7896_v20 = vld [vmem:[%s8173_s17 + $0x1e0] ss:$100 sps:$4 sm:$0xff]  }
 0x1b6   : > { %4692 = vmatmul.mubr.bf16.gmra.mrb[200].mxu1 %v7880_v55  ;;  %4805 = vmatmul.mubr.bf16.vlgmr.msra.gmra.mrb[200].mxu0 %v7877_v38  ;;  %v7899_v7 = vld [vmem:[%s8173_s17 + $0x36c] ss:$100 sps:$4 sm:$0xff]  }
 0x1b7   : > { %v4019_v15 = vadd.f32 %v6616_v58, %v8892_v4  ;;  %v9059_v2 = vadd.f32 %v6692_v10, %v4011_v43  ;;  %7311 = vmatpush3.bf16.msra.mxu0 %v7881_v36  ;;  %4699 = vmatprep.mubr.bf16.mxu1 %v7883_v3  ;;  %v7907_v4 = vld [vmem:[%s9633_s1 + $0x598] sm:$0xff]   ;;  %v7923_v10 = vld [vmem:[%s9633_s1 + $0x620] sm:$0xff]  }
 0x1b8   : > { %4812 = vmatprep.mubr.bf16.mxu0 %v7885_v39  ;;  %7312 = vmatprep.subr.bf16.mxu0 %v8100_v6  ;;  %v7901_v39 = vld [vmem:[%s8173_s17 + $0x2ac] ss:$100 sps:$4 sm:$0xff]  }
 0x1b9   : > { %v6617_v18 = vpop.f32.mrb[96].mxu1  ;;  %v6693_v62 = vpop.f32.mrb[96].mxu0  ;;  %7214 = vmatpush3.bf16.msra.mxu1 %v7898_v9  ;;  %v7931_v9 = vld [vmem:[%s9633_s1 + $0x5a8] sm:$0xff]  }
 0x1ba   : > { %v6618_v23 = vpop.f32.mrb[97].mxu1  ;;  %v6694_v16 = vpop.f32.mrb[97].mxu0  ;;  %7215 = vmatprep.subr.bf16.mxu1 %v7906_v14 }
 0x1bb   : > { %v6619_v31 = vadd.f32 %v6618_v23, %v6617_v18  ;;  %v6695_v49 = vadd.f32 %v6694_v16, %v6693_v62  ;;  %v6620_v22 = vpop.f32.mrb[98].mxu1  ;;  %v6696_v56 = vpop.f32.mrb[98].mxu0  ;;  %7313 = vmatpush3.bf16.msra.mxu0 %v7890_v41  ;;  %v7939_v62 = vld [vmem:[%s9633_s1 + $0x5f0] sm:$0xff]  }
 0x1bc   : > { %v6621_v37 = vpop.f32.mrb[99].mxu1  ;;  %v6697_v11 = vpop.f32.mrb[99].mxu0  ;;  %7314 = vmatprep.subr.bf16.mxu0 %v8100_v6  ;;  %v7940_v16 = vld [vmem:[%s9633_s1 + $0x5b0] sm:$0xff]  }
 0x1bd   : > { %v4024_v42 = vadd.f32 %v6619_v31, %v8917_v63  ;;  %v9080_v43 = vadd.f32 %v6695_v49, %v4016_v46  ;;  %v6622_v50 = vadd.f32 %v6621_v37, %v6620_v22  ;;  %v6698_v19 = vadd.f32 %v6697_v11, %v6696_v56  ;;  %7216 = vmatpush3.bf16.msra.mxu1 %v7907_v4  ;;  %v7904_v49 = vld [vmem:[%s8173_s17 + $0x368] ss:$100 sps:$4 sm:$0xff]   ;;  %v7908_v11 = vld [vmem:[%s8173_s17 + $0x434] ss:$100 sps:$4 sm:$0xff]  }
 0x1be   : > { %4700 = vmatmul.mubr.bf16.gmra.mrb[204].mxu1 %v7888_v26  ;;  %4813 = vmatmul.mubr.bf16.gmra.mrb[204].mxu0 %v7889_v12  ;;  %v7905_v22 = vld [vmem:[%s8173_s17 + $0x2a8] ss:$100 sps:$4 sm:$0xff]  }
 0x1bf   : > { %v4027_v53 = vadd.f32 %v6622_v50, %v8926_v48  ;;  %v9089_v63 = vadd.f32 %v6698_v19, %v4019_v15  ;;  %4707 = vmatprep.mubr.bf16.mxu1 %v7891_v24  ;;  %4820 = vmatprep.mubr.bf16.mxu0 %v7893_v34  ;;  %v7895_v48 = vld [vmem:[%s8173_s17 + $0x2a0] ss:$100 sps:$4 sm:$0xff]   ;;  %v7947_v50 = vld [vmem:[%s9633_s1 + $0x630] sm:$0xff]   ;;  %v7954_v19 = vld [vmem:[%s9633_s1 + $0x5f8] sm:$0xff]  }
 0x1c0   : > { %7315 = vmatpush3.bf16.msra.mxu0 %v7903_v28  ;;  %7217 = vmatprep.subr.bf16.mxu1 %v7919_v35  ;;  %v7910_v28 = vld [vmem:[%s8173_s17 + $0x374] ss:$100 sps:$4 sm:$0xff]  }
 0x1c1   : > { %v6623_v38 = vpop.f32.mrb[100].mxu1  ;;  %v6699_v55 = vpop.f32.mrb[100].mxu0  ;;  %7316 = vmatprep.subr.bf16.mxu0 %v8100_v6  ;;  %7218 = vmatpush3.bf16.msra.mxu1 %v7922_v51 }
 0x1c2   : > { %v6624_v59 = vpop.f32.mrb[101].mxu1  ;;  %v6700_v0 = vpop.f32.mrb[101].mxu0  ;;  %7219 = vmatprep.subr.bf16.mxu1 %v7930_v21 }
 0x1c3   : > { %v6625_v61 = vadd.f32 %v6624_v59, %v6623_v38  ;;  %v6701_v36 = vadd.f32 %v6700_v0, %v6699_v55  ;;  %v6626_v3 = vpop.f32.mrb[102].mxu1  ;;  %v6702_v5 = vpop.f32.mrb[102].mxu0  ;;  %v7955_v38 = vld [vmem:[%s9633_s1 + $0x5b8] sm:$0xff]  }
 0x1c4   : > { %v6627_v46 = vpop.f32.mrb[103].mxu1  ;;  %v6703_v58 = vpop.f32.mrb[103].mxu0  ;;  %7317 = vmatpush3.bf16.msra.mxu0 %v7914_v60 }
 0x1c5   : > { %v4032_v14 = vadd.f32 %v6625_v61, %v8948_v33  ;;  %v9106_v15 = vadd.f32 %v6701_v36, %v4024_v42  ;;  %v6628_v41 = vadd.f32 %v6627_v46, %v6626_v3  ;;  %v6704_v18 = vadd.f32 %v6703_v58, %v6702_v5  ;;  %7318 = vmatprep.subr.bf16.mxu0 %v8100_v6  ;;  %v7938_v33 = vld [vmem:[%s9633_s1 + $0x628] sm:$0xff]   ;;  %v7913_v36 = vld [vmem:[%s8173_s17 + $0x370] ss:$100 sps:$4 sm:$0xff]   ;;  %v7915_v46 = vld [vmem:[%s8173_s17 + $0x4fc] ss:$100 sps:$4 sm:$0xff]  }
 0x1c6   : > { %4708 = vmatmul.mubr.bf16.gmra.mrb[208].mxu1 %v7895_v48  ;;  %4821 = vmatmul.mubr.bf16.gmra.mrb[208].mxu0 %v7896_v20  ;;  %v7917_v58 = vld [vmem:[%s8173_s17 + $0x43c] ss:$100 sps:$4 sm:$0xff]  }
 0x1c7   : > { %v4035_v4 = vadd.f32 %v6628_v41, %v8954_v40  ;;  %v9113_v23 = vadd.f32 %v6704_v18, %v4027_v53  ;;  %4715 = vmatprep.mubr.bf16.mxu1 %v7899_v7  ;;  %4828 = vmatprep.mubr.bf16.mxu0 %v7901_v39 }
 0x1c8   : > { %7319 = vmatpush3.bf16.msra.mxu0 %v7923_v10  ;;  %7220 = vmatpush3.bf16.msra.mxu1 %v7931_v9 }
 0x1c9   : > { %v6629_v26 = vpop.f32.mrb[104].mxu1  ;;  %v6705_v12 = vpop.f32.mrb[104].mxu0  ;;  %7320 = vmatprep.subr.bf16.mxu0 %v8100_v6  ;;  %7221 = vmatprep.subr.bf16.mxu1 %v7939_v62 }
 0x1ca   : > { %v6630_v40 = vpop.f32.mrb[105].mxu1  ;;  %v6706_v31 = vpop.f32.mrb[105].mxu0 }
 0x1cb   : > { %v6631_v56 = vadd.f32 %v6630_v40, %v6629_v26  ;;  %v6707_v24 = vadd.f32 %v6706_v31, %v6705_v12  ;;  %v6632_v34 = vpop.f32.mrb[106].mxu1  ;;  %v6708_v37 = vpop.f32.mrb[106].mxu0  ;;  %v7920_v31 = vld [vmem:[%s8173_s17 + $0x4f8] ss:$100 sps:$4 sm:$0xff]  }
 0x1cc   : > { %v6633_v35 = vpop.f32.mrb[107].mxu1  ;;  %v6709_v42 = vpop.f32.mrb[107].mxu0  ;;  %7321 = vmatpush3.bf16.msra.mxu0 %v7938_v33  ;;  %7222 = vmatpush3.bf16.msra.mxu1 %v7940_v16 }
 0x1cd   : > { %v4040_v51 = vadd.f32 %v6631_v56, %v8963_v1  ;;  %v9133_v21 = vadd.f32 %v6707_v24, %v4032_v14  ;;  %v6634_v53 = vadd.f32 %v6633_v35, %v6632_v34  ;;  %v6710_v60 = vadd.f32 %v6709_v42, %v6708_v37  ;;  %7322 = vmatprep.subr.bf16.mxu0 %v8100_v6  ;;  %v7956_v1 = vld [vmem:[%s9633_s1 + $0x638] sm:$0xff]   ;;  %v7924_v34 = vld [vmem:[%s8173_s17 + $0x5c4] ss:$100 sps:$4 sm:$0xff]  }
 0x1ce   : > { %4716 = vmatmul.mubr.bf16.gmra.mrb[212].mxu1 %v7904_v49  ;;  %4829 = vmatmul.mubr.bf16.gmra.mrb[212].mxu0 %v7905_v22  ;;  %v7921_v49 = vld [vmem:[%s8173_s17 + $0x438] ss:$100 sps:$4 sm:$0xff]   ;;  %v7926_v37 = vld [vmem:[%s8173_s17 + $0x504] ss:$100 sps:$4 sm:$0xff]  }
 0x1cf   : > { %v4043_v55 = vadd.f32 %v6634_v53, %v8967_v47  ;;  %v9140_v59 = vadd.f32 %v6710_v60, %v4035_v4  ;;  %4723 = vmatprep.mubr.bf16.mxu1 %v7908_v11  ;;  %4836 = vmatprep.mubr.bf16.mxu0 %v7910_v28  ;;  %v7912_v47 = vld [vmem:[%s8173_s17 + $0x430] ss:$100 sps:$4 sm:$0xff]  }
 0x1d0   : > { %7323 = vmatpush3.bf16.msra.mxu0 %v7947_v50  ;;  %7223 = vmatprep.subr.bf16.mxu1 %v7954_v19 }
 0x1d1   : > { %v6711_v0 = vpop.f32.mrb[108].mxu0  ;;  %v6733_v48 = vpop.f32.mrb[108].mxu1  ;;  %7224 = vmatpush3.bf16.msra.mxu1 %v7955_v38  ;;  %7324 = vmatprep.subr.bf16.mxu0 %v8100_v6 }
 0x1d2   : > { %v6712_v20 = vpop.f32.mrb[109].mxu0  ;;  %v6734_v61 = vpop.f32.mrb[109].mxu1 }
 0x1d3   : > { %v6713_v3 = vadd.f32 %v6712_v20, %v6711_v0  ;;  %v6735_v5 = vadd.f32 %v6734_v61, %v6733_v48  ;;  %v6714_v7 = vpop.f32.mrb[110].mxu0  ;;  %v6736_v39 = vpop.f32.mrb[110].mxu1 }
 0x1d4   : > { %v6715_v10 = vpop.f32.mrb[111].mxu0  ;;  %v6737_v9 = vpop.f32.mrb[111].mxu1  ;;  %7325 = vmatpush3.bf16.msra.mxu0 %v7956_v1  ;;  %v7928_v1 = vld [vmem:[%s8173_s17 + $0x5c0] ss:$100 sps:$4 sm:$0xff]  }
 0x1d5   : > { %v9150_v14 = vadd.f32 %v6713_v3, %v4040_v51  ;;  %v4202_v41 = vadd.f32 %v6735_v5, %v8975_v29  ;;  %v6716_v18 = vadd.f32 %v6715_v10, %v6714_v7  ;;  %v6738_v62 = vadd.f32 %v6737_v9, %v6736_v39 }
 0x1d6   : > { %4724 = vmatmul.mubr.bf16.gmra.mrb[216].mxu1 %v7912_v47  ;;  %4837 = vmatmul.mubr.bf16.gmra.mrb[216].mxu0 %v7913_v36  ;;  %v7932_v47 = vld [vmem:[%s8173_s17 + $0x68c] ss:$100 sps:$4 sm:$0xff]  }
 0x1d7   : > { %v9153_v4 = vadd.f32 %v6716_v18, %v4043_v55  ;;  %v4205_v33 = vadd.f32 %v6738_v62, %v8978_v32  ;;  %4731 = vmatprep.mubr.bf16.mxu1 %v7915_v46  ;;  %4844 = vmatprep.mubr.bf16.mxu0 %v7917_v58  ;;  %v7934_v36 = vld [vmem:[%s8173_s17 + $0x5cc] ss:$100 sps:$4 sm:$0xff]  }
 0x1d9   : > { %v6739_v16 = vpop.f32.mrb[112].mxu1  ;;  %v6815_v26 = vpop.f32.mrb[112].mxu0 }
 0x1da   : > { %v6740_v12 = vpop.f32.mrb[113].mxu1  ;;  %v6816_v40 = vpop.f32.mrb[113].mxu0 }
 0x1db   : > { %v6741_v22 = vadd.f32 %v6740_v12, %v6739_v16  ;;  %v6817_v29 = vadd.f32 %v6816_v40, %v6815_v26  ;;  %v6742_v56 = vpop.f32.mrb[114].mxu1  ;;  %v6818_v24 = vpop.f32.mrb[114].mxu0 }
 0x1dc   : > { %v6743_v11 = vpop.f32.mrb[115].mxu1  ;;  %v6819_v28 = vpop.f32.mrb[115].mxu0 }
 0x1dd   : > { %v4210_v32 = vadd.f32 %v6741_v22, %v8985_v54  ;;  %v9161_v35 = vadd.f32 %v6817_v29, %v4202_v41  ;;  %v6744_v42 = vadd.f32 %v6743_v11, %v6742_v56  ;;  %v6820_v50 = vadd.f32 %v6819_v28, %v6818_v24  ;;  %v7929_v54 = vld [vmem:[%s8173_s17 + $0x500] ss:$100 sps:$4 sm:$0xff]  }
 0x1de   : > { %4732 = vmatmul.mubr.bf16.gmra.mrb[220].mxu1 %v7920_v31  ;;  %4845 = vmatmul.mubr.bf16.gmra.mrb[220].mxu0 %v7921_v49  ;;  %v7941_v31 = vld [vmem:[%s8173_s17 + $0x754] ss:$100 sps:$4 sm:$0xff]  }
 0x1df   : > { %v4213_v19 = vadd.f32 %v6744_v42, %v8988_v27  ;;  %v9164_v51 = vadd.f32 %v6820_v50, %v4205_v33  ;;  %4739 = vmatprep.mubr.bf16.mxu1 %v7924_v34  ;;  %4852 = vmatprep.mubr.bf16.mxu0 %v7926_v37  ;;  %v7936_v33 = vld [vmem:[%s8173_s17 + $0x688] ss:$100 sps:$4 sm:$0xff]   ;;  %v7943_v49 = vld [vmem:[%s8173_s17 + $0x694] ss:$100 sps:$4 sm:$0xff]  }
 0x1e1   : > { %v6745_v53 = vpop.f32.mrb[116].mxu1  ;;  %v6821_v60 = vpop.f32.mrb[116].mxu0 }
 0x1e2   : > { %v6746_v38 = vpop.f32.mrb[117].mxu1  ;;  %v6822_v55 = vpop.f32.mrb[117].mxu0 }
 0x1e3   : > { %v6747_v0 = vadd.f32 %v6746_v38, %v6745_v53  ;;  %v6823_v48 = vadd.f32 %v6822_v55, %v6821_v60  ;;  %v6748_v20 = vpop.f32.mrb[118].mxu1  ;;  %v6824_v61 = vpop.f32.mrb[118].mxu0 }
 0x1e4   : > { %v6749_v3 = vpop.f32.mrb[119].mxu1  ;;  %v6825_v5 = vpop.f32.mrb[119].mxu0 }
 0x1e5   : > { %v4218_v27 = vadd.f32 %v6747_v0, %v8995_v17  ;;  %v9171_v7 = vadd.f32 %v6823_v48, %v4210_v32  ;;  %v6750_v39 = vadd.f32 %v6749_v3, %v6748_v20  ;;  %v6826_v46 = vadd.f32 %v6825_v5, %v6824_v61  ;;  %v7937_v17 = vld [vmem:[%s8173_s17 + $0x5c8] ss:$100 sps:$4 sm:$0xff]  }
 0x1e6   : > { %4740 = vmatmul.mubr.bf16.gmra.mrb[224].mxu1 %v7928_v1  ;;  %4853 = vmatmul.mubr.bf16.gmra.mrb[224].mxu0 %v7929_v54  ;;  %v7948_v1 = vld [vmem:[%s8173_s17 + $0x81c] ss:$100 sps:$4 sm:$0xff]  }
 0x1e7   : > { %v4221_v58 = vadd.f32 %v6750_v39, %v8998_v25  ;;  %v9174_v10 = vadd.f32 %v6826_v46, %v4213_v19  ;;  %4747 = vmatprep.mubr.bf16.mxu1 %v7932_v47  ;;  %4860 = vmatprep.mubr.bf16.mxu0 %v7934_v36  ;;  %v7945_v19 = vld [vmem:[%s8173_s17 + $0x750] ss:$100 sps:$4 sm:$0xff]   ;;  %v7950_v54 = vld [vmem:[%s8173_s17 + $0x75c] ss:$100 sps:$4 sm:$0xff]  }
 0x1e9   : > { %v6751_v9 = vpop.f32.mrb[120].mxu1  ;;  %v6827_v41 = vpop.f32.mrb[120].mxu0 }
 0x1ea   : > { %v6752_v18 = vpop.f32.mrb[121].mxu1  ;;  %v6828_v62 = vpop.f32.mrb[121].mxu0 }
 0x1eb   : > { %v6753_v16 = vadd.f32 %v6752_v18, %v6751_v9  ;;  %v6829_v26 = vadd.f32 %v6828_v62, %v6827_v41  ;;  %v6754_v12 = vpop.f32.mrb[122].mxu1  ;;  %v6830_v40 = vpop.f32.mrb[122].mxu0 }
 0x1ec   : > { %v6755_v22 = vpop.f32.mrb[123].mxu1  ;;  %v6831_v29 = vpop.f32.mrb[123].mxu0 }
 0x1ed   : > { %v4226_v25 = vadd.f32 %v6753_v16, %v9005_v44  ;;  %v9181_v56 = vadd.f32 %v6829_v26, %v4218_v27  ;;  %v6756_v24 = vadd.f32 %v6755_v22, %v6754_v12  ;;  %v6832_v34 = vadd.f32 %v6831_v29, %v6830_v40  ;;  %v7946_v44 = vld [vmem:[%s8173_s17 + $0x690] ss:$100 sps:$4 sm:$0xff]  }
 0x1ee   : > { %4748 = vmatmul.mubr.bf16.gmra.mrb[228].mxu1 %v7936_v33  ;;  %4861 = vmatmul.mubr.bf16.gmra.mrb[228].mxu0 %v7937_v17  ;;  %v7957_v33 = vld [vmem:[%s8173_s17 + $0x824] ss:$100 sps:$4 sm:$0xff]   ;;  %v7961_v17 = vld [vmem:[%s8173_s17 + $0x5c] ss:$100 sps:$4 sm:$0xff]  }
 0x1ef   : > { %v4229_v37 = vadd.f32 %v6756_v24, %v9008_v52  ;;  %v9184_v11 = vadd.f32 %v6832_v34, %v4221_v58  ;;  %4755 = vmatprep.mubr.bf16.mxu1 %v7941_v31  ;;  %4868 = vmatprep.mubr.bf16.mxu0 %v7943_v49  ;;  %v7952_v58 = vld [vmem:[%s8173_s17 + $0x818] ss:$100 sps:$4 sm:$0xff]  }
 0x1f1   : > { %v6757_v28 = vpop.f32.mrb[124].mxu1  ;;  %v6833_v32 = vpop.f32.mrb[124].mxu0 }
 0x1f2   : > { %v6758_v42 = vpop.f32.mrb[125].mxu1  ;;  %v6834_v50 = vpop.f32.mrb[125].mxu0 }
 0x1f3   : > { %v6759_v53 = vadd.f32 %v6758_v42, %v6757_v28  ;;  %v6835_v60 = vadd.f32 %v6834_v50, %v6833_v32  ;;  %v6760_v38 = vpop.f32.mrb[126].mxu1  ;;  %v6836_v55 = vpop.f32.mrb[126].mxu0  ;;  %v7962_v28 = vld [vmem:[%s8173_s17 + $0x820] ss:$100 sps:$4 sm:$0xff]  }
 0x1f4   : > { %v6761_v0 = vpop.f32.mrb[127].mxu1  ;;  %v6837_v48 = vpop.f32.mrb[127].mxu0 }
 0x1f5   : > { %v4234_v52 = vadd.f32 %v6759_v53, %v9015_v45  ;;  %v9191_v20 = vadd.f32 %v6835_v60, %v4226_v25  ;;  %v6762_v61 = vadd.f32 %v6761_v0, %v6760_v38  ;;  %v6838_v47 = vadd.f32 %v6837_v48, %v6836_v55  ;;  %v7953_v45 = vld [vmem:[%s8173_s17 + $0x758] ss:$100 sps:$4 sm:$0xff]  }
 0x1f6   : > { %4756 = vmatmul.mubr.bf16.gmra.mrb[232].mxu1 %v7945_v19  ;;  %4869 = vmatmul.mubr.bf16.gmra.mrb[232].mxu0 %v7946_v44  ;;  %v7963_v19 = vld [vmem:[%s8173_s17 + $0x124] ss:$100 sps:$4 sm:$0xff]  }
 0x1f7   : > { %v4237_v36 = vadd.f32 %v6762_v61, %v9018_v57  ;;  %v9194_v3 = vadd.f32 %v6838_v47, %v4229_v37  ;;  %4763 = vmatprep.mubr.bf16.mxu1 %v7948_v1  ;;  %4876 = vmatprep.mubr.bf16.mxu0 %v7950_v54  ;;  %v7959_v37 = vld [vmem:[%s8173_s17 + $0x58] ss:$100 sps:$4 sm:$0xff]   ;;  %v7965_v61 = vld [vmem:[%s8173_s17 + $0x120] ss:$100 sps:$4 sm:$0xff]  }
 0x1f8   : > { %v7966_v47 = vld [vmem:[%s8173_s17 + $0x60] ss:$100 sps:$4 sm:$0xff]  }
 0x1f9   : > { %v6763_v5 = vpop.f32.mrb[128].mxu1  ;;  %v6839_v27 = vpop.f32.mrb[128].mxu0 }
 0x1fa   : > { %v6764_v39 = vpop.f32.mrb[129].mxu1  ;;  %v6840_v46 = vpop.f32.mrb[129].mxu0 }
 0x1fb   : > { %v6765_v9 = vadd.f32 %v6764_v39, %v6763_v5  ;;  %v6841_v41 = vadd.f32 %v6840_v46, %v6839_v27  ;;  %v6766_v18 = vpop.f32.mrb[130].mxu1  ;;  %v6842_v62 = vpop.f32.mrb[130].mxu0  ;;  %v7967_v46 = vld [vmem:[%s8173_s17 + $0x1ec] ss:$100 sps:$4 sm:$0xff]  }
 0x1fc   : > { %v6767_v16 = vpop.f32.mrb[131].mxu1  ;;  %v6843_v26 = vpop.f32.mrb[131].mxu0 }
 0x1fd   : > { %v4242_v57 = vadd.f32 %v6765_v9, %v9031_v13  ;;  %v9201_v12 = vadd.f32 %v6841_v41, %v4234_v52  ;;  %v6768_v40 = vadd.f32 %v6767_v16, %v6766_v18  ;;  %v6844_v31 = vadd.f32 %v6843_v26, %v6842_v62 }
 0x1fe   : > { %4764 = vmatmul.mubr.bf16.gmra.mrb[236].mxu1 %v7952_v58  ;;  %4877 = vmatmul.mubr.bf16.gmra.mrb[236].mxu0 %v7953_v45 }
 0x1ff   : > { %v4245_v49 = vadd.f32 %v6768_v40, %v9034_v30  ;;  %v9204_v22 = vadd.f32 %v6844_v31, %v4237_v36  ;;  %4884 = vmatprep.mubr.bf16.mxu0 %v7957_v33  ;;  %4925 = vmatprep.mubr.bf16.mxu1 %v7961_v17  ;;  %v7970_v40 = vld [vmem:[%s8173_s17 + $0x128] ss:$100 sps:$4 sm:$0xff]  }
 0x201   : > { %v6769_v29 = vpop.f32.mrb[132].mxu1  ;;  %v6845_v25 = vpop.f32.mrb[132].mxu0 }
 0x202   : > { %v6770_v24 = vpop.f32.mrb[133].mxu1  ;;  %v6846_v34 = vpop.f32.mrb[133].mxu0 }
 0x203   : > { %v6771_v13 = vadd.f32 %v6770_v24, %v6769_v29  ;;  %v6847_v32 = vadd.f32 %v6846_v34, %v6845_v25  ;;  %v6772_v42 = vpop.f32.mrb[134].mxu1  ;;  %v6848_v50 = vpop.f32.mrb[134].mxu0  ;;  %v7971_v24 = vld [vmem:[%s8173_s17 + $0x2b4] ss:$100 sps:$4 sm:$0xff]  }
 0x204   : > { %v6773_v44 = vpop.f32.mrb[135].mxu1  ;;  %v6849_v53 = vpop.f32.mrb[135].mxu0 }
 0x205   : > { %v4250_v30 = vadd.f32 %v6771_v13, %v9050_v8  ;;  %v9210_v60 = vadd.f32 %v6847_v32, %v4242_v57  ;;  %v6774_v38 = vadd.f32 %v6773_v44, %v6772_v42  ;;  %v6850_v55 = vadd.f32 %v6849_v53, %v6848_v50 }
 0x206   : > { %4885 = vmatmul.mubr.bf16.gmra.mrb[240].mxu0 %v7962_v28  ;;  %4926 = vmatmul.mubr.bf16.vlgmr.msra.gmra.mrb[240].mxu1 %v7959_v37 }
 0x207   : > { %v4253_v1 = vadd.f32 %v6774_v38, %v9059_v2  ;;  %v9213_v54 = vadd.f32 %v6850_v55, %v4245_v49  ;;  %4933 = vmatprep.mubr.bf16.mxu1 %v7963_v19  ;;  %7326 = vmatprep.mubr.msk.bf16.mxu0 %vm8101_vm0, %v8100_v6  ;;  %v7974_v38 = vld [vmem:[%s8173_s17 + $0x1f0] ss:$100 sps:$4 sm:$0xff]  }
 0x209   : > { %v6775_v0 = vpop.f32.mrb[136].mxu1  ;;  %v6851_v48 = vpop.f32.mrb[136].mxu0 }
 0x20a   : > { %v6776_v8 = vpop.f32.mrb[137].mxu1  ;;  %v6852_v52 = vpop.f32.mrb[137].mxu0 }
 0x20b   : > { %v6777_v36 = vadd.f32 %v6776_v8, %v6775_v0  ;;  %v6853_v5 = vadd.f32 %v6852_v52, %v6851_v48  ;;  %v6778_v27 = vpop.f32.mrb[138].mxu1  ;;  %v6854_v39 = vpop.f32.mrb[138].mxu0  ;;  %v7977_v8 = vld [vmem:[%s8173_s17 + $0x37c] ss:$100 sps:$4 sm:$0xff]  }
 0x20c   : > { %v6779_v58 = vpop.f32.mrb[139].mxu1  ;;  %v6855_v2 = vpop.f32.mrb[139].mxu0 }
 0x20d   : > { %v4258_v45 = vadd.f32 %v6777_v36, %v9080_v43  ;;  %v9221_v9 = vadd.f32 %v6853_v5, %v4250_v30  ;;  %v6780_v41 = vadd.f32 %v6779_v58, %v6778_v27  ;;  %v6856_v18 = vadd.f32 %v6855_v2, %v6854_v39  ;;  %v7969_v43 = vld [vmem:[%s8173_s17 + $0x1e8] ss:$100 sps:$4 sm:$0xff]  }
 0x20e   : > { %4934 = vmatmul.mubr.bf16.gmra.mrb[244].mxu1 %v7965_v61  ;;  %7327 = vmatmul.mubr.bf16.vlgmr.msra.gmra.mrb[244].mxu0 %v7966_v47 }
 0x20f   : > { %v4261_v62 = vadd.f32 %v6780_v41, %v9089_v63  ;;  %v9224_v33 = vadd.f32 %v6856_v18, %v4253_v1  ;;  %4941 = vmatprep.mubr.bf16.mxu1 %v7967_v46  ;;  %7330 = vmatprep.mubr.msk.bf16.mxu0 %vm8101_vm0, %v8100_v6  ;;  %v7978_v41 = vld [vmem:[%s8173_s17 + $0x2b8] ss:$100 sps:$4 sm:$0xff]  }
 0x211   : > { %v6781_v17 = vpop.f32.mrb[140].mxu1  ;;  %v6857_v16 = vpop.f32.mrb[140].mxu0 }
 0x212   : > { %v6782_v26 = vpop.f32.mrb[141].mxu1  ;;  %v6858_v57 = vpop.f32.mrb[141].mxu0 }
 0x213   : > { %v6783_v31 = vadd.f32 %v6782_v26, %v6781_v17  ;;  %v6859_v49 = vadd.f32 %v6858_v57, %v6857_v16  ;;  %v6784_v29 = vpop.f32.mrb[142].mxu1  ;;  %v6860_v25 = vpop.f32.mrb[142].mxu0  ;;  %v7981_v26 = vld [vmem:[%s8173_s17 + $0x444] ss:$100 sps:$4 sm:$0xff]  }
 0x214   : > { %v6785_v34 = vpop.f32.mrb[143].mxu1  ;;  %v6861_v63 = vpop.f32.mrb[143].mxu0 }
 0x215   : > { %v4266_v37 = vadd.f32 %v6783_v31, %v9106_v15  ;;  %v9232_v28 = vadd.f32 %v6859_v49, %v4258_v45  ;;  %v6786_v13 = vadd.f32 %v6785_v34, %v6784_v29  ;;  %v6862_v32 = vadd.f32 %v6861_v63, %v6860_v25  ;;  %v7973_v15 = vld [vmem:[%s8173_s17 + $0x2b0] ss:$100 sps:$4 sm:$0xff]  }
 0x216   : > { %4942 = vmatmul.mubr.bf16.gmra.mrb[248].mxu1 %v7969_v43  ;;  %7331 = vmatmul.mubr.bf16.gmra.mrb[248].mxu0 %v7970_v40 }
 0x217   : > { %v4269_v42 = vadd.f32 %v6786_v13, %v9113_v23  ;;  %v9235_v50 = vadd.f32 %v6862_v32, %v4261_v62  ;;  %4949 = vmatprep.mubr.bf16.mxu1 %v7971_v24  ;;  %7334 = vmatprep.mubr.msk.bf16.mxu0 %vm8101_vm0, %v8100_v6  ;;  %v7982_v13 = vld [vmem:[%s8173_s17 + $0x380] ss:$100 sps:$4 sm:$0xff]  }
 0x219   : > { %v6787_v19 = vpop.f32.mrb[144].mxu1  ;;  %v6863_v44 = vpop.f32.mrb[144].mxu0 }
 0x21a   : > { %v6788_v53 = vpop.f32.mrb[145].mxu1  ;;  %v6864_v30 = vpop.f32.mrb[145].mxu0 }
 0x21b   : > { %v6789_v55 = vadd.f32 %v6788_v53, %v6787_v19  ;;  %v6865_v1 = vadd.f32 %v6864_v30, %v6863_v44  ;;  %v6790_v0 = vpop.f32.mrb[146].mxu1  ;;  %v6866_v48 = vpop.f32.mrb[146].mxu0  ;;  %v7985_v53 = vld [vmem:[%s8173_s17 + $0x50c] ss:$100 sps:$4 sm:$0xff]  }
 0x21c   : > { %v6791_v52 = vpop.f32.mrb[147].mxu1  ;;  %v6867_v23 = vpop.f32.mrb[147].mxu0 }
 0x21d   : > { %v4274_v61 = vadd.f32 %v6789_v55, %v9133_v21  ;;  %v9243_v47 = vadd.f32 %v6865_v1, %v4266_v37  ;;  %v6792_v36 = vadd.f32 %v6791_v52, %v6790_v0  ;;  %v6868_v5 = vadd.f32 %v6867_v23, %v6866_v48  ;;  %v7975_v21 = vld [vmem:[%s8173_s17 + $0x378] ss:$100 sps:$4 sm:$0xff]  }
 0x21e   : > { %4950 = vmatmul.mubr.bf16.gmra.mrb[252].mxu1 %v7973_v15  ;;  %7335 = vmatmul.mubr.bf16.gmra.mrb[252].mxu0 %v7974_v38 }
 0x21f   : > { %v4277_v27 = vadd.f32 %v6792_v36, %v9140_v59  ;;  %v9246_v39 = vadd.f32 %v6868_v5, %v4269_v42  ;;  %4957 = vmatprep.mubr.bf16.mxu1 %v7977_v8  ;;  %7338 = vmatprep.mubr.msk.bf16.mxu0 %vm8101_vm0, %v8100_v6  ;;  %v7983_v36 = vld [vmem:[%s8173_s17 + $0x508] ss:$100 sps:$4 sm:$0xff]  }
 0x220   : > { %v7986_v5 = vld [vmem:[%s8173_s17 + $0x448] ss:$100 sps:$4 sm:$0xff]  }
 0x221   : > { %v6793_v46 = vpop.f32.mrb[148].mxu1  ;;  %v6869_v58 = vpop.f32.mrb[148].mxu0 }
 0x222   : > { %v6794_v2 = vpop.f32.mrb[149].mxu1  ;;  %v6870_v45 = vpop.f32.mrb[149].mxu0 }
 0x223   : > { %v6795_v18 = vadd.f32 %v6794_v2, %v6793_v46  ;;  %v6871_v62 = vadd.f32 %v6870_v45, %v6869_v58  ;;  %v6796_v17 = vpop.f32.mrb[150].mxu1  ;;  %v6872_v16 = vpop.f32.mrb[150].mxu0  ;;  %v7989_v2 = vld [vmem:[%s8173_s17 + $0x5d4] ss:$100 sps:$4 sm:$0xff]  }
 0x224   : > { %v6797_v57 = vpop.f32.mrb[151].mxu1  ;;  %v6873_v59 = vpop.f32.mrb[151].mxu0 }
 0x225   : > { %v4282_v43 = vadd.f32 %v6795_v18, %v9150_v14  ;;  %v9254_v40 = vadd.f32 %v6871_v62, %v4274_v61  ;;  %v6798_v31 = vadd.f32 %v6797_v57, %v6796_v17  ;;  %v6874_v49 = vadd.f32 %v6873_v59, %v6872_v16  ;;  %v7979_v14 = vld [vmem:[%s8173_s17 + $0x440] ss:$100 sps:$4 sm:$0xff]  }
 0x226   : > { %4958 = vmatmul.mubr.bf16.gmra.mrb[0].mxu1 %v7975_v21  ;;  %7339 = vmatmul.mubr.bf16.gmra.mrb[0].mxu0 %v7978_v41 }
 0x227   : > { %v4285_v29 = vadd.f32 %v6798_v31, %v9153_v4  ;;  %v9257_v25 = vadd.f32 %v6874_v49, %v4277_v27  ;;  %4965 = vmatprep.mubr.bf16.mxu1 %v7981_v26  ;;  %7342 = vmatprep.mubr.msk.bf16.mxu0 %vm8101_vm0, %v8100_v6  ;;  %v7990_v31 = vld [vmem:[%s8173_s17 + $0x510] ss:$100 sps:$4 sm:$0xff]  }
 0x229   : > { %v6875_v24 = vpop.f32.mrb[152].mxu0  ;;  %v6897_v34 = vpop.f32.mrb[152].mxu1 }
 0x22a   : > { %v6876_v63 = vpop.f32.mrb[153].mxu0  ;;  %v6898_v37 = vpop.f32.mrb[153].mxu1 }
 0x22b   : > { %v6877_v32 = vadd.f32 %v6876_v63, %v6875_v24  ;;  %v6899_v42 = vadd.f32 %v6898_v37, %v6897_v34  ;;  %v6878_v19 = vpop.f32.mrb[154].mxu0  ;;  %v6900_v44 = vpop.f32.mrb[154].mxu1  ;;  %v7993_v63 = vld [vmem:[%s8173_s17 + $0x69c] ss:$100 sps:$4 sm:$0xff]  }
 0x22c   : > { %v6879_v30 = vpop.f32.mrb[155].mxu0  ;;  %v6901_v4 = vpop.f32.mrb[155].mxu1 }
 0x22d   : > { %v9264_v15 = vadd.f32 %v6877_v32, %v4282_v43  ;;  %v4444_v38 = vadd.f32 %v6899_v42, %v9161_v35  ;;  %v6880_v55 = vadd.f32 %v6879_v30, %v6878_v19  ;;  %v6902_v1 = vadd.f32 %v6901_v4, %v6900_v44 }
 0x22e   : > { %4966 = vmatmul.mubr.bf16.gmra.mrb[4].mxu1 %v7979_v14  ;;  %7343 = vmatmul.mubr.bf16.gmra.mrb[4].mxu0 %v7982_v13 }
 0x22f   : > { %v9267_v0 = vadd.f32 %v6880_v55, %v4285_v29  ;;  %v4447_v48 = vadd.f32 %v6902_v1, %v9164_v51  ;;  %4973 = vmatprep.mubr.bf16.mxu1 %v7985_v53  ;;  %7346 = vmatprep.mubr.msk.bf16.mxu0 %vm8101_vm0, %v8100_v6  ;;  %v7994_v55 = vld [vmem:[%s8173_s17 + $0x5d8] ss:$100 sps:$4 sm:$0xff]  }
 0x231   : > { %v6903_v8 = vpop.f32.mrb[156].mxu1  ;;  %v6979_v52 = vpop.f32.mrb[156].mxu0 }
 0x232   : > { %v6904_v23 = vpop.f32.mrb[157].mxu1  ;;  %v6980_v61 = vpop.f32.mrb[157].mxu0 }
 0x233   : > { %v6905_v35 = vadd.f32 %v6904_v23, %v6903_v8  ;;  %v6981_v27 = vadd.f32 %v6980_v61, %v6979_v52  ;;  %v6906_v46 = vpop.f32.mrb[158].mxu1  ;;  %v6982_v58 = vpop.f32.mrb[158].mxu0  ;;  %v7997_v23 = vld [vmem:[%s8173_s17 + $0x764] ss:$100 sps:$4 sm:$0xff]  }
 0x234   : > { %v6907_v45 = vpop.f32.mrb[159].mxu1  ;;  %v6983_v21 = vpop.f32.mrb[159].mxu0 }
 0x235   : > { %v4452_v51 = vadd.f32 %v6905_v35, %v9171_v7  ;;  %v9276_v41 = vadd.f32 %v6981_v27, %v4444_v38  ;;  %v6908_v18 = vadd.f32 %v6907_v45, %v6906_v46  ;;  %v6984_v62 = vadd.f32 %v6983_v21, %v6982_v58  ;;  %v7987_v7 = vld [vmem:[%s8173_s17 + $0x5d0] ss:$100 sps:$4 sm:$0xff]  }
 0x236   : > { %4974 = vmatmul.mubr.bf16.gmra.mrb[8].mxu1 %v7983_v36  ;;  %7347 = vmatmul.mubr.bf16.gmra.mrb[8].mxu0 %v7986_v5 }
 0x237   : > { %v4455_v17 = vadd.f32 %v6908_v18, %v9174_v10  ;;  %v9279_v16 = vadd.f32 %v6984_v62, %v4447_v48  ;;  %4981 = vmatprep.mubr.bf16.mxu1 %v7989_v2  ;;  %7350 = vmatprep.mubr.msk.bf16.mxu0 %vm8101_vm0, %v8100_v6  ;;  %v7998_v18 = vld [vmem:[%s8173_s17 + $0x6a0] ss:$100 sps:$4 sm:$0xff]  }
 0x239   : > { %v6909_v26 = vpop.f32.mrb[160].mxu1  ;;  %v6985_v57 = vpop.f32.mrb[160].mxu0 }
 0x23a   : > { %v6910_v59 = vpop.f32.mrb[161].mxu1  ;;  %v6986_v43 = vpop.f32.mrb[161].mxu0 }
 0x23b   : > { %v6911_v49 = vadd.f32 %v6910_v59, %v6909_v26  ;;  %v6987_v29 = vadd.f32 %v6986_v43, %v6985_v57  ;;  %v6912_v24 = vpop.f32.mrb[162].mxu1  ;;  %v6988_v34 = vpop.f32.mrb[162].mxu0  ;;  %v8001_v59 = vld [vmem:[%s8173_s17 + $0x82c] ss:$100 sps:$4 sm:$0xff]  }
 0x23c   : > { %v6913_v37 = vpop.f32.mrb[163].mxu1  ;;  %v6989_v10 = vpop.f32.mrb[163].mxu0 }
 0x23d   : > { %v4460_v14 = vadd.f32 %v6911_v49, %v9181_v56  ;;  %v9287_v13 = vadd.f32 %v6987_v29, %v4452_v51  ;;  %v6914_v32 = vadd.f32 %v6913_v37, %v6912_v24  ;;  %v6990_v42 = vadd.f32 %v6989_v10, %v6988_v34  ;;  %v7991_v56 = vld [vmem:[%s8173_s17 + $0x698] ss:$100 sps:$4 sm:$0xff]  }
 0x23e   : > { %4982 = vmatmul.mubr.bf16.gmra.mrb[12].mxu1 %v7987_v7  ;;  %7351 = vmatmul.mubr.bf16.gmra.mrb[12].mxu0 %v7990_v31 }
 0x23f   : > { %v4463_v19 = vadd.f32 %v6914_v32, %v9184_v11  ;;  %v9290_v44 = vadd.f32 %v6990_v42, %v4455_v17  ;;  %4989 = vmatprep.mubr.bf16.mxu1 %v7993_v63  ;;  %7354 = vmatprep.mubr.msk.bf16.mxu0 %vm8101_vm0, %v8100_v6  ;;  %v7999_v32 = vld [vmem:[%s8173_s17 + $0x828] ss:$100 sps:$4 sm:$0xff]  }
 0x241   : > { %v6915_v53 = vpop.f32.mrb[164].mxu1  ;;  %v6991_v30 = vpop.f32.mrb[164].mxu0 }
 0x242   : > { %v6916_v4 = vpop.f32.mrb[165].mxu1  ;;  %v6992_v38 = vpop.f32.mrb[165].mxu0 }
 0x243   : > { %v6917_v1 = vadd.f32 %v6916_v4, %v6915_v53  ;;  %v6993_v48 = vadd.f32 %v6992_v38, %v6991_v30  ;;  %v6918_v8 = vpop.f32.mrb[166].mxu1  ;;  %v6994_v52 = vpop.f32.mrb[166].mxu0 }
 0x244   : > { %v6919_v61 = vpop.f32.mrb[167].mxu1  ;;  %v6995_v11 = vpop.f32.mrb[167].mxu0 }
 0x245   : > { %v4468_v36 = vadd.f32 %v6917_v1, %v9191_v20  ;;  %v9298_v5 = vadd.f32 %v6993_v48, %v4460_v14  ;;  %v6920_v35 = vadd.f32 %v6919_v61, %v6918_v8  ;;  %v6996_v27 = vadd.f32 %v6995_v11, %v6994_v52  ;;  %v7995_v20 = vld [vmem:[%s8173_s17 + $0x760] ss:$100 sps:$4 sm:$0xff]  }
 0x246   : > { %4990 = vmatmul.mubr.bf16.gmra.mrb[16].mxu1 %v7991_v56  ;;  %7355 = vmatmul.mubr.bf16.gmra.mrb[16].mxu0 %v7994_v55 }
 0x247   : > { %v4471_v46 = vadd.f32 %v6920_v35, %v9194_v3  ;;  %v9301_v58 = vadd.f32 %v6996_v27, %v4463_v19  ;;  %4997 = vmatprep.mubr.bf16.mxu1 %v7997_v23  ;;  %7358 = vmatprep.mubr.msk.bf16.mxu0 %vm8101_vm0, %v8100_v6 }
 0x249   : > { %v6921_v2 = vpop.f32.mrb[168].mxu1  ;;  %v6997_v45 = vpop.f32.mrb[168].mxu0 }
 0x24a   : > { %v6922_v21 = vpop.f32.mrb[169].mxu1  ;;  %v6998_v51 = vpop.f32.mrb[169].mxu0 }
 0x24b   : > { %v6923_v62 = vadd.f32 %v6922_v21, %v6921_v2  ;;  %v6999_v17 = vadd.f32 %v6998_v51, %v6997_v45  ;;  %v6924_v26 = vpop.f32.mrb[170].mxu1  ;;  %v7000_v57 = vpop.f32.mrb[170].mxu0 }
 0x24c   : > { %v6925_v43 = vpop.f32.mrb[171].mxu1  ;;  %v7001_v3 = vpop.f32.mrb[171].mxu0 }
 0x24d   : > { %v4476_v7 = vadd.f32 %v6923_v62, %v9201_v12  ;;  %v9309_v31 = vadd.f32 %v6999_v17, %v4468_v36  ;;  %v6926_v49 = vadd.f32 %v6925_v43, %v6924_v26  ;;  %v7002_v29 = vadd.f32 %v7001_v3, %v7000_v57  ;;  %v8002_v12 = vld [vmem:[%s8173_s17 + $0x768] ss:$100 sps:$4 sm:$0xff]   ;;  %v8003_v36 = vld [vmem:[%s8173_s17 + $0x830] ss:$100 sps:$4 sm:$0xff]   ;;  %s9424_s17 = sshll.u32 %s9639_s22, 3 }
 0x24e   : > { %4998 = vmatmul.mubr.bf16.gmra.mrb[20].mxu1 %v7995_v20  ;;  %7359 = vmatmul.mubr.bf16.gmra.mrb[20].mxu0 %v7998_v18  ;;  %s9430_s30 = scalar_lea.vmem %s9635_s3, %s9424_s17  ;;  %s9497_s8 = scalar_lea.vmem %s9637_s5, %s9424_s17 }
 0x24f   : > { %v4479_v24 = vadd.f32 %v6926_v49, %v9204_v22  ;;  %v9312_v34 = vadd.f32 %v7002_v29, %v4471_v46  ;;  %5005 = vmatprep.mubr.bf16.mxu1 %v8001_v59  ;;  %7362 = vmatprep.mubr.msk.bf16.mxu0 %vm8101_vm0, %v8100_v6  ;;  %s9523_s11 = scalar_lea.vmem %s9634_s2, %s9424_s17 }
 0x251   : > { %v6927_v63 = vpop.f32.mrb[172].mxu1  ;;  %v7003_v37 = vpop.f32.mrb[172].mxu0 }
 0x252   : > { %v6928_v10 = vpop.f32.mrb[173].mxu1  ;;  %v7004_v14 = vpop.f32.mrb[173].mxu0 }
 0x253   : > { %v6929_v42 = vadd.f32 %v6928_v10, %v6927_v63  ;;  %v7005_v19 = vadd.f32 %v7004_v14, %v7003_v37  ;;  %v6930_v53 = vpop.f32.mrb[174].mxu1  ;;  %v7006_v30 = vpop.f32.mrb[174].mxu0 }
 0x254   : > { %v6931_v4 = vpop.f32.mrb[175].mxu1  ;;  %v7007_v38 = vpop.f32.mrb[175].mxu0 }
 0x255   : > { %v4484_v22 = vadd.f32 %v6929_v42, %v9210_v60  ;;  %v9319_v56 = vadd.f32 %v7005_v19, %v4476_v7  ;;  %v6932_v55 = vadd.f32 %v6931_v4, %v6930_v53  ;;  %v7008_v1 = vadd.f32 %v7007_v38, %v7006_v30 }
 0x256   : > { %5006 = vmatmul.mubr.bf16.gmra.mrb[24].mxu1 %v7999_v32  ;;  %7363 = vmatmul.mubr.bf16.gmra.mrb[24].mxu0 %v8002_v12 }
 0x257   : > { %v4487_v48 = vadd.f32 %v6932_v55, %v9213_v54  ;;  %v9322_v8 = vadd.f32 %v7008_v1, %v4479_v24  ;;  %7366 = vmatprep.mubr.msk.bf16.mxu0 %vm8101_vm0, %v8100_v6 }
 0x259   : > { %v6933_v52 = vpop.f32.mrb[176].mxu1  ;;  %v7009_v23 = vpop.f32.mrb[176].mxu0 }
 0x25a   : > { %v6934_v61 = vpop.f32.mrb[177].mxu1  ;;  %v7010_v11 = vpop.f32.mrb[177].mxu0 }
 0x25b   : > { %v6935_v35 = vadd.f32 %v6934_v61, %v6933_v52  ;;  %v7011_v60 = vadd.f32 %v7010_v11, %v7009_v23  ;;  %v6936_v27 = vpop.f32.mrb[178].mxu1  ;;  %v7012_v46 = vpop.f32.mrb[178].mxu0 }
 0x25c   : > { %v6937_v2 = vpop.f32.mrb[179].mxu1  ;;  %v7013_v45 = vpop.f32.mrb[179].mxu0 }
 0x25d   : > { %v4492_v21 = vadd.f32 %v6935_v35, %v9221_v9  ;;  %v9328_v51 = vadd.f32 %v7011_v60, %v4484_v22  ;;  %v6938_v54 = vadd.f32 %v6937_v2, %v6936_v27  ;;  %v7014_v20 = vadd.f32 %v7013_v45, %v7012_v46 }
 0x25e   : > { %7367 = vmatmul.mubr.bf16.gmra.mrb[28].mxu0 %v8003_v36 }
 0x25f   : > { %v4495_v18 = vadd.f32 %v6938_v54, %v9224_v33  ;;  %v9331_v62 = vadd.f32 %v7014_v20, %v4487_v48 }
 0x261   : > { %v6939_v17 = vpop.f32.mrb[180].mxu1  ;;  %v7015_v26 = vpop.f32.mrb[180].mxu0 }
 0x262   : > { %v6940_v57 = vpop.f32.mrb[181].mxu1  ;;  %v7016_v59 = vpop.f32.mrb[181].mxu0 }
 0x263   : > { %v6941_v43 = vadd.f32 %v6940_v57, %v6939_v17  ;;  %v7017_v3 = vadd.f32 %v7016_v59, %v7015_v26  ;;  %v6942_v7 = vpop.f32.mrb[182].mxu1  ;;  %v7018_v49 = vpop.f32.mrb[182].mxu0 }
 0x264   : > { %v6943_v29 = vpop.f32.mrb[183].mxu1  ;;  %v7019_v24 = vpop.f32.mrb[183].mxu0 }
 0x265   : > { %v4500_v9 = vadd.f32 %v6941_v43, %v9232_v28  ;;  %v9334_v63 = vadd.f32 %v7017_v3, %v4492_v21  ;;  %v6944_v37 = vadd.f32 %v6943_v29, %v6942_v7  ;;  %v7020_v10 = vadd.f32 %v7019_v24, %v7018_v49 }
 0x267   : > { %v4503_v33 = vadd.f32 %v6944_v37, %v9235_v50  ;;  %v9337_v14 = vadd.f32 %v7020_v10, %v4495_v18 }
 0x269   : > { %v6945_v32 = vpop.f32.mrb[184].mxu1  ;;  %v7021_v12 = vpop.f32.mrb[184].mxu0 }
 0x26a   : > { %v6946_v42 = vpop.f32.mrb[185].mxu1  ;;  %v7022_v19 = vpop.f32.mrb[185].mxu0 }
 0x26b   : > { %v6947_v53 = vadd.f32 %v6946_v42, %v6945_v32  ;;  %v7023_v30 = vadd.f32 %v7022_v19, %v7021_v12  ;;  %v6948_v4 = vpop.f32.mrb[186].mxu1  ;;  %v7024_v38 = vpop.f32.mrb[186].mxu0 }
 0x26c   : > { %v6949_v22 = vpop.f32.mrb[187].mxu1  ;;  %v7025_v55 = vpop.f32.mrb[187].mxu0 }
 0x26d   : > { %v4508_v28 = vadd.f32 %v6947_v53, %v9243_v47  ;;  %v9340_v1 = vadd.f32 %v7023_v30, %v4500_v9  ;;  %v6950_v48 = vadd.f32 %v6949_v22, %v6948_v4  ;;  %v7026_v52 = vadd.f32 %v7025_v55, %v7024_v38 }
 0x26f   : > { %v4511_v50 = vadd.f32 %v6950_v48, %v9246_v39  ;;  %v9343_v23 = vadd.f32 %v7026_v52, %v4503_v33 }
 0x271   : > { %v6951_v61 = vpop.f32.mrb[188].mxu1  ;;  %v7027_v11 = vpop.f32.mrb[188].mxu0 }
 0x272   : > { %v6952_v36 = vpop.f32.mrb[189].mxu1  ;;  %v7028_v35 = vpop.f32.mrb[189].mxu0 }
 0x273   : > { %v6953_v60 = vadd.f32 %v6952_v36, %v6951_v61  ;;  %v7029_v27 = vadd.f32 %v7028_v35, %v7027_v11  ;;  %v6954_v46 = vpop.f32.mrb[190].mxu1  ;;  %v7030_v2 = vpop.f32.mrb[190].mxu0 }
 0x274   : > { %v6955_v45 = vpop.f32.mrb[191].mxu1  ;;  %v7031_v21 = vpop.f32.mrb[191].mxu0 }
 0x275   : > { %v4516_v47 = vadd.f32 %v6953_v60, %v9254_v40  ;;  %v9346_v54 = vadd.f32 %v7029_v27, %v4508_v28  ;;  %v6956_v20 = vadd.f32 %v6955_v45, %v6954_v46  ;;  %v7032_v18 = vadd.f32 %v7031_v21, %v7030_v2 }
 0x277   : > { %v4519_v39 = vadd.f32 %v6956_v20, %v9257_v25  ;;  %v9349_v17 = vadd.f32 %v7032_v18, %v4511_v50 }
 0x279   : > { %v6957_v26 = vpop.f32.mrb[192].mxu1  ;;  %v7033_v57 = vpop.f32.mrb[192].mxu0 }
 0x27a   : > { %v6958_v59 = vpop.f32.mrb[193].mxu1  ;;  %v7034_v43 = vpop.f32.mrb[193].mxu0 }
 0x27b   : > { %v6959_v3 = vadd.f32 %v6958_v59, %v6957_v26  ;;  %v7035_v7 = vadd.f32 %v7034_v43, %v7033_v57  ;;  %v6960_v49 = vpop.f32.mrb[194].mxu1  ;;  %v7036_v29 = vpop.f32.mrb[194].mxu0 }
 0x27c   : > { %v6961_v24 = vpop.f32.mrb[195].mxu1  ;;  %v7037_v9 = vpop.f32.mrb[195].mxu0 }
 0x27d   : > { %v4524_v40 = vadd.f32 %v6959_v3, %v9264_v15  ;;  %v9352_v37 = vadd.f32 %v7035_v7, %v4516_v47  ;;  %v6962_v10 = vadd.f32 %v6961_v24, %v6960_v49  ;;  %v7038_v33 = vadd.f32 %v7037_v9, %v7036_v29 }
 0x27f   : > { %v4527_v25 = vadd.f32 %v6962_v10, %v9267_v0  ;;  %v9355_v32 = vadd.f32 %v7038_v33, %v4519_v39 }
 0x281   : > { %v7039_v12 = vpop.f32.mrb[196].mxu0  ;;  %v7061_v42 = vpop.f32.mrb[196].mxu1 }
 0x282   : > { %v7040_v19 = vpop.f32.mrb[197].mxu0  ;;  %v7062_v53 = vpop.f32.mrb[197].mxu1 }
 0x283   : > { %v7041_v30 = vadd.f32 %v7040_v19, %v7039_v12  ;;  %v7063_v4 = vadd.f32 %v7062_v53, %v7061_v42  ;;  %v7042_v38 = vpop.f32.mrb[198].mxu0  ;;  %v7064_v22 = vpop.f32.mrb[198].mxu1 }
 0x284   : > { %v7043_v55 = vpop.f32.mrb[199].mxu0  ;;  %v7065_v28 = vpop.f32.mrb[199].mxu1 }
 0x285   : > { %v9357_v48 = vadd.f32 %v7041_v30, %v4524_v40  ;;  %v4686_v15 = vadd.f32 %v7063_v4, %v9276_v41  ;;  %v7044_v52 = vadd.f32 %v7043_v55, %v7042_v38  ;;  %v7066_v50 = vadd.f32 %v7065_v28, %v7064_v22 }
 0x287   : > { %v9360_v61 = vadd.f32 %v7044_v52, %v4527_v25  ;;  %v4689_v0 = vadd.f32 %v7066_v50, %v9279_v16 }
 0x289   : > { %v7067_v11 = vpop.f32.mrb[200].mxu1  ;;  %v7143_v36 = vpop.f32.mrb[200].mxu0 }
 0x28a   : > { %v7068_v35 = vpop.f32.mrb[201].mxu1  ;;  %v7144_v60 = vpop.f32.mrb[201].mxu0 }
 0x28b   : > { %v7069_v27 = vadd.f32 %v7068_v35, %v7067_v11  ;;  %v7145_v46 = vadd.f32 %v7144_v60, %v7143_v36  ;;  %v7070_v2 = vpop.f32.mrb[202].mxu1  ;;  %v7146_v45 = vpop.f32.mrb[202].mxu0 }
 0x28c   : > { %v7071_v21 = vpop.f32.mrb[203].mxu1  ;;  %v7147_v47 = vpop.f32.mrb[203].mxu0 }
 0x28d   : > { %v4694_v20 = vadd.f32 %v7069_v27, %v9287_v13  ;;  %v9364_v18 = vadd.f32 %v7145_v46, %v4686_v15  ;;  %v7072_v41 = vadd.f32 %v7071_v21, %v7070_v2  ;;  %v7148_v39 = vadd.f32 %v7147_v47, %v7146_v45 }
 0x28f   : > { %v4697_v26 = vadd.f32 %v7072_v41, %v9290_v44  ;;  %v9367_v57 = vadd.f32 %v7148_v39, %v4689_v0 }
 0x291   : > { %v7073_v16 = vpop.f32.mrb[204].mxu1  ;;  %v7149_v59 = vpop.f32.mrb[204].mxu0 }
 0x292   : > { %v7074_v43 = vpop.f32.mrb[205].mxu1  ;;  %v7150_v3 = vpop.f32.mrb[205].mxu0 }
 0x293   : > { %v7075_v7 = vadd.f32 %v7074_v43, %v7073_v16  ;;  %v7151_v49 = vadd.f32 %v7150_v3, %v7149_v59  ;;  %v7076_v29 = vpop.f32.mrb[206].mxu1  ;;  %v7152_v24 = vpop.f32.mrb[206].mxu0 }
 0x294   : > { %v7077_v9 = vpop.f32.mrb[207].mxu1  ;;  %v7153_v40 = vpop.f32.mrb[207].mxu0 }
 0x295   : > { %v4702_v13 = vadd.f32 %v7075_v7, %v9298_v5  ;;  %v9370_v10 = vadd.f32 %v7151_v49, %v4694_v20  ;;  %v7078_v33 = vadd.f32 %v7077_v9, %v7076_v29  ;;  %v7154_v25 = vadd.f32 %v7153_v40, %v7152_v24 }
 0x297   : > { %v4705_v44 = vadd.f32 %v7078_v33, %v9301_v58  ;;  %v9373_v12 = vadd.f32 %v7154_v25, %v4697_v26 }
 0x299   : > { %v7079_v42 = vpop.f32.mrb[208].mxu1  ;;  %v7155_v19 = vpop.f32.mrb[208].mxu0 }
 0x29a   : > { %v7080_v53 = vpop.f32.mrb[209].mxu1  ;;  %v7156_v30 = vpop.f32.mrb[209].mxu0 }
 0x29b   : > { %v7081_v4 = vadd.f32 %v7080_v53, %v7079_v42  ;;  %v7157_v38 = vadd.f32 %v7156_v30, %v7155_v19  ;;  %v7082_v22 = vpop.f32.mrb[210].mxu1  ;;  %v7158_v55 = vpop.f32.mrb[210].mxu0 }
 0x29c   : > { %v7083_v28 = vpop.f32.mrb[211].mxu1  ;;  %v7159_v15 = vpop.f32.mrb[211].mxu0 }
 0x29d   : > { %v4710_v5 = vadd.f32 %v7081_v4, %v9309_v31  ;;  %v9376_v52 = vadd.f32 %v7157_v38, %v4702_v13  ;;  %v7084_v50 = vadd.f32 %v7083_v28, %v7082_v22  ;;  %v7160_v0 = vadd.f32 %v7159_v15, %v7158_v55 }
 0x29f   : > { %v4713_v58 = vadd.f32 %v7084_v50, %v9312_v34  ;;  %v9379_v11 = vadd.f32 %v7160_v0, %v4705_v44 }
 0x2a1   : > { %v7085_v36 = vpop.f32.mrb[212].mxu1  ;;  %v7161_v35 = vpop.f32.mrb[212].mxu0 }
 0x2a2   : > { %v7086_v60 = vpop.f32.mrb[213].mxu1  ;;  %v7162_v27 = vpop.f32.mrb[213].mxu0 }
 0x2a3   : > { %v7087_v46 = vadd.f32 %v7086_v60, %v7085_v36  ;;  %v7163_v2 = vadd.f32 %v7162_v27, %v7161_v35  ;;  %v7088_v45 = vpop.f32.mrb[214].mxu1  ;;  %v7164_v21 = vpop.f32.mrb[214].mxu0 }
 0x2a4   : > { %v7089_v47 = vpop.f32.mrb[215].mxu1  ;;  %v7165_v20 = vpop.f32.mrb[215].mxu0 }
 0x2a5   : > { %v4718_v31 = vadd.f32 %v7087_v46, %v9319_v56  ;;  %v9382_v41 = vadd.f32 %v7163_v2, %v4710_v5  ;;  %v7090_v39 = vadd.f32 %v7089_v47, %v7088_v45  ;;  %v7166_v26 = vadd.f32 %v7165_v20, %v7164_v21 }
 0x2a7   : > { %v4721_v34 = vadd.f32 %v7090_v39, %v9322_v8  ;;  %v9385_v16 = vadd.f32 %v7166_v26, %v4713_v58 }
 0x2a9   : > { %v7091_v59 = vpop.f32.mrb[216].mxu1  ;;  %v7167_v43 = vpop.f32.mrb[216].mxu0 }
 0x2aa   : > { %v7092_v3 = vpop.f32.mrb[217].mxu1  ;;  %v7168_v7 = vpop.f32.mrb[217].mxu0 }
 0x2ab   : > { %v7093_v49 = vadd.f32 %v7092_v3, %v7091_v59  ;;  %v7169_v29 = vadd.f32 %v7168_v7, %v7167_v43  ;;  %v7094_v24 = vpop.f32.mrb[218].mxu1  ;;  %v7170_v9 = vpop.f32.mrb[218].mxu0 }
 0x2ac   : > { %v7095_v40 = vpop.f32.mrb[219].mxu1  ;;  %v7171_v13 = vpop.f32.mrb[219].mxu0 }
 0x2ad   : > { %v4726_v56 = vadd.f32 %v7093_v49, %v9328_v51  ;;  %v9388_v33 = vadd.f32 %v7169_v29, %v4718_v31  ;;  %v7096_v25 = vadd.f32 %v7095_v40, %v7094_v24  ;;  %v7172_v44 = vadd.f32 %v7171_v13, %v7170_v9 }
 0x2af   : > { %v4729_v8 = vadd.f32 %v7096_v25, %v9331_v62  ;;  %v9391_v42 = vadd.f32 %v7172_v44, %v4721_v34 }
 0x2b1   : > { %v7097_v19 = vpop.f32.mrb[220].mxu1  ;;  %v7173_v53 = vpop.f32.mrb[220].mxu0 }
 0x2b2   : > { %v7098_v30 = vpop.f32.mrb[221].mxu1  ;;  %v7174_v4 = vpop.f32.mrb[221].mxu0 }
 0x2b3   : > { %v7099_v38 = vadd.f32 %v7098_v30, %v7097_v19  ;;  %v7175_v22 = vadd.f32 %v7174_v4, %v7173_v53  ;;  %v7100_v55 = vpop.f32.mrb[222].mxu1  ;;  %v7176_v28 = vpop.f32.mrb[222].mxu0 }
 0x2b4   : > { %v7101_v15 = vpop.f32.mrb[223].mxu1  ;;  %v7177_v5 = vpop.f32.mrb[223].mxu0 }
 0x2b5   : > { %v4734_v51 = vadd.f32 %v7099_v38, %v9334_v63  ;;  %v9394_v50 = vadd.f32 %v7175_v22, %v4726_v56  ;;  %v7102_v0 = vadd.f32 %v7101_v15, %v7100_v55  ;;  %v7178_v58 = vadd.f32 %v7177_v5, %v7176_v28 }
 0x2b7   : > { %v4737_v62 = vadd.f32 %v7102_v0, %v9337_v14  ;;  %v9397_v36 = vadd.f32 %v7178_v58, %v4729_v8 }
 0x2b9   : > { %v7103_v35 = vpop.f32.mrb[224].mxu1  ;;  %v7179_v60 = vpop.f32.mrb[224].mxu0 }
 0x2ba   : > { %v7104_v27 = vpop.f32.mrb[225].mxu1  ;;  %v7180_v46 = vpop.f32.mrb[225].mxu0 }
 0x2bb   : > { %v7105_v2 = vadd.f32 %v7104_v27, %v7103_v35  ;;  %v7181_v45 = vadd.f32 %v7180_v46, %v7179_v60  ;;  %v7106_v21 = vpop.f32.mrb[226].mxu1  ;;  %v7182_v47 = vpop.f32.mrb[226].mxu0 }
 0x2bc   : > { %v7107_v20 = vpop.f32.mrb[227].mxu1  ;;  %v7183_v31 = vpop.f32.mrb[227].mxu0 }
 0x2bd   : > { %v4742_v63 = vadd.f32 %v7105_v2, %v9340_v1  ;;  %v9400_v39 = vadd.f32 %v7181_v45, %v4734_v51  ;;  %v7108_v26 = vadd.f32 %v7107_v20, %v7106_v21  ;;  %v7184_v34 = vadd.f32 %v7183_v31, %v7182_v47 }
 0x2bf   : > { %v4745_v14 = vadd.f32 %v7108_v26, %v9343_v23  ;;  %v9403_v59 = vadd.f32 %v7184_v34, %v4737_v62 }
 0x2c1   : > { %v7109_v43 = vpop.f32.mrb[228].mxu1  ;;  %v7185_v3 = vpop.f32.mrb[228].mxu0 }
 0x2c2   : > { %v7110_v7 = vpop.f32.mrb[229].mxu1  ;;  %v7186_v49 = vpop.f32.mrb[229].mxu0 }
 0x2c3   : > { %v7111_v29 = vadd.f32 %v7110_v7, %v7109_v43  ;;  %v7187_v24 = vadd.f32 %v7186_v49, %v7185_v3  ;;  %v7112_v9 = vpop.f32.mrb[230].mxu1  ;;  %v7188_v40 = vpop.f32.mrb[230].mxu0 }
 0x2c4   : > { %v7113_v13 = vpop.f32.mrb[231].mxu1  ;;  %v7189_v56 = vpop.f32.mrb[231].mxu0 }
 0x2c5   : > { %v4750_v1 = vadd.f32 %v7111_v29, %v9346_v54  ;;  %v9406_v25 = vadd.f32 %v7187_v24, %v4742_v63  ;;  %v7114_v44 = vadd.f32 %v7113_v13, %v7112_v9  ;;  %v7190_v8 = vadd.f32 %v7189_v56, %v7188_v40 }
 0x2c7   : > { %v4753_v23 = vadd.f32 %v7114_v44, %v9349_v17  ;;  %v9409_v19 = vadd.f32 %v7190_v8, %v4745_v14 }
 0x2c9   : > { %v7115_v53 = vpop.f32.mrb[232].mxu1  ;;  %v7191_v30 = vpop.f32.mrb[232].mxu0 }
 0x2ca   : > { %v7116_v4 = vpop.f32.mrb[233].mxu1  ;;  %v7192_v38 = vpop.f32.mrb[233].mxu0 }
 0x2cb   : > { %v7117_v22 = vadd.f32 %v7116_v4, %v7115_v53  ;;  %v7193_v55 = vadd.f32 %v7192_v38, %v7191_v30  ;;  %v7118_v28 = vpop.f32.mrb[234].mxu1  ;;  %v7194_v15 = vpop.f32.mrb[234].mxu0  ;;  %v5136_v53 = vld [vmem:[%s9430_s30 + $0x8] sm:$0xff] }
 0x2cc   : > { %v7119_v5 = vpop.f32.mrb[235].mxu1  ;;  %v7195_v51 = vpop.f32.mrb[235].mxu0 }
 0x2cd   : > { %v4758_v54 = vadd.f32 %v7117_v22, %v9352_v37  ;;  %v9412_v0 = vadd.f32 %v7193_v55, %v4750_v1  ;;  %v7120_v58 = vadd.f32 %v7119_v5, %v7118_v28  ;;  %v7196_v62 = vadd.f32 %v7195_v51, %v7194_v15  ;;  %v5137_v15 = vld [vmem:[%s9430_s30 + $0x10] sm:$0xff]  ;;  %v5138_v5 = vld [vmem:[%s9430_s30 + $0x18] sm:$0xff]  ;;  %v9446_v51 = vld [vmem:[%s9430_s30 + $0x28] sm:$0xff] }
 0x2ce   : > { %v5158_v22 = vmul.f32 0.9, %v5136_v53  ;;  %v5159_v53 = vmul.f32 0.9, %v5137_v15 }
 0x2cf   : > { %v4761_v17 = vadd.f32 %v7120_v58, %v9355_v32  ;;  %v9415_v35 = vadd.f32 %v7196_v62, %v4753_v23  ;;  %v5135_v23 = vld [vmem:[%s9430_s30] sm:$0xff]  ;;  %v9452_v58 = vld [vmem:[%s9430_s30 + $0x38] sm:$0xff]  ;;  %v9458_v62 = vld [vmem:[%s9430_s30 + $0x48] sm:$0xff] }
 0x2d0   : > { %v5157_v38 = vmul.f32 0.9, %v5135_v23 }
 0x2d1   : > { %v7121_v60 = vpop.f32.mrb[236].mxu1  ;;  %v7197_v27 = vpop.f32.mrb[236].mxu0 }
 0x2d2   : > { %v7122_v46 = vpop.f32.mrb[237].mxu1  ;;  %v7198_v2 = vpop.f32.mrb[237].mxu0 }
 0x2d3   : > { %v7123_v45 = vadd.f32 %v7122_v46, %v7121_v60  ;;  %v7199_v21 = vadd.f32 %v7198_v2, %v7197_v27  ;;  %v7124_v47 = vpop.f32.mrb[238].mxu1  ;;  %v7200_v20 = vpop.f32.mrb[238].mxu0  ;;  %v9464_v60 = vld [vmem:[%s9430_s30 + $0x58] sm:$0xff]  ;;  %v9467_v27 = vld [vmem:[%s9430_s30 + $0x60] sm:$0xff]  ;;  %v9470_v46 = vld [vmem:[%s9430_s30 + $0x68] sm:$0xff] }
 0x2d4   : > { %v7125_v31 = vpop.f32.mrb[239].mxu1  ;;  %v7201_v63 = vpop.f32.mrb[239].mxu0  ;;  %v9473_v2 = vld [vmem:[%s9430_s30 + $0x70] sm:$0xff] }
 0x2d5   : > { %v4766_v37 = vadd.f32 %v7123_v45, %v9357_v48  ;;  %v9418_v26 = vadd.f32 %v7199_v21, %v4758_v54  ;;  %v7126_v34 = vadd.f32 %v7125_v31, %v7124_v47  ;;  %v7202_v14 = vadd.f32 %v7201_v63, %v7200_v20  ;;  %v9449_v54 = vld [vmem:[%s9430_s30 + $0x30] sm:$0xff]  ;;  %v9476_v45 = vld [vmem:[%s9430_s30 + $0x78] sm:$0xff]  ;;  %v9479_v31 = vld [vmem:[%s9430_s30 + $0x80] sm:$0xff] }
 0x2d6   : > { %v9482_v63 = vld [vmem:[%s9430_s30 + $0x88] sm:$0xff] }
 0x2d7   : > { %v4769_v32 = vadd.f32 %v7126_v34, %v9360_v61  ;;  %v9421_v43 = vadd.f32 %v7202_v14, %v4761_v17  ;;  %v9461_v17 = vld [vmem:[%s9430_s30 + $0x50] sm:$0xff] }
 0x2d9   : > { %v7203_v3 = vpop.f32.mrb[240].mxu0  ;;  %v7225_v7 = vpop.f32.mrb[240].mxu1 }
 0x2da   : > { %v7204_v49 = vpop.f32.mrb[241].mxu0  ;;  %v7226_v29 = vpop.f32.mrb[241].mxu1 }
 0x2db   : > { %v7205_v48 = vadd.f32 %v7204_v49, %v7203_v3  ;;  %v7227_v24 = vadd.f32 %v7226_v29, %v7225_v7  ;;  %v7206_v9 = vpop.f32.mrb[242].mxu0  ;;  %v7228_v61 = vpop.f32.mrb[242].mxu1  ;;  %v9488_v3 = vld [vmem:[%s9430_s30 + $0x98] sm:$0xff]  ;;  %v9491_v7 = vld [vmem:[%s9430_s30 + $0xa0] sm:$0xff]  ;;  %v9500_v49 = vld [vmem:[%s9430_s30 + $0xa8] sm:$0xff] }
 0x2dc   : > { %v7207_v40 = vpop.f32.mrb[243].mxu0  ;;  %v7229_v13 = vpop.f32.mrb[243].mxu1 }
 0x2dd   : > { %v9432_v56 = vadd.f32 %v7205_v48, %v4766_v37  ;;  %v7208_v1 = vadd.f32 %v7207_v40, %v7206_v9  ;;  %v7230_v44 = vadd.f32 %v7229_v13, %v7228_v61  ;;  %v4928_v8 = vadd.f32 %v7227_v24, %v9364_v18  ;;  %v9443_v18 = vld [vmem:[%s9430_s30 + $0x20] sm:$0xff]  ;;  %v9485_v37 = vld [vmem:[%s9430_s30 + $0x90] sm:$0xff] }
 0x2df   : > { %v9437_v30 = vadd.f32 %v7208_v1, %v4769_v32  ;;  %v4931_v4 = vadd.f32 %v7230_v44, %v9367_v57  ;;  %v9455_v57 = vld [vmem:[%s9430_s30 + $0x40] sm:$0xff] }
 0x2e1   : > { %v7231_v55 = vpop.f32.mrb[244].mxu1  ;;  %v5048_v28 = vpop.f32.mrb[244].mxu0 }
 0x2e2   : > { %v5049_v21 = vadd.f32 %v5048_v28, %v4928_v8  ;;  %v7232_v47 = vpop.f32.mrb[245].mxu1  ;;  %v7328_v20 = vpop.f32.mrb[245].mxu0 }
 0x2e3   : > { %v7233_v34 = vadd.f32 %v7232_v47, %v7231_v55  ;;  %v7234_v14 = vpop.f32.mrb[246].mxu1  ;;  %v5051_v32 = vpop.f32.mrb[246].mxu0  ;;  %v5160_v47 = vmul.f32 0.9, %v5138_v5 }
 0x2e4   : > { %v5179_v29 = vadd.f32 %v5157_v38, %v5049_v21  ;;  %v5052_v48 = vadd.f32 %v5051_v32, %v4931_v4  ;;  %v7235_v24 = vpop.f32.mrb[247].mxu1  ;;  %v7329_v9 = vpop.f32.mrb[247].mxu0 }
 0x2e5   : > { %v7236_v61 = vadd.f32 %v7235_v24, %v7234_v14  ;;  %v4936_v40 = vadd.f32 %v7233_v34, %v9370_v10 }
 0x2e6   : > { %v6174_v13 = vadd.f32 -1.0, %v5179_v29  ;;  %v5180_v1 = vadd.f32 %v5158_v22, %v5052_v48  ;;  %5553 = vst [vmem:[%s9497_s8] sm:$0xff] %v5179_v29 }
 0x2e7   : > { %v4939_v44 = vadd.f32 %v7236_v61, %v9373_v12 }
 0x2e8   : > { %v5245_v8 = vsub.f32 0.0, %v6174_v13  ;;  %v6175_v23 = vadd.f32 -1.0, %v5180_v1  ;;  %5554 = vst [vmem:[%s9497_s8 + $0x8] sm:$0xff] %v5180_v1 }
 0x2e9   : > { %v7237_v55 = vpop.f32.mrb[248].mxu1  ;;  %v5056_v28 = vpop.f32.mrb[248].mxu0 }
 0x2ea   : > { %v5267_v20 = vmul.f32 1.442695, %v5245_v8  ;;  %v5246_v38 = vsub.f32 0.0, %v6175_v23  ;;  %v5057_v4 = vadd.f32 %v5056_v28, %v4936_v40  ;;  %v7238_v21 = vpop.f32.mrb[249].mxu1  ;;  %v7332_v14 = vpop.f32.mrb[249].mxu0 }
 0x2eb   : > { %v7239_v32 = vadd.f32 %v7238_v21, %v7237_v55  ;;  %v7240_v10 = vpop.f32.mrb[250].mxu1  ;;  %v5059_v34 = vpop.f32.mrb[250].mxu0  ;;  %v5161_v8 = vmul.f32 0.9, %v9443_v18 }
 0x2ec   : > { %8004 = vpow2.f32 %v5267_v20  ;;  %v5269_v22 = vmul.f32 1.442695, %v5246_v38  ;;  %v5181_v12 = vadd.f32 %v5159_v53, %v5057_v4  ;;  %v5060_v29 = vadd.f32 %v5059_v34, %v4939_v44  ;;  %v7241_v48 = vpop.f32.mrb[251].mxu1  ;;  %v7333_v15 = vpop.f32.mrb[251].mxu0 }
 0x2ed   : > { %v7242_v24 = vadd.f32 %v7241_v48, %v7240_v10  ;;  %v4944_v9 = vadd.f32 %v7239_v32, %v9376_v52  ;;  %v5162_v44 = vmul.f32 0.9, %v9446_v51 }
 0x2ee   : > { %8006 = vpow2.f32 %v5269_v22  ;;  %v6176_v5 = vadd.f32 -1.0, %v5181_v12  ;;  %v5182_v61 = vadd.f32 %v5160_v47, %v5060_v29  ;;  %5555 = vst [vmem:[%s9497_s8 + $0x10] sm:$0xff] %v5181_v12 }
 0x2ef   : > { %v4947_v40 = vadd.f32 %v7242_v24, %v9379_v11 }
 0x2f0   : > { %v5247_v13 = vsub.f32 0.0, %v6176_v5  ;;  %v6177_v1 = vadd.f32 -1.0, %v5182_v61  ;;  %5556 = vst [vmem:[%s9497_s8 + $0x18] sm:$0xff] %v5182_v61  ;;  %v5163_v61 = vmul.f32 0.9, %v9449_v54 }
 0x2f1   : > { %v7243_v23 = vpop.f32.mrb[252].mxu1  ;;  %v5064_v55 = vpop.f32.mrb[252].mxu0 }
 0x2f2   : > { %v5271_v53 = vmul.f32 1.442695, %v5247_v13  ;;  %v5248_v28 = vsub.f32 0.0, %v6177_v1  ;;  %v5065_v20 = vadd.f32 %v5064_v55, %v4944_v9  ;;  %v7244_v38 = vpop.f32.mrb[253].mxu1  ;;  %v7336_v52 = vpop.f32.mrb[253].mxu0 }
 0x2f3   : > { %v7245_v4 = vadd.f32 %v7244_v38, %v7243_v23  ;;  %v7246_v47 = vpop.f32.mrb[254].mxu1  ;;  %v5067_v21 = vpop.f32.mrb[254].mxu0 }
 0x2f4   : > { %8008 = vpow2.f32 %v5271_v53  ;;  %v5273_v11 = vmul.f32 1.442695, %v5248_v28  ;;  %v5183_v14 = vadd.f32 %v5161_v8, %v5065_v20  ;;  %v5068_v32 = vadd.f32 %v5067_v21, %v4947_v40  ;;  %v7247_v18 = vpop.f32.mrb[255].mxu1  ;;  %v7337_v10 = vpop.f32.mrb[255].mxu0 }
 0x2f5   : > { %v7248_v34 = vadd.f32 %v7247_v18, %v7246_v47  ;;  %v4952_v22 = vadd.f32 %v7245_v4, %v9382_v41  ;;  %v5164_v41 = vmul.f32 0.9, %v9452_v58 }
 0x2f6   : > { %v8005_v51 = vpop.eup %8004  ;;  %8010 = vpow2.f32 %v5273_v11  ;;  %v6178_v12 = vadd.f32 -1.0, %v5183_v14  ;;  %v5184_v29 = vadd.f32 %v5162_v44, %v5068_v32  ;;  %5557 = vst [vmem:[%s9497_s8 + $0x20] sm:$0xff] %v5183_v14 }
 0x2f7   : > { %v5311_v48 = vadd.f32 1.0, %v8005_v51  ;;  %v4955_v15 = vadd.f32 %v7248_v34, %v9385_v16 }
 0x2f8   : > { %v8007_v24 = vpop.eup %8006  ;;  %v5249_v9 = vsub.f32 0.0, %v6178_v12  ;;  %v6179_v5 = vadd.f32 -1.0, %v5184_v29  ;;  %5558 = vst [vmem:[%s9497_s8 + $0x28] sm:$0xff] %v5184_v29  ;;  %v5223_v12 = vld [vmem:[%s9523_s11] sm:$0xff] }
 0x2f9   : > { %8012 = vrcp.f32 %v5311_v48  ;;  %v5312_v40 = vadd.f32 1.0, %v8007_v24  ;;  %v7249_v13 = vpop.f32.mrb[0].mxu1  ;;  %v5072_v1 = vpop.f32.mrb[0].mxu0 }
 0x2fa   : > { %v5275_v8 = vmul.f32 1.442695, %v5249_v9  ;;  %v5250_v23 = vsub.f32 0.0, %v6179_v5  ;;  %v5073_v55 = vadd.f32 %v5072_v1, %v4952_v22  ;;  %v7250_v44 = vpop.f32.mrb[1].mxu1  ;;  %v7340_v53 = vpop.f32.mrb[1].mxu0 }
 0x2fb   : > { %8014 = vrcp.f32 %v5312_v40  ;;  %v7251_v16 = vadd.f32 %v7250_v44, %v7249_v13  ;;  %v7252_v28 = vpop.f32.mrb[2].mxu1  ;;  %v5075_v20 = vpop.f32.mrb[2].mxu0 }
 0x2fc   : > { %8016 = vpow2.f32 %v5275_v8  ;;  %v5277_v54 = vmul.f32 1.442695, %v5250_v23  ;;  %v5185_v38 = vadd.f32 %v5163_v61, %v5073_v55  ;;  %v5076_v52 = vadd.f32 %v5075_v20, %v4955_v15  ;;  %v7253_v4 = vpop.f32.mrb[3].mxu1  ;;  %v7341_v47 = vpop.f32.mrb[3].mxu0 }
 0x2fd   : > { %v7254_v21 = vadd.f32 %v7253_v4, %v7252_v28  ;;  %v4960_v58 = vadd.f32 %v7251_v16, %v9388_v33  ;;  %v5165_v33 = vmul.f32 0.9, %v9455_v57  ;;  %v5166_v57 = vmul.f32 0.9, %v9458_v62 }
 0x2fe   : > { %v8009_v11 = vpop.eup %8008  ;;  %8018 = vpow2.f32 %v5277_v54  ;;  %v6180_v14 = vadd.f32 -1.0, %v5185_v38  ;;  %v5186_v32 = vadd.f32 %v5164_v41, %v5076_v52  ;;  %5559 = vst [vmem:[%s9497_s8 + $0x30] sm:$0xff] %v5185_v38 }
 0x2ff   : > { %v5313_v18 = vadd.f32 1.0, %v8009_v11  ;;  %v4963_v10 = vadd.f32 %v7254_v21, %v9391_v42  ;;  %v5224_v42 = vld [vmem:[%s9523_s11 + $0x8] sm:$0xff] }
 0x300   : > { %v8011_v34 = vpop.eup %8010  ;;  %v5251_v22 = vsub.f32 0.0, %v6180_v14  ;;  %v6181_v51 = vadd.f32 -1.0, %v5186_v32  ;;  %5560 = vst [vmem:[%s9497_s8 + $0x38] sm:$0xff] %v5186_v32  ;;  %v5167_v32 = vmul.f32 0.9, %v9461_v17 }
 0x301   : > { %8020 = vrcp.f32 %v5313_v18  ;;  %v5314_v29 = vadd.f32 1.0, %v8011_v34  ;;  %v7255_v48 = vpop.f32.mrb[4].mxu1  ;;  %v5080_v15 = vpop.f32.mrb[4].mxu0  ;;  %v5225_v18 = vld [vmem:[%s9523_s11 + $0x10] sm:$0xff] }
 0x302   : > { %v5279_v24 = vmul.f32 1.442695, %v5251_v22  ;;  %v5252_v9 = vsub.f32 0.0, %v6181_v51  ;;  %v5081_v5 = vadd.f32 %v5080_v15, %v4960_v58  ;;  %v7256_v61 = vpop.f32.mrb[5].mxu1  ;;  %v7344_v40 = vpop.f32.mrb[5].mxu0 }
 0x303   : > { %v8013_v13 = vpop.eup %8012  ;;  %8022 = vrcp.f32 %v5314_v29  ;;  %v7257_v1 = vadd.f32 %v7256_v61, %v7255_v48  ;;  %v7258_v41 = vpop.f32.mrb[6].mxu1 }
 0x304   : > { %v5083_v8 = vpop.f32.mrb[6].mxu0  ;;  %vm5377_vm1 = vcmp.lt.f32.partialorder %v5223_v12, %v8013_v13  ;;  %8024 = vpow2.f32 %v5279_v24  ;;  %v5281_v23 = vmul.f32 1.442695, %v5252_v9  ;;  %v5187_v55 = vadd.f32 %v5165_v33, %v5081_v5  ;;  %v7259_v44 = vpop.f32.mrb[7].mxu1  ;;  %v5226_v24 = vld [vmem:[%s9523_s11 + $0x18] sm:$0xff] }
 0x305   : > { %v7345_v53 = vpop.f32.mrb[7].mxu0  ;;  %v8015_v16 = vpop.eup %8014  ;;  %v5084_v28 = vadd.f32 %v5083_v8, %v4963_v10  ;;  %v7260_v20 = vadd.f32 %v7259_v44, %v7258_v41  ;;  %v4968_v54 = vadd.f32 %v7257_v1, %v9394_v50  ;;  %v6196_v52 = vsel %vm5377_vm1, 1.0, %v8100_v6 }
 0x306   : > { %v8017_v38 = vpop.eup %8016  ;;  %vm5378_vm2 = vcmp.lt.f32.partialorder %v5224_v42, %v8015_v16  ;;  %8026 = vpow2.f32 %v5281_v23  ;;  %v6182_v62 = vadd.f32 -1.0, %v5187_v55  ;;  %5561 = vst [vmem:[%s9497_s8 + $0x40] sm:$0xff] %v5187_v55 }
 0x307   : > { %v6197_v4 = vsel %vm5378_vm2, 1.0, %v8100_v6  ;;  %v5315_v47 = vadd.f32 1.0, %v8017_v38  ;;  %v5188_v21 = vadd.f32 %v5166_v57, %v5084_v28  ;;  %v4971_v50 = vadd.f32 %v7260_v20, %v9397_v36 }
 0x308   : > { %v8019_v58 = vpop.eup %8018  ;;  %v6265_v11 = vpack.c.bf16 %v6197_v4, %v6196_v52  ;;  %v5253_v14 = vsub.f32 0.0, %v6182_v62  ;;  %v5168_v36 = vmul.f32 0.9, %v9464_v60  ;;  %v5169_v62 = vmul.f32 0.9, %v9467_v27  ;;  %v5227_v4 = vld [vmem:[%s9523_s11 + $0x20] sm:$0xff] }
 0x309   : > { %8028 = vrcp.f32 %v5315_v47  ;;  %v5316_v10 = vadd.f32 1.0, %v8019_v58  ;;  %v6183_v34 = vadd.f32 -1.0, %v5188_v21  ;;  %v7261_v22 = vpop.f32.mrb[8].mxu1  ;;  %v5088_v51 = vpop.f32.mrb[8].mxu0  ;;  %5562 = vst [vmem:[%s9497_s8 + $0x48] sm:$0xff] %v5188_v21 }
 0x30a   : > { %6266 = vst [vmem:[%s9539_s14] sm:$0xff] %v6265_v11   ;;  %v5283_v33 = vmul.f32 1.442695, %v5253_v14  ;;  %v5089_v12 = vadd.f32 %v5088_v51, %v4968_v54  ;;  %v7262_v29 = vpop.f32.mrb[9].mxu1  ;;  %v7348_v48 = vpop.f32.mrb[9].mxu0  ;;  %v5170_v27 = vmul.f32 0.9, %v9470_v46 }
 0x30b   : > { %v8021_v15 = vpop.eup %8020  ;;  %8030 = vrcp.f32 %v5316_v10  ;;  %v5254_v9 = vsub.f32 0.0, %v6183_v34  ;;  %v7263_v5 = vadd.f32 %v7262_v29, %v7261_v22  ;;  %v7264_v17 = vpop.f32.mrb[10].mxu1  ;;  %v5228_v10 = vld [vmem:[%s9523_s11 + $0x28] sm:$0xff] }
 0x30c   : > { %v5091_v61 = vpop.f32.mrb[10].mxu0  ;;  %vm5379_vm3 = vcmp.lt.f32.partialorder %v5225_v18, %v8021_v15  ;;  %8032 = vpow2.f32 %v5283_v33  ;;  %v5189_v40 = vadd.f32 %v5167_v32, %v5089_v12  ;;  %v7265_v42 = vpop.f32.mrb[11].mxu1 }
 0x30d   : > { %v5092_v13 = vadd.f32 %v5091_v61, %v4971_v50  ;;  %v7349_v1 = vpop.f32.mrb[11].mxu0  ;;  %v8023_v41 = vpop.eup %8022  ;;  %v5285_v8 = vmul.f32 1.442695, %v5254_v9  ;;  %v7266_v57 = vadd.f32 %v7265_v42, %v7264_v17  ;;  %v4976_v23 = vadd.f32 %v7263_v5, %v9400_v39 }
 0x30e   : > { %v8025_v60 = vpop.eup %8024  ;;  %v6198_v55 = vsel %vm5379_vm3, 1.0, %v8100_v6  ;;  %vm5380_vm4 = vcmp.lt.f32.partialorder %v5226_v24, %v8023_v41  ;;  %v6184_v44 = vadd.f32 -1.0, %v5189_v40  ;;  %5563 = vst [vmem:[%s9497_s8 + $0x50] sm:$0xff] %v5189_v40 }
 0x30f   : > { %v5190_v53 = vadd.f32 %v5168_v36, %v5092_v13  ;;  %v6199_v16 = vsel %vm5380_vm4, 1.0, %v8100_v6  ;;  %v5317_v28 = vadd.f32 1.0, %v8025_v60  ;;  %8034 = vpow2.f32 %v5285_v8 }
 0x310   : > { %v4979_v20 = vadd.f32 %v7266_v57, %v9403_v59  ;;  %v8027_v54 = vpop.eup %8026  ;;  %v6268_v38 = vpack.c.bf16 %v6199_v16, %v6198_v55  ;;  %v5255_v52 = vsub.f32 0.0, %v6184_v44  ;;  %v5171_v8 = vmul.f32 0.9, %v9473_v2  ;;  %v5229_v57 = vld [vmem:[%s9523_s11 + $0x30] sm:$0xff] }
 0x311   : > { %v6185_v39 = vadd.f32 -1.0, %v5190_v53  ;;  %5564 = vst [vmem:[%s9497_s8 + $0x58] sm:$0xff] %v5190_v53  ;;  %8036 = vrcp.f32 %v5317_v28  ;;  %v5318_v47 = vadd.f32 1.0, %v8027_v54  ;;  %v7267_v21 = vpop.f32.mrb[12].mxu1  ;;  %v5096_v50 = vpop.f32.mrb[12].mxu0 }
 0x312   : > { %6297 = vst [vmem:[%s9539_s14 + $0x8] sm:$0xff] %v6268_v38   ;;  %v5287_v58 = vmul.f32 1.442695, %v5255_v52  ;;  %v5097_v14 = vadd.f32 %v5096_v50, %v4976_v23  ;;  %v7268_v32 = vpop.f32.mrb[13].mxu1  ;;  %v7352_v18 = vpop.f32.mrb[13].mxu0  ;;  %v5230_v38 = vld [vmem:[%s9523_s11 + $0x38] sm:$0xff] }
 0x313   : > { %v5256_v11 = vsub.f32 0.0, %v6185_v39  ;;  %v8029_v59 = vpop.eup %8028  ;;  %8038 = vrcp.f32 %v5318_v47  ;;  %v7269_v34 = vadd.f32 %v7268_v32, %v7267_v21  ;;  %v7270_v22 = vpop.f32.mrb[14].mxu1  ;;  %v5172_v44 = vmul.f32 0.9, %v9476_v45 }
 0x314   : > { %v5099_v51 = vpop.f32.mrb[14].mxu0  ;;  %vm5381_vm5 = vcmp.lt.f32.partialorder %v5227_v4, %v8029_v59  ;;  %8040 = vpow2.f32 %v5287_v58  ;;  %v5191_v12 = vadd.f32 %v5169_v62, %v5097_v14  ;;  %v7271_v29 = vpop.f32.mrb[15].mxu1 }
 0x315   : > { %v5289_v33 = vmul.f32 1.442695, %v5256_v11  ;;  %v7353_v48 = vpop.f32.mrb[15].mxu0  ;;  %v8031_v36 = vpop.eup %8030  ;;  %v5100_v15 = vadd.f32 %v5099_v51, %v4979_v20  ;;  %v7272_v24 = vadd.f32 %v7271_v29, %v7270_v22  ;;  %v4984_v9 = vadd.f32 %v7269_v34, %v9406_v25 }
 0x316   : > { %v8033_v5 = vpop.eup %8032  ;;  %v6200_v17 = vsel %vm5381_vm5, 1.0, %v8100_v6  ;;  %vm5382_vm6 = vcmp.lt.f32.partialorder %v5228_v10, %v8031_v36  ;;  %v6186_v61 = vadd.f32 -1.0, %v5191_v12  ;;  %5565 = vst [vmem:[%s9497_s8 + $0x60] sm:$0xff] %v5191_v12  ;;  %v5173_v48 = vmul.f32 0.9, %v9479_v31 }
 0x317   : > { %8042 = vpow2.f32 %v5289_v33  ;;  %v6201_v46 = vsel %vm5382_vm6, 1.0, %v8100_v6  ;;  %v5319_v40 = vadd.f32 1.0, %v8033_v5  ;;  %v5192_v13 = vadd.f32 %v5170_v27, %v5100_v15 }
 0x318   : > { %v4987_v42 = vadd.f32 %v7272_v24, %v9409_v19  ;;  %v6271_v1 = vpack.c.bf16 %v6201_v46, %v6200_v17  ;;  %v5257_v41 = vsub.f32 0.0, %v6186_v61  ;;  %v5231_v24 = vld [vmem:[%s9523_s11 + $0x40] sm:$0xff]  ;;  %v5174_v31 = vmul.f32 0.9, %v9482_v63 }
 0x319   : > { %v8035_v25 = vpop.eup %8034  ;;  %8044 = vrcp.f32 %v5319_v40  ;;  %v6187_v23 = vadd.f32 -1.0, %v5192_v13  ;;  %v7273_v60 = vpop.f32.mrb[16].mxu1  ;;  %5566 = vst [vmem:[%s9497_s8 + $0x68] sm:$0xff] %v5192_v13 }
 0x31a   : > { %v5104_v55 = vpop.f32.mrb[16].mxu0  ;;  %6298 = vst [vmem:[%s9539_s14 + $0x10] sm:$0xff] %v6271_v1   ;;  %v5320_v53 = vadd.f32 1.0, %v8035_v25  ;;  %v5291_v16 = vmul.f32 1.442695, %v5257_v41  ;;  %v7274_v20 = vpop.f32.mrb[17].mxu1 }
 0x31b   : > { %v5105_v28 = vadd.f32 %v5104_v55, %v4984_v9  ;;  %v7356_v19 = vpop.f32.mrb[17].mxu0  ;;  %v8037_v54 = vpop.eup %8036  ;;  %v5258_v52 = vsub.f32 0.0, %v6187_v23  ;;  %v7275_v2 = vadd.f32 %v7274_v20, %v7273_v60  ;;  %v5232_v1 = vld [vmem:[%s9523_s11 + $0x48] sm:$0xff] }
 0x31c   : > { %v7276_v39 = vpop.f32.mrb[18].mxu1  ;;  %v5107_v62 = vpop.f32.mrb[18].mxu0  ;;  %vm5383_vm7 = vcmp.lt.f32.partialorder %v5229_v57, %v8037_v54  ;;  %8046 = vrcp.f32 %v5320_v53 }
 0x31d   : > { %v5193_v4 = vadd.f32 %v5171_v8, %v5105_v28  ;;  %v5108_v47 = vadd.f32 %v5107_v62, %v4987_v42  ;;  %v7277_v21 = vpop.f32.mrb[19].mxu1  ;;  %v7357_v45 = vpop.f32.mrb[19].mxu0  ;;  %v6202_v58 = vsel %vm5383_vm7, 1.0, %v8100_v6  ;;  %8048 = vpow2.f32 %v5291_v16 }
 0x31e   : > { %v8039_v50 = vpop.eup %8038  ;;  %v5293_v11 = vmul.f32 1.442695, %v5258_v52  ;;  %v7278_v14 = vadd.f32 %v7277_v21, %v7276_v39  ;;  %v4992_v10 = vadd.f32 %v7275_v2, %v9412_v0  ;;  %v5175_v28 = vmul.f32 0.9, %v9485_v37  ;;  %v5233_v39 = vld [vmem:[%s9523_s11 + $0x50] sm:$0xff] }
 0x31f   : > { %v8041_v32 = vpop.eup %8040  ;;  %vm5384_vm8 = vcmp.lt.f32.partialorder %v5230_v38, %v8039_v50  ;;  %v6188_v18 = vadd.f32 -1.0, %v5193_v4  ;;  %v5194_v59 = vadd.f32 %v5172_v44, %v5108_v47  ;;  %5567 = vst [vmem:[%s9497_s8 + $0x70] sm:$0xff] %v5193_v4  ;;  %v5176_v21 = vmul.f32 0.9, %v9488_v3 }
 0x320   : > { %v6203_v34 = vsel %vm5384_vm8, 1.0, %v8100_v6  ;;  %v5321_v22 = vadd.f32 1.0, %v8041_v32  ;;  %8050 = vpow2.f32 %v5293_v11  ;;  %v4995_v51 = vadd.f32 %v7278_v14, %v9415_v35  ;;  %v5234_v14 = vld [vmem:[%s9523_s11 + $0x58] sm:$0xff] }
 0x321   : > { %v8043_v27 = vpop.eup %8042  ;;  %v6274_v33 = vpack.c.bf16 %v6203_v34, %v6202_v58  ;;  %v5259_v12 = vsub.f32 0.0, %v6188_v18  ;;  %v6189_v29 = vadd.f32 -1.0, %v5194_v59  ;;  %5568 = vst [vmem:[%s9497_s8 + $0x78] sm:$0xff] %v5194_v59  ;;  %v7279_v0 = vpop.f32.mrb[20].mxu1 }
 0x322   : > { %8052 = vrcp.f32 %v5321_v22  ;;  %v5322_v36 = vadd.f32 1.0, %v8043_v27  ;;  %v5112_v15 = vpop.f32.mrb[20].mxu0  ;;  %v7280_v61 = vpop.f32.mrb[21].mxu1 }
 0x323   : > { %6299 = vst [vmem:[%s9539_s14 + $0x18] sm:$0xff] %v6274_v33   ;;  %v5295_v9 = vmul.f32 1.442695, %v5259_v12  ;;  %v5260_v5 = vsub.f32 0.0, %v6189_v29  ;;  %v5113_v17 = vadd.f32 %v5112_v15, %v4992_v10  ;;  %v7360_v46 = vpop.f32.mrb[21].mxu0  ;;  %v8045_v35 = vpop.eup %8044  ;;  %v7281_v40 = vadd.f32 %v7280_v61, %v7279_v0 }
 0x324   : > { %8054 = vrcp.f32 %v5322_v36  ;;  %v7282_v13 = vpop.f32.mrb[22].mxu1  ;;  %v5115_v42 = vpop.f32.mrb[22].mxu0  ;;  %vm5385_vm9 = vcmp.lt.f32.partialorder %v5231_v24, %v8045_v35 }
 0x325   : > { %8056 = vpow2.f32 %v5295_v9  ;;  %v5297_v41 = vmul.f32 1.442695, %v5260_v5  ;;  %v5195_v8 = vadd.f32 %v5173_v48, %v5113_v17  ;;  %v7283_v25 = vpop.f32.mrb[23].mxu1  ;;  %v7361_v57 = vpop.f32.mrb[23].mxu0  ;;  %v5116_v23 = vadd.f32 %v5115_v42, %v4995_v51 }
 0x326   : > { %v7284_v60 = vadd.f32 %v7283_v25, %v7282_v13  ;;  %v5000_v55 = vadd.f32 %v7281_v40, %v9418_v26  ;;  %v8047_v44 = vpop.eup %8046  ;;  %v6204_v19 = vsel %vm5385_vm9, 1.0, %v8100_v6  ;;  %v5177_v40 = vmul.f32 0.9, %v9491_v7  ;;  %v5235_v13 = vld [vmem:[%s9523_s11 + $0x60] sm:$0xff] }
 0x327   : > { %8058 = vpow2.f32 %v5297_v41  ;;  %v6190_v53 = vadd.f32 -1.0, %v5195_v8  ;;  %5569 = vst [vmem:[%s9497_s8 + $0x80] sm:$0xff] %v5195_v8  ;;  %v8049_v16 = vpop.eup %8048  ;;  %vm5386_vm10 = vcmp.lt.f32.partialorder %v5232_v1, %v8047_v44  ;;  %v5196_v63 = vadd.f32 %v5174_v31, %v5116_v23  ;;  %v5236_v23 = vld [vmem:[%s9523_s11 + $0x68] sm:$0xff] }
 0x328   : > { %v5003_v20 = vadd.f32 %v7284_v60, %v9421_v43  ;;  %v6205_v54 = vsel %vm5386_vm10, 1.0, %v8100_v6  ;;  %v5323_v38 = vadd.f32 1.0, %v8049_v16 }
 0x329   : > { %v5261_v52 = vsub.f32 0.0, %v6190_v53  ;;  %v6277_v2 = vpack.c.bf16 %v6205_v54, %v6204_v19  ;;  %v6191_v62 = vadd.f32 -1.0, %v5196_v63  ;;  %v7285_v4 = vpop.f32.mrb[24].mxu1  ;;  %v5120_v47 = vpop.f32.mrb[24].mxu0  ;;  %5570 = vst [vmem:[%s9497_s8 + $0x88] sm:$0xff] %v5196_v63 }
 0x32a   : > { %v8051_v26 = vpop.eup %8050  ;;  %8060 = vrcp.f32 %v5323_v38  ;;  %v5121_v45 = vadd.f32 %v5120_v47, %v5000_v55  ;;  %v7286_v50 = vpop.f32.mrb[25].mxu1 }
 0x32b   : > { %v5324_v37 = vadd.f32 1.0, %v8051_v26  ;;  %v5299_v43 = vmul.f32 1.442695, %v5261_v52  ;;  %v7364_v58 = vpop.f32.mrb[25].mxu0  ;;  %6300 = vst [vmem:[%s9539_s14 + $0x20] sm:$0xff] %v6277_v2   ;;  %v5262_v32 = vsub.f32 0.0, %v6191_v62  ;;  %v7287_v18 = vadd.f32 %v7286_v50, %v7285_v4 }
 0x32c   : > { %v8053_v11 = vpop.eup %8052  ;;  %v7288_v59 = vpop.f32.mrb[26].mxu1  ;;  %v5197_v34 = vadd.f32 %v5175_v28, %v5121_v45  ;;  %v5237_v2 = vld [vmem:[%s9523_s11 + $0x70] sm:$0xff] }
 0x32d   : > { %v5123_v10 = vpop.f32.mrb[26].mxu0  ;;  %vm5387_vm11 = vcmp.lt.f32.partialorder %v5233_v39, %v8053_v11  ;;  %8062 = vrcp.f32 %v5324_v37  ;;  %v7289_v3 = vpop.f32.mrb[27].mxu1  ;;  %v5301_v12 = vmul.f32 1.442695, %v5262_v32  ;;  %v5008_v15 = vadd.f32 %v7287_v18, %v9432_v56 }
 0x32e   : > { %v5124_v22 = vadd.f32 %v5123_v10, %v5003_v20  ;;  %v7365_v51 = vpop.f32.mrb[27].mxu0  ;;  %v8055_v27 = vpop.eup %8054  ;;  %v6206_v33 = vsel %vm5387_vm11, 1.0, %v8100_v6  ;;  %8064 = vpow2.f32 %v5299_v43  ;;  %v7290_v29 = vadd.f32 %v7289_v3, %v7288_v59  ;;  %5571 = vst [vmem:[%s9497_s8 + $0x90] sm:$0xff] %v5197_v34  ;;  %v5239_v59 = vld [vmem:[%s9523_s11 + $0x80] sm:$0xff] }
 0x32f   : > { %v8057_v48 = vpop.eup %8056  ;;  %vm5388_vm12 = vcmp.lt.f32.partialorder %v5234_v14, %v8055_v27  ;;  %v6192_v36 = vadd.f32 -1.0, %v5197_v34  ;;  %8066 = vpow2.f32 %v5301_v12  ;;  %v5240_v34 = vld [vmem:[%s9523_s11 + $0x88] sm:$0xff] }
 0x330   : > { %v5198_v0 = vadd.f32 %v5176_v21, %v5124_v22  ;;  %v6207_v24 = vsel %vm5388_vm12, 1.0, %v8100_v6  ;;  %v5325_v9 = vadd.f32 1.0, %v8057_v48  ;;  %v5011_v5 = vadd.f32 %v7290_v29, %v9437_v30  ;;  %v5238_v21 = vld [vmem:[%s9523_s11 + $0x78] sm:$0xff]  ;;  %v5241_v48 = vld [vmem:[%s9523_s11 + $0x90] sm:$0xff] }
 0x331   : > { %v8059_v17 = vpop.eup %8058  ;;  %v6280_v61 = vpack.c.bf16 %v6207_v24, %v6206_v33  ;;  %v5263_v46 = vsub.f32 0.0, %v6192_v36  ;;  %v5128_v56 = vpop.f32.mrb[28].mxu0  ;;  %v5178_v30 = vmul.f32 0.9, %v9500_v49 }
 0x332   : > { %v6193_v35 = vadd.f32 -1.0, %v5198_v0  ;;  %5572 = vst [vmem:[%s9497_s8 + $0x98] sm:$0xff] %v5198_v0  ;;  %8068 = vrcp.f32 %v5325_v9  ;;  %v5326_v42 = vadd.f32 1.0, %v8059_v17  ;;  %v5129_v41 = vadd.f32 %v5128_v56, %v5008_v15  ;;  %v7368_v8 = vpop.f32.mrb[29].mxu0  ;;  %v5242_v15 = vld [vmem:[%s9523_s11 + $0x98] sm:$0xff] }
 0x333   : > { %6301 = vst [vmem:[%s9539_s14 + $0x28] sm:$0xff] %v6280_v61   ;;  %v5303_v31 = vmul.f32 1.442695, %v5263_v46  ;;  %v5131_v25 = vpop.f32.mrb[30].mxu0  ;;  %v5243_v61 = vld [vmem:[%s9523_s11 + $0xa0] sm:$0xff]  ;;  %v5244_v46 = vld [vmem:[%s9523_s11 + $0xa8] sm:$0xff] }
 0x334   : > { %v5264_v1 = vsub.f32 0.0, %v6193_v35  ;;  %8070 = vrcp.f32 %v5326_v42  ;;  %v8061_v57 = vpop.eup %8060  ;;  %v5199_v7 = vadd.f32 %v5177_v40, %v5129_v41  ;;  %v5132_v55 = vadd.f32 %v5131_v25, %v5011_v5  ;;  %v7369_v44 = vpop.f32.mrb[31].mxu0 }
 0x335   : > { %8072 = vpow2.f32 %v5303_v31  ;;  %vm5389_vm13 = vcmp.lt.f32.partialorder %v5235_v13, %v8061_v57 }
 0x336   : > { %v5305_v60 = vmul.f32 1.442695, %v5264_v1  ;;  %v6194_v16 = vadd.f32 -1.0, %v5199_v7  ;;  %v5200_v63 = vadd.f32 %v5178_v30, %v5132_v55  ;;  %5573 = vst [vmem:[%s9497_s8 + $0xa0] sm:$0xff] %v5199_v7  ;;  %v6208_v49 = vsel %vm5389_vm13, 1.0, %v8100_v6 }
 0x337   : > { %v8063_v53 = vpop.eup %8062 }
 0x338   : > { %8074 = vpow2.f32 %v5305_v60  ;;  %v8065_v28 = vpop.eup %8064  ;;  %vm5390_vm14 = vcmp.lt.f32.partialorder %v5236_v23, %v8063_v53  ;;  %v5265_v54 = vsub.f32 0.0, %v6194_v16  ;;  %v6195_v38 = vadd.f32 -1.0, %v5200_v63  ;;  %5574 = vst [vmem:[%s9497_s8 + $0xa8] sm:$0xff] %v5200_v63 }
 0x339   : > { %v6209_v20 = vsel %vm5390_vm14, 1.0, %v8100_v6  ;;  %v5327_v19 = vadd.f32 1.0, %v8065_v28  ;;  %v8067_v52 = vpop.eup %8066 }
 0x33a   : > { %v6283_v26 = vpack.c.bf16 %v6209_v20, %v6208_v49  ;;  %v5328_v39 = vadd.f32 1.0, %v8067_v52  ;;  %v5307_v62 = vmul.f32 1.442695, %v5265_v54  ;;  %v5266_v4 = vsub.f32 0.0, %v6195_v38 }
 0x33b   : > { %8076 = vrcp.f32 %v5327_v19 }
 0x33c   : > { %v8069_v47 = vpop.eup %8068  ;;  %6302 = vst [vmem:[%s9539_s14 + $0x30] sm:$0xff] %v6283_v26   ;;  %8078 = vrcp.f32 %v5328_v39  ;;  %v5309_v37 = vmul.f32 1.442695, %v5266_v4 }
 0x33d   : > { %vm5391_vm15 = vcmp.lt.f32.partialorder %v5237_v2, %v8069_v47  ;;  %8080 = vpow2.f32 %v5307_v62 }
 0x33e   : > { %v8071_v43 = vpop.eup %8070  ;;  %8082 = vpow2.f32 %v5309_v37  ;;  %v6210_v50 = vsel %vm5391_vm15, 1.0, %v8100_v6 }
 0x33f   : > { %v8073_v45 = vpop.eup %8072  ;;  %vm5392_vm0 = vcmp.lt.f32.partialorder %v5238_v21, %v8071_v43 }
 0x340   : > { %v6211_v58 = vsel %vm5392_vm0, 1.0, %v8100_v6  ;;  %v5329_v11 = vadd.f32 1.0, %v8073_v45 }
 0x341   : > { %v6286_v32 = vpack.c.bf16 %v6211_v58, %v6210_v50 }
 0x342   : > { %v8075_v14 = vpop.eup %8074  ;;  %8084 = vrcp.f32 %v5329_v11 }
 0x343   : > { %v5330_v18 = vadd.f32 1.0, %v8075_v14  ;;  %6303 = vst [vmem:[%s9539_s14 + $0x38] sm:$0xff] %v6286_v32  }
 0x345   : > { %8086 = vrcp.f32 %v5330_v18  ;;  %v8077_v10 = vpop.eup %8076 }
 0x346   : > { %vm5393_vm1 = vcmp.lt.f32.partialorder %v5239_v59, %v8077_v10  ;;  %v8079_v22 = vpop.eup %8078 }
 0x347   : > { %v8081_v3 = vpop.eup %8080  ;;  %vm5394_vm2 = vcmp.lt.f32.partialorder %v5240_v34, %v8079_v22  ;;  %v6212_v27 = vsel %vm5393_vm1, 1.0, %v8100_v6 }
 0x348   : > { %v8083_v51 = vpop.eup %8082  ;;  %v6213_v33 = vsel %vm5394_vm2, 1.0, %v8100_v6  ;;  %v5331_v12 = vadd.f32 1.0, %v8081_v3 }
 0x349   : > { %v6289_v29 = vpack.c.bf16 %v6213_v33, %v6212_v27  ;;  %v5332_v36 = vadd.f32 1.0, %v8083_v51 }
 0x34a   : > { %8088 = vrcp.f32 %v5331_v12 }
 0x34b   : > { %6304 = vst [vmem:[%s9539_s14 + $0x40] sm:$0xff] %v6289_v29   ;;  %8090 = vrcp.f32 %v5332_v36 }
 0x34c   : > { %v8085_v0 = vpop.eup %8084 }
 0x34d   : > { %vm5395_vm3 = vcmp.lt.f32.partialorder %v5241_v48, %v8085_v0 }
 0x34e   : > { %v6214_v9 = vsel %vm5395_vm3, 1.0, %v8100_v6 }
 0x34f   : > { %v8087_v24 = vpop.eup %8086 }
 0x350   : > { %vm5396_vm4 = vcmp.lt.f32.partialorder %v5242_v15, %v8087_v24 }
 0x351   : > { %v6215_v5 = vsel %vm5396_vm4, 1.0, %v8100_v6 }
 0x352   : > { %v6292_v17 = vpack.c.bf16 %v6215_v5, %v6214_v9 }
 0x354   : > { %6305 = vst [vmem:[%s9539_s14 + $0x48] sm:$0xff] %v6292_v17   ;;  %v8089_v35 = vpop.eup %8088 }
 0x355   : > { %v8091_v40 = vpop.eup %8090  ;;  %vm5397_vm5 = vcmp.lt.f32.partialorder %v5243_v61, %v8089_v35 }
 0x356   : > { %vm5398_vm6 = vcmp.lt.f32.partialorder %v5244_v46, %v8091_v40  ;;  %v6216_v13 = vsel %vm5397_vm5, 1.0, %v8100_v6 }
 0x357   : > { %v6217_v42 = vsel %vm5398_vm6, 1.0, %v8100_v6 }
 0x358   : > { %v6295_v56 = vpack.c.bf16 %v6217_v42, %v6216_v13 }
 0x35a   : > { %6306 = vst [vmem:[%s9539_s14 + $0x50] sm:$0xff] %v6295_v56  }
 0x35b PF: > { %s16_s18 = sadd.s32 1, %s8098_s18  }
 0x35c   : > { %p13_p4 = scmp.ge.s32.totalorder %s16_s18, 4  }
 0x35e   :  { %15 = sbr.rel (!%p13_p4) target bundleno = 1 (0x1), region = 84 }

// kernel: closed_call.49
= control target key start
LH: loop header
LB: loop body
LE: loop exit
PB: predicated region body
PF: predicated region fallthrough
CT: control target
= control target key end

     0   :  { %vm3023_vm0 = vmmov 0   ;;  %s3717_s1 = inlined_call_operand.vmem [shape: bf16[3200,128], index: 1, kind: input, shape index: {}]   ;;  %s3718_s0 = inlined_call_operand.vmem [shape: bf16[8,3200], index: 0, kind: input, shape index: {}]   ;;  %s3719_s3 = inlined_call_operand.vmem [shape: f32[8,128], index: 3, kind: input, shape index: {}, may-alias: {3,5}]   ;;  %s3720_s5 = inlined_call_operand.vmem [shape: f32[8,128], index: 5, kind: output, shape index: {1}, may-alias: {3,5}]   ;;  %s3721_s2 = inlined_call_operand.vmem [shape: f32[8,128], index: 2, kind: input, shape index: {}]   ;;  %s3722_s4 = inlined_call_operand.vmem [shape: bf16[8,128], index: 4, kind: output, shape index: {0}]  }
   0x1   :  { %v2793_v0 = vld [vmem:[%s3717_s1 + $0x40] sm:$0xff]   ;;  %v2797_v4 = vld [vmem:[%s3717_s1 + $0x48] sm:$0xff]   ;;  %v2801_v8 = vld [vmem:[%s3717_s1 + $0x50] sm:$0xff]  }
   0x2   :  { %v2794_v1 = vld [vmem:[%s3717_s1 + $0xc0] sm:$0xff]   ;;  %2498 = vmatprep.subr.bf16.mxu0 %v2793_v0  ;;  %v2798_v5 = vld [vmem:[%s3717_s1 + $0xc8] sm:$0xff]   ;;  %v2802_v9 = vld [vmem:[%s3717_s1 + $0xd0] sm:$0xff]  }
   0x3   :  { %v2795_v2 = vld [vmem:[%s3717_s1] sm:$0xff]   ;;  %2520 = vmatprep.subr.bf16.mxu1 %v2794_v1  ;;  %v2799_v6 = vld [vmem:[%s3717_s1 + $0x8] sm:$0xff]   ;;  %v2803_v10 = vld [vmem:[%s3717_s1 + $0x10] sm:$0xff]  }
   0x4   :  { %v2796_v3 = vld [vmem:[%s3717_s1 + $0x80] sm:$0xff]   ;;  %2499 = vmatpush3.bf16.msra.mxu0 %v2795_v2  ;;  %v2800_v7 = vld [vmem:[%s3717_s1 + $0x88] sm:$0xff]   ;;  %v2804_v11 = vld [vmem:[%s3717_s1 + $0x90] sm:$0xff]  }
   0x5   :  { %2521 = vmatpush3.bf16.msra.mxu1 %v2796_v3  ;;  %2500 = vmatprep.subr.bf16.mxu0 %v2797_v4  ;;  %v2805_v12 = vld [vmem:[%s3717_s1 + $0x58] sm:$0xff]   ;;  %v2809_v16 = vld [vmem:[%s3717_s1 + $0x60] sm:$0xff]   ;;  %v2813_v20 = vld [vmem:[%s3717_s1 + $0x68] sm:$0xff]  }
   0x6   :  { %2522 = vmatprep.subr.bf16.mxu1 %v2798_v5  ;;  %v2806_v13 = vld [vmem:[%s3717_s1 + $0xd8] sm:$0xff]   ;;  %v2810_v17 = vld [vmem:[%s3717_s1 + $0xe0] sm:$0xff]   ;;  %v2814_v21 = vld [vmem:[%s3717_s1 + $0xe8] sm:$0xff]  }
   0x7   :  { %v2807_v14 = vld [vmem:[%s3717_s1 + $0x18] sm:$0xff]   ;;  %v2811_v18 = vld [vmem:[%s3717_s1 + $0x20] sm:$0xff]   ;;  %v2815_v22 = vld [vmem:[%s3717_s1 + $0x28] sm:$0xff]  }
   0x8   :  { %2501 = vmatpush3.bf16.msra.mxu0 %v2799_v6  ;;  %v2808_v15 = vld [vmem:[%s3717_s1 + $0x98] sm:$0xff]   ;;  %v2812_v19 = vld [vmem:[%s3717_s1 + $0xa0] sm:$0xff]   ;;  %v2816_v23 = vld [vmem:[%s3717_s1 + $0xa8] sm:$0xff]  }
   0x9   :  { %2523 = vmatpush3.bf16.msra.mxu1 %v2800_v7  ;;  %2502 = vmatprep.subr.bf16.mxu0 %v2801_v8  ;;  %v2817_v24 = vld [vmem:[%s3717_s1 + $0x70] sm:$0xff]   ;;  %v2821_v28 = vld [vmem:[%s3717_s1 + $0x78] sm:$0xff]   ;;  %v20_v32 = vld [vmem:[%s3718_s0] sm:$0xff] }
   0xa   :  { %2524 = vmatprep.subr.bf16.mxu1 %v2802_v9  ;;  %v2818_v25 = vld [vmem:[%s3717_s1 + $0xf0] sm:$0xff]   ;;  %v2822_v29 = vld [vmem:[%s3717_s1 + $0xf8] sm:$0xff]   ;;  %v21_v33 = vld [vmem:[%s3718_s0 + $0x8] sm:$0xff]  ;;  %v2271_v34 = vcombine.low %v20_v32, %v20_v32  ;;  %v2272_v35 = vcombine.high %v20_v32, %v20_v32 }
   0xb   :  { %v2819_v26 = vld [vmem:[%s3717_s1 + $0x30] sm:$0xff]   ;;  %v2823_v30 = vld [vmem:[%s3717_s1 + $0x38] sm:$0xff]   ;;  %v2273_v36 = vcombine.low %v21_v33, %v21_v33  ;;  %v2274_v37 = vcombine.high %v21_v33, %v21_v33  ;;  %v2829_v38 = vld [vmem:[%s3717_s1 + $0x140] sm:$0xff]  }
   0xc   :  { %2503 = vmatpush3.bf16.msra.mxu0 %v2803_v10  ;;  %v2820_v27 = vld [vmem:[%s3717_s1 + $0xb0] sm:$0xff]   ;;  %v2824_v31 = vld [vmem:[%s3717_s1 + $0xb8] sm:$0xff]   ;;  %v2830_v39 = vld [vmem:[%s3717_s1 + $0x100] sm:$0xff]   ;;  %1753 = vmatprep.mubr.bf16.mxu0 %v2272_v35 }
   0xd   :  { %2525 = vmatpush3.bf16.msra.mxu1 %v2804_v11  ;;  %2504 = vmatprep.subr.bf16.mxu0 %v2805_v12  ;;  %v2831_v40 = vld [vmem:[%s3717_s1 + $0x1c0] sm:$0xff]   ;;  %v2833_v42 = vld [vmem:[%s3717_s1 + $0x148] sm:$0xff]   ;;  %v2837_v46 = vld [vmem:[%s3717_s1 + $0x150] sm:$0xff]  }
   0xe   :  { %2526 = vmatprep.subr.bf16.mxu1 %v2806_v13  ;;  %1793 = vmatprep.mubr.bf16.mxu1 %v2274_v37  ;;  %v2832_v41 = vld [vmem:[%s3717_s1 + $0x180] sm:$0xff]   ;;  %v2834_v43 = vld [vmem:[%s3717_s1 + $0x108] sm:$0xff]   ;;  %v2838_v47 = vld [vmem:[%s3717_s1 + $0x110] sm:$0xff]  }
   0xf   :  { %v2835_v44 = vld [vmem:[%s3717_s1 + $0x1c8] sm:$0xff]   ;;  %v2839_v48 = vld [vmem:[%s3717_s1 + $0x1d0] sm:$0xff]   ;;  %v2841_v50 = vld [vmem:[%s3717_s1 + $0x158] sm:$0xff]  }
  0x10   :  { %2505 = vmatpush3.bf16.msra.mxu0 %v2807_v14  ;;  %v2836_v45 = vld [vmem:[%s3717_s1 + $0x188] sm:$0xff]   ;;  %v2840_v49 = vld [vmem:[%s3717_s1 + $0x190] sm:$0xff]   ;;  %v2842_v51 = vld [vmem:[%s3717_s1 + $0x118] sm:$0xff]  }
  0x11   :  { %2527 = vmatpush3.bf16.msra.mxu1 %v2808_v15  ;;  %2506 = vmatprep.subr.bf16.mxu0 %v2809_v16  ;;  %v2843_v52 = vld [vmem:[%s3717_s1 + $0x1d8] sm:$0xff]   ;;  %v2845_v54 = vld [vmem:[%s3717_s1 + $0x160] sm:$0xff]   ;;  %v2849_v58 = vld [vmem:[%s3717_s1 + $0x168] sm:$0xff]  }
  0x12   :  { %2528 = vmatprep.subr.bf16.mxu1 %v2810_v17  ;;  %v2844_v53 = vld [vmem:[%s3717_s1 + $0x198] sm:$0xff]   ;;  %v2846_v55 = vld [vmem:[%s3717_s1 + $0x120] sm:$0xff]   ;;  %v2850_v59 = vld [vmem:[%s3717_s1 + $0x128] sm:$0xff]  }
  0x13   :  { %v2847_v56 = vld [vmem:[%s3717_s1 + $0x1e0] sm:$0xff]   ;;  %v2851_v60 = vld [vmem:[%s3717_s1 + $0x1e8] sm:$0xff]   ;;  %v2853_v62 = vld [vmem:[%s3717_s1 + $0x170] sm:$0xff]  }
  0x14   :  { %2507 = vmatpush3.bf16.msra.mxu0 %v2811_v18  ;;  %v2848_v57 = vld [vmem:[%s3717_s1 + $0x1a0] sm:$0xff]   ;;  %v2852_v61 = vld [vmem:[%s3717_s1 + $0x1a8] sm:$0xff]   ;;  %v2854_v63 = vld [vmem:[%s3717_s1 + $0x130] sm:$0xff]  }
  0x15   :  { %2529 = vmatpush3.bf16.msra.mxu1 %v2812_v19  ;;  %2508 = vmatprep.subr.bf16.mxu0 %v2813_v20  ;;  %v2855_v0 = vld [vmem:[%s3717_s1 + $0x1f0] sm:$0xff]   ;;  %v2857_v2 = vld [vmem:[%s3717_s1 + $0x178] sm:$0xff]   ;;  %v2863_v9 = vld [vmem:[%s3717_s1 + $0x240] sm:$0xff]  }
  0x16   :  { %2530 = vmatprep.subr.bf16.mxu1 %v2814_v21  ;;  %v2856_v1 = vld [vmem:[%s3717_s1 + $0x1b0] sm:$0xff]   ;;  %v2858_v3 = vld [vmem:[%s3717_s1 + $0x138] sm:$0xff]   ;;  %v2866_v13 = vld [vmem:[%s3717_s1 + $0x200] sm:$0xff]  }
  0x17   :  { %v2859_v4 = vld [vmem:[%s3717_s1 + $0x1f8] sm:$0xff]   ;;  %v22_v5 = vld [vmem:[%s3718_s0 + $0x10] sm:$0xff]  ;;  %v2867_v14 = vld [vmem:[%s3717_s1 + $0x2c0] sm:$0xff]  }
  0x18   :  { %2509 = vmatpush3.bf16.msra.mxu0 %v2815_v22  ;;  %v2276_v6 = vcombine.high %v22_v5, %v22_v5  ;;  %v2862_v7 = vld [vmem:[%s3717_s1 + $0x1b8] sm:$0xff]   ;;  %v2275_v8 = vcombine.low %v22_v5, %v22_v5  ;;  %v2868_v15 = vld [vmem:[%s3717_s1 + $0x280] sm:$0xff]   ;;  %v2869_v16 = vld [vmem:[%s3717_s1 + $0x248] sm:$0xff]  }
  0x19   :  { %2531 = vmatpush3.bf16.msra.mxu1 %v2816_v23  ;;  %2510 = vmatprep.subr.bf16.mxu0 %v2817_v24  ;;  %v23_v10 = vld [vmem:[%s3718_s0 + $0x18] sm:$0xff]  ;;  %v2870_v17 = vld [vmem:[%s3717_s1 + $0x208] sm:$0xff]   ;;  %v2873_v20 = vld [vmem:[%s3717_s1 + $0x250] sm:$0xff]  }
  0x1a   :  { %2532 = vmatprep.subr.bf16.mxu1 %v2818_v25  ;;  %v2277_v11 = vcombine.low %v23_v10, %v23_v10  ;;  %v2278_v12 = vcombine.high %v23_v10, %v23_v10  ;;  %v2871_v18 = vld [vmem:[%s3717_s1 + $0x2c8] sm:$0xff]   ;;  %v2874_v21 = vld [vmem:[%s3717_s1 + $0x210] sm:$0xff]   ;;  %v2877_v24 = vld [vmem:[%s3717_s1 + $0x258] sm:$0xff]  }
  0x1b   :  { %v2872_v19 = vld [vmem:[%s3717_s1 + $0x288] sm:$0xff]   ;;  %v2875_v22 = vld [vmem:[%s3717_s1 + $0x2d0] sm:$0xff]   ;;  %v2878_v25 = vld [vmem:[%s3717_s1 + $0x218] sm:$0xff]  }
  0x1c   :  { %2511 = vmatpush3.bf16.msra.mxu0 %v2819_v26  ;;  %v2876_v23 = vld [vmem:[%s3717_s1 + $0x290] sm:$0xff]   ;;  %v2879_v26 = vld [vmem:[%s3717_s1 + $0x2d8] sm:$0xff]   ;;  %v2885_v32 = vld [vmem:[%s3717_s1 + $0x268] sm:$0xff]  }
  0x1d   :  { %2533 = vmatpush3.bf16.msra.mxu1 %v2820_v27  ;;  %2512 = vmatprep.subr.bf16.mxu0 %v2821_v28  ;;  %v2880_v27 = vld [vmem:[%s3717_s1 + $0x298] sm:$0xff]   ;;  %v2881_v28 = vld [vmem:[%s3717_s1 + $0x260] sm:$0xff]   ;;  %v2886_v33 = vld [vmem:[%s3717_s1 + $0x228] sm:$0xff]  }
  0x1e   :  { %2534 = vmatprep.subr.bf16.mxu1 %v2822_v29  ;;  %v2882_v29 = vld [vmem:[%s3717_s1 + $0x220] sm:$0xff]   ;;  %v2888_v35 = vld [vmem:[%s3717_s1 + $0x2a8] sm:$0xff]   ;;  %v2890_v37 = vld [vmem:[%s3717_s1 + $0x230] sm:$0xff]  }
  0x1f   :  { %v2920_v5 = vld [vmem:[%s3717_s1 + $0x3a0] sm:$0xff]   ;;  %v2925_v10 = vld [vmem:[%s3717_s1 + $0x370] sm:$0xff]  }
  0x20   :  { %2513 = vmatpush3.bf16.msra.mxu0 %v2823_v30  ;;  %v2883_v30 = vld [vmem:[%s3717_s1 + $0x2e0] sm:$0xff]  }
  0x21   :  { %2535 = vmatpush3.bf16.msra.mxu1 %v2824_v31  ;;  %2542 = vmatprep.subr.bf16.mxu0 %v2829_v38  ;;  %v2884_v31 = vld [vmem:[%s3717_s1 + $0x2a0] sm:$0xff]   ;;  %v2891_v38 = vld [vmem:[%s3717_s1 + $0x2f0] sm:$0xff]  }
  0x22   :  { %2564 = vmatprep.subr.bf16.mxu1 %v2831_v40  ;;  %v2893_v40 = vld [vmem:[%s3717_s1 + $0x278] sm:$0xff]  }
  0x23   :  { %1754 = vmatmul.mubr.bf16.vlgmr.msra.gmra.mrb[0].mxu0 %v2271_v34  ;;  %v2887_v34 = vld [vmem:[%s3717_s1 + $0x2e8] sm:$0xff]  }
  0x24   :  { %1794 = vmatmul.mubr.bf16.vlgmr.msra.gmra.mrb[0].mxu1 %v2273_v36  ;;  %2543 = vmatpush3.bf16.msra.mxu0 %v2830_v39  ;;  %v2889_v36 = vld [vmem:[%s3717_s1 + $0x270] sm:$0xff]  }
  0x25   :  { %2565 = vmatpush3.bf16.msra.mxu1 %v2832_v41  ;;  %2544 = vmatprep.subr.bf16.mxu0 %v2833_v42  ;;  %v2892_v39 = vld [vmem:[%s3717_s1 + $0x2b0] sm:$0xff]   ;;  %v2894_v41 = vld [vmem:[%s3717_s1 + $0x238] sm:$0xff]  }
  0x26   :  { %2566 = vmatprep.subr.bf16.mxu1 %v2835_v44  ;;  %1833 = vmatprep.mubr.bf16.mxu0 %v2276_v6  ;;  %v2895_v42 = vld [vmem:[%s3717_s1 + $0x2f8] sm:$0xff]   ;;  %v2921_v6 = vld [vmem:[%s3717_s1 + $0x368] sm:$0xff]  }
  0x27   :  { %1873 = vmatprep.mubr.bf16.mxu1 %v2278_v12  ;;  %v2927_v12 = vld [vmem:[%s3717_s1 + $0x3f0] sm:$0xff]  }
  0x28   :  { %2545 = vmatpush3.bf16.msra.mxu0 %v2834_v43  ;;  %v24_v43 = vld [vmem:[%s3718_s0 + $0x20] sm:$0xff] }
  0x29   :  { %2567 = vmatpush3.bf16.msra.mxu1 %v2836_v45  ;;  %2546 = vmatprep.subr.bf16.mxu0 %v2837_v46  ;;  %v2279_v44 = vcombine.low %v24_v43, %v24_v43  ;;  %v2280_v45 = vcombine.high %v24_v43, %v24_v43  ;;  %v2898_v46 = vld [vmem:[%s3717_s1 + $0x2b8] sm:$0xff]   ;;  %v2956_v43 = vld [vmem:[%s3717_s1 + $0x4a0] sm:$0xff]  }
  0x2a   :  { %2568 = vmatprep.subr.bf16.mxu1 %v2839_v48  ;;  %v25_v48 = vld [vmem:[%s3718_s0 + $0x28] sm:$0xff] }
  0x2c   :  { %2547 = vmatpush3.bf16.msra.mxu0 %v2838_v47  ;;  %v2899_v47 = vld [vmem:[%s3717_s1 + $0x340] sm:$0xff]  }
  0x2d   :  { %2569 = vmatpush3.bf16.msra.mxu1 %v2840_v49  ;;  %2548 = vmatprep.subr.bf16.mxu0 %v2841_v50  ;;  %v2281_v49 = vcombine.low %v25_v48, %v25_v48  ;;  %v2282_v50 = vcombine.high %v25_v48, %v25_v48  ;;  %v2961_v48 = vld [vmem:[%s3717_s1 + $0x470] sm:$0xff]  }
  0x2e   :  { %2570 = vmatprep.subr.bf16.mxu1 %v2843_v52  ;;  %v2903_v52 = vld [vmem:[%s3717_s1 + $0x3c0] sm:$0xff]  }
  0x30   :  { %2549 = vmatpush3.bf16.msra.mxu0 %v2842_v51  ;;  %v2902_v51 = vld [vmem:[%s3717_s1 + $0x300] sm:$0xff]  }
  0x31   :  { %2571 = vmatpush3.bf16.msra.mxu1 %v2844_v53  ;;  %2550 = vmatprep.subr.bf16.mxu0 %v2845_v54  ;;  %v2904_v53 = vld [vmem:[%s3717_s1 + $0x380] sm:$0xff]   ;;  %v2905_v54 = vld [vmem:[%s3717_s1 + $0x348] sm:$0xff]  }
  0x32   :  { %2572 = vmatprep.subr.bf16.mxu1 %v2847_v56  ;;  %v2907_v56 = vld [vmem:[%s3717_s1 + $0x3c8] sm:$0xff]  }
  0x34   :  { %2551 = vmatpush3.bf16.msra.mxu0 %v2846_v55  ;;  %v2906_v55 = vld [vmem:[%s3717_s1 + $0x308] sm:$0xff]  }
  0x35   :  { %2573 = vmatpush3.bf16.msra.mxu1 %v2848_v57  ;;  %2552 = vmatprep.subr.bf16.mxu0 %v2849_v58  ;;  %v2908_v57 = vld [vmem:[%s3717_s1 + $0x388] sm:$0xff]   ;;  %v2909_v58 = vld [vmem:[%s3717_s1 + $0x350] sm:$0xff]  }
  0x36   :  { %2574 = vmatprep.subr.bf16.mxu1 %v2851_v60  ;;  %v2911_v60 = vld [vmem:[%s3717_s1 + $0x3d0] sm:$0xff]  }
  0x38   :  { %2553 = vmatpush3.bf16.msra.mxu0 %v2850_v59  ;;  %v2910_v59 = vld [vmem:[%s3717_s1 + $0x310] sm:$0xff]  }
  0x39   :  { %2575 = vmatpush3.bf16.msra.mxu1 %v2852_v61  ;;  %2554 = vmatprep.subr.bf16.mxu0 %v2853_v62  ;;  %v2912_v61 = vld [vmem:[%s3717_s1 + $0x390] sm:$0xff]   ;;  %v2913_v62 = vld [vmem:[%s3717_s1 + $0x358] sm:$0xff]  }
  0x3a   :  { %2576 = vmatprep.subr.bf16.mxu1 %v2855_v0  ;;  %v2915_v0 = vld [vmem:[%s3717_s1 + $0x3d8] sm:$0xff]  }
  0x3c   :  { %2555 = vmatpush3.bf16.msra.mxu0 %v2854_v63  ;;  %v2914_v63 = vld [vmem:[%s3717_s1 + $0x318] sm:$0xff]  }
  0x3d   :  { %2577 = vmatpush3.bf16.msra.mxu1 %v2856_v1  ;;  %2556 = vmatprep.subr.bf16.mxu0 %v2857_v2  ;;  %v2916_v1 = vld [vmem:[%s3717_s1 + $0x398] sm:$0xff]   ;;  %v2917_v2 = vld [vmem:[%s3717_s1 + $0x360] sm:$0xff]  }
  0x3e   :  { %2578 = vmatprep.subr.bf16.mxu1 %v2859_v4  ;;  %v2919_v4 = vld [vmem:[%s3717_s1 + $0x3e0] sm:$0xff]  }
  0x40   :  { %2557 = vmatpush3.bf16.msra.mxu0 %v2858_v3  ;;  %v2918_v3 = vld [vmem:[%s3717_s1 + $0x320] sm:$0xff]  }
  0x41   :  { %2579 = vmatpush3.bf16.msra.mxu1 %v2862_v7  ;;  %2586 = vmatprep.subr.bf16.mxu0 %v2863_v9  ;;  %v2922_v7 = vld [vmem:[%s3717_s1 + $0x328] sm:$0xff]  }
  0x42   :  { %2608 = vmatprep.subr.bf16.mxu1 %v2867_v14  ;;  %v2924_v9 = vld [vmem:[%s3717_s1 + $0x3a8] sm:$0xff]   ;;  %v2929_v14 = vld [vmem:[%s3717_s1 + $0x378] sm:$0xff]  }
  0x43   :  { %1834 = vmatmul.mubr.bf16.vlgmr.msra.gmra.mrb[4].mxu0 %v2275_v8  ;;  %v2923_v8 = vld [vmem:[%s3717_s1 + $0x3e8] sm:$0xff]  }
  0x44   :  { %2587 = vmatpush3.bf16.msra.mxu0 %v2866_v13  ;;  %1874 = vmatmul.mubr.bf16.vlgmr.msra.gmra.mrb[4].mxu1 %v2277_v11  ;;  %v2926_v11 = vld [vmem:[%s3717_s1 + $0x330] sm:$0xff]  }
  0x45   :  { %2609 = vmatpush3.bf16.msra.mxu1 %v2868_v15  ;;  %2588 = vmatprep.subr.bf16.mxu0 %v2869_v16  ;;  %v2928_v13 = vld [vmem:[%s3717_s1 + $0x3b0] sm:$0xff]   ;;  %v2930_v15 = vld [vmem:[%s3717_s1 + $0x338] sm:$0xff]  }
  0x46   :  { %2610 = vmatprep.subr.bf16.mxu1 %v2871_v18  ;;  %1913 = vmatprep.mubr.bf16.mxu0 %v2280_v45  ;;  %v2931_v16 = vld [vmem:[%s3717_s1 + $0x3f8] sm:$0xff]   ;;  %v2958_v45 = vld [vmem:[%s3717_s1 + $0x428] sm:$0xff]  }
  0x47   :  { %1953 = vmatprep.mubr.bf16.mxu1 %v2282_v50  ;;  %v2963_v50 = vld [vmem:[%s3717_s1 + $0x4f0] sm:$0xff]  }
  0x48   :  { %2589 = vmatpush3.bf16.msra.mxu0 %v2870_v17  ;;  %v26_v17 = vld [vmem:[%s3718_s0 + $0x30] sm:$0xff] }
  0x49   :  { %2611 = vmatpush3.bf16.msra.mxu1 %v2872_v19  ;;  %2590 = vmatprep.subr.bf16.mxu0 %v2873_v20  ;;  %v2283_v18 = vcombine.low %v26_v17, %v26_v17  ;;  %v2284_v19 = vcombine.high %v26_v17, %v26_v17  ;;  %v2934_v20 = vld [vmem:[%s3717_s1 + $0x3b8] sm:$0xff]   ;;  %v2992_v17 = vld [vmem:[%s3717_s1 + $0x5a0] sm:$0xff]  }
  0x4a   :  { %2612 = vmatprep.subr.bf16.mxu1 %v2875_v22  ;;  %v27_v22 = vld [vmem:[%s3718_s0 + $0x38] sm:$0xff] }
  0x4c   :  { %2591 = vmatpush3.bf16.msra.mxu0 %v2874_v21  ;;  %v2935_v21 = vld [vmem:[%s3717_s1 + $0x440] sm:$0xff]  }
  0x4d   :  { %2613 = vmatpush3.bf16.msra.mxu1 %v2876_v23  ;;  %2592 = vmatprep.subr.bf16.mxu0 %v2877_v24  ;;  %v2285_v23 = vcombine.low %v27_v22, %v27_v22  ;;  %v2286_v24 = vcombine.high %v27_v22, %v27_v22  ;;  %v2997_v22 = vld [vmem:[%s3717_s1 + $0x570] sm:$0xff]  }
  0x4e   :  { %2614 = vmatprep.subr.bf16.mxu1 %v2879_v26  ;;  %v2939_v26 = vld [vmem:[%s3717_s1 + $0x4c0] sm:$0xff]  }
  0x50   :  { %2593 = vmatpush3.bf16.msra.mxu0 %v2878_v25  ;;  %v2938_v25 = vld [vmem:[%s3717_s1 + $0x400] sm:$0xff]  }
  0x51   :  { %2615 = vmatpush3.bf16.msra.mxu1 %v2880_v27  ;;  %2594 = vmatprep.subr.bf16.mxu0 %v2881_v28  ;;  %v2940_v27 = vld [vmem:[%s3717_s1 + $0x480] sm:$0xff]   ;;  %v2941_v28 = vld [vmem:[%s3717_s1 + $0x448] sm:$0xff]  }
  0x52   :  { %2616 = vmatprep.subr.bf16.mxu1 %v2883_v30  ;;  %v2943_v30 = vld [vmem:[%s3717_s1 + $0x4c8] sm:$0xff]  }
  0x54   :  { %2595 = vmatpush3.bf16.msra.mxu0 %v2882_v29  ;;  %v2942_v29 = vld [vmem:[%s3717_s1 + $0x408] sm:$0xff]  }
  0x55   :  { %2617 = vmatpush3.bf16.msra.mxu1 %v2884_v31  ;;  %2596 = vmatprep.subr.bf16.mxu0 %v2885_v32  ;;  %v2944_v31 = vld [vmem:[%s3717_s1 + $0x488] sm:$0xff]   ;;  %v2945_v32 = vld [vmem:[%s3717_s1 + $0x450] sm:$0xff]  }
  0x56   :  { %2618 = vmatprep.subr.bf16.mxu1 %v2887_v34  ;;  %v2947_v34 = vld [vmem:[%s3717_s1 + $0x4d0] sm:$0xff]  }
  0x58   :  { %2597 = vmatpush3.bf16.msra.mxu0 %v2886_v33  ;;  %v2946_v33 = vld [vmem:[%s3717_s1 + $0x410] sm:$0xff]  }
  0x59   :  { %2619 = vmatpush3.bf16.msra.mxu1 %v2888_v35  ;;  %2598 = vmatprep.subr.bf16.mxu0 %v2889_v36  ;;  %v2948_v35 = vld [vmem:[%s3717_s1 + $0x490] sm:$0xff]   ;;  %v2949_v36 = vld [vmem:[%s3717_s1 + $0x458] sm:$0xff]  }
  0x5a   :  { %2620 = vmatprep.subr.bf16.mxu1 %v2891_v38  ;;  %v2951_v38 = vld [vmem:[%s3717_s1 + $0x4d8] sm:$0xff]  }
  0x5c   :  { %2599 = vmatpush3.bf16.msra.mxu0 %v2890_v37  ;;  %v2950_v37 = vld [vmem:[%s3717_s1 + $0x418] sm:$0xff]  }
  0x5d   :  { %2621 = vmatpush3.bf16.msra.mxu1 %v2892_v39  ;;  %2600 = vmatprep.subr.bf16.mxu0 %v2893_v40  ;;  %v2952_v39 = vld [vmem:[%s3717_s1 + $0x498] sm:$0xff]   ;;  %v2953_v40 = vld [vmem:[%s3717_s1 + $0x460] sm:$0xff]  }
  0x5e   :  { %2622 = vmatprep.subr.bf16.mxu1 %v2895_v42  ;;  %v2955_v42 = vld [vmem:[%s3717_s1 + $0x4e0] sm:$0xff]  }
  0x60   :  { %2601 = vmatpush3.bf16.msra.mxu0 %v2894_v41  ;;  %v2954_v41 = vld [vmem:[%s3717_s1 + $0x420] sm:$0xff]  }
  0x61   :  { %2623 = vmatpush3.bf16.msra.mxu1 %v2898_v46  ;;  %2630 = vmatprep.subr.bf16.mxu0 %v2899_v47  ;;  %v2959_v46 = vld [vmem:[%s3717_s1 + $0x4e8] sm:$0xff]  }
  0x62   :  { %2652 = vmatprep.subr.bf16.mxu1 %v2903_v52  ;;  %v2960_v47 = vld [vmem:[%s3717_s1 + $0x4a8] sm:$0xff]   ;;  %v2965_v52 = vld [vmem:[%s3717_s1 + $0x478] sm:$0xff]  }
  0x63   :  { %1914 = vmatmul.mubr.bf16.vlgmr.msra.gmra.mrb[8].mxu0 %v2279_v44  ;;  %v2957_v44 = vld [vmem:[%s3717_s1 + $0x468] sm:$0xff]  }
  0x64   :  { %2631 = vmatpush3.bf16.msra.mxu0 %v2902_v51  ;;  %1954 = vmatmul.mubr.bf16.vlgmr.msra.gmra.mrb[8].mxu1 %v2281_v49  ;;  %v2962_v49 = vld [vmem:[%s3717_s1 + $0x430] sm:$0xff]  }
  0x65   :  { %2653 = vmatpush3.bf16.msra.mxu1 %v2904_v53  ;;  %2632 = vmatprep.subr.bf16.mxu0 %v2905_v54  ;;  %v2964_v51 = vld [vmem:[%s3717_s1 + $0x4b0] sm:$0xff]   ;;  %v2966_v53 = vld [vmem:[%s3717_s1 + $0x438] sm:$0xff]  }
  0x66   :  { %2654 = vmatprep.subr.bf16.mxu1 %v2907_v56  ;;  %1993 = vmatprep.mubr.bf16.mxu0 %v2284_v19  ;;  %v2967_v54 = vld [vmem:[%s3717_s1 + $0x4f8] sm:$0xff]   ;;  %v2994_v19 = vld [vmem:[%s3717_s1 + $0x528] sm:$0xff]  }
  0x67   :  { %2033 = vmatprep.mubr.bf16.mxu1 %v2286_v24  ;;  %v2999_v24 = vld [vmem:[%s3717_s1 + $0x5f0] sm:$0xff]  }
  0x68   :  { %2633 = vmatpush3.bf16.msra.mxu0 %v2906_v55  ;;  %v28_v55 = vld [vmem:[%s3718_s0 + $0x40] sm:$0xff] }
  0x69   :  { %2655 = vmatpush3.bf16.msra.mxu1 %v2908_v57  ;;  %2634 = vmatprep.subr.bf16.mxu0 %v2909_v58  ;;  %v2287_v56 = vcombine.low %v28_v55, %v28_v55  ;;  %v2288_v57 = vcombine.high %v28_v55, %v28_v55  ;;  %v2970_v58 = vld [vmem:[%s3717_s1 + $0x4b8] sm:$0xff]  }
  0x6a   :  { %2656 = vmatprep.subr.bf16.mxu1 %v2911_v60  ;;  %v29_v60 = vld [vmem:[%s3718_s0 + $0x48] sm:$0xff] }
  0x6c   :  { %2635 = vmatpush3.bf16.msra.mxu0 %v2910_v59  ;;  %v2971_v59 = vld [vmem:[%s3717_s1 + $0x540] sm:$0xff]  }
  0x6d   :  { %2657 = vmatpush3.bf16.msra.mxu1 %v2912_v61  ;;  %2636 = vmatprep.subr.bf16.mxu0 %v2913_v62  ;;  %v2289_v61 = vcombine.low %v29_v60, %v29_v60  ;;  %v2290_v62 = vcombine.high %v29_v60, %v29_v60 }
  0x6e   :  { %2658 = vmatprep.subr.bf16.mxu1 %v2915_v0  ;;  %v2975_v0 = vld [vmem:[%s3717_s1 + $0x5c0] sm:$0xff]  }
  0x70   :  { %2637 = vmatpush3.bf16.msra.mxu0 %v2914_v63  ;;  %v2974_v63 = vld [vmem:[%s3717_s1 + $0x500] sm:$0xff]  }
  0x71   :  { %2659 = vmatpush3.bf16.msra.mxu1 %v2916_v1  ;;  %2638 = vmatprep.subr.bf16.mxu0 %v2917_v2  ;;  %v2976_v1 = vld [vmem:[%s3717_s1 + $0x580] sm:$0xff]   ;;  %v2977_v2 = vld [vmem:[%s3717_s1 + $0x548] sm:$0xff]  }
  0x72   :  { %2660 = vmatprep.subr.bf16.mxu1 %v2919_v4  ;;  %v2979_v4 = vld [vmem:[%s3717_s1 + $0x5c8] sm:$0xff]  }
  0x74   :  { %2639 = vmatpush3.bf16.msra.mxu0 %v2918_v3  ;;  %v2978_v3 = vld [vmem:[%s3717_s1 + $0x508] sm:$0xff]  }
  0x75   :  { %2661 = vmatpush3.bf16.msra.mxu1 %v2920_v5  ;;  %2640 = vmatprep.subr.bf16.mxu0 %v2921_v6  ;;  %v2980_v5 = vld [vmem:[%s3717_s1 + $0x588] sm:$0xff]   ;;  %v2981_v6 = vld [vmem:[%s3717_s1 + $0x550] sm:$0xff]  }
  0x76   :  { %2662 = vmatprep.subr.bf16.mxu1 %v2923_v8  ;;  %v2983_v8 = vld [vmem:[%s3717_s1 + $0x5d0] sm:$0xff]  }
  0x78   :  { %2641 = vmatpush3.bf16.msra.mxu0 %v2922_v7  ;;  %v2982_v7 = vld [vmem:[%s3717_s1 + $0x510] sm:$0xff]  }
  0x79   :  { %2663 = vmatpush3.bf16.msra.mxu1 %v2924_v9  ;;  %2642 = vmatprep.subr.bf16.mxu0 %v2925_v10  ;;  %v2984_v9 = vld [vmem:[%s3717_s1 + $0x590] sm:$0xff]   ;;  %v2985_v10 = vld [vmem:[%s3717_s1 + $0x558] sm:$0xff]  }
  0x7a   :  { %2664 = vmatprep.subr.bf16.mxu1 %v2927_v12  ;;  %v2987_v12 = vld [vmem:[%s3717_s1 + $0x5d8] sm:$0xff]  }
  0x7c   :  { %2643 = vmatpush3.bf16.msra.mxu0 %v2926_v11  ;;  %v2986_v11 = vld [vmem:[%s3717_s1 + $0x518] sm:$0xff]  }
  0x7d   :  { %2665 = vmatpush3.bf16.msra.mxu1 %v2928_v13  ;;  %2644 = vmatprep.subr.bf16.mxu0 %v2929_v14  ;;  %v2988_v13 = vld [vmem:[%s3717_s1 + $0x598] sm:$0xff]   ;;  %v2989_v14 = vld [vmem:[%s3717_s1 + $0x560] sm:$0xff]  }
  0x7e   :  { %2666 = vmatprep.subr.bf16.mxu1 %v2931_v16  ;;  %v2991_v16 = vld [vmem:[%s3717_s1 + $0x5e0] sm:$0xff]  }
  0x80   :  { %2645 = vmatpush3.bf16.msra.mxu0 %v2930_v15  ;;  %v2990_v15 = vld [vmem:[%s3717_s1 + $0x520] sm:$0xff]  }
  0x81   :  { %2667 = vmatpush3.bf16.msra.mxu1 %v2934_v20  ;;  %2674 = vmatprep.subr.bf16.mxu0 %v2935_v21  ;;  %v2995_v20 = vld [vmem:[%s3717_s1 + $0x5e8] sm:$0xff]  }
  0x82   :  { %2696 = vmatprep.subr.bf16.mxu1 %v2939_v26  ;;  %v2996_v21 = vld [vmem:[%s3717_s1 + $0x5a8] sm:$0xff]   ;;  %v3001_v26 = vld [vmem:[%s3717_s1 + $0x578] sm:$0xff]  }
  0x83   :  { %1994 = vmatmul.mubr.bf16.vlgmr.msra.gmra.mrb[12].mxu0 %v2283_v18  ;;  %v2993_v18 = vld [vmem:[%s3717_s1 + $0x568] sm:$0xff]  }
  0x84   :  { %2675 = vmatpush3.bf16.msra.mxu0 %v2938_v25  ;;  %2034 = vmatmul.mubr.bf16.vlgmr.msra.gmra.mrb[12].mxu1 %v2285_v23  ;;  %v2998_v23 = vld [vmem:[%s3717_s1 + $0x530] sm:$0xff]  }
  0x85   :  { %2697 = vmatpush3.bf16.msra.mxu1 %v2940_v27  ;;  %2676 = vmatprep.subr.bf16.mxu0 %v2941_v28  ;;  %v3000_v25 = vld [vmem:[%s3717_s1 + $0x5b0] sm:$0xff]   ;;  %v3002_v27 = vld [vmem:[%s3717_s1 + $0x538] sm:$0xff]  }
  0x86   :  { %2698 = vmatprep.subr.bf16.mxu1 %v2943_v30  ;;  %2073 = vmatprep.mubr.bf16.mxu0 %v2288_v57  ;;  %v3003_v28 = vld [vmem:[%s3717_s1 + $0x5f8] sm:$0xff]  }
  0x87   :  { %2113 = vmatprep.mubr.bf16.mxu1 %v2290_v62 }
  0x88   :  { %2677 = vmatpush3.bf16.msra.mxu0 %v2942_v29  ;;  %v30_v29 = vld [vmem:[%s3718_s0 + $0x50] sm:$0xff] }
  0x89   :  { %2699 = vmatpush3.bf16.msra.mxu1 %v2944_v31  ;;  %2678 = vmatprep.subr.bf16.mxu0 %v2945_v32  ;;  %v2291_v30 = vcombine.low %v30_v29, %v30_v29  ;;  %v2292_v31 = vcombine.high %v30_v29, %v30_v29  ;;  %v3006_v32 = vld [vmem:[%s3717_s1 + $0x5b8] sm:$0xff]  }
  0x8a   :  { %2700 = vmatprep.subr.bf16.mxu1 %v2947_v34  ;;  %v3022_v34 = vmov 0.0  }
  0x8c   :  { %2679 = vmatpush3.bf16.msra.mxu0 %v2946_v33  ;;  %v31_v33 = vld [vmem:[%s3718_s0 + $0x58] sm:$0xff] }
  0x8d   :  { %2701 = vmatpush3.bf16.msra.mxu1 %v2948_v35  ;;  %2680 = vmatprep.subr.bf16.mxu0 %v2949_v36  ;;  %v2293_v35 = vcombine.low %v31_v33, %v31_v33  ;;  %v2294_v36 = vcombine.high %v31_v33, %v31_v33 }
  0x8e   :  { %2702 = vmatprep.subr.bf16.mxu1 %v2951_v38  ;;  %v3010_v38 = vld [vmem:[%s3717_s1 + $0x608] sm:$0xff]  }
  0x90   :  { %2681 = vmatpush3.bf16.msra.mxu0 %v2950_v37  ;;  %v3009_v37 = vld [vmem:[%s3717_s1 + $0x600] sm:$0xff]  }
  0x91   :  { %2703 = vmatpush3.bf16.msra.mxu1 %v2952_v39  ;;  %2682 = vmatprep.subr.bf16.mxu0 %v2953_v40  ;;  %v3011_v39 = vld [vmem:[%s3717_s1 + $0x610] sm:$0xff]   ;;  %v3012_v40 = vld [vmem:[%s3717_s1 + $0x618] sm:$0xff]  }
  0x92   :  { %2704 = vmatprep.subr.bf16.mxu1 %v2955_v42  ;;  %v3014_v42 = vld [vmem:[%s3717_s1 + $0x628] sm:$0xff]  }
  0x94   :  { %2683 = vmatpush3.bf16.msra.mxu0 %v2954_v41  ;;  %v3013_v41 = vld [vmem:[%s3717_s1 + $0x620] sm:$0xff]  }
  0x95   :  { %2705 = vmatpush3.bf16.msra.mxu1 %v2956_v43  ;;  %2684 = vmatprep.subr.bf16.mxu0 %v2957_v44  ;;  %v3015_v43 = vld [vmem:[%s3717_s1 + $0x630] sm:$0xff]   ;;  %v3016_v44 = vld [vmem:[%s3717_s1 + $0x638] sm:$0xff]  }
  0x96   :  { %2706 = vmatprep.subr.bf16.mxu1 %v2959_v46 }
  0x98   :  { %2685 = vmatpush3.bf16.msra.mxu0 %v2958_v45  ;;  %v3017_v45 = vld [vmem:[%s3718_s0 + $0x60] ss:$0 sps:$4 sm:$0xff]  }
  0x99   :  { %2707 = vmatpush3.bf16.msra.mxu1 %v2960_v47  ;;  %2686 = vmatprep.subr.bf16.mxu0 %v2961_v48 }
  0x9a   :  { %2708 = vmatprep.subr.bf16.mxu1 %v2963_v50 }
  0x9c   :  { %2687 = vmatpush3.bf16.msra.mxu0 %v2962_v49 }
  0x9d   :  { %2709 = vmatpush3.bf16.msra.mxu1 %v2964_v51  ;;  %2688 = vmatprep.subr.bf16.mxu0 %v2965_v52 }
  0x9e   :  { %2710 = vmatprep.subr.bf16.mxu1 %v2967_v54 }
  0xa0   :  { %2689 = vmatpush3.bf16.msra.mxu0 %v2966_v53 }
  0xa1   :  { %2711 = vmatpush3.bf16.msra.mxu1 %v2970_v58  ;;  %2718 = vmatprep.subr.bf16.mxu0 %v2971_v59 }
  0xa2   :  { %2740 = vmatprep.subr.bf16.mxu1 %v2975_v0 }
  0xa3   :  { %2074 = vmatmul.mubr.bf16.vlgmr.msra.gmra.mrb[16].mxu0 %v2287_v56 }
  0xa4   :  { %2719 = vmatpush3.bf16.msra.mxu0 %v2974_v63  ;;  %2114 = vmatmul.mubr.bf16.vlgmr.msra.gmra.mrb[16].mxu1 %v2289_v61 }
  0xa5   :  { %2741 = vmatpush3.bf16.msra.mxu1 %v2976_v1  ;;  %2720 = vmatprep.subr.bf16.mxu0 %v2977_v2 }
  0xa6   :  { %2742 = vmatprep.subr.bf16.mxu1 %v2979_v4  ;;  %2153 = vmatprep.mubr.bf16.mxu0 %v2292_v31 }
  0xa7   :  { %2193 = vmatprep.mubr.bf16.mxu1 %v2294_v36 }
  0xa8   :  { %2721 = vmatpush3.bf16.msra.mxu0 %v2978_v3 }
  0xa9   :  { %2743 = vmatpush3.bf16.msra.mxu1 %v2980_v5  ;;  %2722 = vmatprep.subr.bf16.mxu0 %v2981_v6 }
  0xaa   :  { %2744 = vmatprep.subr.bf16.mxu1 %v2983_v8 }
  0xac   :  { %2723 = vmatpush3.bf16.msra.mxu0 %v2982_v7 }
  0xad   :  { %2745 = vmatpush3.bf16.msra.mxu1 %v2984_v9  ;;  %2724 = vmatprep.subr.bf16.mxu0 %v2985_v10 }
  0xae   :  { %2746 = vmatprep.subr.bf16.mxu1 %v2987_v12 }
  0xb0   :  { %2725 = vmatpush3.bf16.msra.mxu0 %v2986_v11 }
  0xb1   :  { %2747 = vmatpush3.bf16.msra.mxu1 %v2988_v13  ;;  %2726 = vmatprep.subr.bf16.mxu0 %v2989_v14 }
  0xb2   :  { %2748 = vmatprep.subr.bf16.mxu1 %v2991_v16 }
  0xb4   :  { %2727 = vmatpush3.bf16.msra.mxu0 %v2990_v15 }
  0xb5   :  { %2749 = vmatpush3.bf16.msra.mxu1 %v2992_v17  ;;  %2728 = vmatprep.subr.bf16.mxu0 %v2993_v18 }
  0xb6   :  { %2750 = vmatprep.subr.bf16.mxu1 %v2995_v20 }
  0xb8   :  { %2729 = vmatpush3.bf16.msra.mxu0 %v2994_v19 }
  0xb9   :  { %2751 = vmatpush3.bf16.msra.mxu1 %v2996_v21  ;;  %2730 = vmatprep.subr.bf16.mxu0 %v2997_v22 }
  0xba   :  { %2752 = vmatprep.subr.bf16.mxu1 %v2999_v24 }
  0xbc   :  { %2731 = vmatpush3.bf16.msra.mxu0 %v2998_v23 }
  0xbd   :  { %2753 = vmatpush3.bf16.msra.mxu1 %v3000_v25  ;;  %2732 = vmatprep.subr.bf16.mxu0 %v3001_v26 }
  0xbe   :  { %2754 = vmatprep.subr.bf16.mxu1 %v3003_v28 }
  0xc0   :  { %2733 = vmatpush3.bf16.msra.mxu0 %v3002_v27 }
  0xc1   :  { %2771 = vmatprep.subr.bf16.mxu0 %v3022_v34  ;;  %2755 = vmatpush3.bf16.msra.mxu1 %v3006_v32 }
  0xc3   :  { %2154 = vmatmul.mubr.bf16.vlgmr.msra.gmra.mrb[20].mxu0 %v2291_v30 }
  0xc4   :  { %2772 = vmatpush3.bf16.msra.mxu0 %v3009_v37  ;;  %2787 = vmatprep.mubr.msk.bf16.mxu0 %vm3023_vm0, %v3022_v34 }
  0xc5   :  { %2194 = vmatmul.mubr.bf16.vlgmr.msra.gmra.mrb[20].mxu1 %v2293_v35  ;;  %2773 = vmatprep.subr.bf16.mxu0 %v3022_v34 }
  0xc8   :  { %2774 = vmatpush3.bf16.msra.mxu0 %v3010_v38 }
  0xc9   :  { %2775 = vmatprep.subr.bf16.mxu0 %v3022_v34 }
  0xcc   :  { %2776 = vmatpush3.bf16.msra.mxu0 %v3011_v39 }
  0xcd   :  { %2777 = vmatprep.subr.bf16.mxu0 %v3022_v34 }
  0xd0   :  { %2778 = vmatpush3.bf16.msra.mxu0 %v3012_v40 }
  0xd1   :  { %2779 = vmatprep.subr.bf16.mxu0 %v3022_v34 }
  0xd4   :  { %2780 = vmatpush3.bf16.msra.mxu0 %v3013_v41 }
  0xd5   :  { %2781 = vmatprep.subr.bf16.mxu0 %v3022_v34 }
  0xd8   :  { %2782 = vmatpush3.bf16.msra.mxu0 %v3014_v42 }
  0xd9   :  { %2783 = vmatprep.subr.bf16.mxu0 %v3022_v34 }
  0xdc   :  { %2784 = vmatpush3.bf16.msra.mxu0 %v3015_v43 }
  0xdd   :  { %2785 = vmatprep.subr.bf16.mxu0 %v3022_v34 }
  0xe0   :  { %2786 = vmatpush3.bf16.msra.mxu0 %v3016_v44 }
  0xe3   :  { %2788 = vmatmul.mubr.bf16.vlgmr.msra.gmra.mrb[24].mxu0 %v3017_v45 }
  0xf6   :  { %v2514_v46 = vpop.f32.mrb[0].mxu0 }
  0xf7   :  { %v2536_v47 = vpop.f32.mrb[0].mxu1  ;;  %v2515_v48 = vpop.f32.mrb[1].mxu0 }
  0xf8   :  { %v2537_v49 = vpop.f32.mrb[1].mxu1  ;;  %v2516_v50 = vadd.f32 %v2515_v48, %v2514_v46  ;;  %v2517_v52 = vpop.f32.mrb[2].mxu0 }
  0xf9   :  { %v2538_v51 = vadd.f32 %v2537_v49, %v2536_v47  ;;  %v2539_v53 = vpop.f32.mrb[2].mxu1  ;;  %v2518_v54 = vpop.f32.mrb[3].mxu0 }
  0xfa   :  { %v2540_v55 = vpop.f32.mrb[3].mxu1  ;;  %v2255_v54 = vlaneseq }
  0xfb   :  { %v1796_v56 = vadd.f32 %v2538_v51, %v2516_v50  ;;  %v2241_v55 = vld [vmem:[%s3719_s3] sm:$0xff] }
 0x116   :  { %v2558_v57 = vpop.f32.mrb[4].mxu0 }
 0x117   :  { %v2559_v58 = vpop.f32.mrb[5].mxu0  ;;  %v2580_v59 = vpop.f32.mrb[4].mxu1 }
 0x118   :  { %v2560_v60 = vadd.f32 %v2559_v58, %v2558_v57  ;;  %v2561_v61 = vpop.f32.mrb[6].mxu0  ;;  %v2581_v62 = vpop.f32.mrb[5].mxu1  ;;  %v2242_v57 = vmul.f32 0.9, %v2241_v55 }
 0x119   :  { %v2562_v63 = vpop.f32.mrb[7].mxu0  ;;  %v2582_v0 = vadd.f32 %v2581_v62, %v2580_v59  ;;  %v2583_v1 = vpop.f32.mrb[6].mxu1 }
 0x11a   :  { %v1836_v2 = vadd.f32 %v2560_v60, %v1796_v56  ;;  %v2584_v3 = vpop.f32.mrb[7].mxu1  ;;  %v2256_v56 = vand.u32 127, %v2255_v54 }
 0x11c   :  { %v1876_v4 = vadd.f32 %v2582_v0, %v1836_v2  ;;  %vm2257_vm1 = vcmp.lt.s32.totalorder %v2256_v56, 11 }
 0x136   :  { %v2602_v5 = vpop.f32.mrb[8].mxu0 }
 0x137   :  { %v2603_v6 = vpop.f32.mrb[9].mxu0  ;;  %v2624_v9 = vpop.f32.mrb[8].mxu1 }
 0x138   :  { %v2604_v7 = vadd.f32 %v2603_v6, %v2602_v5  ;;  %v2605_v8 = vpop.f32.mrb[10].mxu0  ;;  %v2625_v11 = vpop.f32.mrb[9].mxu1  ;;  %v2245_v6 = vld [vmem:[%s3721_s2] sm:$0xff] }
 0x139   :  { %v2606_v10 = vpop.f32.mrb[11].mxu0  ;;  %v2626_v13 = vadd.f32 %v2625_v11, %v2624_v9  ;;  %v2627_v14 = vpop.f32.mrb[10].mxu1 }
 0x13a   :  { %v1916_v12 = vadd.f32 %v2604_v7, %v1876_v4  ;;  %v2628_v15 = vpop.f32.mrb[11].mxu1 }
 0x13c   :  { %v1956_v16 = vadd.f32 %v2626_v13, %v1916_v12 }
 0x156   :  { %v2646_v17 = vpop.f32.mrb[12].mxu0 }
 0x157   :  { %v2647_v18 = vpop.f32.mrb[13].mxu0  ;;  %v2668_v21 = vpop.f32.mrb[12].mxu1 }
 0x158   :  { %v2648_v19 = vadd.f32 %v2647_v18, %v2646_v17  ;;  %v2649_v20 = vpop.f32.mrb[14].mxu0  ;;  %v2669_v23 = vpop.f32.mrb[13].mxu1 }
 0x159   :  { %v2650_v22 = vpop.f32.mrb[15].mxu0  ;;  %v2670_v25 = vadd.f32 %v2669_v23, %v2668_v21  ;;  %v2671_v26 = vpop.f32.mrb[14].mxu1 }
 0x15a   :  { %v1996_v24 = vadd.f32 %v2648_v19, %v1956_v16  ;;  %v2672_v27 = vpop.f32.mrb[15].mxu1 }
 0x15c   :  { %v2036_v28 = vadd.f32 %v2670_v25, %v1996_v24 }
 0x176   :  { %v2690_v29 = vpop.f32.mrb[16].mxu0 }
 0x177   :  { %v2691_v30 = vpop.f32.mrb[17].mxu0  ;;  %v2712_v33 = vpop.f32.mrb[16].mxu1 }
 0x178   :  { %v2692_v31 = vadd.f32 %v2691_v30, %v2690_v29  ;;  %v2693_v32 = vpop.f32.mrb[18].mxu0  ;;  %v2713_v37 = vpop.f32.mrb[17].mxu1 }
 0x179   :  { %v2694_v35 = vpop.f32.mrb[19].mxu0  ;;  %v2714_v38 = vadd.f32 %v2713_v37, %v2712_v33  ;;  %v2715_v39 = vpop.f32.mrb[18].mxu1 }
 0x17a   :  { %v2076_v36 = vadd.f32 %v2692_v31, %v2036_v28  ;;  %v2716_v40 = vpop.f32.mrb[19].mxu1 }
 0x17c   :  { %v2116_v41 = vadd.f32 %v2714_v38, %v2076_v36 }
 0x196   :  { %v2734_v42 = vpop.f32.mrb[20].mxu0 }
 0x197   :  { %v2735_v43 = vpop.f32.mrb[21].mxu0 }
 0x198   :  { %v2736_v44 = vadd.f32 %v2735_v43, %v2734_v42  ;;  %v2737_v45 = vpop.f32.mrb[22].mxu0  ;;  %v2756_v46 = vpop.f32.mrb[20].mxu1 }
 0x199   :  { %v2738_v47 = vpop.f32.mrb[23].mxu0  ;;  %v2757_v48 = vpop.f32.mrb[21].mxu1 }
 0x19a   :  { %v2156_v49 = vadd.f32 %v2736_v44, %v2116_v41  ;;  %v2758_v50 = vadd.f32 %v2757_v48, %v2756_v46  ;;  %v2759_v51 = vpop.f32.mrb[22].mxu1 }
 0x19b   :  { %v2760_v52 = vpop.f32.mrb[23].mxu1 }
 0x19c   :  { %v2196_v53 = vadd.f32 %v2758_v50, %v2156_v49 }
 0x1b6   :  { %v2235_v58 = vpop.f32.mrb[24].mxu0 }
 0x1b7   :  { %v2236_v59 = vadd.f32 %v2235_v58, %v2196_v53  ;;  %v2789_v60 = vpop.f32.mrb[25].mxu0 }
 0x1b8   :  { %v2238_v61 = vpop.f32.mrb[26].mxu0 }
 0x1b9   :  { %v2243_v62 = vadd.f32 %v2242_v57, %v2236_v59  ;;  %v2790_v63 = vpop.f32.mrb[27].mxu0 }
 0x1bb   :  { %v2496_v0 = vadd.f32 -1.0, %v2243_v62  ;;  %v2259_v1 = vsel %vm2257_vm1, %v2243_v62, 0.0 }
 0x1bc   :  { %2262 = vst [vmem:[%s3720_s5] sm:$0xff] %v2259_v1 }
 0x1bd   :  { %v2246_v2 = vsub.f32 0.0, %v2496_v0 }
 0x1bf   :  { %v2247_v3 = vmul.f32 1.442695, %v2246_v2 }
 0x1c1   :  { %3018 = vpow2.f32 %v2247_v3 }
 0x1cb   :  { %v3019_v4 = vpop.eup %3018 }
 0x1cc   :  { %v2249_v5 = vadd.f32 1.0, %v3019_v4 }
 0x1ce   :  { %3020 = vrcp.f32 %v2249_v5 }
 0x1d8   :  { %v3021_v7 = vpop.eup %3020 }
 0x1d9   :  { %vm2252_vm2 = vcmp.lt.f32.partialorder %v2245_v6, %v3021_v7 }
 0x1da   :  { %v2497_v8 = vsel %vm2252_vm2, 1.0, %v3022_v34 }
 0x1db   :  { %v2258_v9 = vsel %vm2257_vm1, %v2497_v8, 0.0 }
 0x1dc   :  { %v2260_v10 = vpack.c.bf16 %v2258_v9, %v2258_v9 }
 0x1de   :  { %2261 = vst [vmem:[%s3722_s4] sm:$0xf] %v2260_v10 }

// kernel: closed_call.48
= control target key start
LH: loop header
LB: loop body
LE: loop exit
PB: predicated region body
PF: predicated region fallthrough
CT: control target
= control target key end

     0   :  { %s9070_s18 = smov 0   ;;  %s10888_s0 = inlined_call_operand.vmem [shape: bf16[64,8192], index: 0, kind: input, shape index: {}]   ;;  %s10889_s1 = inlined_call_operand.vmem [shape: bf16[8192,128], index: 1, kind: input, shape index: {}]   ;;  %s10890_s2 = inlined_call_operand.vmem [shape: f32[64,128], index: 2, kind: input, shape index: {}]   ;;  %s10891_s3 = inlined_call_operand.vmem [shape: f32[64,128], index: 3, kind: input, shape index: {}, may-alias: {3,5}]   ;;  %s10892_s4 = inlined_call_operand.vmem [shape: bf16[64,128], index: 4, kind: output, shape index: {0}]   ;;  %s10893_s5 = inlined_call_operand.vmem [shape: f32[64,128], index: 5, kind: output, shape index: {1}, may-alias: {3,5}]  }
   0x1 LB: > { %s6916_s19 = sadd.s32 4294967295, %s9037_s18   ;;  %p6920_p0 = scmp.ge.s32.totalorder %s9037_s18, 1  ;;  %s9037_s18 = sphi %s9070_s18, %s16_s18  }
   0x2   : > { %p214_p1 = scmp.lt.s32.totalorder %s9037_s18, 3 }
   0x4   : > { %p215_p2 = pnand %p6920_p0, %p214_p1 }
   0x5   : > { %v8503_v0 = vld [vmem:[%s10889_s1 + $0x40] sm:$0xff] (!%p215_p2)   ;;  %v8507_v4 = vld [vmem:[%s10889_s1 + $0x48] sm:$0xff] (!%p215_p2)   ;;  %v8511_v8 = vld [vmem:[%s10889_s1 + $0x50] sm:$0xff] (!%p215_p2)   ;;  %s6921_s29 = sshll.u32 (!%p215_p2), %s6916_s19, 2 }
   0x6   : > { %218 = sbr.rel (%p215_p2) target bundleno = 808 (0x328), region = 36  ;;  %v8504_v1 = vld [vmem:[%s10889_s1 + $0xc0] sm:$0xff] (!%p215_p2)   ;;  %7598 = vmatprep.subr.bf16.mxu0 (!%p215_p2), %v8503_v0  ;;  %v8508_v5 = vld [vmem:[%s10889_s1 + $0xc8] sm:$0xff] (!%p215_p2)   ;;  %v8512_v9 = vld [vmem:[%s10889_s1 + $0xd0] sm:$0xff] (!%p215_p2)   ;;  %p259_p3 = scmp.lt.s32.totalorder (!%p215_p2), %s6921_s29, 7 }
   0x7   : > { %v8505_v2 = vld [vmem:[%s10889_s1] sm:$0xff] (!%p215_p2)   ;;  %7626 = vmatprep.subr.bf16.mxu1 (!%p215_p2), %v8504_v1  ;;  %v8509_v6 = vld [vmem:[%s10889_s1 + $0x8] sm:$0xff] (!%p215_p2)   ;;  %v8513_v10 = vld [vmem:[%s10889_s1 + $0x10] sm:$0xff] (!%p215_p2)  }
   0x8   : > { %v8506_v3 = vld [vmem:[%s10889_s1 + $0x80] sm:$0xff] (!%p215_p2)   ;;  %7599 = vmatpush3.bf16.msra.mxu0 (!%p215_p2), %v8505_v2  ;;  %v8510_v7 = vld [vmem:[%s10889_s1 + $0x88] sm:$0xff] (!%p215_p2)   ;;  %v8514_v11 = vld [vmem:[%s10889_s1 + $0x90] sm:$0xff] (!%p215_p2)  }
   0x9   : > { %7627 = vmatpush3.bf16.msra.mxu1 (!%p215_p2), %v8506_v3  ;;  %7600 = vmatprep.subr.bf16.mxu0 (!%p215_p2), %v8507_v4  ;;  %v8515_v12 = vld [vmem:[%s10889_s1 + $0x58] sm:$0xff] (!%p215_p2)   ;;  %v8519_v16 = vld [vmem:[%s10889_s1 + $0x60] sm:$0xff] (!%p215_p2)   ;;  %v8523_v20 = vld [vmem:[%s10889_s1 + $0x68] sm:$0xff] (!%p215_p2)  }
   0xa   : > { %7628 = vmatprep.subr.bf16.mxu1 (!%p215_p2), %v8508_v5  ;;  %v8516_v13 = vld [vmem:[%s10889_s1 + $0xd8] sm:$0xff] (!%p215_p2)   ;;  %v8520_v17 = vld [vmem:[%s10889_s1 + $0xe0] sm:$0xff] (!%p215_p2)   ;;  %v8524_v21 = vld [vmem:[%s10889_s1 + $0xe8] sm:$0xff] (!%p215_p2)  }
   0xb   : > { %v8517_v14 = vld [vmem:[%s10889_s1 + $0x18] sm:$0xff] (!%p215_p2)   ;;  %v8521_v18 = vld [vmem:[%s10889_s1 + $0x20] sm:$0xff] (!%p215_p2)   ;;  %v8525_v22 = vld [vmem:[%s10889_s1 + $0x28] sm:$0xff] (!%p215_p2)  }
   0xc   : > { %7601 = vmatpush3.bf16.msra.mxu0 (!%p215_p2), %v8509_v6  ;;  %v8518_v15 = vld [vmem:[%s10889_s1 + $0x98] sm:$0xff] (!%p215_p2)   ;;  %v8522_v19 = vld [vmem:[%s10889_s1 + $0xa0] sm:$0xff] (!%p215_p2)   ;;  %v8526_v23 = vld [vmem:[%s10889_s1 + $0xa8] sm:$0xff] (!%p215_p2)  }
   0xd   : > { %7629 = vmatpush3.bf16.msra.mxu1 %v8510_v7  ;;  %7602 = vmatprep.subr.bf16.mxu0 %v8511_v8  ;;  %s10895_s29 = smov (!%p259_p3, %s6921_s29), 7  ;;  %v8527_v24 = vld [vmem:[%s10889_s1 + $0x70] sm:$0xff]   ;;  %v8531_v28 = vld [vmem:[%s10889_s1 + $0x78] sm:$0xff]   ;;  %v8535_v40 = vld [vmem:[%s10889_s1 + $0x140] sm:$0xff]  }
   0xe   : > { %7630 = vmatprep.subr.bf16.mxu1 %v8512_v9  ;;  %v8528_v25 = vld [vmem:[%s10889_s1 + $0xf0] sm:$0xff]   ;;  %s7586_s28 = sshll.u32 %s10895_s29, 8  ;;  %v8532_v29 = vld [vmem:[%s10889_s1 + $0xf8] sm:$0xff]   ;;  %v8536_v41 = vld [vmem:[%s10889_s1 + $0x1c0] sm:$0xff]   ;;  %s6929_s20 = sshll.u32 %s10895_s29, 2 }
   0xf   : > { %v8529_v26 = vld [vmem:[%s10889_s1 + $0x30] sm:$0xff]   ;;  %s9176_s19 = scalar_lea.vmem %s10888_s0, %s7586_s28  ;;  %v8533_v30 = vld [vmem:[%s10889_s1 + $0x38] sm:$0xff]   ;;  %v8537_v42 = vld [vmem:[%s10889_s1 + $0x100] sm:$0xff]   ;;  %s281_s23 = scalar_lea.vmem %s10892_s4, %s6929_s20 }
  0x10   : > { %7603 = vmatpush3.bf16.msra.mxu0 %v8513_v10  ;;  %v8530_v27 = vld [vmem:[%s10889_s1 + $0xb0] sm:$0xff]   ;;  %v8534_v31 = vld [vmem:[%s10889_s1 + $0xb8] sm:$0xff]   ;;  %v290_v32 = vld [vmem:[%s9176_s19] sm:$0xff] }
  0x11   : > { %7631 = vmatpush3.bf16.msra.mxu1 %v8514_v11  ;;  %7604 = vmatprep.subr.bf16.mxu0 %v8515_v12  ;;  %v322_v33 = vld [vmem:[%s9176_s19 + $0x100] sm:$0xff]  ;;  %v291_v34 = vld [vmem:[%s9176_s19 + $0x8] sm:$0xff]  ;;  %v8543_v48 = vld [vmem:[%s10889_s1 + $0x150] sm:$0xff]  }
  0x12   : > { %7632 = vmatprep.subr.bf16.mxu1 %v8516_v13  ;;  %v6932_v35 = vcombine.low %v290_v32, %v322_v33  ;;  %v6933_v36 = vcombine.high %v290_v32, %v322_v33  ;;  %v323_v37 = vld [vmem:[%s9176_s19 + $0x108] sm:$0xff]  ;;  %v8538_v43 = vld [vmem:[%s10889_s1 + $0x180] sm:$0xff]   ;;  %v8544_v49 = vld [vmem:[%s10889_s1 + $0x1d0] sm:$0xff]  }
  0x13   : > { %v6934_v38 = vcombine.low %v291_v34, %v323_v37  ;;  %v6935_v39 = vcombine.high %v291_v34, %v323_v37  ;;  %v8539_v44 = vld [vmem:[%s10889_s1 + $0x148] sm:$0xff]   ;;  %v8545_v50 = vld [vmem:[%s10889_s1 + $0x110] sm:$0xff]   ;;  %v8547_v52 = vld [vmem:[%s10889_s1 + $0x158] sm:$0xff]  }
  0x14   : > { %7605 = vmatpush3.bf16.msra.mxu0 %v8517_v14  ;;  %5186 = vmatprep.mubr.bf16.mxu0 %v6933_v36  ;;  %v8540_v45 = vld [vmem:[%s10889_s1 + $0x1c8] sm:$0xff]   ;;  %v8546_v51 = vld [vmem:[%s10889_s1 + $0x190] sm:$0xff]   ;;  %v8548_v53 = vld [vmem:[%s10889_s1 + $0x1d8] sm:$0xff]  }
  0x15   : > { %7633 = vmatpush3.bf16.msra.mxu1 %v8518_v15  ;;  %7606 = vmatprep.subr.bf16.mxu0 %v8519_v16  ;;  %v8541_v46 = vld [vmem:[%s10889_s1 + $0x108] sm:$0xff]   ;;  %v8549_v54 = vld [vmem:[%s10889_s1 + $0x118] sm:$0xff]   ;;  %v8551_v56 = vld [vmem:[%s10889_s1 + $0x160] sm:$0xff]  }
  0x16   : > { %7634 = vmatprep.subr.bf16.mxu1 %v8520_v17  ;;  %5235 = vmatprep.mubr.bf16.mxu1 %v6935_v39  ;;  %v8542_v47 = vld [vmem:[%s10889_s1 + $0x188] sm:$0xff]   ;;  %v8550_v55 = vld [vmem:[%s10889_s1 + $0x198] sm:$0xff]   ;;  %v8552_v57 = vld [vmem:[%s10889_s1 + $0x1e0] sm:$0xff]  }
  0x17   : > { %v8553_v58 = vld [vmem:[%s10889_s1 + $0x120] sm:$0xff]   ;;  %v8555_v60 = vld [vmem:[%s10889_s1 + $0x168] sm:$0xff]   ;;  %v8559_v8 = vld [vmem:[%s10889_s1 + $0x170] sm:$0xff]  }
  0x18   : > { %7607 = vmatpush3.bf16.msra.mxu0 %v8521_v18  ;;  %v8554_v59 = vld [vmem:[%s10889_s1 + $0x1a0] sm:$0xff]   ;;  %v8556_v61 = vld [vmem:[%s10889_s1 + $0x1e8] sm:$0xff]   ;;  %v8560_v9 = vld [vmem:[%s10889_s1 + $0x1f0] sm:$0xff]  }
  0x19   : > { %7635 = vmatpush3.bf16.msra.mxu1 %v8522_v19  ;;  %7608 = vmatprep.subr.bf16.mxu0 %v8523_v20  ;;  %v354_v62 = vld [vmem:[%s9176_s19 + $0x200] sm:$0xff]  ;;  %v355_v1 = vld [vmem:[%s9176_s19 + $0x208] sm:$0xff]  ;;  %v8561_v10 = vld [vmem:[%s10889_s1 + $0x130] sm:$0xff]  }
  0x1a   : > { %7636 = vmatprep.subr.bf16.mxu1 %v8524_v21  ;;  %v386_v63 = vld [vmem:[%s9176_s19 + $0x300] sm:$0xff]  ;;  %v387_v2 = vld [vmem:[%s9176_s19 + $0x308] sm:$0xff]  ;;  %v8562_v11 = vld [vmem:[%s10889_s1 + $0x1b0] sm:$0xff]  }
  0x1b   : > { %v6997_v0 = vcombine.high %v354_v62, %v386_v63  ;;  %v6996_v3 = vcombine.low %v354_v62, %v386_v63  ;;  %v6999_v4 = vcombine.high %v355_v1, %v387_v2  ;;  %v8557_v5 = vld [vmem:[%s10889_s1 + $0x128] sm:$0xff]   ;;  %v6998_v6 = vcombine.low %v355_v1, %v387_v2  ;;  %v8563_v12 = vld [vmem:[%s10889_s1 + $0x178] sm:$0xff]   ;;  %v292_v16 = vld [vmem:[%s9176_s19 + $0x10] sm:$0xff] }
  0x1c   : > { %7609 = vmatpush3.bf16.msra.mxu0 %v8525_v22  ;;  %v8558_v7 = vld [vmem:[%s10889_s1 + $0x1a8] sm:$0xff]   ;;  %v8564_v13 = vld [vmem:[%s10889_s1 + $0x1f8] sm:$0xff]   ;;  %v324_v17 = vld [vmem:[%s9176_s19 + $0x110] sm:$0xff] }
  0x1d   : > { %7637 = vmatpush3.bf16.msra.mxu1 %v8526_v23  ;;  %7610 = vmatprep.subr.bf16.mxu0 %v8527_v24  ;;  %v8565_v14 = vld [vmem:[%s10889_s1 + $0x138] sm:$0xff]   ;;  %v6936_v20 = vcombine.low %v292_v16, %v324_v17  ;;  %v6937_v21 = vcombine.high %v292_v16, %v324_v17  ;;  %v8567_v24 = vld [vmem:[%s10889_s1 + $0x240] sm:$0xff]   ;;  %v356_v32 = vld [vmem:[%s9176_s19 + $0x210] sm:$0xff] }
  0x1e   : > { %7638 = vmatprep.subr.bf16.mxu1 %v8528_v25  ;;  %v8566_v15 = vld [vmem:[%s10889_s1 + $0x1b8] sm:$0xff]   ;;  %v8568_v25 = vld [vmem:[%s10889_s1 + $0x2c0] sm:$0xff]   ;;  %v388_v33 = vld [vmem:[%s9176_s19 + $0x310] sm:$0xff] }
  0x1f   : > { %v293_v18 = vld [vmem:[%s9176_s19 + $0x18] sm:$0xff]  ;;  %v7001_v34 = vcombine.high %v356_v32, %v388_v33  ;;  %v8575_v36 = vld [vmem:[%s10889_s1 + $0x250] sm:$0xff]   ;;  %v326_v1 = vld [vmem:[%s9176_s19 + $0x120] sm:$0xff] }
  0x20   : > { %7611 = vmatpush3.bf16.msra.mxu0 %v8529_v26  ;;  %v325_v19 = vld [vmem:[%s9176_s19 + $0x118] sm:$0xff]  ;;  %v8569_v26 = vld [vmem:[%s10889_s1 + $0x200] sm:$0xff]   ;;  %v8576_v37 = vld [vmem:[%s10889_s1 + $0x2d0] sm:$0xff]  }
  0x21   : > { %7639 = vmatpush3.bf16.msra.mxu1 %v8530_v27  ;;  %7612 = vmatprep.subr.bf16.mxu0 %v8531_v28  ;;  %v6938_v22 = vcombine.low %v293_v18, %v325_v19  ;;  %v6939_v23 = vcombine.high %v293_v18, %v325_v19  ;;  %v8570_v27 = vld [vmem:[%s10889_s1 + $0x280] sm:$0xff]   ;;  %v8571_v28 = vld [vmem:[%s10889_s1 + $0x248] sm:$0xff]   ;;  %v389_v39 = vld [vmem:[%s9176_s19 + $0x318] sm:$0xff] }
  0x22   : > { %7640 = vmatprep.subr.bf16.mxu1 %v8532_v29  ;;  %v8572_v29 = vld [vmem:[%s10889_s1 + $0x2c8] sm:$0xff]   ;;  %v8597_v62 = vld [vmem:[%s10889_s1 + $0x238] sm:$0xff]   ;;  %v358_v16 = vld [vmem:[%s9176_s19 + $0x220] sm:$0xff] }
  0x23   : > { %v8598_v63 = vld [vmem:[%s10889_s1 + $0x2b8] sm:$0xff]   ;;  %v390_v17 = vld [vmem:[%s9176_s19 + $0x320] sm:$0xff] }
  0x24   : > { %7613 = vmatpush3.bf16.msra.mxu0 %v8533_v30  ;;  %v8573_v30 = vld [vmem:[%s10889_s1 + $0x208] sm:$0xff]   ;;  %v7005_v18 = vcombine.high %v358_v16, %v390_v17  ;;  %v7004_v19 = vcombine.low %v358_v16, %v390_v17  ;;  %v8647_v16 = vld [vmem:[%s10889_s1 + $0x460] sm:$0xff]  }
  0x25   : > { %7641 = vmatpush3.bf16.msra.mxu1 %v8534_v31  ;;  %7654 = vmatprep.subr.bf16.mxu0 %v8535_v40  ;;  %v8574_v31 = vld [vmem:[%s10889_s1 + $0x288] sm:$0xff]   ;;  %v8648_v17 = vld [vmem:[%s10889_s1 + $0x4e0] sm:$0xff]  }
  0x26   : > { %7682 = vmatprep.subr.bf16.mxu1 %v8536_v41  ;;  %v8577_v41 = vld [vmem:[%s10889_s1 + $0x210] sm:$0xff]  }
  0x27   : > { %5187 = vmatmul.mubr.bf16.vlgmr.msra.gmra.mrb[0].mxu0 %v6932_v35  ;;  %v7000_v35 = vcombine.low %v356_v32, %v388_v33  ;;  %v8615_v32 = vld [vmem:[%s10889_s1 + $0x360] sm:$0xff]  }
  0x28   : > { %5236 = vmatmul.mubr.bf16.vlgmr.msra.gmra.mrb[0].mxu1 %v6934_v38  ;;  %7655 = vmatpush3.bf16.msra.mxu0 %v8537_v42  ;;  %v357_v38 = vld [vmem:[%s9176_s19 + $0x218] sm:$0xff]  ;;  %v8616_v33 = vld [vmem:[%s10889_s1 + $0x3e0] sm:$0xff]  }
  0x29   : > { %7683 = vmatpush3.bf16.msra.mxu1 %v8538_v43  ;;  %7656 = vmatprep.subr.bf16.mxu0 %v8539_v44  ;;  %v7003_v40 = vcombine.high %v357_v38, %v389_v39  ;;  %v7002_v42 = vcombine.low %v357_v38, %v389_v39  ;;  %v8578_v43 = vld [vmem:[%s10889_s1 + $0x290] sm:$0xff]   ;;  %v8579_v44 = vld [vmem:[%s10889_s1 + $0x258] sm:$0xff]   ;;  %v8621_v38 = vld [vmem:[%s10889_s1 + $0x328] sm:$0xff]  }
  0x2a   : > { %7684 = vmatprep.subr.bf16.mxu1 %v8540_v45  ;;  %5194 = vmatprep.mubr.bf16.mxu0 %v6997_v0  ;;  %v8580_v45 = vld [vmem:[%s10889_s1 + $0x2d8] sm:$0xff]   ;;  %v294_v0 = vld [vmem:[%s9176_s19 + $0x20] sm:$0xff]  ;;  %v8622_v39 = vld [vmem:[%s10889_s1 + $0x3a8] sm:$0xff]  }
  0x2b   : > { %5243 = vmatprep.mubr.bf16.mxu1 %v6999_v4  ;;  %v6940_v2 = vcombine.low %v294_v0, %v326_v1  ;;  %v295_v4 = vld [vmem:[%s9176_s19 + $0x28] sm:$0xff] }
  0x2c   : > { %7657 = vmatpush3.bf16.msra.mxu0 %v8541_v46  ;;  %v8581_v46 = vld [vmem:[%s10889_s1 + $0x218] sm:$0xff]  }
  0x2d   : > { %7685 = vmatpush3.bf16.msra.mxu1 %v8542_v47  ;;  %7658 = vmatprep.subr.bf16.mxu0 %v8543_v48  ;;  %v8582_v47 = vld [vmem:[%s10889_s1 + $0x298] sm:$0xff]   ;;  %v8583_v48 = vld [vmem:[%s10889_s1 + $0x260] sm:$0xff]  }
  0x2e   : > { %7686 = vmatprep.subr.bf16.mxu1 %v8544_v49  ;;  %v8584_v49 = vld [vmem:[%s10889_s1 + $0x2e0] sm:$0xff]  }
  0x2f   : > { %5195 = vmatmul.mubr.bf16.gmra.mrb[4].mxu0 %v6996_v3  ;;  %v6941_v3 = vcombine.high %v294_v0, %v326_v1  ;;  %v360_v0 = vld [vmem:[%s9176_s19 + $0x230] sm:$0xff] }
  0x30   : > { %7659 = vmatpush3.bf16.msra.mxu0 %v8545_v50  ;;  %5244 = vmatmul.mubr.bf16.gmra.mrb[4].mxu1 %v6998_v6  ;;  %v8585_v50 = vld [vmem:[%s10889_s1 + $0x220] sm:$0xff]   ;;  %v392_v1 = vld [vmem:[%s9176_s19 + $0x330] sm:$0xff] }
  0x31   : > { %7687 = vmatpush3.bf16.msra.mxu1 %v8546_v51  ;;  %7660 = vmatprep.subr.bf16.mxu0 %v8547_v52  ;;  %v8586_v51 = vld [vmem:[%s10889_s1 + $0x2a0] sm:$0xff]   ;;  %v8587_v52 = vld [vmem:[%s10889_s1 + $0x268] sm:$0xff]  }
  0x32   : > { %7688 = vmatprep.subr.bf16.mxu1 %v8548_v53  ;;  %5284 = vmatprep.mubr.bf16.mxu0 %v6937_v21  ;;  %v8588_v53 = vld [vmem:[%s10889_s1 + $0x2e8] sm:$0xff]   ;;  %v8608_v21 = vld [vmem:[%s10889_s1 + $0x3d0] sm:$0xff]  }
  0x33   : > { %5333 = vmatprep.mubr.bf16.mxu1 %v6939_v23  ;;  %v391_v23 = vld [vmem:[%s9176_s19 + $0x328] sm:$0xff] }
  0x34   : > { %7661 = vmatpush3.bf16.msra.mxu0 %v8549_v54  ;;  %v8589_v54 = vld [vmem:[%s10889_s1 + $0x228] sm:$0xff]  }
  0x35   : > { %7689 = vmatpush3.bf16.msra.mxu1 %v8550_v55  ;;  %7662 = vmatprep.subr.bf16.mxu0 %v8551_v56  ;;  %v8590_v55 = vld [vmem:[%s10889_s1 + $0x2a8] sm:$0xff]   ;;  %v8591_v56 = vld [vmem:[%s10889_s1 + $0x270] sm:$0xff]  }
  0x36   : > { %7690 = vmatprep.subr.bf16.mxu1 %v8552_v57  ;;  %v8592_v57 = vld [vmem:[%s10889_s1 + $0x2f0] sm:$0xff]  }
  0x38   : > { %7663 = vmatpush3.bf16.msra.mxu0 %v8553_v58  ;;  %v8593_v58 = vld [vmem:[%s10889_s1 + $0x230] sm:$0xff]  }
  0x39   : > { %7691 = vmatpush3.bf16.msra.mxu1 %v8554_v59  ;;  %7664 = vmatprep.subr.bf16.mxu0 %v8555_v60  ;;  %v8594_v59 = vld [vmem:[%s10889_s1 + $0x2b0] sm:$0xff]   ;;  %v8595_v60 = vld [vmem:[%s10889_s1 + $0x278] sm:$0xff]  }
  0x3a   : > { %7692 = vmatprep.subr.bf16.mxu1 %v8556_v61  ;;  %v8596_v61 = vld [vmem:[%s10889_s1 + $0x2f8] sm:$0xff]  }
  0x3c   : > { %7665 = vmatpush3.bf16.msra.mxu0 %v8557_v5  ;;  %v327_v5 = vld [vmem:[%s9176_s19 + $0x128] sm:$0xff] }
  0x3d   : > { %7693 = vmatpush3.bf16.msra.mxu1 %v8558_v7  ;;  %7666 = vmatprep.subr.bf16.mxu0 %v8559_v8  ;;  %v6942_v6 = vcombine.low %v295_v4, %v327_v5  ;;  %v6943_v7 = vcombine.high %v295_v4, %v327_v5  ;;  %v8599_v8 = vld [vmem:[%s10889_s1 + $0x340] sm:$0xff]   ;;  %v8639_v4 = vld [vmem:[%s10889_s1 + $0x450] sm:$0xff]  }
  0x3e   : > { %7694 = vmatprep.subr.bf16.mxu1 %v8560_v9  ;;  %v8600_v9 = vld [vmem:[%s10889_s1 + $0x3c0] sm:$0xff]   ;;  %v8640_v5 = vld [vmem:[%s10889_s1 + $0x4d0] sm:$0xff]  }
  0x40   : > { %7667 = vmatpush3.bf16.msra.mxu0 %v8561_v10  ;;  %v8601_v10 = vld [vmem:[%s10889_s1 + $0x300] sm:$0xff]  }
  0x41   : > { %7695 = vmatpush3.bf16.msra.mxu1 %v8562_v11  ;;  %7668 = vmatprep.subr.bf16.mxu0 %v8563_v12  ;;  %v8602_v11 = vld [vmem:[%s10889_s1 + $0x380] sm:$0xff]   ;;  %v8603_v12 = vld [vmem:[%s10889_s1 + $0x348] sm:$0xff]  }
  0x42   : > { %7696 = vmatprep.subr.bf16.mxu1 %v8564_v13  ;;  %v8604_v13 = vld [vmem:[%s10889_s1 + $0x3c8] sm:$0xff]  }
  0x44   : > { %7669 = vmatpush3.bf16.msra.mxu0 %v8565_v14  ;;  %v8605_v14 = vld [vmem:[%s10889_s1 + $0x308] sm:$0xff]  }
  0x45   : > { %7697 = vmatpush3.bf16.msra.mxu1 %v8566_v15  ;;  %7710 = vmatprep.subr.bf16.mxu0 %v8567_v24  ;;  %v8606_v15 = vld [vmem:[%s10889_s1 + $0x388] sm:$0xff]  }
  0x46   : > { %7738 = vmatprep.subr.bf16.mxu1 %v8568_v25  ;;  %v8609_v25 = vld [vmem:[%s10889_s1 + $0x310] sm:$0xff]  }
  0x47   : > { %5285 = vmatmul.mubr.bf16.vlgmr.msra.gmra.mrb[8].mxu0 %v6936_v20  ;;  %v8607_v20 = vld [vmem:[%s10889_s1 + $0x350] sm:$0xff]  }
  0x48   : > { %5334 = vmatmul.mubr.bf16.vlgmr.msra.gmra.mrb[8].mxu1 %v6938_v22  ;;  %7711 = vmatpush3.bf16.msra.mxu0 %v8569_v26  ;;  %v359_v22 = vld [vmem:[%s9176_s19 + $0x228] sm:$0xff] }
  0x49   : > { %7739 = vmatpush3.bf16.msra.mxu1 %v8570_v27  ;;  %7712 = vmatprep.subr.bf16.mxu0 %v8571_v28  ;;  %v7007_v24 = vcombine.high %v359_v22, %v391_v23  ;;  %v7006_v26 = vcombine.low %v359_v22, %v391_v23  ;;  %v8610_v27 = vld [vmem:[%s10889_s1 + $0x390] sm:$0xff]   ;;  %v8611_v28 = vld [vmem:[%s10889_s1 + $0x358] sm:$0xff]   ;;  %v8653_v22 = vld [vmem:[%s10889_s1 + $0x428] sm:$0xff]  }
  0x4a   : > { %7740 = vmatprep.subr.bf16.mxu1 %v8572_v29  ;;  %5292 = vmatprep.mubr.bf16.mxu0 %v7001_v34  ;;  %v8612_v29 = vld [vmem:[%s10889_s1 + $0x3d8] sm:$0xff]   ;;  %v8617_v34 = vld [vmem:[%s10889_s1 + $0x320] sm:$0xff]   ;;  %v8654_v23 = vld [vmem:[%s10889_s1 + $0x4a8] sm:$0xff]  }
  0x4b   : > { %5341 = vmatprep.mubr.bf16.mxu1 %v7003_v40  ;;  %v8623_v40 = vld [vmem:[%s10889_s1 + $0x370] sm:$0xff]  }
  0x4c   : > { %7713 = vmatpush3.bf16.msra.mxu0 %v8573_v30  ;;  %v8613_v30 = vld [vmem:[%s10889_s1 + $0x318] sm:$0xff]  }
  0x4d   : > { %7741 = vmatpush3.bf16.msra.mxu1 %v8574_v31  ;;  %7714 = vmatprep.subr.bf16.mxu0 %v8575_v36  ;;  %v8614_v31 = vld [vmem:[%s10889_s1 + $0x398] sm:$0xff]   ;;  %v8619_v36 = vld [vmem:[%s10889_s1 + $0x368] sm:$0xff]  }
  0x4e   : > { %7742 = vmatprep.subr.bf16.mxu1 %v8576_v37  ;;  %v8620_v37 = vld [vmem:[%s10889_s1 + $0x3e8] sm:$0xff]  }
  0x4f   : > { %5293 = vmatmul.mubr.bf16.gmra.mrb[12].mxu0 %v7000_v35  ;;  %v8618_v35 = vld [vmem:[%s10889_s1 + $0x3a0] sm:$0xff]  }
  0x50   : > { %7715 = vmatpush3.bf16.msra.mxu0 %v8577_v41  ;;  %5342 = vmatmul.mubr.bf16.gmra.mrb[12].mxu1 %v7002_v42  ;;  %v8624_v41 = vld [vmem:[%s10889_s1 + $0x3f0] sm:$0xff]  }
  0x51   : > { %7743 = vmatpush3.bf16.msra.mxu1 %v8578_v43  ;;  %7716 = vmatprep.subr.bf16.mxu0 %v8579_v44  ;;  %v8625_v42 = vld [vmem:[%s10889_s1 + $0x330] sm:$0xff]   ;;  %v8627_v44 = vld [vmem:[%s10889_s1 + $0x378] sm:$0xff]  }
  0x52   : > { %7744 = vmatprep.subr.bf16.mxu1 %v8580_v45  ;;  %5382 = vmatprep.mubr.bf16.mxu0 %v6941_v3  ;;  %v8626_v43 = vld [vmem:[%s10889_s1 + $0x3b0] sm:$0xff]   ;;  %v8628_v45 = vld [vmem:[%s10889_s1 + $0x3f8] sm:$0xff]   ;;  %v7008_v3 = vcombine.low %v360_v0, %v392_v1 }
  0x53   : > { %5431 = vmatprep.mubr.bf16.mxu1 %v6943_v7  ;;  %v393_v7 = vld [vmem:[%s9176_s19 + $0x338] sm:$0xff] }
  0x54   : > { %7717 = vmatpush3.bf16.msra.mxu0 %v8581_v46  ;;  %v8629_v46 = vld [vmem:[%s10889_s1 + $0x338] sm:$0xff]  }
  0x55   : > { %7745 = vmatpush3.bf16.msra.mxu1 %v8582_v47  ;;  %7718 = vmatprep.subr.bf16.mxu0 %v8583_v48  ;;  %v8630_v47 = vld [vmem:[%s10889_s1 + $0x3b8] sm:$0xff]   ;;  %v296_v48 = vld [vmem:[%s9176_s19 + $0x30] sm:$0xff] }
  0x56   : > { %7746 = vmatprep.subr.bf16.mxu1 %v8584_v49  ;;  %v328_v49 = vld [vmem:[%s9176_s19 + $0x130] sm:$0xff] }
  0x58   : > { %7719 = vmatpush3.bf16.msra.mxu0 %v8585_v50  ;;  %v297_v50 = vld [vmem:[%s9176_s19 + $0x38] sm:$0xff] }
  0x59   : > { %7747 = vmatpush3.bf16.msra.mxu1 %v8586_v51  ;;  %7720 = vmatprep.subr.bf16.mxu0 %v8587_v52  ;;  %v6944_v51 = vcombine.low %v296_v48, %v328_v49  ;;  %v6945_v52 = vcombine.high %v296_v48, %v328_v49  ;;  %v362_v48 = vld [vmem:[%s9176_s19 + $0x240] sm:$0xff] }
  0x5a   : > { %7748 = vmatprep.subr.bf16.mxu1 %v8588_v53  ;;  %v329_v53 = vld [vmem:[%s9176_s19 + $0x138] sm:$0xff]  ;;  %v394_v49 = vld [vmem:[%s9176_s19 + $0x340] sm:$0xff] }
  0x5c   : > { %7721 = vmatpush3.bf16.msra.mxu0 %v8589_v54  ;;  %v6946_v54 = vcombine.low %v297_v50, %v329_v53 }
  0x5d   : > { %7749 = vmatpush3.bf16.msra.mxu1 %v8590_v55  ;;  %7722 = vmatprep.subr.bf16.mxu0 %v8591_v56  ;;  %v6947_v55 = vcombine.high %v297_v50, %v329_v53  ;;  %v8631_v56 = vld [vmem:[%s10889_s1 + $0x440] sm:$0xff]   ;;  %v7013_v50 = vcombine.high %v362_v48, %v394_v49  ;;  %v8672_v53 = vld [vmem:[%s10889_s1 + $0x5d0] sm:$0xff]  }
  0x5e   : > { %7750 = vmatprep.subr.bf16.mxu1 %v8592_v57  ;;  %v8632_v57 = vld [vmem:[%s10889_s1 + $0x4c0] sm:$0xff]  }
  0x60   : > { %7723 = vmatpush3.bf16.msra.mxu0 %v8593_v58  ;;  %v8633_v58 = vld [vmem:[%s10889_s1 + $0x400] sm:$0xff]  }
  0x61   : > { %7751 = vmatpush3.bf16.msra.mxu1 %v8594_v59  ;;  %7724 = vmatprep.subr.bf16.mxu0 %v8595_v60  ;;  %v8634_v59 = vld [vmem:[%s10889_s1 + $0x480] sm:$0xff]   ;;  %v8635_v60 = vld [vmem:[%s10889_s1 + $0x448] sm:$0xff]  }
  0x62   : > { %7752 = vmatprep.subr.bf16.mxu1 %v8596_v61  ;;  %v8636_v61 = vld [vmem:[%s10889_s1 + $0x4c8] sm:$0xff]  }
  0x64   : > { %7725 = vmatpush3.bf16.msra.mxu0 %v8597_v62  ;;  %v8637_v62 = vld [vmem:[%s10889_s1 + $0x408] sm:$0xff]  }
  0x65   : > { %7753 = vmatpush3.bf16.msra.mxu1 %v8598_v63  ;;  %7766 = vmatprep.subr.bf16.mxu0 %v8599_v8  ;;  %v8638_v63 = vld [vmem:[%s10889_s1 + $0x488] sm:$0xff]  }
  0x66   : > { %7794 = vmatprep.subr.bf16.mxu1 %v8600_v9  ;;  %v8641_v9 = vld [vmem:[%s10889_s1 + $0x410] sm:$0xff]  }
  0x67   : > { %5383 = vmatmul.mubr.bf16.vlgmr.msra.gmra.mrb[16].mxu0 %v6940_v2  ;;  %v7009_v2 = vcombine.high %v360_v0, %v392_v1  ;;  %v8679_v0 = vld [vmem:[%s10889_s1 + $0x560] sm:$0xff]  }
  0x68   : > { %5432 = vmatmul.mubr.bf16.vlgmr.msra.gmra.mrb[16].mxu1 %v6942_v6  ;;  %7767 = vmatpush3.bf16.msra.mxu0 %v8601_v10  ;;  %v361_v6 = vld [vmem:[%s9176_s19 + $0x238] sm:$0xff]  ;;  %v8680_v1 = vld [vmem:[%s10889_s1 + $0x5e0] sm:$0xff]  }
  0x69   : > { %7795 = vmatpush3.bf16.msra.mxu1 %v8602_v11  ;;  %7768 = vmatprep.subr.bf16.mxu0 %v8603_v12  ;;  %v7011_v8 = vcombine.high %v361_v6, %v393_v7  ;;  %v7010_v10 = vcombine.low %v361_v6, %v393_v7  ;;  %v8642_v11 = vld [vmem:[%s10889_s1 + $0x490] sm:$0xff]   ;;  %v8643_v12 = vld [vmem:[%s10889_s1 + $0x458] sm:$0xff]   ;;  %v8685_v6 = vld [vmem:[%s10889_s1 + $0x528] sm:$0xff]  }
  0x6a   : > { %7796 = vmatprep.subr.bf16.mxu1 %v8604_v13  ;;  %5390 = vmatprep.mubr.bf16.mxu0 %v7005_v18  ;;  %v8644_v13 = vld [vmem:[%s10889_s1 + $0x4d8] sm:$0xff]   ;;  %v8649_v18 = vld [vmem:[%s10889_s1 + $0x420] sm:$0xff]   ;;  %v8686_v7 = vld [vmem:[%s10889_s1 + $0x5a8] sm:$0xff]  }
  0x6b   : > { %5439 = vmatprep.mubr.bf16.mxu1 %v7007_v24  ;;  %v8655_v24 = vld [vmem:[%s10889_s1 + $0x470] sm:$0xff]  }
  0x6c   : > { %7769 = vmatpush3.bf16.msra.mxu0 %v8605_v14  ;;  %v8645_v14 = vld [vmem:[%s10889_s1 + $0x418] sm:$0xff]  }
  0x6d   : > { %7797 = vmatpush3.bf16.msra.mxu1 %v8606_v15  ;;  %7770 = vmatprep.subr.bf16.mxu0 %v8607_v20  ;;  %v8646_v15 = vld [vmem:[%s10889_s1 + $0x498] sm:$0xff]   ;;  %v8651_v20 = vld [vmem:[%s10889_s1 + $0x468] sm:$0xff]  }
  0x6e   : > { %7798 = vmatprep.subr.bf16.mxu1 %v8608_v21  ;;  %v8652_v21 = vld [vmem:[%s10889_s1 + $0x4e8] sm:$0xff]  }
  0x6f   : > { %5391 = vmatmul.mubr.bf16.gmra.mrb[20].mxu0 %v7004_v19  ;;  %v8650_v19 = vld [vmem:[%s10889_s1 + $0x4a0] sm:$0xff]  }
  0x70   : > { %7771 = vmatpush3.bf16.msra.mxu0 %v8609_v25  ;;  %5440 = vmatmul.mubr.bf16.gmra.mrb[20].mxu1 %v7006_v26  ;;  %v8656_v25 = vld [vmem:[%s10889_s1 + $0x4f0] sm:$0xff]  }
  0x71   : > { %7799 = vmatpush3.bf16.msra.mxu1 %v8610_v27  ;;  %7772 = vmatprep.subr.bf16.mxu0 %v8611_v28  ;;  %v8657_v26 = vld [vmem:[%s10889_s1 + $0x430] sm:$0xff]   ;;  %v8659_v28 = vld [vmem:[%s10889_s1 + $0x478] sm:$0xff]  }
  0x72   : > { %7800 = vmatprep.subr.bf16.mxu1 %v8612_v29  ;;  %5480 = vmatprep.mubr.bf16.mxu0 %v6945_v52  ;;  %v8658_v27 = vld [vmem:[%s10889_s1 + $0x4b0] sm:$0xff]   ;;  %v8660_v29 = vld [vmem:[%s10889_s1 + $0x4f8] sm:$0xff]  }
  0x73   : > { %5529 = vmatprep.mubr.bf16.mxu1 %v6947_v55  ;;  %v8671_v52 = vld [vmem:[%s10889_s1 + $0x550] sm:$0xff]   ;;  %v395_v55 = vld [vmem:[%s9176_s19 + $0x348] sm:$0xff] }
  0x74   : > { %7773 = vmatpush3.bf16.msra.mxu0 %v8613_v30  ;;  %v8661_v30 = vld [vmem:[%s10889_s1 + $0x438] sm:$0xff]  }
  0x75   : > { %7801 = vmatpush3.bf16.msra.mxu1 %v8614_v31  ;;  %7774 = vmatprep.subr.bf16.mxu0 %v8615_v32  ;;  %v8662_v31 = vld [vmem:[%s10889_s1 + $0x4b8] sm:$0xff]   ;;  %v298_v32 = vld [vmem:[%s9176_s19 + $0x40] sm:$0xff] }
  0x76   : > { %7802 = vmatprep.subr.bf16.mxu1 %v8616_v33  ;;  %v330_v33 = vld [vmem:[%s9176_s19 + $0x140] sm:$0xff] }
  0x78   : > { %7775 = vmatpush3.bf16.msra.mxu0 %v8617_v34  ;;  %v299_v34 = vld [vmem:[%s9176_s19 + $0x48] sm:$0xff] }
  0x79   : > { %7803 = vmatpush3.bf16.msra.mxu1 %v8618_v35  ;;  %7776 = vmatprep.subr.bf16.mxu0 %v8619_v36  ;;  %v331_v35 = vld [vmem:[%s9176_s19 + $0x148] sm:$0xff]  ;;  %v6948_v36 = vcombine.low %v298_v32, %v330_v33 }
  0x7a   : > { %7804 = vmatprep.subr.bf16.mxu1 %v8620_v37  ;;  %v6949_v37 = vcombine.high %v298_v32, %v330_v33  ;;  %v364_v32 = vld [vmem:[%s9176_s19 + $0x250] sm:$0xff] }
  0x7b   : > { %v396_v33 = vld [vmem:[%s9176_s19 + $0x350] sm:$0xff] }
  0x7c   : > { %7777 = vmatpush3.bf16.msra.mxu0 %v8621_v38  ;;  %v6950_v38 = vcombine.low %v299_v34, %v331_v35 }
  0x7d   : > { %7805 = vmatpush3.bf16.msra.mxu1 %v8622_v39  ;;  %7778 = vmatprep.subr.bf16.mxu0 %v8623_v40  ;;  %v6951_v39 = vcombine.high %v299_v34, %v331_v35  ;;  %v8663_v40 = vld [vmem:[%s10889_s1 + $0x540] sm:$0xff]   ;;  %v7017_v34 = vcombine.high %v364_v32, %v396_v33  ;;  %v7016_v35 = vcombine.low %v364_v32, %v396_v33 }
  0x7e   : > { %7806 = vmatprep.subr.bf16.mxu1 %v8624_v41  ;;  %v8664_v41 = vld [vmem:[%s10889_s1 + $0x5c0] sm:$0xff]  }
  0x80   : > { %7779 = vmatpush3.bf16.msra.mxu0 %v8625_v42  ;;  %v8665_v42 = vld [vmem:[%s10889_s1 + $0x500] sm:$0xff]  }
  0x81   : > { %7807 = vmatpush3.bf16.msra.mxu1 %v8626_v43  ;;  %7780 = vmatprep.subr.bf16.mxu0 %v8627_v44  ;;  %v8666_v43 = vld [vmem:[%s10889_s1 + $0x580] sm:$0xff]   ;;  %v8667_v44 = vld [vmem:[%s10889_s1 + $0x548] sm:$0xff]  }
  0x82   : > { %7808 = vmatprep.subr.bf16.mxu1 %v8628_v45  ;;  %v8668_v45 = vld [vmem:[%s10889_s1 + $0x5c8] sm:$0xff]  }
  0x84   : > { %7781 = vmatpush3.bf16.msra.mxu0 %v8629_v46  ;;  %v8669_v46 = vld [vmem:[%s10889_s1 + $0x508] sm:$0xff]  }
  0x85   : > { %7809 = vmatpush3.bf16.msra.mxu1 %v8630_v47  ;;  %7822 = vmatprep.subr.bf16.mxu0 %v8631_v56  ;;  %v8670_v47 = vld [vmem:[%s10889_s1 + $0x588] sm:$0xff]  }
  0x86   : > { %7850 = vmatprep.subr.bf16.mxu1 %v8632_v57  ;;  %v8673_v57 = vld [vmem:[%s10889_s1 + $0x510] sm:$0xff]  }
  0x87   : > { %5481 = vmatmul.mubr.bf16.vlgmr.msra.gmra.mrb[24].mxu0 %v6944_v51  ;;  %v7012_v51 = vcombine.low %v362_v48, %v394_v49  ;;  %v8711_v48 = vld [vmem:[%s10889_s1 + $0x660] sm:$0xff]  }
  0x88   : > { %5530 = vmatmul.mubr.bf16.vlgmr.msra.gmra.mrb[24].mxu1 %v6946_v54  ;;  %7823 = vmatpush3.bf16.msra.mxu0 %v8633_v58  ;;  %v363_v54 = vld [vmem:[%s9176_s19 + $0x248] sm:$0xff]  ;;  %v8712_v49 = vld [vmem:[%s10889_s1 + $0x6e0] sm:$0xff]  }
  0x89   : > { %7851 = vmatpush3.bf16.msra.mxu1 %v8634_v59  ;;  %7824 = vmatprep.subr.bf16.mxu0 %v8635_v60  ;;  %v7015_v56 = vcombine.high %v363_v54, %v395_v55  ;;  %v7014_v58 = vcombine.low %v363_v54, %v395_v55  ;;  %v8674_v59 = vld [vmem:[%s10889_s1 + $0x590] sm:$0xff]   ;;  %v8675_v60 = vld [vmem:[%s10889_s1 + $0x558] sm:$0xff]   ;;  %v8717_v54 = vld [vmem:[%s10889_s1 + $0x628] sm:$0xff]  }
  0x8a   : > { %7852 = vmatprep.subr.bf16.mxu1 %v8636_v61  ;;  %5488 = vmatprep.mubr.bf16.mxu0 %v7009_v2  ;;  %v8676_v61 = vld [vmem:[%s10889_s1 + $0x5d8] sm:$0xff]   ;;  %v8681_v2 = vld [vmem:[%s10889_s1 + $0x520] sm:$0xff]   ;;  %v8718_v55 = vld [vmem:[%s10889_s1 + $0x6a8] sm:$0xff]  }
  0x8b   : > { %5537 = vmatprep.mubr.bf16.mxu1 %v7011_v8  ;;  %v8687_v8 = vld [vmem:[%s10889_s1 + $0x570] sm:$0xff]  }
  0x8c   : > { %7825 = vmatpush3.bf16.msra.mxu0 %v8637_v62  ;;  %v8677_v62 = vld [vmem:[%s10889_s1 + $0x518] sm:$0xff]  }
  0x8d   : > { %7853 = vmatpush3.bf16.msra.mxu1 %v8638_v63  ;;  %7826 = vmatprep.subr.bf16.mxu0 %v8639_v4  ;;  %v8678_v63 = vld [vmem:[%s10889_s1 + $0x598] sm:$0xff]   ;;  %v8683_v4 = vld [vmem:[%s10889_s1 + $0x568] sm:$0xff]  }
  0x8e   : > { %7854 = vmatprep.subr.bf16.mxu1 %v8640_v5  ;;  %v8684_v5 = vld [vmem:[%s10889_s1 + $0x5e8] sm:$0xff]  }
  0x8f   : > { %5489 = vmatmul.mubr.bf16.gmra.mrb[28].mxu0 %v7008_v3  ;;  %v8682_v3 = vld [vmem:[%s10889_s1 + $0x5a0] sm:$0xff]  }
  0x90   : > { %7827 = vmatpush3.bf16.msra.mxu0 %v8641_v9  ;;  %5538 = vmatmul.mubr.bf16.gmra.mrb[28].mxu1 %v7010_v10  ;;  %v8688_v9 = vld [vmem:[%s10889_s1 + $0x5f0] sm:$0xff]  }
  0x91   : > { %7855 = vmatpush3.bf16.msra.mxu1 %v8642_v11  ;;  %7828 = vmatprep.subr.bf16.mxu0 %v8643_v12  ;;  %v8689_v10 = vld [vmem:[%s10889_s1 + $0x530] sm:$0xff]   ;;  %v8691_v12 = vld [vmem:[%s10889_s1 + $0x578] sm:$0xff]  }
  0x92   : > { %7856 = vmatprep.subr.bf16.mxu1 %v8644_v13  ;;  %5578 = vmatprep.mubr.bf16.mxu0 %v6949_v37  ;;  %v8690_v11 = vld [vmem:[%s10889_s1 + $0x5b0] sm:$0xff]   ;;  %v8692_v13 = vld [vmem:[%s10889_s1 + $0x5f8] sm:$0xff]  }
  0x93   : > { %5627 = vmatprep.mubr.bf16.mxu1 %v6951_v39  ;;  %v8704_v37 = vld [vmem:[%s10889_s1 + $0x6d0] sm:$0xff]   ;;  %v397_v39 = vld [vmem:[%s9176_s19 + $0x358] sm:$0xff] }
  0x94   : > { %7829 = vmatpush3.bf16.msra.mxu0 %v8645_v14  ;;  %v8693_v14 = vld [vmem:[%s10889_s1 + $0x538] sm:$0xff]  }
  0x95   : > { %7857 = vmatpush3.bf16.msra.mxu1 %v8646_v15  ;;  %7830 = vmatprep.subr.bf16.mxu0 %v8647_v16  ;;  %v8694_v15 = vld [vmem:[%s10889_s1 + $0x5b8] sm:$0xff]   ;;  %v300_v16 = vld [vmem:[%s9176_s19 + $0x50] sm:$0xff] }
  0x96   : > { %7858 = vmatprep.subr.bf16.mxu1 %v8648_v17  ;;  %v332_v17 = vld [vmem:[%s9176_s19 + $0x150] sm:$0xff] }
  0x98   : > { %7831 = vmatpush3.bf16.msra.mxu0 %v8649_v18  ;;  %v6952_v18 = vcombine.low %v300_v16, %v332_v17 }
  0x99   : > { %7859 = vmatpush3.bf16.msra.mxu1 %v8650_v19  ;;  %7832 = vmatprep.subr.bf16.mxu0 %v8651_v20  ;;  %v6953_v19 = vcombine.high %v300_v16, %v332_v17  ;;  %v301_v20 = vld [vmem:[%s9176_s19 + $0x58] sm:$0xff]  ;;  %v8734_v17 = vld [vmem:[%s10889_s1 + $0x788] sm:$0xff]  }
  0x9a   : > { %7860 = vmatprep.subr.bf16.mxu1 %v8652_v21  ;;  %v333_v21 = vld [vmem:[%s9176_s19 + $0x158] sm:$0xff] }
  0x9c   : > { %7833 = vmatpush3.bf16.msra.mxu0 %v8653_v22  ;;  %v6954_v22 = vcombine.low %v301_v20, %v333_v21 }
  0x9d   : > { %7861 = vmatpush3.bf16.msra.mxu1 %v8654_v23  ;;  %7834 = vmatprep.subr.bf16.mxu0 %v8655_v24  ;;  %v6955_v23 = vcombine.high %v301_v20, %v333_v21  ;;  %v8695_v24 = vld [vmem:[%s10889_s1 + $0x640] sm:$0xff]  }
  0x9e   : > { %7862 = vmatprep.subr.bf16.mxu1 %v8656_v25  ;;  %v8696_v25 = vld [vmem:[%s10889_s1 + $0x6c0] sm:$0xff]  }
  0xa0   : > { %7835 = vmatpush3.bf16.msra.mxu0 %v8657_v26  ;;  %v8697_v26 = vld [vmem:[%s10889_s1 + $0x600] sm:$0xff]  }
  0xa1   : > { %7863 = vmatpush3.bf16.msra.mxu1 %v8658_v27  ;;  %7836 = vmatprep.subr.bf16.mxu0 %v8659_v28  ;;  %v8698_v27 = vld [vmem:[%s10889_s1 + $0x680] sm:$0xff]   ;;  %v8699_v28 = vld [vmem:[%s10889_s1 + $0x648] sm:$0xff]  }
  0xa2   : > { %7864 = vmatprep.subr.bf16.mxu1 %v8660_v29  ;;  %v8700_v29 = vld [vmem:[%s10889_s1 + $0x6c8] sm:$0xff]  }
  0xa4   : > { %7837 = vmatpush3.bf16.msra.mxu0 %v8661_v30  ;;  %v8701_v30 = vld [vmem:[%s10889_s1 + $0x608] sm:$0xff]  }
  0xa5   : > { %7865 = vmatpush3.bf16.msra.mxu1 %v8662_v31  ;;  %7878 = vmatprep.subr.bf16.mxu0 %v8663_v40  ;;  %v8702_v31 = vld [vmem:[%s10889_s1 + $0x688] sm:$0xff]  }
  0xa6   : > { %7906 = vmatprep.subr.bf16.mxu1 %v8664_v41  ;;  %v8705_v41 = vld [vmem:[%s10889_s1 + $0x610] sm:$0xff]  }
  0xa7   : > { %5579 = vmatmul.mubr.bf16.vlgmr.msra.gmra.mrb[32].mxu0 %v6948_v36  ;;  %v8703_v36 = vld [vmem:[%s10889_s1 + $0x650] sm:$0xff]  }
  0xa8   : > { %5628 = vmatmul.mubr.bf16.vlgmr.msra.gmra.mrb[32].mxu1 %v6950_v38  ;;  %7879 = vmatpush3.bf16.msra.mxu0 %v8665_v42  ;;  %v365_v38 = vld [vmem:[%s9176_s19 + $0x258] sm:$0xff] }
  0xa9   : > { %7907 = vmatpush3.bf16.msra.mxu1 %v8666_v43  ;;  %7880 = vmatprep.subr.bf16.mxu0 %v8667_v44  ;;  %v7019_v40 = vcombine.high %v365_v38, %v397_v39  ;;  %v7018_v42 = vcombine.low %v365_v38, %v397_v39  ;;  %v8706_v43 = vld [vmem:[%s10889_s1 + $0x690] sm:$0xff]   ;;  %v8707_v44 = vld [vmem:[%s10889_s1 + $0x658] sm:$0xff]  }
  0xaa   : > { %7908 = vmatprep.subr.bf16.mxu1 %v8668_v45  ;;  %5586 = vmatprep.mubr.bf16.mxu0 %v7013_v50  ;;  %v8708_v45 = vld [vmem:[%s10889_s1 + $0x6d8] sm:$0xff]   ;;  %v8713_v50 = vld [vmem:[%s10889_s1 + $0x620] sm:$0xff]   ;;  %v8738_v39 = vld [vmem:[%s10889_s1 + $0x790] sm:$0xff]  }
  0xab   : > { %5635 = vmatprep.mubr.bf16.mxu1 %v7015_v56  ;;  %v8719_v56 = vld [vmem:[%s10889_s1 + $0x670] sm:$0xff]  }
  0xac   : > { %7881 = vmatpush3.bf16.msra.mxu0 %v8669_v46  ;;  %v8709_v46 = vld [vmem:[%s10889_s1 + $0x618] sm:$0xff]  }
  0xad   : > { %7909 = vmatpush3.bf16.msra.mxu1 %v8670_v47  ;;  %7882 = vmatprep.subr.bf16.mxu0 %v8671_v52  ;;  %v8710_v47 = vld [vmem:[%s10889_s1 + $0x698] sm:$0xff]   ;;  %v8715_v52 = vld [vmem:[%s10889_s1 + $0x668] sm:$0xff]  }
  0xae   : > { %7910 = vmatprep.subr.bf16.mxu1 %v8672_v53  ;;  %v8716_v53 = vld [vmem:[%s10889_s1 + $0x6e8] sm:$0xff]  }
  0xaf   : > { %5587 = vmatmul.mubr.bf16.gmra.mrb[36].mxu0 %v7012_v51  ;;  %v8714_v51 = vld [vmem:[%s10889_s1 + $0x6a0] sm:$0xff]  }
  0xb0   : > { %7883 = vmatpush3.bf16.msra.mxu0 %v8673_v57  ;;  %5636 = vmatmul.mubr.bf16.gmra.mrb[36].mxu1 %v7014_v58  ;;  %v8720_v57 = vld [vmem:[%s10889_s1 + $0x6f0] sm:$0xff]  }
  0xb1   : > { %7911 = vmatpush3.bf16.msra.mxu1 %v8674_v59  ;;  %7884 = vmatprep.subr.bf16.mxu0 %v8675_v60  ;;  %v8721_v58 = vld [vmem:[%s10889_s1 + $0x630] sm:$0xff]   ;;  %v8723_v60 = vld [vmem:[%s10889_s1 + $0x678] sm:$0xff]  }
  0xb2   : > { %7912 = vmatprep.subr.bf16.mxu1 %v8676_v61  ;;  %5676 = vmatprep.mubr.bf16.mxu0 %v6953_v19  ;;  %v8722_v59 = vld [vmem:[%s10889_s1 + $0x6b0] sm:$0xff]   ;;  %v8724_v61 = vld [vmem:[%s10889_s1 + $0x6f8] sm:$0xff]   ;;  %v398_v19 = vld [vmem:[%s9176_s19 + $0x360] sm:$0xff] }
  0xb3   : > { %5725 = vmatprep.mubr.bf16.mxu1 %v6955_v23 }
  0xb4   : > { %7885 = vmatpush3.bf16.msra.mxu0 %v8677_v62  ;;  %v8725_v62 = vld [vmem:[%s10889_s1 + $0x638] sm:$0xff]  }
  0xb5   : > { %7913 = vmatpush3.bf16.msra.mxu1 %v8678_v63  ;;  %7886 = vmatprep.subr.bf16.mxu0 %v8679_v0  ;;  %v8726_v63 = vld [vmem:[%s10889_s1 + $0x6b8] sm:$0xff]   ;;  %v302_v0 = vld [vmem:[%s9176_s19 + $0x60] sm:$0xff] }
  0xb6   : > { %7914 = vmatprep.subr.bf16.mxu1 %v8680_v1  ;;  %v334_v1 = vld [vmem:[%s9176_s19 + $0x160] sm:$0xff] }
  0xb8   : > { %7887 = vmatpush3.bf16.msra.mxu0 %v8681_v2  ;;  %v303_v2 = vld [vmem:[%s9176_s19 + $0x68] sm:$0xff] }
  0xb9   : > { %7915 = vmatpush3.bf16.msra.mxu1 %v8682_v3  ;;  %7888 = vmatprep.subr.bf16.mxu0 %v8683_v4  ;;  %v6956_v3 = vcombine.low %v302_v0, %v334_v1  ;;  %v6957_v4 = vcombine.high %v302_v0, %v334_v1  ;;  %v8758_v0 = vld [vmem:[%s10889_s1 + $0x7b8] sm:$0xff]   ;;  %v304_v1 = vld [vmem:[%s9176_s19 + $0x70] sm:$0xff] }
  0xba   : > { %7916 = vmatprep.subr.bf16.mxu1 %v8684_v5  ;;  %v335_v5 = vld [vmem:[%s9176_s19 + $0x168] sm:$0xff] }
  0xbc   : > { %7889 = vmatpush3.bf16.msra.mxu0 %v8685_v6  ;;  %v6958_v6 = vcombine.low %v303_v2, %v335_v5 }
  0xbd   : > { %7917 = vmatpush3.bf16.msra.mxu1 %v8686_v7  ;;  %7890 = vmatprep.subr.bf16.mxu0 %v8687_v8  ;;  %v6959_v7 = vcombine.high %v303_v2, %v335_v5  ;;  %v8727_v8 = vld [vmem:[%s10889_s1 + $0x740] sm:$0xff]   ;;  %v336_v5 = vld [vmem:[%s9176_s19 + $0x170] sm:$0xff] }
  0xbe   : > { %7918 = vmatprep.subr.bf16.mxu1 %v8688_v9  ;;  %v8728_v9 = vld [vmem:[%s10889_s1 + $0x7c0] sm:$0xff]  }
  0xc0   : > { %7891 = vmatpush3.bf16.msra.mxu0 %v8689_v10  ;;  %v8729_v10 = vld [vmem:[%s10889_s1 + $0x700] sm:$0xff]  }
  0xc1   : > { %7919 = vmatpush3.bf16.msra.mxu1 %v8690_v11  ;;  %7892 = vmatprep.subr.bf16.mxu0 %v8691_v12  ;;  %v8730_v11 = vld [vmem:[%s10889_s1 + $0x780] sm:$0xff]   ;;  %v8731_v12 = vld [vmem:[%s10889_s1 + $0x748] sm:$0xff]  }
  0xc2   : > { %7920 = vmatprep.subr.bf16.mxu1 %v8692_v13  ;;  %v8732_v13 = vld [vmem:[%s10889_s1 + $0x7c8] sm:$0xff]  }
  0xc4   : > { %7893 = vmatpush3.bf16.msra.mxu0 %v8693_v14 }
  0xc5   : > { %7921 = vmatpush3.bf16.msra.mxu1 %v8694_v15  ;;  %7934 = vmatprep.subr.bf16.mxu0 %v8695_v24  ;;  %v8733_v15 = vld [vmem:[%s10889_s1 + $0x708] sm:$0xff]   ;;  %v8735_v24 = vld [vmem:[%s10889_s1 + $0x750] sm:$0xff]  }
  0xc6   : > { %7962 = vmatprep.subr.bf16.mxu1 %v8696_v25 }
  0xc7   : > { %5677 = vmatmul.mubr.bf16.vlgmr.msra.gmra.mrb[40].mxu0 %v6952_v18  ;;  %v366_v18 = vld [vmem:[%s9176_s19 + $0x260] sm:$0xff] }
  0xc8   : > { %5726 = vmatmul.mubr.bf16.vlgmr.msra.gmra.mrb[40].mxu1 %v6954_v22  ;;  %7935 = vmatpush3.bf16.msra.mxu0 %v8697_v26  ;;  %v7021_v22 = vcombine.high %v366_v18, %v398_v19  ;;  %v7020_v23 = vcombine.low %v366_v18, %v398_v19 }
  0xc9   : > { %7963 = vmatpush3.bf16.msra.mxu1 %v8698_v27  ;;  %7936 = vmatprep.subr.bf16.mxu0 %v8699_v28  ;;  %v8736_v28 = vld [vmem:[%s10889_s1 + $0x7d0] sm:$0xff]  }
  0xca   : > { %7964 = vmatprep.subr.bf16.mxu1 %v8700_v29  ;;  %5684 = vmatprep.mubr.bf16.mxu0 %v7017_v34 }
  0xcb   : > { %5733 = vmatprep.mubr.bf16.mxu1 %v7019_v40 }
  0xcc   : > { %7937 = vmatpush3.bf16.msra.mxu0 %v8701_v30  ;;  %v367_v30 = vld [vmem:[%s9176_s19 + $0x268] sm:$0xff] }
  0xcd   : > { %7965 = vmatpush3.bf16.msra.mxu1 %v8702_v31  ;;  %7938 = vmatprep.subr.bf16.mxu0 %v8703_v36  ;;  %v399_v31 = vld [vmem:[%s9176_s19 + $0x368] sm:$0xff]  ;;  %v8737_v36 = vld [vmem:[%s10889_s1 + $0x710] sm:$0xff]  }
  0xce   : > { %7966 = vmatprep.subr.bf16.mxu1 %v8704_v37  ;;  %v7022_v37 = vcombine.low %v367_v30, %v399_v31 }
  0xcf   : > { %5685 = vmatmul.mubr.bf16.gmra.mrb[44].mxu0 %v7016_v35  ;;  %v7023_v35 = vcombine.high %v367_v30, %v399_v31  ;;  %v368_v30 = vld [vmem:[%s9176_s19 + $0x270] sm:$0xff] }
  0xd0   : > { %7939 = vmatpush3.bf16.msra.mxu0 %v8705_v41  ;;  %5734 = vmatmul.mubr.bf16.gmra.mrb[44].mxu1 %v7018_v42  ;;  %v8739_v41 = vld [vmem:[%s10889_s1 + $0x758] sm:$0xff]   ;;  %v400_v31 = vld [vmem:[%s9176_s19 + $0x370] sm:$0xff] }
  0xd1   : > { %7967 = vmatpush3.bf16.msra.mxu1 %v8706_v43  ;;  %7940 = vmatprep.subr.bf16.mxu0 %v8707_v44  ;;  %v8740_v42 = vld [vmem:[%s10889_s1 + $0x7d8] sm:$0xff]  }
  0xd2   : > { %7968 = vmatprep.subr.bf16.mxu1 %v8708_v45  ;;  %5774 = vmatprep.mubr.bf16.mxu0 %v6957_v4  ;;  %v8741_v44 = vld [vmem:[%s10889_s1 + $0x718] sm:$0xff]  }
  0xd3   : > { %5823 = vmatprep.mubr.bf16.mxu1 %v6959_v7  ;;  %v8742_v45 = vld [vmem:[%s10889_s1 + $0x798] sm:$0xff]  }
  0xd4   : > { %7941 = vmatpush3.bf16.msra.mxu0 %v8709_v46  ;;  %v8743_v46 = vld [vmem:[%s10889_s1 + $0x760] sm:$0xff]   ;;  %v337_v7 = vld [vmem:[%s9176_s19 + $0x178] sm:$0xff] }
  0xd5   : > { %7969 = vmatpush3.bf16.msra.mxu1 %v8710_v47  ;;  %7942 = vmatprep.subr.bf16.mxu0 %v8711_v48  ;;  %v8744_v47 = vld [vmem:[%s10889_s1 + $0x7e0] sm:$0xff]  }
  0xd6   : > { %7970 = vmatprep.subr.bf16.mxu1 %v8712_v49  ;;  %v8745_v48 = vld [vmem:[%s10889_s1 + $0x720] sm:$0xff]  }
  0xd7   : > { %v8746_v49 = vld [vmem:[%s10889_s1 + $0x7a0] sm:$0xff]  }
  0xd8   : > { %7943 = vmatpush3.bf16.msra.mxu0 %v8713_v50  ;;  %v8747_v50 = vld [vmem:[%s10889_s1 + $0x768] sm:$0xff]  }
  0xd9   : > { %7971 = vmatpush3.bf16.msra.mxu1 %v8714_v51  ;;  %7944 = vmatprep.subr.bf16.mxu0 %v8715_v52  ;;  %v8748_v51 = vld [vmem:[%s10889_s1 + $0x7e8] sm:$0xff]  }
  0xda   : > { %7972 = vmatprep.subr.bf16.mxu1 %v8716_v53  ;;  %v8749_v52 = vld [vmem:[%s10889_s1 + $0x728] sm:$0xff]  }
  0xdb   : > { %v8750_v53 = vld [vmem:[%s10889_s1 + $0x7a8] sm:$0xff]  }
  0xdc   : > { %7945 = vmatpush3.bf16.msra.mxu0 %v8717_v54  ;;  %v8751_v54 = vld [vmem:[%s10889_s1 + $0x770] sm:$0xff]  }
  0xdd   : > { %7973 = vmatpush3.bf16.msra.mxu1 %v8718_v55  ;;  %7946 = vmatprep.subr.bf16.mxu0 %v8719_v56  ;;  %v8752_v55 = vld [vmem:[%s10889_s1 + $0x7f0] sm:$0xff]  }
  0xde   : > { %7974 = vmatprep.subr.bf16.mxu1 %v8720_v57  ;;  %v8753_v56 = vld [vmem:[%s10889_s1 + $0x730] sm:$0xff]  }
  0xdf   : > { %v8754_v57 = vld [vmem:[%s10889_s1 + $0x7b0] sm:$0xff]  }
  0xe0   : > { %7947 = vmatpush3.bf16.msra.mxu0 %v8721_v58  ;;  %v8755_v58 = vld [vmem:[%s10889_s1 + $0x778] sm:$0xff]  }
  0xe1   : > { %7975 = vmatpush3.bf16.msra.mxu1 %v8722_v59  ;;  %7948 = vmatprep.subr.bf16.mxu0 %v8723_v60  ;;  %v8756_v60 = vld [vmem:[%s10889_s1 + $0x7f8] sm:$0xff]  }
  0xe2   : > { %7976 = vmatprep.subr.bf16.mxu1 %v8724_v61 }
  0xe4   : > { %7949 = vmatpush3.bf16.msra.mxu0 %v8725_v62  ;;  %v8757_v62 = vld [vmem:[%s10889_s1 + $0x738] sm:$0xff]  }
  0xe5   : > { %7977 = vmatpush3.bf16.msra.mxu1 %v8726_v63  ;;  %7990 = vmatprep.subr.bf16.mxu0 %v8727_v8 }
  0xe6   : > { %8018 = vmatprep.subr.bf16.mxu1 %v8728_v9 }
  0xe7   : > { %5775 = vmatmul.mubr.bf16.vlgmr.msra.gmra.mrb[48].mxu0 %v6956_v3 }
  0xe8   : > { %5824 = vmatmul.mubr.bf16.vlgmr.msra.gmra.mrb[48].mxu1 %v6958_v6  ;;  %7991 = vmatpush3.bf16.msra.mxu0 %v8729_v10  ;;  %v305_v6 = vld [vmem:[%s9176_s19 + $0x78] sm:$0xff] }
  0xe9   : > { %8019 = vmatpush3.bf16.msra.mxu1 %v8730_v11  ;;  %7992 = vmatprep.subr.bf16.mxu0 %v8731_v12  ;;  %v6960_v11 = vcombine.low %v304_v1, %v336_v5  ;;  %v6961_v12 = vcombine.high %v304_v1, %v336_v5 }
  0xea   : > { %8020 = vmatprep.subr.bf16.mxu1 %v8732_v13  ;;  %5782 = vmatprep.mubr.bf16.mxu0 %v7021_v22  ;;  %v6962_v13 = vcombine.low %v305_v6, %v337_v7  ;;  %v8762_v22 = vld [vmem:[%s10889_s1 + $0x880] sm:$0xff]  }
  0xeb   : > { %5831 = vmatprep.mubr.bf16.mxu1 %v7023_v35  ;;  %v7025_v35 = vcombine.high %v368_v30, %v400_v31 }
  0xec   : > { %7993 = vmatpush3.bf16.msra.mxu0 %v8733_v15  ;;  %v8759_v15 = vld [vmem:[%s10889_s1 + $0x840] sm:$0xff]  }
  0xed   : > { %8021 = vmatpush3.bf16.msra.mxu1 %v8734_v17  ;;  %7994 = vmatprep.subr.bf16.mxu0 %v8735_v24  ;;  %v8760_v17 = vld [vmem:[%s10889_s1 + $0x8c0] sm:$0xff]   ;;  %v8763_v24 = vld [vmem:[%s10889_s1 + $0x848] sm:$0xff]  }
  0xee   : > { %8022 = vmatprep.subr.bf16.mxu1 %v8736_v28  ;;  %v8766_v28 = vld [vmem:[%s10889_s1 + $0x888] sm:$0xff]  }
  0xef   : > { %5783 = vmatmul.mubr.bf16.gmra.mrb[52].mxu0 %v7020_v23 }
  0xf0   : > { %7995 = vmatpush3.bf16.msra.mxu0 %v8737_v36  ;;  %5832 = vmatmul.mubr.bf16.gmra.mrb[52].mxu1 %v7022_v37  ;;  %v7024_v36 = vcombine.low %v368_v30, %v400_v31  ;;  %v8767_v37 = vld [vmem:[%s10889_s1 + $0x850] sm:$0xff]  }
  0xf1   : > { %8023 = vmatpush3.bf16.msra.mxu1 %v8738_v39  ;;  %7996 = vmatprep.subr.bf16.mxu0 %v8739_v41  ;;  %v369_v41 = vld [vmem:[%s9176_s19 + $0x278] sm:$0xff] }
  0xf2   : > { %8024 = vmatprep.subr.bf16.mxu1 %v8740_v42  ;;  %5872 = vmatprep.mubr.bf16.mxu0 %v6961_v12  ;;  %v8779_v12 = vld [vmem:[%s10889_s1 + $0x868] sm:$0xff]  }
  0xf4   : > { %7997 = vmatpush3.bf16.msra.mxu0 %v8741_v44 }
  0xf5   : > { %8025 = vmatpush3.bf16.msra.mxu1 %v8742_v45  ;;  %7998 = vmatprep.subr.bf16.mxu0 %v8743_v46  ;;  %v401_v46 = vld [vmem:[%s9176_s19 + $0x378] sm:$0xff] }
  0xf6   : > { %8026 = vmatprep.subr.bf16.mxu1 %v8744_v47 }
  0xf8   : > { %7999 = vmatpush3.bf16.msra.mxu0 %v8745_v48 }
  0xf9   : > { %8027 = vmatpush3.bf16.msra.mxu1 %v8746_v49  ;;  %8000 = vmatprep.subr.bf16.mxu0 %v8747_v50  ;;  %v7027_v50 = vcombine.high %v369_v41, %v401_v46 }
  0xfa   : > { %v7614_v14 = vpop.f32.mrb[0].mxu0  ;;  %8028 = vmatprep.subr.bf16.mxu1 %v8748_v51  ;;  %v8769_v51 = vld [vmem:[%s10889_s1 + $0x810] sm:$0xff]  }
  0xfb   : > { %v7642_v16 = vpop.f32.mrb[0].mxu1  ;;  %v7615_v20 = vpop.f32.mrb[1].mxu0 }
  0xfc   : > { %v7643_v21 = vpop.f32.mrb[1].mxu1  ;;  %v7616_v25 = vadd.f32 %v7615_v20, %v7614_v14  ;;  %v7617_v27 = vpop.f32.mrb[2].mxu0  ;;  %8001 = vmatpush3.bf16.msra.mxu0 %v8749_v52  ;;  %v6963_v14 = vcombine.high %v305_v6, %v337_v7  ;;  %v7026_v52 = vcombine.low %v369_v41, %v401_v46  ;;  %v8777_v6 = vld [vmem:[%s10889_s1 + $0x820] sm:$0xff]   ;;  %v8795_v41 = vld [vmem:[%s10889_s1 + $0x948] sm:$0xff]  }
  0xfd   : > { %v7644_v26 = vadd.f32 %v7643_v21, %v7642_v16  ;;  %v7645_v29 = vpop.f32.mrb[2].mxu1  ;;  %v7618_v33 = vpop.f32.mrb[3].mxu0  ;;  %8029 = vmatpush3.bf16.msra.mxu1 %v8750_v53  ;;  %8002 = vmatprep.subr.bf16.mxu0 %v8751_v54  ;;  %v8761_v21 = vld [vmem:[%s10889_s1 + $0x800] sm:$0xff]   ;;  %v8770_v54 = vld [vmem:[%s10889_s1 + $0x890] sm:$0xff]  }
  0xfe   : > { %v7646_v34 = vpop.f32.mrb[3].mxu1  ;;  %v7619_v38 = vadd.f32 %v7618_v33, %v7617_v27  ;;  %8030 = vmatprep.subr.bf16.mxu1 %v8752_v55  ;;  %5921 = vmatprep.mubr.bf16.mxu1 %v6963_v14  ;;  %v8780_v14 = vld [vmem:[%s10889_s1 + $0x8e8] sm:$0xff]  }
  0xff   : > { %v9846_v32 = vadd.f32 %v7644_v26, %v7616_v25  ;;  %v7647_v40 = vadd.f32 %v7646_v34, %v7645_v29  ;;  %v8764_v25 = vld [vmem:[%s10889_s1 + $0x8c8] sm:$0xff]  }
 0x100   : > { %8003 = vmatpush3.bf16.msra.mxu0 %v8753_v56  ;;  %v8765_v26 = vld [vmem:[%s10889_s1 + $0x808] sm:$0xff]  }
 0x101   : > { %v9860_v43 = vadd.f32 %v7647_v40, %v7619_v38  ;;  %8031 = vmatpush3.bf16.msra.mxu1 %v8754_v57  ;;  %8004 = vmatprep.subr.bf16.mxu0 %v8755_v58  ;;  %v8768_v40 = vld [vmem:[%s10889_s1 + $0x8d0] sm:$0xff]   ;;  %v8772_v57 = vld [vmem:[%s10889_s1 + $0x8d8] sm:$0xff]  }
 0x102   : > { %v7620_v59 = vpop.f32.mrb[4].mxu0  ;;  %8032 = vmatprep.subr.bf16.mxu1 %v8756_v60 }
 0x103   : > { %v7648_v61 = vpop.f32.mrb[4].mxu1  ;;  %v7621_v63 = vpop.f32.mrb[5].mxu0 }
 0x104   : > { %v7622_v2 = vadd.f32 %v7621_v63, %v7620_v59  ;;  %v7649_v3 = vpop.f32.mrb[5].mxu1  ;;  %v7623_v4 = vpop.f32.mrb[6].mxu0  ;;  %8005 = vmatpush3.bf16.msra.mxu0 %v8757_v62 }
 0x105   : > { %v7650_v8 = vadd.f32 %v7649_v3, %v7648_v61  ;;  %v7651_v9 = vpop.f32.mrb[6].mxu1  ;;  %v7624_v10 = vpop.f32.mrb[7].mxu0  ;;  %8033 = vmatpush3.bf16.msra.mxu1 %v8758_v0  ;;  %8046 = vmatprep.subr.bf16.mxu0 %v8759_v15  ;;  %v8774_v61 = vld [vmem:[%s10889_s1 + $0x898] sm:$0xff]   ;;  %v8775_v0 = vld [vmem:[%s10889_s1 + $0x860] sm:$0xff]  }
 0x106   : > { %v7652_v16 = vpop.f32.mrb[7].mxu1  ;;  %v7625_v19 = vadd.f32 %v7624_v10, %v7623_v4  ;;  %8074 = vmatprep.subr.bf16.mxu1 %v8760_v17  ;;  %v8781_v17 = vld [vmem:[%s10889_s1 + $0x828] sm:$0xff]  }
 0x107   : > { %v9926_v18 = vadd.f32 %v7650_v8, %v7622_v2  ;;  %v7653_v20 = vadd.f32 %v7652_v16, %v7651_v9  ;;  %5873 = vmatmul.mubr.bf16.vlgmr.msra.gmra.mrb[56].mxu0 %v6960_v11  ;;  %v8776_v2 = vld [vmem:[%s10889_s1 + $0x8e0] sm:$0xff]  }
 0x108   : > { %5922 = vmatmul.mubr.bf16.vlgmr.msra.gmra.mrb[56].mxu1 %v6962_v13  ;;  %8047 = vmatpush3.bf16.msra.mxu0 %v8761_v21  ;;  %v8778_v8 = vld [vmem:[%s10889_s1 + $0x8a0] sm:$0xff]   ;;  %v8784_v21 = vld [vmem:[%s10889_s1 + $0x8f0] sm:$0xff]  }
 0x109   : > { %v9934_v23 = vadd.f32 %v7653_v20, %v7625_v19  ;;  %8075 = vmatpush3.bf16.msra.mxu1 %v8762_v22  ;;  %8048 = vmatprep.subr.bf16.mxu0 %v8763_v24  ;;  %v8783_v20 = vld [vmem:[%s10889_s1 + $0x870] sm:$0xff]   ;;  %v8787_v24 = vld [vmem:[%s10889_s1 + $0x878] sm:$0xff]  }
 0x10a   : > { %8076 = vmatprep.subr.bf16.mxu1 %v8764_v25  ;;  %5880 = vmatprep.mubr.bf16.mxu0 %v7025_v35  ;;  %v8785_v22 = vld [vmem:[%s10889_s1 + $0x830] sm:$0xff]   ;;  %v8788_v25 = vld [vmem:[%s10889_s1 + $0x8f8] sm:$0xff]  }
 0x10b   : > { %5929 = vmatprep.mubr.bf16.mxu1 %v7027_v50 }
 0x10c   : > { %8049 = vmatpush3.bf16.msra.mxu0 %v8765_v26  ;;  %v8789_v26 = vld [vmem:[%s10889_s1 + $0x838] sm:$0xff]  }
 0x10d   : > { %8077 = vmatpush3.bf16.msra.mxu1 %v8766_v28  ;;  %8050 = vmatprep.subr.bf16.mxu0 %v8767_v37  ;;  %v306_v28 = vld [vmem:[%s9176_s19 + $0x80] sm:$0xff] }
 0x10e   : > { %8078 = vmatprep.subr.bf16.mxu1 %v8768_v40  ;;  %v8791_v37 = vld [vmem:[%s10889_s1 + $0x940] sm:$0xff]  }
 0x10f   : > { %5881 = vmatmul.mubr.bf16.gmra.mrb[60].mxu0 %v7024_v36  ;;  %v8794_v40 = vld [vmem:[%s10889_s1 + $0x980] sm:$0xff]  }
 0x110   : > { %8051 = vmatpush3.bf16.msra.mxu0 %v8769_v51  ;;  %5930 = vmatmul.mubr.bf16.gmra.mrb[60].mxu1 %v7026_v52  ;;  %v402_v51 = vld [vmem:[%s9176_s19 + $0x380] sm:$0xff] }
 0x111   : > { %8079 = vmatpush3.bf16.msra.mxu1 %v8770_v54 }
 0x112   : > { %8080 = vmatprep.subr.bf16.mxu1 %v8772_v57  ;;  %v8799_v57 = vld [vmem:[%s10889_s1 + $0x950] sm:$0xff]  }
 0x115   : > { %8081 = vmatpush3.bf16.msra.mxu1 %v8774_v61  ;;  %v403_v61 = vld [vmem:[%s9176_s19 + $0x388] sm:$0xff] }
 0x116   : > { %8082 = vmatprep.subr.bf16.mxu1 %v8776_v2  ;;  %v8801_v2 = vld [vmem:[%s10889_s1 + $0x910] sm:$0xff]  }
 0x119   : > { %8083 = vmatpush3.bf16.msra.mxu1 %v8778_v8 }
 0x11a   : > { %v7670_v27 = vpop.f32.mrb[8].mxu0  ;;  %8084 = vmatprep.subr.bf16.mxu1 %v8780_v14  ;;  %v8807_v14 = vld [vmem:[%s10889_s1 + $0x960] sm:$0xff]  }
 0x11b   : > { %v7698_v29 = vpop.f32.mrb[8].mxu1  ;;  %v7671_v33 = vpop.f32.mrb[9].mxu0 }
 0x11c   : > { %v7699_v34 = vpop.f32.mrb[9].mxu1  ;;  %v7672_v38 = vadd.f32 %v7671_v33, %v7670_v27  ;;  %v7673_v39 = vpop.f32.mrb[10].mxu0  ;;  %v8790_v27 = vld [vmem:[%s10889_s1 + $0x8b8] sm:$0xff]   ;;  %v307_v33 = vld [vmem:[%s9176_s19 + $0x88] sm:$0xff] }
 0x11d   : > { %v7700_v42 = vadd.f32 %v7699_v34, %v7698_v29  ;;  %v7701_v44 = vpop.f32.mrb[10].mxu1  ;;  %v7674_v45 = vpop.f32.mrb[11].mxu0  ;;  %v338_v29 = vld [vmem:[%s9176_s19 + $0x180] sm:$0xff]  ;;  %v339_v34 = vld [vmem:[%s9176_s19 + $0x188] sm:$0xff] }
 0x11e   : > { %v5287_v47 = vadd.f32 %v7672_v38, %v9846_v32  ;;  %v7675_v48 = vadd.f32 %v7674_v45, %v7673_v39  ;;  %v7702_v49 = vpop.f32.mrb[11].mxu1  ;;  %v8771_v32 = vld [vmem:[%s10889_s1 + $0x858] sm:$0xff]   ;;  %v6964_v30 = vcombine.low %v306_v28, %v338_v29  ;;  %v6965_v31 = vcombine.high %v306_v28, %v338_v29  ;;  %v8792_v38 = vld [vmem:[%s10889_s1 + $0x9c0] sm:$0xff]   ;;  %v8797_v45 = vld [vmem:[%s10889_s1 + $0x908] sm:$0xff]  }
 0x11f   : > { %v7703_v53 = vadd.f32 %v7702_v49, %v7701_v44  ;;  %8052 = vmatprep.subr.bf16.mxu0 %v8771_v32  ;;  %v6966_v35 = vcombine.low %v307_v33, %v339_v34  ;;  %v6967_v36 = vcombine.high %v307_v33, %v339_v34  ;;  %v8793_v39 = vld [vmem:[%s10889_s1 + $0x900] sm:$0xff]   ;;  %v8813_v33 = vld [vmem:[%s10889_s1 + $0x928] sm:$0xff]  }
 0x120   : > { %v9965_v55 = vadd.f32 %v7700_v42, %v5287_v47  ;;  %v5290_v56 = vadd.f32 %v7675_v48, %v9860_v43  ;;  %v8773_v43 = vld [vmem:[%s10889_s1 + $0x818] sm:$0xff]   ;;  %5970 = vmatprep.mubr.bf16.mxu0 %v6965_v31  ;;  %v8796_v42 = vld [vmem:[%s10889_s1 + $0x9c8] sm:$0xff]   ;;  %v370_v48 = vld [vmem:[%s9176_s19 + $0x280] sm:$0xff] }
 0x121   : > { %8053 = vmatpush3.bf16.msra.mxu0 %v8773_v43  ;;  %6019 = vmatprep.mubr.bf16.mxu1 %v6967_v36  ;;  %v8798_v47 = vld [vmem:[%s10889_s1 + $0x988] sm:$0xff]   ;;  %v7028_v32 = vcombine.low %v370_v48, %v402_v51  ;;  %v8800_v43 = vld [vmem:[%s10889_s1 + $0x9d0] sm:$0xff]  }
 0x122   : > { %v9974_v58 = vadd.f32 %v7703_v53, %v5290_v56  ;;  %v7676_v59 = vpop.f32.mrb[12].mxu0  ;;  %8054 = vmatprep.subr.bf16.mxu0 %v8775_v0  ;;  %v7029_v56 = vcombine.high %v370_v48, %v402_v51  ;;  %v8814_v36 = vld [vmem:[%s10889_s1 + $0x9a8] sm:$0xff]   ;;  %v309_v48 = vld [vmem:[%s9176_s19 + $0x98] sm:$0xff] }
 0x123   : > { %v7677_v60 = vpop.f32.mrb[13].mxu0  ;;  %v7704_v4 = vpop.f32.mrb[12].mxu1  ;;  %v341_v51 = vld [vmem:[%s9176_s19 + $0x198] sm:$0xff] }
 0x124   : > { %v7678_v62 = vadd.f32 %v7677_v60, %v7676_v59  ;;  %v7679_v63 = vpop.f32.mrb[14].mxu0  ;;  %v7705_v7 = vpop.f32.mrb[13].mxu1  ;;  %v371_v60 = vld [vmem:[%s9176_s19 + $0x288] sm:$0xff] }
 0x125   : > { %v7680_v1 = vpop.f32.mrb[15].mxu0  ;;  %v7706_v10 = vadd.f32 %v7705_v7, %v7704_v4  ;;  %v7707_v11 = vpop.f32.mrb[14].mxu1  ;;  %8055 = vmatpush3.bf16.msra.mxu0 %v8777_v6  ;;  %v8803_v7 = vld [vmem:[%s10889_s1 + $0x958] sm:$0xff]  }
 0x126   : > { %v5295_v3 = vadd.f32 %v7678_v62, %v9926_v18  ;;  %v7681_v5 = vadd.f32 %v7680_v1, %v7679_v63  ;;  %v7708_v13 = vpop.f32.mrb[15].mxu1  ;;  %8056 = vmatprep.subr.bf16.mxu0 %v8779_v12  ;;  %v8782_v18 = vld [vmem:[%s10889_s1 + $0x8a8] sm:$0xff]   ;;  %v7031_v1 = vcombine.high %v371_v60, %v403_v61 }
 0x127   : > { %v7709_v16 = vadd.f32 %v7708_v13, %v7707_v11  ;;  %8085 = vmatpush3.bf16.msra.mxu1 %v8782_v18  ;;  %v8806_v13 = vld [vmem:[%s10889_s1 + $0x998] sm:$0xff]   ;;  %v8808_v18 = vld [vmem:[%s10889_s1 + $0x9e0] sm:$0xff]  }
 0x128   : > { %v5298_v9 = vadd.f32 %v7681_v5, %v9934_v23  ;;  %v10002_v15 = vadd.f32 %v7706_v10, %v5295_v3  ;;  %8086 = vmatprep.subr.bf16.mxu1 %v8784_v21  ;;  %v8786_v23 = vld [vmem:[%s10889_s1 + $0x8b0] sm:$0xff]   ;;  %v7030_v3 = vcombine.low %v371_v60, %v403_v61  ;;  %v8805_v10 = vld [vmem:[%s10889_s1 + $0x918] sm:$0xff]   ;;  %v8809_v21 = vld [vmem:[%s10889_s1 + $0x920] sm:$0xff]  }
 0x129   : > { %8057 = vmatpush3.bf16.msra.mxu0 %v8781_v17  ;;  %v8802_v5 = vld [vmem:[%s10889_s1 + $0x990] sm:$0xff]   ;;  %v8829_v61 = vld [vmem:[%s10889_s1 + $0xa08] sm:$0xff]  }
 0x12a   : > { %v10010_v19 = vadd.f32 %v7709_v16, %v5298_v9  ;;  %8058 = vmatprep.subr.bf16.mxu0 %v8783_v20  ;;  %v8804_v9 = vld [vmem:[%s10889_s1 + $0x9d8] sm:$0xff]  }
 0x12b   : > { %8087 = vmatpush3.bf16.msra.mxu1 %v8786_v23 }
 0x12c   : > { %8088 = vmatprep.subr.bf16.mxu1 %v8788_v25 }
 0x12d   : > { %8059 = vmatpush3.bf16.msra.mxu0 %v8785_v22 }
 0x12e   : > { %8060 = vmatprep.subr.bf16.mxu0 %v8787_v24  ;;  %v8810_v24 = vld [vmem:[%s10889_s1 + $0x9a0] sm:$0xff]  }
 0x12f   : > { %8089 = vmatpush3.bf16.msra.mxu1 %v8790_v27  ;;  %v8811_v27 = vld [vmem:[%s10889_s1 + $0x968] sm:$0xff]  }
 0x130   : > { %8130 = vmatprep.subr.bf16.mxu1 %v8792_v38  ;;  %v8816_v38 = vld [vmem:[%s10889_s1 + $0x9f0] sm:$0xff]  }
 0x131   : > { %8061 = vmatpush3.bf16.msra.mxu0 %v8789_v26 }
 0x132   : > { %6020 = vmatmul.mubr.bf16.vlgmr.msra.gmra.mrb[64].mxu1 %v6966_v35  ;;  %8102 = vmatprep.subr.bf16.mxu0 %v8791_v37  ;;  %v8815_v37 = vld [vmem:[%s10889_s1 + $0x970] sm:$0xff]  }
 0x133   : > { %8131 = vmatpush3.bf16.msra.mxu1 %v8794_v40  ;;  %6027 = vmatprep.mubr.bf16.mxu1 %v7031_v1  ;;  %v8818_v40 = vld [vmem:[%s10889_s1 + $0x9b0] sm:$0xff]  }
 0x134   : > { %5971 = vmatmul.mubr.bf16.vlgmr.msra.gmra.mrb[64].mxu0 %v6964_v30  ;;  %8132 = vmatprep.subr.bf16.mxu1 %v8796_v42  ;;  %v8820_v42 = vld [vmem:[%s10889_s1 + $0x9f8] sm:$0xff]   ;;  %v404_v1 = vld [vmem:[%s9176_s19 + $0x390] sm:$0xff] }
 0x135   : > { %8103 = vmatpush3.bf16.msra.mxu0 %v8793_v39  ;;  %5978 = vmatprep.mubr.bf16.mxu0 %v7029_v56  ;;  %v8817_v39 = vld [vmem:[%s10889_s1 + $0x930] sm:$0xff]   ;;  %v8824_v56 = vld [vmem:[%s10889_s1 + $0xac0] sm:$0xff]  }
 0x136   : > { %8104 = vmatprep.subr.bf16.mxu0 %v8795_v41  ;;  %v8819_v41 = vld [vmem:[%s10889_s1 + $0x978] sm:$0xff]  }
 0x137   : > { %8133 = vmatpush3.bf16.msra.mxu1 %v8798_v47  ;;  %v340_v47 = vld [vmem:[%s9176_s19 + $0x190] sm:$0xff] }
 0x138   : > { %8134 = vmatprep.subr.bf16.mxu1 %v8800_v43  ;;  %v8828_v43 = vld [vmem:[%s10889_s1 + $0xac8] sm:$0xff]  }
 0x139   : > { %8105 = vmatpush3.bf16.msra.mxu0 %v8797_v45  ;;  %v8822_v45 = vld [vmem:[%s10889_s1 + $0x9b8] sm:$0xff]  }
 0x13a   : > { %v7726_v44 = vpop.f32.mrb[16].mxu0  ;;  %8106 = vmatprep.subr.bf16.mxu0 %v8799_v57  ;;  %6028 = vmatmul.mubr.bf16.gmra.mrb[68].mxu1 %v7030_v3  ;;  %v8826_v57 = vld [vmem:[%s10889_s1 + $0xa80] sm:$0xff]  }
 0x13b   : > { %v7754_v46 = vpop.f32.mrb[16].mxu1  ;;  %v7727_v49 = vpop.f32.mrb[17].mxu0  ;;  %8135 = vmatpush3.bf16.msra.mxu1 %v8802_v5 }
 0x13c   : > { %v7755_v50 = vpop.f32.mrb[17].mxu1  ;;  %v7728_v52 = vadd.f32 %v7727_v49, %v7726_v44  ;;  %v7729_v54 = vpop.f32.mrb[18].mxu0  ;;  %5979 = vmatmul.mubr.bf16.gmra.mrb[68].mxu0 %v7028_v32  ;;  %8136 = vmatprep.subr.bf16.mxu1 %v8804_v9  ;;  %v8821_v44 = vld [vmem:[%s10889_s1 + $0x938] sm:$0xff]   ;;  %v8825_v32 = vld [vmem:[%s10889_s1 + $0xa00] sm:$0xff]  }
 0x13d   : > { %v7756_v53 = vadd.f32 %v7755_v50, %v7754_v46  ;;  %v7757_v59 = vpop.f32.mrb[18].mxu1  ;;  %v7730_v63 = vpop.f32.mrb[19].mxu0  ;;  %8107 = vmatpush3.bf16.msra.mxu0 %v8801_v2  ;;  %v308_v46 = vld [vmem:[%s9176_s19 + $0x90] sm:$0xff] }
 0x13e   : > { %v5385_v62 = vadd.f32 %v7728_v52, %v9965_v55  ;;  %v7758_v0 = vpop.f32.mrb[19].mxu1  ;;  %v7731_v4 = vadd.f32 %v7730_v63, %v7729_v54  ;;  %8108 = vmatprep.subr.bf16.mxu0 %v8803_v7  ;;  %v6968_v49 = vcombine.low %v308_v46, %v340_v47  ;;  %v6969_v50 = vcombine.high %v308_v46, %v340_v47  ;;  %v8823_v54 = vld [vmem:[%s10889_s1 + $0xa40] sm:$0xff]   ;;  %v8830_v63 = vld [vmem:[%s10889_s1 + $0xa88] sm:$0xff]  }
 0x13f   : > { %v7759_v55 = vadd.f32 %v7758_v0, %v7757_v59  ;;  %8137 = vmatpush3.bf16.msra.mxu1 %v8806_v13  ;;  %v6970_v52 = vcombine.low %v309_v48, %v341_v51  ;;  %v8827_v59 = vld [vmem:[%s10889_s1 + $0xa48] sm:$0xff]   ;;  %v372_v0 = vld [vmem:[%s9176_s19 + $0x290] sm:$0xff]  ;;  %v373_v13 = vld [vmem:[%s9176_s19 + $0x298] sm:$0xff] }
 0x140   : > { %v10081_v6 = vadd.f32 %v7756_v53, %v5385_v62  ;;  %v5388_v8 = vadd.f32 %v7731_v4, %v9974_v58  ;;  %8138 = vmatprep.subr.bf16.mxu1 %v8808_v18  ;;  %v6971_v53 = vcombine.high %v309_v48, %v341_v51  ;;  %6068 = vmatprep.mubr.bf16.mxu0 %v6969_v50 }
 0x141   : > { %8109 = vmatpush3.bf16.msra.mxu0 %v8805_v10  ;;  %v7033_v4 = vcombine.high %v372_v0, %v404_v1  ;;  %v7032_v5 = vcombine.low %v372_v0, %v404_v1  ;;  %v8832_v10 = vld [vmem:[%s10889_s1 + $0xad0] sm:$0xff]   ;;  %v311_v0 = vld [vmem:[%s9176_s19 + $0xa8] sm:$0xff] }
 0x142   : > { %v10093_v11 = vadd.f32 %v7759_v55, %v5388_v8  ;;  %v7732_v12 = vpop.f32.mrb[20].mxu0  ;;  %8110 = vmatprep.subr.bf16.mxu0 %v8807_v14  ;;  %6117 = vmatprep.mubr.bf16.mxu1 %v6971_v53  ;;  %v8831_v55 = vld [vmem:[%s10889_s1 + $0xa50] sm:$0xff]   ;;  %v343_v1 = vld [vmem:[%s9176_s19 + $0x1a8] sm:$0xff] }
 0x143   : > { %v7733_v58 = vpop.f32.mrb[21].mxu0  ;;  %v7760_v20 = vpop.f32.mrb[20].mxu1  ;;  %8139 = vmatpush3.bf16.msra.mxu1 %v8810_v24 }
 0x144   : > { %v7734_v16 = vadd.f32 %v7733_v58, %v7732_v12  ;;  %v7735_v17 = vpop.f32.mrb[22].mxu0  ;;  %v7761_v26 = vpop.f32.mrb[21].mxu1  ;;  %v405_v58 = vld [vmem:[%s9176_s19 + $0x398] sm:$0xff] }
 0x145   : > { %v7736_v23 = vpop.f32.mrb[23].mxu0  ;;  %8111 = vmatpush3.bf16.msra.mxu0 %v8809_v21  ;;  %v7762_v28 = vadd.f32 %v7761_v26, %v7760_v20  ;;  %v7763_v29 = vpop.f32.mrb[22].mxu1  ;;  %v7035_v18 = vcombine.high %v373_v13, %v405_v58  ;;  %v8833_v20 = vld [vmem:[%s10889_s1 + $0xa10] sm:$0xff]   ;;  %v7034_v21 = vcombine.low %v373_v13, %v405_v58  ;;  %v8861_v13 = vld [vmem:[%s10889_s1 + $0xb08] sm:$0xff]  }
 0x146   : > { %v5393_v22 = vadd.f32 %v7734_v16, %v10002_v15  ;;  %v7737_v25 = vadd.f32 %v7736_v23, %v7735_v17  ;;  %v8812_v15 = vld [vmem:[%s10889_s1 + $0x9e8] sm:$0xff]   ;;  %v7764_v31 = vpop.f32.mrb[23].mxu1  ;;  %8112 = vmatprep.subr.bf16.mxu0 %v8811_v27  ;;  %v8834_v23 = vld [vmem:[%s10889_s1 + $0xa90] sm:$0xff]   ;;  %v8836_v27 = vld [vmem:[%s10889_s1 + $0xad8] sm:$0xff]  }
 0x147   : > { %v7765_v35 = vadd.f32 %v7764_v31, %v7763_v29  ;;  %8140 = vmatprep.subr.bf16.mxu1 %v8812_v15  ;;  %v8837_v29 = vld [vmem:[%s10889_s1 + $0xa18] sm:$0xff]  }
 0x148   : > { %v5396_v30 = vadd.f32 %v7737_v25, %v10010_v19  ;;  %v10121_v34 = vadd.f32 %v7762_v28, %v5393_v22  ;;  %8141 = vmatpush3.bf16.msra.mxu1 %v8814_v36 }
 0x149   : > { %8113 = vmatpush3.bf16.msra.mxu0 %v8813_v33  ;;  %8142 = vmatprep.subr.bf16.mxu1 %v8816_v38 }
 0x14a   : > { %v10129_v19 = vadd.f32 %v7765_v35, %v5396_v30  ;;  %8114 = vmatprep.subr.bf16.mxu0 %v8815_v37  ;;  %v8839_v35 = vld [vmem:[%s10889_s1 + $0xa60] sm:$0xff]  }
 0x14b   : > { %v8840_v37 = vld [vmem:[%s10889_s1 + $0xae0] sm:$0xff]  }
 0x14c   : > { %8143 = vmatpush3.bf16.msra.mxu1 %v8818_v40 }
 0x14d   : > { %8115 = vmatpush3.bf16.msra.mxu0 %v8817_v39  ;;  %8144 = vmatprep.subr.bf16.mxu1 %v8820_v42 }
 0x14e   : > { %8116 = vmatprep.subr.bf16.mxu0 %v8819_v41  ;;  %v8841_v41 = vld [vmem:[%s10889_s1 + $0xa20] sm:$0xff]  }
 0x150   : > { %8145 = vmatpush3.bf16.msra.mxu1 %v8822_v45 }
 0x151   : > { %8117 = vmatpush3.bf16.msra.mxu0 %v8821_v44  ;;  %8186 = vmatprep.subr.bf16.mxu1 %v8824_v56  ;;  %v8842_v44 = vld [vmem:[%s10889_s1 + $0xaa0] sm:$0xff]   ;;  %v8848_v56 = vld [vmem:[%s10889_s1 + $0xaf0] sm:$0xff]  }
 0x152   : > { %8158 = vmatprep.subr.bf16.mxu0 %v8823_v54  ;;  %v8847_v54 = vld [vmem:[%s10889_s1 + $0xa70] sm:$0xff]  }
 0x153   : > { %6118 = vmatmul.mubr.bf16.vlgmr.msra.gmra.mrb[72].mxu1 %v6970_v52  ;;  %v8846_v52 = vld [vmem:[%s10889_s1 + $0xaa8] sm:$0xff]  }
 0x154   : > { %6069 = vmatmul.mubr.bf16.vlgmr.msra.gmra.mrb[72].mxu0 %v6968_v49  ;;  %8187 = vmatpush3.bf16.msra.mxu1 %v8826_v57  ;;  %v8844_v49 = vld [vmem:[%s10889_s1 + $0xae8] sm:$0xff]   ;;  %v8850_v57 = vld [vmem:[%s10889_s1 + $0xab0] sm:$0xff]  }
 0x155   : > { %8159 = vmatpush3.bf16.msra.mxu0 %v8825_v32  ;;  %8188 = vmatprep.subr.bf16.mxu1 %v8828_v43  ;;  %v8849_v32 = vld [vmem:[%s10889_s1 + $0xa30] sm:$0xff]   ;;  %v8852_v43 = vld [vmem:[%s10889_s1 + $0xaf8] sm:$0xff]  }
 0x156   : > { %8160 = vmatprep.subr.bf16.mxu0 %v8827_v59  ;;  %6076 = vmatprep.mubr.bf16.mxu0 %v7033_v4  ;;  %v8851_v59 = vld [vmem:[%s10889_s1 + $0xa78] sm:$0xff]   ;;  %v6974_v4 = vcombine.low %v311_v0, %v343_v1 }
 0x157   : > { %6125 = vmatprep.mubr.bf16.mxu1 %v7035_v18  ;;  %v406_v18 = vld [vmem:[%s9176_s19 + $0x3a0] sm:$0xff] }
 0x158   : > { %8189 = vmatpush3.bf16.msra.mxu1 %v8830_v63  ;;  %v342_v63 = vld [vmem:[%s9176_s19 + $0x1a0] sm:$0xff] }
 0x159   : > { %8161 = vmatpush3.bf16.msra.mxu0 %v8829_v61  ;;  %8190 = vmatprep.subr.bf16.mxu1 %v8832_v10  ;;  %v8854_v61 = vld [vmem:[%s10889_s1 + $0xab8] sm:$0xff]   ;;  %v8859_v10 = vld [vmem:[%s10889_s1 + $0xb48] sm:$0xff]  }
 0x15a   : > { %v7782_v60 = vpop.f32.mrb[24].mxu0  ;;  %8162 = vmatprep.subr.bf16.mxu0 %v8831_v55  ;;  %v8855_v55 = vld [vmem:[%s10889_s1 + $0xb40] sm:$0xff]  }
 0x15b   : > { %v7810_v62 = vpop.f32.mrb[24].mxu1  ;;  %v7783_v2 = vpop.f32.mrb[25].mxu0  ;;  %6126 = vmatmul.mubr.bf16.gmra.mrb[76].mxu1 %v7034_v21 }
 0x15c   : > { %v7811_v3 = vpop.f32.mrb[25].mxu1  ;;  %v7784_v7 = vadd.f32 %v7783_v2, %v7782_v60  ;;  %v7785_v9 = vpop.f32.mrb[26].mxu0  ;;  %6077 = vmatmul.mubr.bf16.gmra.mrb[76].mxu0 %v7032_v5  ;;  %8191 = vmatpush3.bf16.msra.mxu1 %v8834_v23  ;;  %v8853_v60 = vld [vmem:[%s10889_s1 + $0xa38] sm:$0xff]   ;;  %v6975_v5 = vcombine.high %v311_v0, %v343_v1  ;;  %v8876_v1 = vld [vmem:[%s10889_s1 + $0xbe8] sm:$0xff]  }
 0x15d   : > { %v7812_v8 = vadd.f32 %v7811_v3, %v7810_v62  ;;  %v7813_v12 = vpop.f32.mrb[26].mxu1  ;;  %v7786_v16 = vpop.f32.mrb[27].mxu0  ;;  %8163 = vmatpush3.bf16.msra.mxu0 %v8833_v20  ;;  %8192 = vmatprep.subr.bf16.mxu1 %v8836_v27  ;;  %v310_v62 = vld [vmem:[%s9176_s19 + $0xa0] sm:$0xff]  ;;  %v8864_v27 = vld [vmem:[%s10889_s1 + $0xbd0] sm:$0xff]  }
 0x15e   : > { %v5483_v14 = vadd.f32 %v7784_v7, %v10081_v6  ;;  %v7814_v17 = vpop.f32.mrb[27].mxu1  ;;  %v7787_v22 = vadd.f32 %v7786_v16, %v7785_v9  ;;  %v8835_v6 = vld [vmem:[%s10889_s1 + $0xa58] sm:$0xff]   ;;  %v6972_v2 = vcombine.low %v310_v62, %v342_v63  ;;  %v6973_v3 = vcombine.high %v310_v62, %v342_v63  ;;  %v8856_v7 = vld [vmem:[%s10889_s1 + $0xbc0] sm:$0xff]   ;;  %6215 = vmatprep.mubr.bf16.mxu1 %v6975_v5 }
 0x15f   : > { %v7815_v25 = vadd.f32 %v7814_v17, %v7813_v12  ;;  %8164 = vmatprep.subr.bf16.mxu0 %v8835_v6  ;;  %v8858_v9 = vld [vmem:[%s10889_s1 + $0xb80] sm:$0xff]   ;;  %v8860_v12 = vld [vmem:[%s10889_s1 + $0xbc8] sm:$0xff]  }
 0x160   : > { %v10197_v24 = vadd.f32 %v7812_v8, %v5483_v14  ;;  %v5486_v26 = vadd.f32 %v7787_v22, %v10093_v11  ;;  %v8838_v11 = vld [vmem:[%s10889_s1 + $0xa98] sm:$0xff]   ;;  %6166 = vmatprep.mubr.bf16.mxu0 %v6973_v3  ;;  %v8857_v8 = vld [vmem:[%s10889_s1 + $0xb00] sm:$0xff]   ;;  %v8862_v14 = vld [vmem:[%s10889_s1 + $0xb88] sm:$0xff]  }
 0x161   : > { %8165 = vmatpush3.bf16.msra.mxu0 %v8837_v29  ;;  %8193 = vmatpush3.bf16.msra.mxu1 %v8838_v11  ;;  %v374_v17 = vld [vmem:[%s9176_s19 + $0x2a0] sm:$0xff] }
 0x162   : > { %v7788_v28 = vpop.f32.mrb[28].mxu0  ;;  %v10209_v15 = vadd.f32 %v7815_v25, %v5486_v26  ;;  %8166 = vmatprep.subr.bf16.mxu0 %v8839_v35  ;;  %8194 = vmatprep.subr.bf16.mxu1 %v8840_v37  ;;  %v7037_v22 = vcombine.high %v374_v17, %v406_v18  ;;  %v7036_v23 = vcombine.low %v374_v17, %v406_v18  ;;  %v8863_v25 = vld [vmem:[%s10889_s1 + $0xb50] sm:$0xff]  }
 0x163   : > { %v7789_v30 = vpop.f32.mrb[29].mxu0  ;;  %v7816_v39 = vpop.f32.mrb[28].mxu1 }
 0x164   : > { %v7790_v31 = vadd.f32 %v7789_v30, %v7788_v28  ;;  %v7791_v33 = vpop.f32.mrb[30].mxu0  ;;  %v7817_v42 = vpop.f32.mrb[29].mxu1  ;;  %v375_v28 = vld [vmem:[%s9176_s19 + $0x2a8] sm:$0xff] }
 0x165   : > { %v7792_v36 = vpop.f32.mrb[31].mxu0  ;;  %v7818_v46 = vadd.f32 %v7817_v42, %v7816_v39  ;;  %v7819_v47 = vpop.f32.mrb[30].mxu1  ;;  %8167 = vmatpush3.bf16.msra.mxu0 %v8841_v41  ;;  %8195 = vmatpush3.bf16.msra.mxu1 %v8842_v44  ;;  %v8866_v41 = vld [vmem:[%s10889_s1 + $0xb90] sm:$0xff]  }
 0x166   : > { %v5491_v38 = vadd.f32 %v7790_v31, %v10121_v34  ;;  %v7793_v40 = vadd.f32 %v7792_v36, %v7791_v33  ;;  %v8843_v34 = vld [vmem:[%s10889_s1 + $0xa68] sm:$0xff]   ;;  %v7820_v48 = vpop.f32.mrb[31].mxu1  ;;  %8196 = vmatprep.subr.bf16.mxu1 %v8844_v49 }
 0x167   : > { %v7821_v51 = vadd.f32 %v7820_v48, %v7819_v47  ;;  %8168 = vmatprep.subr.bf16.mxu0 %v8843_v34  ;;  %v407_v31 = vld [vmem:[%s9176_s19 + $0x3a8] sm:$0xff]  ;;  %v8870_v48 = vld [vmem:[%s10889_s1 + $0xb98] sm:$0xff]  }
 0x168   : > { %v5494_v45 = vadd.f32 %v7793_v40, %v10129_v19  ;;  %v10234_v50 = vadd.f32 %v7818_v46, %v5491_v38  ;;  %v8845_v19 = vld [vmem:[%s10889_s1 + $0xa28] sm:$0xff]   ;;  %v7039_v37 = vcombine.high %v375_v28, %v407_v31  ;;  %v8865_v38 = vld [vmem:[%s10889_s1 + $0xb10] sm:$0xff]   ;;  %v7038_v39 = vcombine.low %v375_v28, %v407_v31 }
 0x169   : > { %8169 = vmatpush3.bf16.msra.mxu0 %v8845_v19  ;;  %8197 = vmatpush3.bf16.msra.mxu1 %v8846_v52  ;;  %v8871_v19 = vld [vmem:[%s10889_s1 + $0xb60] sm:$0xff]   ;;  %v8891_v28 = vld [vmem:[%s10889_s1 + $0xc48] sm:$0xff]  }
 0x16a   : > { %v10242_v53 = vadd.f32 %v7821_v51, %v5494_v45  ;;  %8170 = vmatprep.subr.bf16.mxu0 %v8847_v54  ;;  %8198 = vmatprep.subr.bf16.mxu1 %v8848_v56  ;;  %v8868_v45 = vld [vmem:[%s10889_s1 + $0xbd8] sm:$0xff]   ;;  %v8872_v54 = vld [vmem:[%s10889_s1 + $0xbe0] sm:$0xff]  }
 0x16d   : > { %8171 = vmatpush3.bf16.msra.mxu0 %v8849_v32  ;;  %8199 = vmatpush3.bf16.msra.mxu1 %v8850_v57 }
 0x16e   : > { %8172 = vmatprep.subr.bf16.mxu0 %v8851_v59  ;;  %8200 = vmatprep.subr.bf16.mxu1 %v8852_v43  ;;  %v8873_v59 = vld [vmem:[%s10889_s1 + $0xb20] sm:$0xff]  }
 0x171   : > { %8173 = vmatpush3.bf16.msra.mxu0 %v8853_v60  ;;  %8201 = vmatpush3.bf16.msra.mxu1 %v8854_v61  ;;  %v8874_v60 = vld [vmem:[%s10889_s1 + $0xba0] sm:$0xff]  }
 0x172   : > { %8214 = vmatprep.subr.bf16.mxu0 %v8855_v55  ;;  %8242 = vmatprep.subr.bf16.mxu1 %v8856_v7  ;;  %v8879_v55 = vld [vmem:[%s10889_s1 + $0xb70] sm:$0xff]  }
 0x173   : > { %v8880_v7 = vld [vmem:[%s10889_s1 + $0xbf0] sm:$0xff]  }
 0x174   : > { %6167 = vmatmul.mubr.bf16.vlgmr.msra.gmra.mrb[80].mxu0 %v6972_v2  ;;  %6216 = vmatmul.mubr.bf16.vlgmr.msra.gmra.mrb[80].mxu1 %v6974_v4  ;;  %v8878_v4 = vld [vmem:[%s10889_s1 + $0xba8] sm:$0xff]  }
 0x175   : > { %8215 = vmatpush3.bf16.msra.mxu0 %v8857_v8  ;;  %8243 = vmatpush3.bf16.msra.mxu1 %v8858_v9  ;;  %v8881_v8 = vld [vmem:[%s10889_s1 + $0xb30] sm:$0xff]  }
 0x176   : > { %8216 = vmatprep.subr.bf16.mxu0 %v8859_v10  ;;  %8244 = vmatprep.subr.bf16.mxu1 %v8860_v12  ;;  %v8882_v9 = vld [vmem:[%s10889_s1 + $0xbb0] sm:$0xff]   ;;  %v8883_v10 = vld [vmem:[%s10889_s1 + $0xb78] sm:$0xff]  }
 0x177   : > { %6174 = vmatprep.mubr.bf16.mxu0 %v7037_v22  ;;  %6223 = vmatprep.mubr.bf16.mxu1 %v7039_v37  ;;  %v8884_v12 = vld [vmem:[%s10889_s1 + $0xbf8] sm:$0xff]  }
 0x179   : > { %8217 = vmatpush3.bf16.msra.mxu0 %v8861_v13  ;;  %8245 = vmatpush3.bf16.msra.mxu1 %v8862_v14  ;;  %v8885_v13 = vld [vmem:[%s10889_s1 + $0xb38] sm:$0xff]   ;;  %v312_v14 = vld [vmem:[%s9176_s19 + $0xb0] sm:$0xff] }
 0x17a   : > { %v7838_v58 = vpop.f32.mrb[32].mxu0  ;;  %8218 = vmatprep.subr.bf16.mxu0 %v8863_v25  ;;  %8246 = vmatprep.subr.bf16.mxu1 %v8864_v27  ;;  %v8887_v25 = vld [vmem:[%s10889_s1 + $0xc40] sm:$0xff]  }
 0x17b   : > { %v7866_v16 = vpop.f32.mrb[32].mxu1  ;;  %v7839_v20 = vpop.f32.mrb[33].mxu0  ;;  %v8890_v27 = vld [vmem:[%s10889_s1 + $0xc80] sm:$0xff]  }
 0x17c   : > { %v7867_v21 = vpop.f32.mrb[33].mxu1  ;;  %v7840_v6 = vadd.f32 %v7839_v20, %v7838_v58  ;;  %v7841_v26 = vpop.f32.mrb[34].mxu0  ;;  %6175 = vmatmul.mubr.bf16.gmra.mrb[84].mxu0 %v7036_v23  ;;  %6224 = vmatmul.mubr.bf16.gmra.mrb[84].mxu1 %v7038_v39  ;;  %v8886_v58 = vld [vmem:[%s10889_s1 + $0xbb8] sm:$0xff]  }
 0x17d   : > { %v7868_v29 = vadd.f32 %v7867_v21, %v7866_v16  ;;  %v7869_v30 = vpop.f32.mrb[34].mxu1  ;;  %v7842_v11 = vpop.f32.mrb[35].mxu0  ;;  %8219 = vmatpush3.bf16.msra.mxu0 %v8865_v38  ;;  %8247 = vmatpush3.bf16.msra.mxu1 %v8866_v41  ;;  %v344_v16 = vld [vmem:[%s9176_s19 + $0x1b0] sm:$0xff]  ;;  %v313_v20 = vld [vmem:[%s9176_s19 + $0xb8] sm:$0xff] }
 0x17e   : > { %v5581_v33 = vadd.f32 %v7840_v6, %v10197_v24  ;;  %v7843_v35 = vadd.f32 %v7842_v11, %v7841_v26  ;;  %v7870_v36 = vpop.f32.mrb[35].mxu1  ;;  %v8867_v24 = vld [vmem:[%s10889_s1 + $0xb58] sm:$0xff]   ;;  %8248 = vmatprep.subr.bf16.mxu1 %v8868_v45  ;;  %v6976_v17 = vcombine.low %v312_v14, %v344_v16  ;;  %v6977_v18 = vcombine.high %v312_v14, %v344_v16  ;;  %v8888_v6 = vld [vmem:[%s10889_s1 + $0xcc0] sm:$0xff]   ;;  %v8893_v11 = vld [vmem:[%s10889_s1 + $0xc08] sm:$0xff]  }
 0x17f   : > { %v7871_v40 = vadd.f32 %v7870_v36, %v7869_v30  ;;  %8220 = vmatprep.subr.bf16.mxu0 %v8867_v24  ;;  %v345_v21 = vld [vmem:[%s9176_s19 + $0x1b8] sm:$0xff]  ;;  %v8889_v26 = vld [vmem:[%s10889_s1 + $0xc00] sm:$0xff]   ;;  %v408_v38 = vld [vmem:[%s9176_s19 + $0x3b0] sm:$0xff] }
 0x180   : > { %v10313_v42 = vadd.f32 %v7868_v29, %v5581_v33  ;;  %v5584_v44 = vadd.f32 %v7843_v35, %v10209_v15  ;;  %v8869_v15 = vld [vmem:[%s10889_s1 + $0xb18] sm:$0xff]   ;;  %v6978_v22 = vcombine.low %v313_v20, %v345_v21  ;;  %v6979_v23 = vcombine.high %v313_v20, %v345_v21  ;;  %6264 = vmatprep.mubr.bf16.mxu0 %v6977_v18  ;;  %v8892_v29 = vld [vmem:[%s10889_s1 + $0xcc8] sm:$0xff]   ;;  %v376_v35 = vld [vmem:[%s9176_s19 + $0x2b0] sm:$0xff] }
 0x181   : > { %8221 = vmatpush3.bf16.msra.mxu0 %v8869_v15  ;;  %8249 = vmatpush3.bf16.msra.mxu1 %v8870_v48  ;;  %v8894_v33 = vld [vmem:[%s10889_s1 + $0xc88] sm:$0xff]   ;;  %v7040_v24 = vcombine.low %v376_v35, %v408_v38  ;;  %v8895_v45 = vld [vmem:[%s10889_s1 + $0xc50] sm:$0xff]   ;;  %v409_v48 = vld [vmem:[%s9176_s19 + $0x3b8] sm:$0xff] }
 0x182   : > { %v10322_v46 = vadd.f32 %v7871_v40, %v5584_v44  ;;  %v7844_v47 = vpop.f32.mrb[36].mxu0  ;;  %8222 = vmatprep.subr.bf16.mxu0 %v8871_v19  ;;  %8250 = vmatprep.subr.bf16.mxu1 %v8872_v54  ;;  %v7041_v44 = vcombine.high %v376_v35, %v408_v38  ;;  %v8896_v15 = vld [vmem:[%s10889_s1 + $0xcd0] sm:$0xff]   ;;  %v8909_v20 = vld [vmem:[%s10889_s1 + $0xc28] sm:$0xff]  }
 0x183   : > { %v7845_v34 = vpop.f32.mrb[37].mxu0  ;;  %v7872_v32 = vpop.f32.mrb[36].mxu1  ;;  %6313 = vmatprep.mubr.bf16.mxu1 %v6979_v23  ;;  %v8897_v54 = vld [vmem:[%s10889_s1 + $0xc10] sm:$0xff]   ;;  %v8910_v23 = vld [vmem:[%s10889_s1 + $0xca8] sm:$0xff]  }
 0x184   : > { %v7846_v49 = vadd.f32 %v7845_v34, %v7844_v47  ;;  %v7847_v51 = vpop.f32.mrb[38].mxu0  ;;  %v7873_v43 = vpop.f32.mrb[37].mxu1  ;;  %v377_v34 = vld [vmem:[%s9176_s19 + $0x2b8] sm:$0xff]  ;;  %v315_v35 = vld [vmem:[%s9176_s19 + $0xc8] sm:$0xff] }
 0x185   : > { %v7848_v52 = vpop.f32.mrb[39].mxu0  ;;  %v7874_v62 = vadd.f32 %v7873_v43, %v7872_v32  ;;  %v7875_v63 = vpop.f32.mrb[38].mxu1  ;;  %8223 = vmatpush3.bf16.msra.mxu0 %v8873_v59  ;;  %8251 = vmatpush3.bf16.msra.mxu1 %v8874_v60  ;;  %v8899_v43 = vld [vmem:[%s10889_s1 + $0xc58] sm:$0xff]   ;;  %v347_v38 = vld [vmem:[%s9176_s19 + $0x1c8] sm:$0xff] }
 0x186   : > { %v5589_v56 = vadd.f32 %v7846_v49, %v10234_v50  ;;  %v7849_v57 = vadd.f32 %v7848_v52, %v7847_v51  ;;  %v8875_v50 = vld [vmem:[%s10889_s1 + $0xb68] sm:$0xff]   ;;  %v7876_v0 = vpop.f32.mrb[39].mxu1  ;;  %8252 = vmatprep.subr.bf16.mxu1 %v8876_v1  ;;  %v7043_v52 = vcombine.high %v377_v34, %v409_v48  ;;  %v8903_v1 = vld [vmem:[%s10889_s1 + $0xc60] sm:$0xff]  }
 0x187   : > { %v7877_v3 = vadd.f32 %v7876_v0, %v7875_v63  ;;  %8224 = vmatprep.subr.bf16.mxu0 %v8875_v50  ;;  %v8902_v0 = vld [vmem:[%s10889_s1 + $0xc98] sm:$0xff]  }
 0x188   : > { %v5592_v61 = vadd.f32 %v7849_v57, %v10242_v53  ;;  %v10350_v2 = vadd.f32 %v7874_v62, %v5589_v56  ;;  %v8877_v53 = vld [vmem:[%s10889_s1 + $0xb28] sm:$0xff]   ;;  %v7042_v56 = vcombine.low %v377_v34, %v409_v48  ;;  %v8898_v57 = vld [vmem:[%s10889_s1 + $0xc90] sm:$0xff]   ;;  %v8901_v62 = vld [vmem:[%s10889_s1 + $0xc18] sm:$0xff]  }
 0x189   : > { %8225 = vmatpush3.bf16.msra.mxu0 %v8877_v53  ;;  %8253 = vmatpush3.bf16.msra.mxu1 %v8878_v4  ;;  %v8904_v4 = vld [vmem:[%s10889_s1 + $0xce0] sm:$0xff]   ;;  %v8925_v48 = vld [vmem:[%s10889_s1 + $0xd08] sm:$0xff]  }
 0x18a   : > { %v10358_v5 = vadd.f32 %v7877_v3, %v5592_v61  ;;  %8226 = vmatprep.subr.bf16.mxu0 %v8879_v55  ;;  %8254 = vmatprep.subr.bf16.mxu1 %v8880_v7  ;;  %v8900_v61 = vld [vmem:[%s10889_s1 + $0xcd8] sm:$0xff]   ;;  %v8905_v7 = vld [vmem:[%s10889_s1 + $0xc20] sm:$0xff]  }
 0x18d   : > { %8227 = vmatpush3.bf16.msra.mxu0 %v8881_v8  ;;  %8255 = vmatpush3.bf16.msra.mxu1 %v8882_v9 }
 0x18e   : > { %8228 = vmatprep.subr.bf16.mxu0 %v8883_v10  ;;  %8256 = vmatprep.subr.bf16.mxu1 %v8884_v12  ;;  %v8906_v10 = vld [vmem:[%s10889_s1 + $0xca0] sm:$0xff]  }
 0x191   : > { %8229 = vmatpush3.bf16.msra.mxu0 %v8885_v13  ;;  %8257 = vmatpush3.bf16.msra.mxu1 %v8886_v58  ;;  %v8907_v58 = vld [vmem:[%s10889_s1 + $0xc68] sm:$0xff]  }
 0x192   : > { %8270 = vmatprep.subr.bf16.mxu0 %v8887_v25  ;;  %8298 = vmatprep.subr.bf16.mxu1 %v8888_v6  ;;  %v8911_v25 = vld [vmem:[%s10889_s1 + $0xc70] sm:$0xff]  }
 0x193   : > { %v8912_v6 = vld [vmem:[%s10889_s1 + $0xcf0] sm:$0xff]  }
 0x194   : > { %6265 = vmatmul.mubr.bf16.vlgmr.msra.gmra.mrb[88].mxu0 %v6976_v17  ;;  %6314 = vmatmul.mubr.bf16.vlgmr.msra.gmra.mrb[88].mxu1 %v6978_v22 }
 0x195   : > { %8271 = vmatpush3.bf16.msra.mxu0 %v8889_v26  ;;  %8299 = vmatpush3.bf16.msra.mxu1 %v8890_v27  ;;  %v8913_v26 = vld [vmem:[%s10889_s1 + $0xc30] sm:$0xff]  }
 0x196   : > { %8272 = vmatprep.subr.bf16.mxu0 %v8891_v28  ;;  %8300 = vmatprep.subr.bf16.mxu1 %v8892_v29  ;;  %v8914_v27 = vld [vmem:[%s10889_s1 + $0xcb0] sm:$0xff]   ;;  %v8915_v28 = vld [vmem:[%s10889_s1 + $0xc78] sm:$0xff]  }
 0x197   : > { %6272 = vmatprep.mubr.bf16.mxu0 %v7041_v44  ;;  %6321 = vmatprep.mubr.bf16.mxu1 %v7043_v52  ;;  %v8916_v29 = vld [vmem:[%s10889_s1 + $0xcf8] sm:$0xff]   ;;  %v8920_v44 = vld [vmem:[%s10889_s1 + $0xdc0] sm:$0xff]  }
 0x198   : > { %v410_v52 = vld [vmem:[%s9176_s19 + $0x3c0] sm:$0xff] }
 0x199   : > { %8273 = vmatpush3.bf16.msra.mxu0 %v8893_v11  ;;  %8301 = vmatpush3.bf16.msra.mxu1 %v8894_v33  ;;  %v8918_v11 = vld [vmem:[%s10889_s1 + $0xcb8] sm:$0xff]   ;;  %v346_v33 = vld [vmem:[%s9176_s19 + $0x1c0] sm:$0xff] }
 0x19a   : > { %v7894_v30 = vpop.f32.mrb[40].mxu0  ;;  %8274 = vmatprep.subr.bf16.mxu0 %v8895_v45  ;;  %8302 = vmatprep.subr.bf16.mxu1 %v8896_v15  ;;  %v8922_v45 = vld [vmem:[%s10889_s1 + $0xd80] sm:$0xff]   ;;  %v8924_v15 = vld [vmem:[%s10889_s1 + $0xdc8] sm:$0xff]  }
 0x19b   : > { %v7922_v31 = vpop.f32.mrb[40].mxu1  ;;  %v7895_v36 = vpop.f32.mrb[41].mxu0 }
 0x19c   : > { %v7923_v37 = vpop.f32.mrb[41].mxu1  ;;  %v7896_v39 = vadd.f32 %v7895_v36, %v7894_v30  ;;  %v7897_v41 = vpop.f32.mrb[42].mxu0  ;;  %6273 = vmatmul.mubr.bf16.gmra.mrb[92].mxu0 %v7040_v24  ;;  %6322 = vmatmul.mubr.bf16.gmra.mrb[92].mxu1 %v7042_v56  ;;  %v8917_v30 = vld [vmem:[%s10889_s1 + $0xc38] sm:$0xff]   ;;  %v8921_v24 = vld [vmem:[%s10889_s1 + $0xd00] sm:$0xff]  }
 0x19d   : > { %v7924_v40 = vadd.f32 %v7923_v37, %v7922_v31  ;;  %v7925_v47 = vpop.f32.mrb[42].mxu1  ;;  %v7898_v51 = vpop.f32.mrb[43].mxu0  ;;  %8275 = vmatpush3.bf16.msra.mxu0 %v8897_v54  ;;  %8303 = vmatpush3.bf16.msra.mxu1 %v8898_v57  ;;  %v314_v31 = vld [vmem:[%s9176_s19 + $0xc0] sm:$0xff] }
 0x19e   : > { %v5679_v49 = vadd.f32 %v7896_v39, %v10313_v42  ;;  %v7926_v19 = vpop.f32.mrb[43].mxu1  ;;  %v7899_v32 = vadd.f32 %v7898_v51, %v7897_v41  ;;  %8276 = vmatprep.subr.bf16.mxu0 %v8899_v43  ;;  %8304 = vmatprep.subr.bf16.mxu1 %v8900_v61  ;;  %v6980_v36 = vcombine.low %v314_v31, %v346_v33  ;;  %v8919_v41 = vld [vmem:[%s10889_s1 + $0xd40] sm:$0xff]   ;;  %v8926_v51 = vld [vmem:[%s10889_s1 + $0xd88] sm:$0xff]  }
 0x19f   : > { %v7927_v42 = vadd.f32 %v7926_v19, %v7925_v47  ;;  %v6981_v37 = vcombine.high %v314_v31, %v346_v33  ;;  %v6982_v39 = vcombine.low %v315_v35, %v347_v38  ;;  %v8923_v47 = vld [vmem:[%s10889_s1 + $0xd48] sm:$0xff]   ;;  %v378_v19 = vld [vmem:[%s9176_s19 + $0x2c0] sm:$0xff] }
 0x1a0   : > { %v10429_v59 = vadd.f32 %v7924_v40, %v5679_v49  ;;  %v5682_v60 = vadd.f32 %v7899_v32, %v10322_v46  ;;  %v6983_v40 = vcombine.high %v315_v35, %v347_v38  ;;  %v7045_v32 = vcombine.high %v378_v19, %v410_v52 }
 0x1a1   : > { %8277 = vmatpush3.bf16.msra.mxu0 %v8901_v62  ;;  %8305 = vmatpush3.bf16.msra.mxu1 %v8902_v0  ;;  %v7044_v57 = vcombine.low %v378_v19, %v410_v52  ;;  %v8928_v62 = vld [vmem:[%s10889_s1 + $0xdd0] sm:$0xff]   ;;  %v379_v0 = vld [vmem:[%s9176_s19 + $0x2c8] sm:$0xff]  ;;  %v317_v19 = vld [vmem:[%s9176_s19 + $0xd8] sm:$0xff] }
 0x1a2   : > { %v10441_v63 = vadd.f32 %v7927_v42, %v5682_v60  ;;  %v7900_v50 = vpop.f32.mrb[44].mxu0  ;;  %8278 = vmatprep.subr.bf16.mxu0 %v8903_v1  ;;  %8306 = vmatprep.subr.bf16.mxu1 %v8904_v4  ;;  %v8927_v42 = vld [vmem:[%s10889_s1 + $0xd50] sm:$0xff]   ;;  %v349_v52 = vld [vmem:[%s9176_s19 + $0x1d8] sm:$0xff] }
 0x1a3   : > { %v7901_v46 = vpop.f32.mrb[45].mxu0  ;;  %v7928_v55 = vpop.f32.mrb[44].mxu1  ;;  %6362 = vmatprep.mubr.bf16.mxu0 %v6981_v37  ;;  %6411 = vmatprep.mubr.bf16.mxu1 %v6983_v40 }
 0x1a4   : > { %v7902_v3 = vadd.f32 %v7901_v46, %v7900_v50  ;;  %v7903_v53 = vpop.f32.mrb[46].mxu0  ;;  %v7929_v13 = vpop.f32.mrb[45].mxu1  ;;  %v411_v46 = vld [vmem:[%s9176_s19 + $0x3c8] sm:$0xff] }
 0x1a5   : > { %v7904_v9 = vpop.f32.mrb[47].mxu0  ;;  %8279 = vmatpush3.bf16.msra.mxu0 %v8905_v7  ;;  %v7930_v14 = vadd.f32 %v7929_v13, %v7928_v55  ;;  %v7931_v16 = vpop.f32.mrb[46].mxu1  ;;  %8307 = vmatpush3.bf16.msra.mxu1 %v8906_v10  ;;  %v7047_v4 = vcombine.high %v379_v0, %v411_v46  ;;  %v8929_v55 = vld [vmem:[%s10889_s1 + $0xd10] sm:$0xff]   ;;  %v7046_v7 = vcombine.low %v379_v0, %v411_v46  ;;  %v8957_v0 = vld [vmem:[%s10889_s1 + $0xe08] sm:$0xff]  }
 0x1a6   : > { %v5687_v8 = vadd.f32 %v7902_v3, %v10350_v2  ;;  %v7905_v12 = vadd.f32 %v7904_v9, %v7903_v53  ;;  %v8908_v2 = vld [vmem:[%s10889_s1 + $0xce8] sm:$0xff]   ;;  %v7932_v18 = vpop.f32.mrb[47].mxu1  ;;  %8280 = vmatprep.subr.bf16.mxu0 %v8907_v58  ;;  %v8930_v9 = vld [vmem:[%s10889_s1 + $0xd90] sm:$0xff]   ;;  %v8932_v58 = vld [vmem:[%s10889_s1 + $0xdd8] sm:$0xff]  }
 0x1a7   : > { %v7933_v22 = vadd.f32 %v7932_v18, %v7931_v16  ;;  %8308 = vmatprep.subr.bf16.mxu1 %v8908_v2  ;;  %v8933_v16 = vld [vmem:[%s10889_s1 + $0xd18] sm:$0xff]  }
 0x1a8   : > { %v5690_v17 = vadd.f32 %v7905_v12, %v10358_v5  ;;  %v10469_v21 = vadd.f32 %v7930_v14, %v5687_v8 }
 0x1a9   : > { %8281 = vmatpush3.bf16.msra.mxu0 %v8909_v20  ;;  %8309 = vmatpush3.bf16.msra.mxu1 %v8910_v23 }
 0x1aa   : > { %v10477_v5 = vadd.f32 %v7933_v22, %v5690_v17  ;;  %8282 = vmatprep.subr.bf16.mxu0 %v8911_v25  ;;  %8310 = vmatprep.subr.bf16.mxu1 %v8912_v6  ;;  %v8935_v22 = vld [vmem:[%s10889_s1 + $0xd60] sm:$0xff]  }
 0x1ab   : > { %v8936_v25 = vld [vmem:[%s10889_s1 + $0xde0] sm:$0xff]  }
 0x1ad   : > { %8283 = vmatpush3.bf16.msra.mxu0 %v8913_v26  ;;  %8311 = vmatpush3.bf16.msra.mxu1 %v8914_v27 }
 0x1ae   : > { %8284 = vmatprep.subr.bf16.mxu0 %v8915_v28  ;;  %8312 = vmatprep.subr.bf16.mxu1 %v8916_v29  ;;  %v8937_v28 = vld [vmem:[%s10889_s1 + $0xd20] sm:$0xff]  }
 0x1b1   : > { %8285 = vmatpush3.bf16.msra.mxu0 %v8917_v30  ;;  %8313 = vmatpush3.bf16.msra.mxu1 %v8918_v11  ;;  %v8938_v30 = vld [vmem:[%s10889_s1 + $0xda0] sm:$0xff]  }
 0x1b2   : > { %8326 = vmatprep.subr.bf16.mxu0 %v8919_v41  ;;  %8354 = vmatprep.subr.bf16.mxu1 %v8920_v44  ;;  %v8943_v41 = vld [vmem:[%s10889_s1 + $0xd70] sm:$0xff]  }
 0x1b3   : > { %v8944_v44 = vld [vmem:[%s10889_s1 + $0xdf0] sm:$0xff]  }
 0x1b4   : > { %6363 = vmatmul.mubr.bf16.vlgmr.msra.gmra.mrb[96].mxu0 %v6980_v36  ;;  %6412 = vmatmul.mubr.bf16.vlgmr.msra.gmra.mrb[96].mxu1 %v6982_v39  ;;  %v8940_v36 = vld [vmem:[%s10889_s1 + $0xde8] sm:$0xff]  }
 0x1b5   : > { %8327 = vmatpush3.bf16.msra.mxu0 %v8921_v24  ;;  %8355 = vmatpush3.bf16.msra.mxu1 %v8922_v45  ;;  %v8942_v39 = vld [vmem:[%s10889_s1 + $0xda8] sm:$0xff]   ;;  %v8945_v24 = vld [vmem:[%s10889_s1 + $0xd30] sm:$0xff]  }
 0x1b6   : > { %8328 = vmatprep.subr.bf16.mxu0 %v8923_v47  ;;  %8356 = vmatprep.subr.bf16.mxu1 %v8924_v15  ;;  %v8946_v45 = vld [vmem:[%s10889_s1 + $0xdb0] sm:$0xff]   ;;  %v8947_v47 = vld [vmem:[%s10889_s1 + $0xd78] sm:$0xff]  }
 0x1b7   : > { %6370 = vmatprep.mubr.bf16.mxu0 %v7045_v32  ;;  %6419 = vmatprep.mubr.bf16.mxu1 %v7047_v4  ;;  %v8948_v15 = vld [vmem:[%s10889_s1 + $0xdf8] sm:$0xff]   ;;  %v6986_v32 = vcombine.low %v317_v19, %v349_v52  ;;  %v412_v4 = vld [vmem:[%s9176_s19 + $0x3d0] sm:$0xff] }
 0x1b9   : > { %8329 = vmatpush3.bf16.msra.mxu0 %v8925_v48  ;;  %8357 = vmatpush3.bf16.msra.mxu1 %v8926_v51  ;;  %v8950_v48 = vld [vmem:[%s10889_s1 + $0xdb8] sm:$0xff]   ;;  %v348_v51 = vld [vmem:[%s9176_s19 + $0x1d0] sm:$0xff] }
 0x1ba   : > { %v7950_v34 = vpop.f32.mrb[48].mxu0  ;;  %8330 = vmatprep.subr.bf16.mxu0 %v8927_v42  ;;  %8358 = vmatprep.subr.bf16.mxu1 %v8928_v62  ;;  %v8951_v42 = vld [vmem:[%s10889_s1 + $0xe40] sm:$0xff]   ;;  %v8955_v62 = vld [vmem:[%s10889_s1 + $0xe48] sm:$0xff]  }
 0x1bb   : > { %v7978_v49 = vpop.f32.mrb[48].mxu1  ;;  %v7951_v54 = vpop.f32.mrb[49].mxu0 }
 0x1bc   : > { %v7979_v56 = vpop.f32.mrb[49].mxu1  ;;  %v7952_v43 = vadd.f32 %v7951_v54, %v7950_v34  ;;  %v7953_v61 = vpop.f32.mrb[50].mxu0  ;;  %6371 = vmatmul.mubr.bf16.gmra.mrb[100].mxu0 %v7044_v57  ;;  %6420 = vmatmul.mubr.bf16.gmra.mrb[100].mxu1 %v7046_v7  ;;  %v8949_v34 = vld [vmem:[%s10889_s1 + $0xd38] sm:$0xff]   ;;  %v6987_v57 = vcombine.high %v317_v19, %v349_v52  ;;  %v8972_v52 = vld [vmem:[%s10889_s1 + $0xee8] sm:$0xff]  }
 0x1bd   : > { %v7980_v60 = vadd.f32 %v7979_v56, %v7978_v49  ;;  %v7981_v50 = vpop.f32.mrb[50].mxu1  ;;  %v7954_v3 = vpop.f32.mrb[51].mxu0  ;;  %8331 = vmatpush3.bf16.msra.mxu0 %v8929_v55  ;;  %8359 = vmatpush3.bf16.msra.mxu1 %v8930_v9  ;;  %v316_v49 = vld [vmem:[%s9176_s19 + $0xd0] sm:$0xff] }
 0x1be   : > { %v5777_v1 = vadd.f32 %v7952_v43, %v10429_v59  ;;  %v7982_v53 = vpop.f32.mrb[51].mxu1  ;;  %v7955_v8 = vadd.f32 %v7954_v3, %v7953_v61  ;;  %v8931_v59 = vld [vmem:[%s10889_s1 + $0xd58] sm:$0xff]   ;;  %8360 = vmatprep.subr.bf16.mxu1 %v8932_v58  ;;  %v6984_v54 = vcombine.low %v316_v49, %v348_v51  ;;  %v6985_v56 = vcombine.high %v316_v49, %v348_v51  ;;  %v8952_v43 = vld [vmem:[%s10889_s1 + $0xec0] sm:$0xff]   ;;  %v8960_v58 = vld [vmem:[%s10889_s1 + $0xed0] sm:$0xff]  }
 0x1bf   : > { %v7983_v12 = vadd.f32 %v7982_v53, %v7981_v50  ;;  %8332 = vmatprep.subr.bf16.mxu0 %v8931_v59  ;;  %6509 = vmatprep.mubr.bf16.mxu1 %v6987_v57  ;;  %v8954_v61 = vld [vmem:[%s10889_s1 + $0xe80] sm:$0xff]   ;;  %v8956_v50 = vld [vmem:[%s10889_s1 + $0xec8] sm:$0xff]   ;;  %v380_v53 = vld [vmem:[%s9176_s19 + $0x2d0] sm:$0xff] }
 0x1c0   : > { %v10545_v10 = vadd.f32 %v7980_v60, %v5777_v1  ;;  %v5780_v13 = vadd.f32 %v7955_v8, %v10441_v63  ;;  %v8934_v63 = vld [vmem:[%s10889_s1 + $0xd98] sm:$0xff]   ;;  %6460 = vmatprep.mubr.bf16.mxu0 %v6985_v56  ;;  %v8953_v60 = vld [vmem:[%s10889_s1 + $0xe00] sm:$0xff]   ;;  %v8958_v1 = vld [vmem:[%s10889_s1 + $0xe88] sm:$0xff]   ;;  %v7049_v8 = vcombine.high %v380_v53, %v412_v4  ;;  %v7048_v9 = vcombine.low %v380_v53, %v412_v4 }
 0x1c1   : > { %8333 = vmatpush3.bf16.msra.mxu0 %v8933_v16  ;;  %8361 = vmatpush3.bf16.msra.mxu1 %v8934_v63 }
 0x1c2   : > { %v7956_v14 = vpop.f32.mrb[52].mxu0  ;;  %v10557_v2 = vadd.f32 %v7983_v12, %v5780_v13  ;;  %8334 = vmatprep.subr.bf16.mxu0 %v8935_v22  ;;  %8362 = vmatprep.subr.bf16.mxu1 %v8936_v25  ;;  %v8959_v12 = vld [vmem:[%s10889_s1 + $0xe50] sm:$0xff]  }
 0x1c3   : > { %v7957_v17 = vpop.f32.mrb[53].mxu0  ;;  %v7984_v26 = vpop.f32.mrb[52].mxu1 }
 0x1c4   : > { %v7958_v18 = vadd.f32 %v7957_v17, %v7956_v14  ;;  %v7959_v20 = vpop.f32.mrb[54].mxu0  ;;  %v7985_v29 = vpop.f32.mrb[53].mxu1  ;;  %v381_v14 = vld [vmem:[%s9176_s19 + $0x2d8] sm:$0xff] }
 0x1c5   : > { %v7960_v23 = vpop.f32.mrb[55].mxu0  ;;  %v7986_v31 = vadd.f32 %v7985_v29, %v7984_v26  ;;  %v7987_v33 = vpop.f32.mrb[54].mxu1  ;;  %8335 = vmatpush3.bf16.msra.mxu0 %v8937_v28  ;;  %8363 = vmatpush3.bf16.msra.mxu1 %v8938_v30  ;;  %v8962_v28 = vld [vmem:[%s10889_s1 + $0xe90] sm:$0xff]  }
 0x1c6   : > { %v5785_v6 = vadd.f32 %v7958_v18, %v10469_v21  ;;  %v7961_v27 = vadd.f32 %v7960_v23, %v7959_v20  ;;  %v8939_v21 = vld [vmem:[%s10889_s1 + $0xd68] sm:$0xff]   ;;  %v7988_v35 = vpop.f32.mrb[55].mxu1  ;;  %8364 = vmatprep.subr.bf16.mxu1 %v8940_v36  ;;  %v413_v18 = vld [vmem:[%s9176_s19 + $0x3d8] sm:$0xff] }
 0x1c7   : > { %v7989_v38 = vadd.f32 %v7988_v35, %v7987_v33  ;;  %8336 = vmatprep.subr.bf16.mxu0 %v8939_v21  ;;  %v7051_v25 = vcombine.high %v381_v14, %v413_v18  ;;  %v7050_v26 = vcombine.low %v381_v14, %v413_v18  ;;  %v8966_v35 = vld [vmem:[%s10889_s1 + $0xe98] sm:$0xff]   ;;  %v8987_v14 = vld [vmem:[%s10889_s1 + $0xf48] sm:$0xff]  }
 0x1c8   : > { %v5788_v11 = vadd.f32 %v7961_v27, %v10477_v5  ;;  %v10582_v37 = vadd.f32 %v7986_v31, %v5785_v6  ;;  %v8941_v5 = vld [vmem:[%s10889_s1 + $0xd28] sm:$0xff]   ;;  %v8961_v6 = vld [vmem:[%s10889_s1 + $0xe10] sm:$0xff]  }
 0x1c9   : > { %8337 = vmatpush3.bf16.msra.mxu0 %v8941_v5  ;;  %8365 = vmatpush3.bf16.msra.mxu1 %v8942_v39  ;;  %v8967_v5 = vld [vmem:[%s10889_s1 + $0xe60] sm:$0xff]  }
 0x1ca   : > { %v10590_v40 = vadd.f32 %v7989_v38, %v5788_v11  ;;  %8338 = vmatprep.subr.bf16.mxu0 %v8943_v41  ;;  %8366 = vmatprep.subr.bf16.mxu1 %v8944_v44  ;;  %v8964_v11 = vld [vmem:[%s10889_s1 + $0xed8] sm:$0xff]   ;;  %v8968_v41 = vld [vmem:[%s10889_s1 + $0xee0] sm:$0xff]  }
 0x1cd   : > { %8339 = vmatpush3.bf16.msra.mxu0 %v8945_v24  ;;  %8367 = vmatpush3.bf16.msra.mxu1 %v8946_v45 }
 0x1ce   : > { %8340 = vmatprep.subr.bf16.mxu0 %v8947_v47  ;;  %8368 = vmatprep.subr.bf16.mxu1 %v8948_v15  ;;  %v8969_v47 = vld [vmem:[%s10889_s1 + $0xe20] sm:$0xff]  }
 0x1d1   : > { %8341 = vmatpush3.bf16.msra.mxu0 %v8949_v34  ;;  %8369 = vmatpush3.bf16.msra.mxu1 %v8950_v48  ;;  %v8970_v34 = vld [vmem:[%s10889_s1 + $0xea0] sm:$0xff]  }
 0x1d2   : > { %8382 = vmatprep.subr.bf16.mxu0 %v8951_v42  ;;  %8410 = vmatprep.subr.bf16.mxu1 %v8952_v43  ;;  %v8975_v42 = vld [vmem:[%s10889_s1 + $0xe70] sm:$0xff]  }
 0x1d3   : > { %v8976_v43 = vld [vmem:[%s10889_s1 + $0xef0] sm:$0xff]  }
 0x1d4   : > { %6461 = vmatmul.mubr.bf16.vlgmr.msra.gmra.mrb[104].mxu0 %v6984_v54  ;;  %6510 = vmatmul.mubr.bf16.vlgmr.msra.gmra.mrb[104].mxu1 %v6986_v32  ;;  %v8974_v32 = vld [vmem:[%s10889_s1 + $0xea8] sm:$0xff]  }
 0x1d5   : > { %8383 = vmatpush3.bf16.msra.mxu0 %v8953_v60  ;;  %8411 = vmatpush3.bf16.msra.mxu1 %v8954_v61  ;;  %v8977_v60 = vld [vmem:[%s10889_s1 + $0xe30] sm:$0xff]  }
 0x1d6   : > { %8384 = vmatprep.subr.bf16.mxu0 %v8955_v62  ;;  %8412 = vmatprep.subr.bf16.mxu1 %v8956_v50  ;;  %v8978_v61 = vld [vmem:[%s10889_s1 + $0xeb0] sm:$0xff]   ;;  %v8979_v62 = vld [vmem:[%s10889_s1 + $0xe78] sm:$0xff]  }
 0x1d7   : > { %6468 = vmatprep.mubr.bf16.mxu0 %v7049_v8  ;;  %6517 = vmatprep.mubr.bf16.mxu1 %v7051_v25  ;;  %v8980_v50 = vld [vmem:[%s10889_s1 + $0xef8] sm:$0xff]  }
 0x1d9   : > { %8385 = vmatpush3.bf16.msra.mxu0 %v8957_v0  ;;  %8413 = vmatpush3.bf16.msra.mxu1 %v8958_v1  ;;  %v8981_v0 = vld [vmem:[%s10889_s1 + $0xe38] sm:$0xff]   ;;  %v318_v1 = vld [vmem:[%s9176_s19 + $0xe0] sm:$0xff] }
 0x1da   : > { %v8006_v46 = vpop.f32.mrb[56].mxu0  ;;  %8386 = vmatprep.subr.bf16.mxu0 %v8959_v12  ;;  %8414 = vmatprep.subr.bf16.mxu1 %v8960_v58  ;;  %v8983_v12 = vld [vmem:[%s10889_s1 + $0xf40] sm:$0xff]  }
 0x1db   : > { %v8034_v3 = vpop.f32.mrb[56].mxu1  ;;  %v8007_v55 = vpop.f32.mrb[57].mxu0  ;;  %v8986_v58 = vld [vmem:[%s10889_s1 + $0xf80] sm:$0xff]  }
 0x1dc   : > { %v8035_v7 = vpop.f32.mrb[57].mxu1  ;;  %v8008_v59 = vadd.f32 %v8007_v55, %v8006_v46  ;;  %v8009_v13 = vpop.f32.mrb[58].mxu0  ;;  %6469 = vmatmul.mubr.bf16.gmra.mrb[108].mxu0 %v7048_v9  ;;  %6518 = vmatmul.mubr.bf16.gmra.mrb[108].mxu1 %v7050_v26  ;;  %v8982_v46 = vld [vmem:[%s10889_s1 + $0xeb8] sm:$0xff]   ;;  %v319_v55 = vld [vmem:[%s9176_s19 + $0xe8] sm:$0xff] }
 0x1dd   : > { %v8036_v16 = vadd.f32 %v8035_v7, %v8034_v3  ;;  %v8037_v17 = vpop.f32.mrb[58].mxu1  ;;  %v8010_v63 = vpop.f32.mrb[59].mxu0  ;;  %8387 = vmatpush3.bf16.msra.mxu0 %v8961_v6  ;;  %8415 = vmatpush3.bf16.msra.mxu1 %v8962_v28  ;;  %v350_v3 = vld [vmem:[%s9176_s19 + $0x1e0] sm:$0xff]  ;;  %v351_v7 = vld [vmem:[%s9176_s19 + $0x1e8] sm:$0xff] }
 0x1de   : > { %v5875_v20 = vadd.f32 %v8008_v59, %v10545_v10  ;;  %v8011_v22 = vadd.f32 %v8010_v63, %v8009_v13  ;;  %v8038_v23 = vpop.f32.mrb[59].mxu1  ;;  %v8963_v10 = vld [vmem:[%s10889_s1 + $0xe58] sm:$0xff]   ;;  %8416 = vmatprep.subr.bf16.mxu1 %v8964_v11  ;;  %v6988_v53 = vcombine.low %v318_v1, %v350_v3  ;;  %v6989_v4 = vcombine.high %v318_v1, %v350_v3  ;;  %v8984_v59 = vld [vmem:[%s10889_s1 + $0xfc0] sm:$0xff]   ;;  %v8989_v63 = vld [vmem:[%s10889_s1 + $0xf08] sm:$0xff]  }
 0x1df   : > { %v8039_v27 = vadd.f32 %v8038_v23, %v8037_v17  ;;  %8388 = vmatprep.subr.bf16.mxu0 %v8963_v10  ;;  %v6990_v8 = vcombine.low %v319_v55, %v351_v7  ;;  %v6991_v9 = vcombine.high %v319_v55, %v351_v7  ;;  %v8985_v13 = vld [vmem:[%s10889_s1 + $0xf00] sm:$0xff]   ;;  %v8991_v11 = vld [vmem:[%s10889_s1 + $0xf50] sm:$0xff]   ;;  %v9005_v55 = vld [vmem:[%s10889_s1 + $0xf28] sm:$0xff]  }
 0x1e0   : > { %v10661_v29 = vadd.f32 %v8036_v16, %v5875_v20  ;;  %v5878_v30 = vadd.f32 %v8011_v22, %v10557_v2  ;;  %v8965_v2 = vld [vmem:[%s10889_s1 + $0xe18] sm:$0xff]   ;;  %6558 = vmatprep.mubr.bf16.mxu0 %v6989_v4  ;;  %v8988_v16 = vld [vmem:[%s10889_s1 + $0xfc8] sm:$0xff]   ;;  %v382_v22 = vld [vmem:[%s9176_s19 + $0x2e0] sm:$0xff] }
 0x1e1   : > { %8389 = vmatpush3.bf16.msra.mxu0 %v8965_v2  ;;  %8417 = vmatpush3.bf16.msra.mxu1 %v8966_v35  ;;  %v8990_v20 = vld [vmem:[%s10889_s1 + $0xf88] sm:$0xff]   ;;  %v414_v6 = vld [vmem:[%s9176_s19 + $0x3e0] sm:$0xff]  ;;  %v8992_v2 = vld [vmem:[%s10889_s1 + $0xfd0] sm:$0xff]  }
 0x1e2   : > { %v10670_v31 = vadd.f32 %v8039_v27, %v5878_v30  ;;  %v8012_v33 = vpop.f32.mrb[60].mxu0  ;;  %8390 = vmatprep.subr.bf16.mxu0 %v8967_v5  ;;  %8418 = vmatprep.subr.bf16.mxu1 %v8968_v41  ;;  %v7053_v30 = vcombine.high %v382_v22, %v414_v6  ;;  %v7052_v10 = vcombine.low %v382_v22, %v414_v6  ;;  %v415_v35 = vld [vmem:[%s9176_s19 + $0x3e8] sm:$0xff]  ;;  %v8993_v41 = vld [vmem:[%s10889_s1 + $0xf10] sm:$0xff]   ;;  %v321_v22 = vld [vmem:[%s9176_s19 + $0xf8] sm:$0xff] }
 0x1e3   : > { %v8013_v21 = vpop.f32.mrb[61].mxu0  ;;  %v8040_v24 = vpop.f32.mrb[60].mxu1  ;;  %6607 = vmatprep.mubr.bf16.mxu1 %v6991_v9  ;;  %v9006_v9 = vld [vmem:[%s10889_s1 + $0xfa8] sm:$0xff]   ;;  %v353_v6 = vld [vmem:[%s9176_s19 + $0x1f8] sm:$0xff] }
 0x1e4   : > { %v8014_v36 = vadd.f32 %v8013_v21, %v8012_v33  ;;  %v8015_v38 = vpop.f32.mrb[62].mxu0  ;;  %v8041_v15 = vpop.f32.mrb[61].mxu1  ;;  %v383_v21 = vld [vmem:[%s9176_s19 + $0x2e8] sm:$0xff] }
 0x1e5   : > { %v8016_v39 = vpop.f32.mrb[63].mxu0  ;;  %v8042_v49 = vadd.f32 %v8041_v15, %v8040_v24  ;;  %v8043_v51 = vpop.f32.mrb[62].mxu1  ;;  %8391 = vmatpush3.bf16.msra.mxu0 %v8969_v47  ;;  %8419 = vmatpush3.bf16.msra.mxu1 %v8970_v34  ;;  %v8995_v15 = vld [vmem:[%s10889_s1 + $0xf58] sm:$0xff]  }
 0x1e6   : > { %v5883_v44 = vadd.f32 %v8014_v36, %v10582_v37  ;;  %v8017_v45 = vadd.f32 %v8016_v39, %v8015_v38  ;;  %v8971_v37 = vld [vmem:[%s10889_s1 + $0xe68] sm:$0xff]   ;;  %v8044_v19 = vpop.f32.mrb[63].mxu1  ;;  %8420 = vmatprep.subr.bf16.mxu1 %v8972_v52  ;;  %v7055_v39 = vcombine.high %v383_v21, %v415_v35  ;;  %v8999_v52 = vld [vmem:[%s10889_s1 + $0xf60] sm:$0xff]  }
 0x1e7   : > { %v8045_v56 = vadd.f32 %v8044_v19, %v8043_v51  ;;  %8392 = vmatprep.subr.bf16.mxu0 %v8971_v37  ;;  %v8998_v19 = vld [vmem:[%s10889_s1 + $0xf98] sm:$0xff]  }
 0x1e8   : > { %v5886_v48 = vadd.f32 %v8017_v45, %v10590_v40  ;;  %v10698_v54 = vadd.f32 %v8042_v49, %v5883_v44  ;;  %v8973_v40 = vld [vmem:[%s10889_s1 + $0xe28] sm:$0xff]   ;;  %v7054_v44 = vcombine.low %v383_v21, %v415_v35  ;;  %v8994_v45 = vld [vmem:[%s10889_s1 + $0xf90] sm:$0xff]   ;;  %v8997_v49 = vld [vmem:[%s10889_s1 + $0xf18] sm:$0xff]  }
 0x1e9   : > { %8393 = vmatpush3.bf16.msra.mxu0 %v8973_v40  ;;  %8421 = vmatpush3.bf16.msra.mxu1 %v8974_v32  ;;  %v9000_v32 = vld [vmem:[%s10889_s1 + $0xfe0] sm:$0xff]  }
 0x1ea   : > { %v10706_v57 = vadd.f32 %v8045_v56, %v5886_v48  ;;  %8394 = vmatprep.subr.bf16.mxu0 %v8975_v42  ;;  %8422 = vmatprep.subr.bf16.mxu1 %v8976_v43  ;;  %v8996_v48 = vld [vmem:[%s10889_s1 + $0xfd8] sm:$0xff]   ;;  %v9001_v43 = vld [vmem:[%s10889_s1 + $0xf20] sm:$0xff]  }
 0x1ed   : > { %8395 = vmatpush3.bf16.msra.mxu0 %v8977_v60  ;;  %8423 = vmatpush3.bf16.msra.mxu1 %v8978_v61 }
 0x1ee   : > { %8396 = vmatprep.subr.bf16.mxu0 %v8979_v62  ;;  %8424 = vmatprep.subr.bf16.mxu1 %v8980_v50  ;;  %v9002_v62 = vld [vmem:[%s10889_s1 + $0xfa0] sm:$0xff]  }
 0x1f1   : > { %8397 = vmatpush3.bf16.msra.mxu0 %v8981_v0  ;;  %8425 = vmatpush3.bf16.msra.mxu1 %v8982_v46  ;;  %v9003_v46 = vld [vmem:[%s10889_s1 + $0xf68] sm:$0xff]  }
 0x1f2   : > { %8438 = vmatprep.subr.bf16.mxu0 %v8983_v12  ;;  %8466 = vmatprep.subr.bf16.mxu1 %v8984_v59  ;;  %v9007_v12 = vld [vmem:[%s10889_s1 + $0xf70] sm:$0xff]  }
 0x1f3   : > { %v9008_v59 = vld [vmem:[%s10889_s1 + $0xff0] sm:$0xff]  }
 0x1f4   : > { %6559 = vmatmul.mubr.bf16.vlgmr.msra.gmra.mrb[112].mxu0 %v6988_v53  ;;  %6608 = vmatmul.mubr.bf16.vlgmr.msra.gmra.mrb[112].mxu1 %v6990_v8 }
 0x1f5   : > { %8439 = vmatpush3.bf16.msra.mxu0 %v8985_v13  ;;  %8467 = vmatpush3.bf16.msra.mxu1 %v8986_v58  ;;  %v9009_v13 = vld [vmem:[%s10889_s1 + $0xf30] sm:$0xff]  }
 0x1f6   : > { %8440 = vmatprep.subr.bf16.mxu0 %v8987_v14  ;;  %8468 = vmatprep.subr.bf16.mxu1 %v8988_v16  ;;  %v9010_v58 = vld [vmem:[%s10889_s1 + $0xfb0] sm:$0xff]   ;;  %v9011_v14 = vld [vmem:[%s10889_s1 + $0xf78] sm:$0xff]  }
 0x1f7   : > { %6566 = vmatprep.mubr.bf16.mxu0 %v7053_v30  ;;  %6615 = vmatprep.mubr.bf16.mxu1 %v7055_v39  ;;  %v9012_v16 = vld [vmem:[%s10889_s1 + $0xff8] sm:$0xff]   ;;  %v6995_v30 = vcombine.high %v321_v22, %v353_v6 }
 0x1f9   : > { %8441 = vmatpush3.bf16.msra.mxu0 %v8989_v63  ;;  %8469 = vmatpush3.bf16.msra.mxu1 %v8990_v20  ;;  %v9014_v63 = vld [vmem:[%s10889_s1 + $0xfb8] sm:$0xff]   ;;  %v352_v20 = vld [vmem:[%s9176_s19 + $0x1f0] sm:$0xff] }
 0x1fa   : > { %8442 = vmatprep.subr.bf16.mxu0 %v8991_v11  ;;  %8470 = vmatprep.subr.bf16.mxu1 %v8992_v2  ;;  %v385_v11 = vld [vmem:[%s9176_s19 + $0x2f8] sm:$0xff] }
 0x1fc   : > { %6567 = vmatmul.mubr.bf16.gmra.mrb[116].mxu0 %v7052_v10  ;;  %6616 = vmatmul.mubr.bf16.gmra.mrb[116].mxu1 %v7054_v44 }
 0x1fd   : > { %8443 = vmatpush3.bf16.msra.mxu0 %v8993_v41  ;;  %8471 = vmatpush3.bf16.msra.mxu1 %v8994_v45 }
 0x1fe   : > { %8444 = vmatprep.subr.bf16.mxu0 %v8995_v15  ;;  %8472 = vmatprep.subr.bf16.mxu1 %v8996_v48 }
 0x1ff   : > { %6705 = vmatprep.mubr.bf16.mxu1 %v6995_v30 }
 0x201   : > { %8445 = vmatpush3.bf16.msra.mxu0 %v8997_v49  ;;  %8473 = vmatpush3.bf16.msra.mxu1 %v8998_v19 }
 0x202   : > { %8446 = vmatprep.subr.bf16.mxu0 %v8999_v52  ;;  %8474 = vmatprep.subr.bf16.mxu1 %v9000_v32 }
 0x205   : > { %v8090_v18 = vpop.f32.mrb[64].mxu1  ;;  %8447 = vmatpush3.bf16.msra.mxu0 %v9001_v43  ;;  %8475 = vmatpush3.bf16.msra.mxu1 %v9002_v62 }
 0x206   : > { %v8091_v25 = vpop.f32.mrb[65].mxu1  ;;  %8448 = vmatprep.subr.bf16.mxu0 %v9003_v46 }
 0x207   : > { %v8062_v17 = vpop.f32.mrb[64].mxu0  ;;  %v8092_v27 = vadd.f32 %v8091_v25, %v8090_v18  ;;  %v8093_v33 = vpop.f32.mrb[66].mxu1  ;;  %v320_v18 = vld [vmem:[%s9176_s19 + $0xf0] sm:$0xff] }
 0x208   : > { %v8063_v23 = vpop.f32.mrb[65].mxu0  ;;  %v8094_v5 = vpop.f32.mrb[67].mxu1  ;;  %v6993_v25 = vcombine.high %v320_v18, %v352_v20 }
 0x209   : > { %v8064_v26 = vadd.f32 %v8063_v23, %v8062_v17  ;;  %v8065_v28 = vpop.f32.mrb[66].mxu0  ;;  %8449 = vmatpush3.bf16.msra.mxu0 %v9005_v55  ;;  %v9013_v17 = vld [vmem:[%s10889_s1 + $0xf38] sm:$0xff]   ;;  %v6992_v23 = vcombine.low %v320_v18, %v352_v20 }
 0x20a   : > { %v8066_v38 = vpop.f32.mrb[67].mxu0  ;;  %8450 = vmatprep.subr.bf16.mxu0 %v9007_v12  ;;  %6656 = vmatprep.mubr.bf16.mxu0 %v6993_v25 }
 0x20b   : > { %v5973_v36 = vadd.f32 %v8064_v26, %v10661_v29  ;;  %v8067_v24 = vadd.f32 %v8066_v38, %v8065_v28  ;;  %v8095_v29 = vadd.f32 %v8094_v5, %v8093_v33  ;;  %v384_v26 = vld [vmem:[%s9176_s19 + $0x2f0] sm:$0xff]  ;;  %v6994_v28 = vcombine.low %v321_v22, %v353_v6  ;;  %v417_v33 = vld [vmem:[%s9176_s19 + $0x3f8] sm:$0xff] }
 0x20c   : > { %v7059_v2 = vcombine.high %v385_v11, %v417_v33  ;;  %v7058_v5 = vcombine.low %v385_v11, %v417_v33 }
 0x20d   : > { %v10777_v47 = vadd.f32 %v8092_v27, %v5973_v36  ;;  %v5976_v34 = vadd.f32 %v8067_v24, %v10670_v31  ;;  %v8096_v42 = vpop.f32.mrb[68].mxu1  ;;  %8451 = vmatpush3.bf16.msra.mxu0 %v9009_v13  ;;  %v416_v27 = vld [vmem:[%s9176_s19 + $0x3f0] sm:$0xff]  ;;  %s10861_s19 = sshll.u32 %s10895_s29, 3 }
 0x20e   : > { %v8097_v0 = vpop.f32.mrb[69].mxu1  ;;  %8452 = vmatprep.subr.bf16.mxu0 %v9011_v14  ;;  %v7057_v10 = vcombine.high %v384_v26, %v416_v27  ;;  %v7056_v35 = vcombine.low %v384_v26, %v416_v27  ;;  %s275_s11 = scalar_lea.vmem %s10891_s3, %s10861_s19  ;;  %s10871_s14 = scalar_lea.vmem %s10893_s5, %s10861_s19 }
 0x20f   : > { %v10789_v51 = vadd.f32 %v8095_v29, %v5976_v34  ;;  %v8068_v37 = vpop.f32.mrb[68].mxu0  ;;  %v8098_v1 = vadd.f32 %v8097_v0, %v8096_v42  ;;  %v8099_v3 = vpop.f32.mrb[70].mxu1  ;;  %s269_s17 = scalar_lea.vmem %s10890_s2, %s10861_s19 }
 0x210   : > { %v8069_v31 = vpop.f32.mrb[69].mxu0  ;;  %v8100_v4 = vpop.f32.mrb[71].mxu1 }
 0x211   : > { %v8070_v56 = vadd.f32 %v8069_v31, %v8068_v37  ;;  %v8071_v40 = vpop.f32.mrb[70].mxu0  ;;  %v8101_v8 = vadd.f32 %v8100_v4, %v8099_v3  ;;  %8453 = vmatpush3.bf16.msra.mxu0 %v9013_v17 }
 0x212   : > { %v8072_v61 = vpop.f32.mrb[71].mxu0 }
 0x213   : > { %v5981_v60 = vadd.f32 %v8070_v56, %v10698_v54  ;;  %v8073_v50 = vadd.f32 %v8072_v61, %v8071_v40  ;;  %v9004_v54 = vld [vmem:[%s10889_s1 + $0xfe8] sm:$0xff]  }
 0x214   : > { %8476 = vmatprep.subr.bf16.mxu1 %v9004_v54  ;;  %6657 = vmatmul.mubr.bf16.vlgmr.msra.gmra.mrb[120].mxu0 %v6992_v23 }
 0x215   : > { %v5984_v53 = vadd.f32 %v8073_v50, %v10706_v57  ;;  %v10817_v7 = vadd.f32 %v8098_v1, %v5981_v60  ;;  %8477 = vmatpush3.bf16.msra.mxu1 %v9006_v9  ;;  %6664 = vmatprep.mubr.bf16.mxu0 %v7057_v10 }
 0x216   : > { %8478 = vmatprep.subr.bf16.mxu1 %v9008_v59 }
 0x217   : > { %v10825_v57 = vadd.f32 %v8101_v8, %v5984_v53 }
 0x219   : > { %8479 = vmatpush3.bf16.msra.mxu1 %v9010_v58 }
 0x21a   : > { %8480 = vmatprep.subr.bf16.mxu1 %v9012_v16 }
 0x21c   : > { %6665 = vmatmul.mubr.bf16.gmra.mrb[124].mxu0 %v7056_v35 }
 0x21d   : > { %8481 = vmatpush3.bf16.msra.mxu1 %v9014_v63 }
 0x220   : > { %6706 = vmatmul.mubr.bf16.vlgmr.msra.gmra.mrb[120].mxu1 %v6994_v28 }
 0x221   : > { %6713 = vmatprep.mubr.bf16.mxu1 %v7059_v2 }
 0x226   : > { %v8146_v36 = vpop.f32.mrb[72].mxu1 }
 0x227   : > { %v8118_v21 = vpop.f32.mrb[72].mxu0  ;;  %v8147_v41 = vpop.f32.mrb[73].mxu1 }
 0x228   : > { %v8119_v38 = vpop.f32.mrb[73].mxu0  ;;  %v8148_v24 = vadd.f32 %v8147_v41, %v8146_v36  ;;  %v8149_v45 = vpop.f32.mrb[74].mxu1  ;;  %6714 = vmatmul.mubr.bf16.gmra.mrb[124].mxu1 %v7058_v5 }
 0x229   : > { %v8120_v39 = vadd.f32 %v8119_v38, %v8118_v21  ;;  %v8121_v44 = vpop.f32.mrb[74].mxu0  ;;  %v8150_v48 = vpop.f32.mrb[75].mxu1 }
 0x22a   : > { %v8122_v29 = vpop.f32.mrb[75].mxu0  ;;  %v8151_v49 = vadd.f32 %v8150_v48, %v8149_v45 }
 0x22b   : > { %v6071_v15 = vadd.f32 %v8120_v39, %v10777_v47  ;;  %v8123_v34 = vadd.f32 %v8122_v29, %v8121_v44 }
 0x22d   : > { %v6120_v37 = vadd.f32 %v8148_v24, %v6071_v15  ;;  %v6074_v19 = vadd.f32 %v8123_v34, %v10789_v51 }
 0x22e   : > { %v8152_v60 = vpop.f32.mrb[76].mxu1 }
 0x22f   : > { %v6123_v31 = vadd.f32 %v8151_v49, %v6074_v19  ;;  %v8124_v52 = vpop.f32.mrb[76].mxu0  ;;  %v8153_v62 = vpop.f32.mrb[77].mxu1 }
 0x230   : > { %v8125_v56 = vpop.f32.mrb[77].mxu0  ;;  %v8154_v50 = vadd.f32 %v8153_v62, %v8152_v60  ;;  %v8155_v0 = vpop.f32.mrb[78].mxu1 }
 0x231   : > { %v8126_v40 = vadd.f32 %v8125_v56, %v8124_v52  ;;  %v8127_v32 = vpop.f32.mrb[78].mxu0  ;;  %v8156_v46 = vpop.f32.mrb[79].mxu1 }
 0x232   : > { %v8128_v42 = vpop.f32.mrb[79].mxu0  ;;  %v8157_v3 = vadd.f32 %v8156_v46, %v8155_v0 }
 0x233   : > { %v6079_v43 = vadd.f32 %v8126_v40, %v10817_v7  ;;  %v8129_v61 = vadd.f32 %v8128_v42, %v8127_v32 }
 0x235   : > { %v6082_v47 = vadd.f32 %v8129_v61, %v10825_v57  ;;  %v6128_v1 = vadd.f32 %v8154_v50, %v6079_v43 }
 0x237   : > { %v6131_v54 = vadd.f32 %v8157_v3, %v6082_v47 }
 0x247   : > { %v8174_v51 = vpop.f32.mrb[80].mxu0  ;;  %v8202_v53 = vpop.f32.mrb[80].mxu1 }
 0x248   : > { %v8175_v4 = vpop.f32.mrb[81].mxu0  ;;  %v8203_v55 = vpop.f32.mrb[81].mxu1 }
 0x249   : > { %v8176_v8 = vadd.f32 %v8175_v4, %v8174_v51  ;;  %v8204_v9 = vadd.f32 %v8203_v55, %v8202_v53  ;;  %v8177_v12 = vpop.f32.mrb[82].mxu0  ;;  %v8205_v59 = vpop.f32.mrb[82].mxu1 }
 0x24a   : > { %v8178_v7 = vpop.f32.mrb[83].mxu0  ;;  %v8206_v13 = vpop.f32.mrb[83].mxu1 }
 0x24b   : > { %v6169_v58 = vadd.f32 %v8176_v8, %v6120_v37  ;;  %v8179_v14 = vadd.f32 %v8178_v7, %v8177_v12  ;;  %v8207_v16 = vadd.f32 %v8206_v13, %v8205_v59 }
 0x24d   : > { %v6218_v57 = vadd.f32 %v8204_v9, %v6169_v58  ;;  %v6172_v17 = vadd.f32 %v8179_v14, %v6123_v31 }
 0x24f   : > { %v6221_v63 = vadd.f32 %v8207_v16, %v6172_v17  ;;  %v8180_v18 = vpop.f32.mrb[84].mxu0  ;;  %v8208_v26 = vpop.f32.mrb[84].mxu1 }
 0x250   : > { %v8181_v20 = vpop.f32.mrb[85].mxu0  ;;  %v8209_v28 = vpop.f32.mrb[85].mxu1 }
 0x251   : > { %v8182_v22 = vadd.f32 %v8181_v20, %v8180_v18  ;;  %v8183_v23 = vpop.f32.mrb[86].mxu0  ;;  %v8210_v10 = vadd.f32 %v8209_v28, %v8208_v26  ;;  %v8211_v11 = vpop.f32.mrb[86].mxu1 }
 0x252   : > { %v8184_v25 = vpop.f32.mrb[87].mxu0  ;;  %v8212_v33 = vpop.f32.mrb[87].mxu1 }
 0x253   : > { %v6177_v6 = vadd.f32 %v8182_v22, %v6128_v1  ;;  %v8185_v27 = vadd.f32 %v8184_v25, %v8183_v23  ;;  %v8213_v21 = vadd.f32 %v8212_v33, %v8211_v11 }
 0x255   : > { %v6180_v30 = vadd.f32 %v8185_v27, %v6131_v54  ;;  %v6226_v2 = vadd.f32 %v8210_v10, %v6177_v6 }
 0x257   : > { %v6229_v35 = vadd.f32 %v8213_v21, %v6180_v30 }
 0x267   : > { %v8230_v36 = vpop.f32.mrb[88].mxu0  ;;  %v8258_v38 = vpop.f32.mrb[88].mxu1 }
 0x268   : > { %v8231_v5 = vpop.f32.mrb[89].mxu0  ;;  %v8259_v41 = vpop.f32.mrb[89].mxu1 }
 0x269   : > { %v8232_v39 = vadd.f32 %v8231_v5, %v8230_v36  ;;  %v8233_v44 = vpop.f32.mrb[90].mxu0  ;;  %v8260_v24 = vadd.f32 %v8259_v41, %v8258_v38  ;;  %v8261_v45 = vpop.f32.mrb[90].mxu1 }
 0x26a   : > { %v8234_v29 = vpop.f32.mrb[91].mxu0  ;;  %v8262_v48 = vpop.f32.mrb[91].mxu1 }
 0x26b   : > { %v6267_v15 = vadd.f32 %v8232_v39, %v6218_v57  ;;  %v8235_v34 = vadd.f32 %v8234_v29, %v8233_v44  ;;  %v8263_v49 = vadd.f32 %v8262_v48, %v8261_v45 }
 0x26d   : > { %v6316_v37 = vadd.f32 %v8260_v24, %v6267_v15  ;;  %v6270_v19 = vadd.f32 %v8235_v34, %v6221_v63 }
 0x26f   : > { %v6319_v31 = vadd.f32 %v8263_v49, %v6270_v19  ;;  %v8236_v52 = vpop.f32.mrb[92].mxu0  ;;  %v8264_v42 = vpop.f32.mrb[92].mxu1 }
 0x270   : > { %v8237_v56 = vpop.f32.mrb[93].mxu0  ;;  %v8265_v62 = vpop.f32.mrb[93].mxu1 }
 0x271   : > { %v8238_v40 = vadd.f32 %v8237_v56, %v8236_v52  ;;  %v8239_v32 = vpop.f32.mrb[94].mxu0  ;;  %v8266_v47 = vadd.f32 %v8265_v62, %v8264_v42  ;;  %v8267_v50 = vpop.f32.mrb[94].mxu1 }
 0x272   : > { %v8240_v43 = vpop.f32.mrb[95].mxu0  ;;  %v8268_v46 = vpop.f32.mrb[95].mxu1 }
 0x273   : > { %v6275_v60 = vadd.f32 %v8238_v40, %v6226_v2  ;;  %v8241_v61 = vadd.f32 %v8240_v43, %v8239_v32  ;;  %v8269_v3 = vadd.f32 %v8268_v46, %v8267_v50 }
 0x275   : > { %v6278_v0 = vadd.f32 %v8241_v61, %v6229_v35  ;;  %v6324_v1 = vadd.f32 %v8266_v47, %v6275_v60 }
 0x277   : > { %v6327_v54 = vadd.f32 %v8269_v3, %v6278_v0 }
 0x287   : > { %v8286_v51 = vpop.f32.mrb[96].mxu0  ;;  %v8314_v53 = vpop.f32.mrb[96].mxu1 }
 0x288   : > { %v8287_v4 = vpop.f32.mrb[97].mxu0  ;;  %v8315_v8 = vpop.f32.mrb[97].mxu1 }
 0x289   : > { %v8288_v55 = vadd.f32 %v8287_v4, %v8286_v51  ;;  %v8289_v9 = vpop.f32.mrb[98].mxu0  ;;  %v8316_v12 = vadd.f32 %v8315_v8, %v8314_v53  ;;  %v8317_v59 = vpop.f32.mrb[98].mxu1 }
 0x28a   : > { %v8290_v7 = vpop.f32.mrb[99].mxu0  ;;  %v8318_v14 = vpop.f32.mrb[99].mxu1 }
 0x28b   : > { %v6365_v13 = vadd.f32 %v8288_v55, %v6316_v37  ;;  %v8291_v58 = vadd.f32 %v8290_v7, %v8289_v9  ;;  %v8319_v16 = vadd.f32 %v8318_v14, %v8317_v59 }
 0x28d   : > { %v6414_v57 = vadd.f32 %v8316_v12, %v6365_v13  ;;  %v6368_v17 = vadd.f32 %v8291_v58, %v6319_v31 }
 0x28f   : > { %v6417_v63 = vadd.f32 %v8319_v16, %v6368_v17  ;;  %v8292_v18 = vpop.f32.mrb[100].mxu0  ;;  %v8320_v26 = vpop.f32.mrb[100].mxu1 }
 0x290   : > { %v8293_v20 = vpop.f32.mrb[101].mxu0  ;;  %v8321_v28 = vpop.f32.mrb[101].mxu1 }
 0x291   : > { %v8294_v22 = vadd.f32 %v8293_v20, %v8292_v18  ;;  %v8295_v23 = vpop.f32.mrb[102].mxu0  ;;  %v8322_v10 = vadd.f32 %v8321_v28, %v8320_v26  ;;  %v8323_v11 = vpop.f32.mrb[102].mxu1 }
 0x292   : > { %v8296_v25 = vpop.f32.mrb[103].mxu0  ;;  %v8324_v33 = vpop.f32.mrb[103].mxu1 }
 0x293   : > { %v6373_v6 = vadd.f32 %v8294_v22, %v6324_v1  ;;  %v8297_v27 = vadd.f32 %v8296_v25, %v8295_v23  ;;  %v8325_v21 = vadd.f32 %v8324_v33, %v8323_v11 }
 0x295   : > { %v6376_v30 = vadd.f32 %v8297_v27, %v6327_v54  ;;  %v6422_v2 = vadd.f32 %v8322_v10, %v6373_v6 }
 0x297   : > { %v6425_v35 = vadd.f32 %v8325_v21, %v6376_v30 }
 0x2a7   : > { %v8342_v36 = vpop.f32.mrb[104].mxu0  ;;  %v8370_v38 = vpop.f32.mrb[104].mxu1 }
 0x2a8   : > { %v8343_v5 = vpop.f32.mrb[105].mxu0  ;;  %v8371_v39 = vpop.f32.mrb[105].mxu1 }
 0x2a9   : > { %v8344_v41 = vadd.f32 %v8343_v5, %v8342_v36  ;;  %v8372_v44 = vadd.f32 %v8371_v39, %v8370_v38  ;;  %v8345_v24 = vpop.f32.mrb[106].mxu0  ;;  %v8373_v45 = vpop.f32.mrb[106].mxu1  ;;  %v6722_v39 = vld [vmem:[%s275_s11] sm:$0xff] }
 0x2aa   : > { %v8346_v29 = vpop.f32.mrb[107].mxu0  ;;  %v8374_v15 = vpop.f32.mrb[107].mxu1 }
 0x2ab   : > { %v6463_v34 = vadd.f32 %v8344_v41, %v6414_v57  ;;  %v8347_v48 = vadd.f32 %v8346_v29, %v8345_v24  ;;  %v8375_v49 = vadd.f32 %v8374_v15, %v8373_v45 }
 0x2ad   : > { %v6512_v37 = vadd.f32 %v8372_v44, %v6463_v34  ;;  %v6466_v19 = vadd.f32 %v8347_v48, %v6417_v63  ;;  %v6723_v34 = vld [vmem:[%s275_s11 + $0x8] sm:$0xff] }
 0x2af   : > { %v6515_v31 = vadd.f32 %v8375_v49, %v6466_v19  ;;  %v8348_v52 = vpop.f32.mrb[108].mxu0  ;;  %v8376_v60 = vpop.f32.mrb[108].mxu1  ;;  %v6726_v49 = vmul.f32 0.9, %v6722_v39 }
 0x2b0   : > { %v8349_v56 = vpop.f32.mrb[109].mxu0  ;;  %v8377_v62 = vpop.f32.mrb[109].mxu1 }
 0x2b1   : > { %v8350_v40 = vadd.f32 %v8349_v56, %v8348_v52  ;;  %v8351_v32 = vpop.f32.mrb[110].mxu0  ;;  %v8378_v50 = vadd.f32 %v8377_v62, %v8376_v60  ;;  %v8379_v0 = vpop.f32.mrb[110].mxu1 }
 0x2b2   : > { %v8352_v42 = vpop.f32.mrb[111].mxu0  ;;  %v8380_v46 = vpop.f32.mrb[111].mxu1 }
 0x2b3   : > { %v6471_v43 = vadd.f32 %v8350_v40, %v6422_v2  ;;  %v8353_v61 = vadd.f32 %v8352_v42, %v8351_v32  ;;  %v8381_v3 = vadd.f32 %v8380_v46, %v8379_v0  ;;  %v6727_v40 = vmul.f32 0.9, %v6723_v34  ;;  %v6724_v32 = vld [vmem:[%s275_s11 + $0x10] sm:$0xff]  ;;  %v6725_v42 = vld [vmem:[%s275_s11 + $0x18] sm:$0xff] }
 0x2b4   : > { %v6741_v34 = vld [vmem:[%s269_s17 + $0x18] sm:$0xff] }
 0x2b5   : > { %v6474_v47 = vadd.f32 %v8353_v61, %v6425_v35  ;;  %v6520_v1 = vadd.f32 %v8378_v50, %v6471_v43 }
 0x2b7   : > { %v6523_v54 = vadd.f32 %v8381_v3, %v6474_v47 }
 0x2c7   : > { %v8398_v51 = vpop.f32.mrb[112].mxu0  ;;  %v8426_v53 = vpop.f32.mrb[112].mxu1 }
 0x2c8   : > { %v8399_v4 = vpop.f32.mrb[113].mxu0  ;;  %v8427_v8 = vpop.f32.mrb[113].mxu1 }
 0x2c9   : > { %v8400_v55 = vadd.f32 %v8399_v4, %v8398_v51  ;;  %v8401_v9 = vpop.f32.mrb[114].mxu0  ;;  %v8428_v12 = vadd.f32 %v8427_v8, %v8426_v53  ;;  %v8429_v59 = vpop.f32.mrb[114].mxu1  ;;  %v6728_v51 = vmul.f32 0.9, %v6724_v32 }
 0x2ca   : > { %v8402_v7 = vpop.f32.mrb[115].mxu0  ;;  %v8430_v14 = vpop.f32.mrb[115].mxu1 }
 0x2cb   : > { %v6561_v13 = vadd.f32 %v8400_v55, %v6512_v37  ;;  %v8403_v58 = vadd.f32 %v8402_v7, %v8401_v9  ;;  %v8431_v16 = vadd.f32 %v8430_v14, %v8429_v59 }
 0x2cd   : > { %v6610_v57 = vadd.f32 %v8428_v12, %v6561_v13  ;;  %v6564_v17 = vadd.f32 %v8403_v58, %v6515_v31  ;;  %v6729_v13 = vmul.f32 0.9, %v6725_v42 }
 0x2cf   : > { %v6613_v63 = vadd.f32 %v8431_v16, %v6564_v17  ;;  %v8404_v18 = vpop.f32.mrb[116].mxu0  ;;  %v8432_v25 = vpop.f32.mrb[116].mxu1 }
 0x2d0   : > { %v8405_v20 = vpop.f32.mrb[117].mxu0  ;;  %v8433_v28 = vpop.f32.mrb[117].mxu1 }
 0x2d1   : > { %v8406_v22 = vadd.f32 %v8405_v20, %v8404_v18  ;;  %v8407_v23 = vpop.f32.mrb[118].mxu0  ;;  %v8434_v30 = vadd.f32 %v8433_v28, %v8432_v25  ;;  %v8435_v10 = vpop.f32.mrb[118].mxu1 }
 0x2d2   : > { %v8408_v6 = vpop.f32.mrb[119].mxu0  ;;  %v8436_v33 = vpop.f32.mrb[119].mxu1 }
 0x2d3   : > { %v6569_v26 = vadd.f32 %v8406_v22, %v6520_v1  ;;  %v8409_v27 = vadd.f32 %v8408_v6, %v8407_v23  ;;  %v8437_v21 = vadd.f32 %v8436_v33, %v8435_v10 }
 0x2d5   : > { %v6572_v11 = vadd.f32 %v8409_v27, %v6523_v54  ;;  %v6618_v2 = vadd.f32 %v8434_v30, %v6569_v26 }
 0x2d7   : > { %v6621_v35 = vadd.f32 %v8437_v21, %v6572_v11 }
 0x2e7   : > { %v8454_v36 = vpop.f32.mrb[120].mxu0 }
 0x2e8   : > { %v8455_v5 = vpop.f32.mrb[121].mxu0 }
 0x2e9   : > { %v8456_v41 = vadd.f32 %v8455_v5, %v8454_v36  ;;  %v8457_v24 = vpop.f32.mrb[122].mxu0  ;;  %v6739_v5 = vld [vmem:[%s269_s17 + $0x8] sm:$0xff] }
 0x2ea   : > { %v8458_v15 = vpop.f32.mrb[123].mxu0 }
 0x2eb   : > { %v6659_v48 = vadd.f32 %v8456_v41, %v6610_v57  ;;  %v8459_v37 = vadd.f32 %v8458_v15, %v8457_v24  ;;  %v9039_v41 = vmov 0.0  }
 0x2ed   : > { %v6662_v56 = vadd.f32 %v8459_v37, %v6613_v63 }
 0x2ef   : > { %v8460_v61 = vpop.f32.mrb[124].mxu0 }
 0x2f0   : > { %v8461_v47 = vpop.f32.mrb[125].mxu0 }
 0x2f1   : > { %v8462_v46 = vadd.f32 %v8461_v47, %v8460_v61  ;;  %v8463_v3 = vpop.f32.mrb[126].mxu0 }
 0x2f2   : > { %v8464_v4 = vpop.f32.mrb[127].mxu0 }
 0x2f3   : > { %v8482_v38 = vpop.f32.mrb[120].mxu1  ;;  %v6667_v9 = vadd.f32 %v8462_v46, %v6618_v2  ;;  %v8465_v12 = vadd.f32 %v8464_v4, %v8463_v3 }
 0x2f4   : > { %v8483_v44 = vpop.f32.mrb[121].mxu1 }
 0x2f5   : > { %v8484_v45 = vadd.f32 %v8483_v44, %v8482_v38  ;;  %v8485_v29 = vpop.f32.mrb[122].mxu1  ;;  %v6670_v57 = vadd.f32 %v8465_v12, %v6621_v35  ;;  %v6738_v35 = vld [vmem:[%s269_s17] sm:$0xff] }
 0x2f6   : > { %v8486_v19 = vpop.f32.mrb[123].mxu1 }
 0x2f7   : > { %v8487_v31 = vadd.f32 %v8486_v19, %v8485_v29  ;;  %v6708_v52 = vadd.f32 %v8484_v45, %v6659_v48  ;;  %v6740_v29 = vld [vmem:[%s269_s17 + $0x10] sm:$0xff] }
 0x2f9   : > { %v6730_v43 = vadd.f32 %v6726_v49, %v6708_v52  ;;  %v6711_v60 = vadd.f32 %v8487_v31, %v6662_v56 }
 0x2fb   : > { %v8488_v62 = vpop.f32.mrb[124].mxu1  ;;  %v7572_v50 = vadd.f32 -1.0, %v6730_v43  ;;  %v6731_v0 = vadd.f32 %v6727_v40, %v6711_v60  ;;  %6798 = vst [vmem:[%s10871_s14] sm:$0xff] %v6730_v43 }
 0x2fc   : > { %v8489_v1 = vpop.f32.mrb[125].mxu1 }
 0x2fd   : > { %v8490_v54 = vadd.f32 %v8489_v1, %v8488_v62  ;;  %v8491_v53 = vpop.f32.mrb[126].mxu1  ;;  %v6742_v55 = vsub.f32 0.0, %v7572_v50  ;;  %v7573_v8 = vadd.f32 -1.0, %v6731_v0  ;;  %6799 = vst [vmem:[%s10871_s14 + $0x8] sm:$0xff] %v6731_v0 }
 0x2fe   : > { %v8492_v59 = vpop.f32.mrb[127].mxu1 }
 0x2ff   : > { %v8493_v7 = vadd.f32 %v8492_v59, %v8491_v53  ;;  %v6746_v58 = vmul.f32 1.442695, %v6742_v55  ;;  %v6743_v14 = vsub.f32 0.0, %v7573_v8  ;;  %v6716_v16 = vadd.f32 %v8490_v54, %v6667_v9 }
 0x301   : > { %9015 = vpow2.f32 %v6746_v58  ;;  %v6748_v17 = vmul.f32 1.442695, %v6743_v14  ;;  %v6732_v63 = vadd.f32 %v6728_v51, %v6716_v16  ;;  %v6719_v18 = vadd.f32 %v8493_v7, %v6670_v57 }
 0x303   : > { %9017 = vpow2.f32 %v6748_v17  ;;  %v7574_v20 = vadd.f32 -1.0, %v6732_v63  ;;  %v6733_v22 = vadd.f32 %v6729_v13, %v6719_v18  ;;  %6800 = vst [vmem:[%s10871_s14 + $0x10] sm:$0xff] %v6732_v63 }
 0x305   : > { %v6744_v23 = vsub.f32 0.0, %v7574_v20  ;;  %v7575_v25 = vadd.f32 -1.0, %v6733_v22  ;;  %6801 = vst [vmem:[%s10871_s14 + $0x18] sm:$0xff] %v6733_v22 }
 0x307   : > { %v6750_v6 = vmul.f32 1.442695, %v6744_v23  ;;  %v6745_v26 = vsub.f32 0.0, %v7575_v25 }
 0x309   : > { %9019 = vpow2.f32 %v6750_v6  ;;  %v6752_v27 = vmul.f32 1.442695, %v6745_v26 }
 0x30b   : > { %v9016_v28 = vpop.eup %9015  ;;  %9021 = vpow2.f32 %v6752_v27 }
 0x30c   : > { %v6754_v30 = vadd.f32 1.0, %v9016_v28 }
 0x30d   : > { %v9018_v10 = vpop.eup %9017 }
 0x30e   : > { %9023 = vrcp.f32 %v6754_v30  ;;  %v6755_v11 = vadd.f32 1.0, %v9018_v10 }
 0x310   : > { %9025 = vrcp.f32 %v6755_v11 }
 0x313   : > { %v9020_v33 = vpop.eup %9019 }
 0x314   : > { %v6756_v2 = vadd.f32 1.0, %v9020_v33 }
 0x315   : > { %v9022_v21 = vpop.eup %9021 }
 0x316   : > { %9027 = vrcp.f32 %v6756_v2  ;;  %v6757_v36 = vadd.f32 1.0, %v9022_v21 }
 0x318   : > { %v9024_v38 = vpop.eup %9023  ;;  %9029 = vrcp.f32 %v6757_v36 }
 0x319   : > { %vm6766_vm0 = vcmp.lt.f32.partialorder %v6738_v35, %v9024_v38 }
 0x31a   : > { %v9026_v39 = vpop.eup %9025  ;;  %v7576_v44 = vsel %vm6766_vm0, 1.0, %v9039_v41 }
 0x31b   : > { %vm6767_vm1 = vcmp.lt.f32.partialorder %v6739_v5, %v9026_v39 }
 0x31c   : > { %v7577_v24 = vsel %vm6767_vm1, 1.0, %v9039_v41 }
 0x31d   : > { %v7592_v45 = vpack.c.bf16 %v7577_v24, %v7576_v44 }
 0x31f   : > { %7593 = vst [vmem:[%s281_s23] sm:$0xff] %v7592_v45  }
 0x320   : > { %v9028_v15 = vpop.eup %9027 }
 0x321   : > { %vm6768_vm2 = vcmp.lt.f32.partialorder %v6740_v29, %v9028_v15 }
 0x322   : > { %v9030_v48 = vpop.eup %9029  ;;  %v7578_v49 = vsel %vm6768_vm2, 1.0, %v9039_v41 }
 0x323   : > { %vm6769_vm3 = vcmp.lt.f32.partialorder %v6741_v34, %v9030_v48 }
 0x324   : > { %v7579_v37 = vsel %vm6769_vm3, 1.0, %v9039_v41 }
 0x325   : > { %v7595_v19 = vpack.c.bf16 %v7579_v37, %v7578_v49 }
 0x327   : > { %7597 = vst [vmem:[%s281_s23 + $0x8] sm:$0xff] %v7595_v19  }
 0x328 PF: > { %s16_s18 = sadd.s32 1, %s9037_s18  }
 0x329   : > { %p13_p4 = scmp.ge.s32.totalorder %s16_s18, 4  }
 0x32b   :  { %15 = sbr.rel (!%p13_p4) target bundleno = 1 (0x1), region = 84 }

</bundles_post_ra>
